<compile_context>
chip_gen: v7x
topology: tpu7x:2x2x1
jax: 0.10.0
libtpu: 0.0.40
codegen_flags: <defaults>
</compile_context>

<pallas_src>
import functools

import jax
import jax.numpy as jnp
from jax import lax
from jax.experimental import pallas as pl
from jax.experimental.pallas import tpu as pltpu

D = 1024             # n_feature // 2 (hard-wired by the `[:, :, 1024:]` split)
_LANE = 128
_DROPOUT_KEEP = 0.3  # torch Dropout(p=0.7) -> keep prob 0.3


def _round_up(x, m):
    return (x + m - 1) // m * m


def _branch_axis_semantic():
    # v7x has 2 TensorCores per chip: shard the branch axis across them.
    # v5e/v6e (1 TC) and CPU interpret mode fall back to plain "parallel".
    try:
        kind = jax.devices()[0].device_kind.lower()
        if "v7" in kind:
            return pltpu.CORE_PARALLEL
    except Exception:
        pass
    return "parallel"


def _dropout_bits(seed_i32, shape):
    """Counter-based hash RNG (splitmix32-style finalizer) -> uint32 bits.

    Pure jnp/lax integer ops: lowers on Mosaic and interprets on CPU
    (pltpu.prng_seed has no CPU lowering, which broke the previous version).
    """
    tile = pl.program_id(0) * pl.num_programs(1) + pl.program_id(1)
    x = (seed_i32.astype(jnp.uint32)
         + tile.astype(jnp.uint32) * jnp.uint32(0x9E3779B9)
         + lax.broadcasted_iota(jnp.int32, shape, 0).astype(jnp.uint32)
         * jnp.uint32(shape[1])
         + lax.broadcasted_iota(jnp.int32, shape, 1).astype(jnp.uint32))
    x = (x ^ (x >> 16)) * jnp.uint32(0x7FEB352D)
    x = (x ^ (x >> 15)) * jnp.uint32(0x846CA68B)
    return x ^ (x >> 16)


# ----------------------------------------------------------------------------
# Kernel 1: fused two-branch MLP
#   h  = relu(x @ W1 + b1);  h = relu(h @ W2 + b2);  h = dropout(h)
#   cls = h @ Wc + bc        (Wc/bc zero-padded to a lane-dense class dim)
# Grid: (branch, row_tile).  x is read as f32 straight from the input slab
# (half selected via index_map) and cast to bf16 in-register; matmuls run on
# the MXU in bf16 with f32 accumulation.
# ----------------------------------------------------------------------------
def _fused_mlp_kernel(seed_ref, x_ref, w1_ref, b1_ref, w2_ref, b2_ref,
                      wc_ref, bc_ref, h_ref, cls_ref, *, train, keep):
    x = x_ref[...].astype(jnp.bfloat16)
    h1 = jnp.maximum(
        jnp.dot(x, w1_ref[...], preferred_element_type=jnp.float32)
        + b1_ref[...], 0.0)
    h2 = jnp.maximum(
        jnp.dot(h1.astype(jnp.bfloat16), w2_ref[...],
                preferred_element_type=jnp.float32) + b2_ref[...], 0.0)
    if train:
        # Keep with prob `keep`, scale kept values by 1/keep.
        bits = _dropout_bits(seed_ref[0], h2.shape)
        thresh = jnp.uint32(min(int(keep * 2.0 ** 32), 2 ** 32 - 1))
        h2 = jnp.where(bits < thresh, h2 * jnp.float32(1.0 / keep),
                       jnp.float32(0.0))
    h_ref[...] = h2
    cls_ref[...] = (
        jnp.dot(h2.astype(jnp.bfloat16), wc_ref[...],
                preferred_element_type=jnp.float32) + bc_ref[...])


def fused_mlp(x_flat, w1, b1, w2, b2, wc, bc, seed, *, train, tm):
    n_pad = x_flat.shape[0]
    cp = wc.shape[-1]
    n_tiles = n_pad // tm

    def out_spec(width):
        return pl.BlockSpec((None, tm, width), lambda br, i, s: (br, i, 0))

    def weight_spec(rows, cols):
        # Default double buffering: hides the weight refetch at the branch
        # boundary (blocks within a branch don't refetch anyway).
        return pl.BlockSpec((None, rows, cols), lambda br, i, s: (br, 0, 0))

    # branch 0 -> forward half (cols 1024:2048), branch 1 -> reverse (0:1024).
    x_spec = pl.BlockSpec((tm, D), lambda br, i, s: (i, 1 - br))

    kernel = functools.partial(_fused_mlp_kernel, train=train,
                               keep=_DROPOUT_KEEP)
    return pl.pallas_call(
        kernel,
        out_shape=(jax.ShapeDtypeStruct((2, n_pad, D), jnp.float32),
                   jax.ShapeDtypeStruct((2, n_pad, cp), jnp.float32)),
        grid_spec=pltpu.PrefetchScalarGridSpec(
            num_scalar_prefetch=1,
            grid=(2, n_tiles),
            in_specs=[
                x_spec,               # x rows (f32, half selected per branch)
                weight_spec(D, D),    # W1 (bf16)
                weight_spec(1, D),    # b1 (f32)
                weight_spec(D, D),    # W2 (bf16)
                weight_spec(1, D),    # b2 (f32)
                weight_spec(D, cp),   # Wc (bf16, class-padded)
                weight_spec(1, cp),   # bc (f32, class-padded)
            ],
            out_specs=[
                out_spec(D),          # h (post-dropout activations, f32)
                out_spec(cp),         # class scores (padded, f32)
            ]),
        compiler_params=pltpu.CompilerParams(
            dimension_semantics=(_branch_axis_semantic(), "parallel"),
            vmem_limit_bytes=32 << 20),
    )(seed, x_flat, w1, b1, w2, b2, wc, bc)


# ----------------------------------------------------------------------------
# Kernel 2: tcam = cls_r * mul_r + cls_f * mul_f, per-batch temporal softmax
# over the first seq_len[b] frames (raw tcam passthrough for the rest), and
# count_feat = tcam * atn.  Gridded over batch: one (1, T, Cpad) block per
# program, seq_len via scalar prefetch.
# ----------------------------------------------------------------------------
def _tcam_kernel(seq_ref, cls_f_ref, cls_r_ref, mul_f_ref, mul_r_ref,
                 tcam_ref, count_ref):
    tcam = (cls_r_ref[...] * mul_r_ref[...]
            + cls_f_ref[...] * mul_f_ref[...])             # (1, T, Cp)
    seq = seq_ref[pl.program_id(0)]
    t_idx = lax.broadcasted_iota(jnp.int32, tcam.shape, 1)
    mask = t_idx < seq

    neg_big = jnp.float32(-3.0e38)                         # finite: avoids inf-inf
    masked = jnp.where(mask, tcam, neg_big)
    mx = jnp.max(masked, axis=1, keepdims=True)
    ex = jnp.where(mask, jnp.exp(tcam - mx), 0.0)
    denom = jnp.maximum(jnp.sum(ex, axis=1, keepdims=True),
                        jnp.float32(1e-30))                # guards seq_len == 0
    atn = jnp.where(mask, ex / denom, tcam)   # frames >= seq_len keep raw tcam
    tcam_ref[...] = tcam
    count_ref[...] = tcam * atn               # labels101to20 is None


def tcam_and_count(cls_f_pad, cls_r_pad, mul_f_pad, mul_r_pad, seq_len):
    bsz, t, cp = cls_f_pad.shape
    mul_f3 = mul_f_pad.reshape(1, 1, cp).astype(jnp.float32)
    mul_r3 = mul_r_pad.reshape(1, 1, cp).astype(jnp.float32)
    seq = seq_len.astype(jnp.int32)
    cls_spec = pl.BlockSpec((1, t, cp), lambda b, s: (b, 0, 0))
    mul_spec = pl.BlockSpec((1, 1, cp), lambda b, s: (0, 0, 0))
    return pl.pallas_call(
        _tcam_kernel,
        out_shape=(jax.ShapeDtypeStruct((bsz, t, cp), jnp.float32),
                   jax.ShapeDtypeStruct((bsz, t, cp), jnp.float32)),
        grid_spec=pltpu.PrefetchScalarGridSpec(
            num_scalar_prefetch=1,
            grid=(bsz,),
            in_specs=[cls_spec, cls_spec, mul_spec, mul_spec],
            out_specs=[cls_spec, cls_spec]),
        compiler_params=pltpu.CompilerParams(
            dimension_semantics=("parallel",),
            vmem_limit_bytes=32 << 20),
    )(seq, cls_f_pad, cls_r_pad, mul_f3, mul_r3)


# ----------------------------------------------------------------------------
# Parameter init (matches weights_init: xavier_uniform weights, zero biases,
# mul_* filled with 1).  Weights stored transposed: (in, out), f32 master copy.
# ----------------------------------------------------------------------------
def init_params(key, n_feature, n_class):
    d = n_feature // 2
    ks = jax.random.split(key, 6)

    def xavier(k, fan_in, fan_out):
        bound = (6.0 / (fan_in + fan_out)) ** 0.5
        return jax.random.uniform(k, (fan_in, fan_out), jnp.float32, -bound, bound)

    return dict(
        w_fc_f=xavier(ks[0], d, d), b_fc_f=jnp.zeros((1, d), jnp.float32),
        w_fc1_f=xavier(ks[1], d, d), b_fc1_f=jnp.zeros((1, d), jnp.float32),
        w_fc_r=xavier(ks[2], d, d), b_fc_r=jnp.zeros((1, d), jnp.float32),
        w_fc1_r=xavier(ks[3], d, d), b_fc1_r=jnp.zeros((1, d), jnp.float32),
        w_cls_f=xavier(ks[4], d, n_class), b_cls_f=jnp.zeros((1, n_class), jnp.float32),
        w_cls_r=xavier(ks[5], d, n_class), b_cls_r=jnp.zeros((1, n_class), jnp.float32),
        mul_f=jnp.ones((n_class,), jnp.float32),
        mul_r=jnp.ones((n_class,), jnp.float32),
    )


@functools.partial(jax.jit, static_argnames=("is_training",))
def model_forward(params, inputs, seq_len, dropout_key, is_training=True):
    bsz, t, _ = inputs.shape
    n = bsz * t
    c = params["mul_f"].shape[0]
    cp = _round_up(c, _LANE)

    # Feed the raw (n, 2048) f32 slab directly; the per-branch half is selected
    # inside the kernel's x BlockSpec (no wrapper-side stack/cast HBM pass).
    x_flat = inputs.reshape(n, 2 * D).astype(jnp.float32)

    # Row tile: 256 on all chips; for small n round up to a multiple of 16
    # (bf16 sublane packing) instead of 8.
    tm = 256 if n >= 256 else max(16, _round_up(n, 16))
    n_pad = _round_up(n, tm)
    if n_pad != n:
        x_flat = jnp.pad(x_flat, ((0, n_pad - n), (0, 0)))

    def pad_c(a):  # zero-pad the class (last) dim to a lane-dense width
        return jnp.pad(a, [(0, 0)] * (a.ndim - 1) + [(0, cp - c)])

    # Branch 0 = forward, branch 1 = reverse (stacked on a leading axis).
    w1 = jnp.stack([params["w_fc_f"], params["w_fc_r"]]).astype(jnp.bfloat16)
    b1 = jnp.stack([params["b_fc_f"], params["b_fc_r"]]).astype(jnp.float32)
    w2 = jnp.stack([params["w_fc1_f"], params["w_fc1_r"]]).astype(jnp.bfloat16)
    b2 = jnp.stack([params["b_fc1_f"], params["b_fc1_r"]]).astype(jnp.float32)
    wc = jnp.stack([pad_c(params["w_cls_f"]),
                    pad_c(params["w_cls_r"])]).astype(jnp.bfloat16)
    bc = jnp.stack([pad_c(params["b_cls_f"]),
                    pad_c(params["b_cls_r"])]).astype(jnp.float32)

    if is_training:
        seed = jax.random.randint(dropout_key, (1,), 0, 2 ** 31 - 1,
                                  dtype=jnp.int32)
    else:
        seed = jnp.zeros((1,), jnp.int32)

    h2, cls2 = fused_mlp(x_flat, w1, b1, w2, b2, wc, bc, seed,
                         train=bool(is_training), tm=tm)

    x_f = h2[0, :n].reshape(bsz, t, D)
    x_r = h2[1, :n].reshape(bsz, t, D)
    cls_f_pad = cls2[0, :n].reshape(bsz, t, cp)
    cls_r_pad = cls2[1, :n].reshape(bsz, t, cp)

    mul_f_pad = jnp.pad(params["mul_f"], (0, cp - c))
    mul_r_pad = jnp.pad(params["mul_r"], (0, cp - c))
    tcam_pad, count_pad = tcam_and_count(cls_f_pad, cls_r_pad,
                                         mul_f_pad, mul_r_pad, seq_len)

    cls_x_f = cls_f_pad[:, :, :c]
    cls_x_r = cls_r_pad[:, :, :c]
    tcam = tcam_pad[:, :, :c]
    count_feat = count_pad[:, :, :c]

    # TODO(synk): grouped dilated Conv1d branch only runs when n_class == 100;
    # this config uses n_class = 20, so that branch is (correctly) skipped.
    return x_f, cls_x_f, x_r, cls_x_r, tcam, count_feat


if __name__ == "__main__":
    n_feature, n_class = 2048, 20   # 2048 forced by the hard-coded 1024 split
    bsz, t = 2, 8

    root = jax.random.PRNGKey(0)
    k_param, k_input, k_drop = jax.random.split(root, 3)

    params = init_params(k_param, n_feature, n_class)
    inputs = jax.random.normal(k_input, (bsz, t, n_feature), jnp.float32)
    seq_len = jnp.array([t, t - 3], dtype=jnp.int32)   # max(seq_len) == t

    outs = model_forward(params, inputs, seq_len, k_drop, is_training=True)
    outs = jax.block_until_ready(outs)

    x_f, cls_x_f, x_r, cls_x_r, tcam, count_feat = outs
    assert x_f.shape == (bsz, t, D) and x_r.shape == (bsz, t, D)
    assert cls_x_f.shape == (bsz, t, n_class) and cls_x_r.shape == (bsz, t, n_class)
    assert tcam.shape == (bsz, t, n_class) and count_feat.shape == (bsz, t, n_class)
    assert all(bool(jnp.all(jnp.isfinite(o))) for o in outs)
    print("KERNEL_OK")
</pallas_src>

<mosaic_0001>
module attributes {stable_mosaic.version = 11 : i64} {
  func.func @_fused_mlp_kernel(%arg0: i32, %arg1: i32, %arg2: memref<1xi32, #tpu.memory_space<smem>>, %arg3: memref<16x1024xf32, #tpu.memory_space<vmem>>, %arg4: memref<1x1024x1024xbf16, #tpu.memory_space<vmem>>, %arg5: memref<1x1x1024xf32, #tpu.memory_space<vmem>>, %arg6: memref<1x1024x1024xbf16, #tpu.memory_space<vmem>>, %arg7: memref<1x1x1024xf32, #tpu.memory_space<vmem>>, %arg8: memref<1x1024x128xbf16, #tpu.memory_space<vmem>>, %arg9: memref<1x1x128xf32, #tpu.memory_space<vmem>>, %arg10: memref<1x16x1024xf32, #tpu.memory_space<vmem>>, %arg11: memref<1x16x128xf32, #tpu.memory_space<vmem>>) attributes {dimension_semantics = [#tpu.dimension_semantics<parallel>, #tpu.dimension_semantics<parallel>], iteration_bounds = array<i64: 2, 1>, scalar_prefetch = 1 : i64, scratch_operands = 0 : i64, tpu.core_type = #tpu.core_type<tc>, window_params = [{transform_indices = @transform_0, window_bounds = array<i64: 16, 1024>}, {transform_indices = @transform_1, window_bounds = array<i64: 1, 1024, 1024>}, {transform_indices = @transform_2, window_bounds = array<i64: 1, 1, 1024>}, {transform_indices = @transform_3, window_bounds = array<i64: 1, 1024, 1024>}, {transform_indices = @transform_4, window_bounds = array<i64: 1, 1, 1024>}, {transform_indices = @transform_5, window_bounds = array<i64: 1, 1024, 128>}, {transform_indices = @transform_6, window_bounds = array<i64: 1, 1, 128>}, {transform_indices = @transform_7, window_bounds = array<i64: 1, 16, 1024>}, {transform_indices = @transform_8, window_bounds = array<i64: 1, 16, 128>}]} {
    %c0 = arith.constant 0 : index
    %c0_0 = arith.constant 0 : index
    %0 = vector.load %arg3[%c0, %c0_0] : memref<16x1024xf32, #tpu.memory_space<vmem>>, vector<16x1024xf32>
    %1 = arith.truncf %0 : vector<16x1024xf32> to vector<16x1024xbf16>
    %c0_1 = arith.constant 0 : index
    %c0_2 = arith.constant 0 : index
    %c0_3 = arith.constant 0 : index
    %2 = vector.load %arg4[%c0_1, %c0_2, %c0_3] : memref<1x1024x1024xbf16, #tpu.memory_space<vmem>>, vector<1x1024x1024xbf16>
    %3 = vector.shape_cast %2 : vector<1x1024x1024xbf16> to vector<1024x1024xbf16>
    %cst = arith.constant dense<0.000000e+00> : vector<16x1024xf32>
    %4 = tpu.matmul %1, %3, %cst {dimension_numbers = #tpu.dot_dimension_numbers<[1], [0], [0], [1], [0, 0, 1, 1], [], []>} : vector<16x1024xbf16>, vector<1024x1024xbf16>, vector<16x1024xf32> -> vector<16x1024xf32>
    %c0_4 = arith.constant 0 : index
    %c0_5 = arith.constant 0 : index
    %c0_6 = arith.constant 0 : index
    %5 = vector.load %arg5[%c0_4, %c0_5, %c0_6] : memref<1x1x1024xf32, #tpu.memory_space<vmem>>, vector<1x1x1024xf32>
    %6 = vector.shape_cast %5 : vector<1x1x1024xf32> to vector<1x1024xf32>
    %7 = vector.broadcast %6 : vector<1x1024xf32> to vector<16x1024xf32>
    %8 = arith.addf %4, %7 : vector<16x1024xf32>
    %cst_7 = arith.constant 0.000000e+00 : f32
    %9 = vector.broadcast %cst_7 : f32 to vector<16x1024xf32>
    %10 = arith.maximumf %8, %9 : vector<16x1024xf32>
    %11 = arith.truncf %10 : vector<16x1024xf32> to vector<16x1024xbf16>
    %c0_8 = arith.constant 0 : index
    %c0_9 = arith.constant 0 : index
    %c0_10 = arith.constant 0 : index
    %12 = vector.load %arg6[%c0_8, %c0_9, %c0_10] : memref<1x1024x1024xbf16, #tpu.memory_space<vmem>>, vector<1x1024x1024xbf16>
    %13 = vector.shape_cast %12 : vector<1x1024x1024xbf16> to vector<1024x1024xbf16>
    %cst_11 = arith.constant dense<0.000000e+00> : vector<16x1024xf32>
    %14 = tpu.matmul %11, %13, %cst_11 {dimension_numbers = #tpu.dot_dimension_numbers<[1], [0], [0], [1], [0, 0, 1, 1], [], []>} : vector<16x1024xbf16>, vector<1024x1024xbf16>, vector<16x1024xf32> -> vector<16x1024xf32>
    %c0_12 = arith.constant 0 : index
    %c0_13 = arith.constant 0 : index
    %c0_14 = arith.constant 0 : index
    %15 = vector.load %arg7[%c0_12, %c0_13, %c0_14] : memref<1x1x1024xf32, #tpu.memory_space<vmem>>, vector<1x1x1024xf32>
    %16 = vector.shape_cast %15 : vector<1x1x1024xf32> to vector<1x1024xf32>
    %17 = vector.broadcast %16 : vector<1x1024xf32> to vector<16x1024xf32>
    %18 = arith.addf %14, %17 : vector<16x1024xf32>
    %cst_15 = arith.constant 0.000000e+00 : f32
    %19 = vector.broadcast %cst_15 : f32 to vector<16x1024xf32>
    %20 = arith.maximumf %18, %19 : vector<16x1024xf32>
    %c0_16 = arith.constant 0 : index
    %21 = memref.load %arg2[%c0_16] : memref<1xi32, #tpu.memory_space<smem>>
    %c1_i32 = arith.constant 1 : i32
    %22 = arith.muli %arg0, %c1_i32 : i32
    %23 = arith.addi %22, %arg1 : i32
    %c-1640531527_i32 = arith.constant -1640531527 : i32
    %24 = arith.muli %23, %c-1640531527_i32 : i32
    %25 = arith.addi %21, %24 : i32
    %26 = tpu.iota {dimensions = array<i32: 0>} : vector<16x1024xi32>
    %c1024_i32 = arith.constant 1024 : i32
    %27 = vector.broadcast %c1024_i32 : i32 to vector<16x1024xi32>
    %28 = arith.muli %26, %27 : vector<16x1024xi32>
    %29 = vector.broadcast %25 : i32 to vector<16x1024xi32>
    %30 = arith.addi %29, %28 : vector<16x1024xi32>
    %31 = tpu.iota {dimensions = array<i32: 1>} : vector<16x1024xi32>
    %32 = arith.addi %30, %31 : vector<16x1024xi32>
    %c16_i32 = arith.constant 16 : i32
    %33 = vector.broadcast %c16_i32 : i32 to vector<16x1024xi32>
    %34 = arith.shrui %32, %33 : vector<16x1024xi32>
    %35 = arith.xori %32, %34 : vector<16x1024xi32>
    %c2146121005_i32 = arith.constant 2146121005 : i32
    %36 = vector.broadcast %c2146121005_i32 : i32 to vector<16x1024xi32>
    %37 = arith.muli %35, %36 : vector<16x1024xi32>
    %c15_i32 = arith.constant 15 : i32
    %38 = vector.broadcast %c15_i32 : i32 to vector<16x1024xi32>
    %39 = arith.shrui %37, %38 : vector<16x1024xi32>
    %40 = arith.xori %37, %39 : vector<16x1024xi32>
    %c-2073254261_i32 = arith.constant -2073254261 : i32
    %41 = vector.broadcast %c-2073254261_i32 : i32 to vector<16x1024xi32>
    %42 = arith.muli %40, %41 : vector<16x1024xi32>
    %c16_i32_17 = arith.constant 16 : i32
    %43 = vector.broadcast %c16_i32_17 : i32 to vector<16x1024xi32>
    %44 = arith.shrui %42, %43 : vector<16x1024xi32>
    %45 = arith.xori %42, %44 : vector<16x1024xi32>
    %c1288490188_i32 = arith.constant 1288490188 : i32
    %46 = vector.broadcast %c1288490188_i32 : i32 to vector<16x1024xi32>
    %47 = arith.cmpi ult, %45, %46 : vector<16x1024xi32>
    %cst_18 = arith.constant 3.33333325 : f32
    %48 = vector.broadcast %cst_18 : f32 to vector<16x1024xf32>
    %49 = arith.mulf %20, %48 : vector<16x1024xf32>
    %cst_19 = arith.constant 0.000000e+00 : f32
    %50 = vector.broadcast %cst_19 : f32 to vector<16x1024xf32>
    %51 = arith.select %47, %49, %50 : vector<16x1024xi1>, vector<16x1024xf32>
    %c0_20 = arith.constant 0 : index
    %c0_21 = arith.constant 0 : index
    %c0_22 = arith.constant 0 : index
    %52 = vector.load %arg10[%c0_20, %c0_21, %c0_22] : memref<1x16x1024xf32, #tpu.memory_space<vmem>>, vector<1x16x1024xf32>
    %53 = vector.shape_cast %52 : vector<1x16x1024xf32> to vector<16x1024xf32>
    %54 = vector.shape_cast %51 : vector<16x1024xf32> to vector<1x16x1024xf32>
    tpu.vector_store %arg10[%c0_20, %c0_21, %c0_22], %54 {strides = array<i32>} : memref<1x16x1024xf32, #tpu.memory_space<vmem>>, vector<1x16x1024xf32>,
    %55 = arith.truncf %51 : vector<16x1024xf32> to vector<16x1024xbf16>
    %c0_23 = arith.constant 0 : index
    %c0_24 = arith.constant 0 : index
    %c0_25 = arith.constant 0 : index
    %56 = vector.load %arg8[%c0_23, %c0_24, %c0_25] : memref<1x1024x128xbf16, #tpu.memory_space<vmem>>, vector<1x1024x128xbf16>
    %57 = vector.shape_cast %56 : vector<1x1024x128xbf16> to vector<1024x128xbf16>
    %cst_26 = arith.constant dense<0.000000e+00> : vector<16x128xf32>
    %58 = tpu.matmul %55, %57, %cst_26 {dimension_numbers = #tpu.dot_dimension_numbers<[1], [0], [0], [1], [0, 0, 1, 1], [], []>} : vector<16x1024xbf16>, vector<1024x128xbf16>, vector<16x128xf32> -> vector<16x128xf32>
    %c0_27 = arith.constant 0 : index
    %c0_28 = arith.constant 0 : index
    %c0_29 = arith.constant 0 : index
    %59 = vector.load %arg9[%c0_27, %c0_28, %c0_29] : memref<1x1x128xf32, #tpu.memory_space<vmem>>, vector<1x1x128xf32>
    %60 = vector.shape_cast %59 : vector<1x1x128xf32> to vector<1x128xf32>
    %61 = vector.broadcast %60 : vector<1x128xf32> to vector<16x128xf32>
    %62 = arith.addf %58, %61 : vector<16x128xf32>
    %c0_30 = arith.constant 0 : index
    %c0_31 = arith.constant 0 : index
    %c0_32 = arith.constant 0 : index
    %63 = vector.load %arg11[%c0_30, %c0_31, %c0_32] : memref<1x16x128xf32, #tpu.memory_space<vmem>>, vector<1x16x128xf32>
    %64 = vector.shape_cast %63 : vector<1x16x128xf32> to vector<16x128xf32>
    %65 = vector.shape_cast %62 : vector<16x128xf32> to vector<1x16x128xf32>
    tpu.vector_store %arg11[%c0_30, %c0_31, %c0_32], %65 {strides = array<i32>} : memref<1x16x128xf32, #tpu.memory_space<vmem>>, vector<1x16x128xf32>,
    return
  }
  func.func @transform_0(%arg0: i32, %arg1: i32, %arg2: memref<1xi32, #tpu.memory_space<smem>>) -> (i32, i32) {
    %c1_i32 = arith.constant 1 : i32
    %0 = arith.subi %c1_i32, %arg0 : i32
    %c0_i32 = arith.constant 0 : i32
    return %arg1, %0 : i32, i32
  }
  func.func @transform_1(%arg0: i32, %arg1: i32, %arg2: memref<1xi32, #tpu.memory_space<smem>>) -> (i32, i32, i32) {
    %c0_i32 = arith.constant 0 : i32
    %c0_i32_0 = arith.constant 0 : i32
    %c0_i32_1 = arith.constant 0 : i32
    return %arg0, %c0_i32, %c0_i32_0 : i32, i32, i32
  }
  func.func @transform_2(%arg0: i32, %arg1: i32, %arg2: memref<1xi32, #tpu.memory_space<smem>>) -> (i32, i32, i32) {
    %c0_i32 = arith.constant 0 : i32
    %c0_i32_0 = arith.constant 0 : i32
    %c0_i32_1 = arith.constant 0 : i32
    return %arg0, %c0_i32, %c0_i32_0 : i32, i32, i32
  }
  func.func @transform_3(%arg0: i32, %arg1: i32, %arg2: memref<1xi32, #tpu.memory_space<smem>>) -> (i32, i32, i32) {
    %c0_i32 = arith.constant 0 : i32
    %c0_i32_0 = arith.constant 0 : i32
    %c0_i32_1 = arith.constant 0 : i32
    return %arg0, %c0_i32, %c0_i32_0 : i32, i32, i32
  }
  func.func @transform_4(%arg0: i32, %arg1: i32, %arg2: memref<1xi32, #tpu.memory_space<smem>>) -> (i32, i32, i32) {
    %c0_i32 = arith.constant 0 : i32
    %c0_i32_0 = arith.constant 0 : i32
    %c0_i32_1 = arith.constant 0 : i32
    return %arg0, %c0_i32, %c0_i32_0 : i32, i32, i32
  }
  func.func @transform_5(%arg0: i32, %arg1: i32, %arg2: memref<1xi32, #tpu.memory_space<smem>>) -> (i32, i32, i32) {
    %c0_i32 = arith.constant 0 : i32
    %c0_i32_0 = arith.constant 0 : i32
    %c0_i32_1 = arith.constant 0 : i32
    return %arg0, %c0_i32, %c0_i32_0 : i32, i32, i32
  }
  func.func @transform_6(%arg0: i32, %arg1: i32, %arg2: memref<1xi32, #tpu.memory_space<smem>>) -> (i32, i32, i32) {
    %c0_i32 = arith.constant 0 : i32
    %c0_i32_0 = arith.constant 0 : i32
    %c0_i32_1 = arith.constant 0 : i32
    return %arg0, %c0_i32, %c0_i32_0 : i32, i32, i32
  }
  func.func @transform_7(%arg0: i32, %arg1: i32, %arg2: memref<1xi32, #tpu.memory_space<smem>>) -> (i32, i32, i32) {
    %c0_i32 = arith.constant 0 : i32
    %c0_i32_0 = arith.constant 0 : i32
    return %arg0, %arg1, %c0_i32 : i32, i32, i32
  }
  func.func @transform_8(%arg0: i32, %arg1: i32, %arg2: memref<1xi32, #tpu.memory_space<smem>>) -> (i32, i32, i32) {
    %c0_i32 = arith.constant 0 : i32
    %c0_i32_0 = arith.constant 0 : i32
    return %arg0, %arg1, %c0_i32 : i32, i32, i32
  }
}

module attributes {stable_mosaic.version = 11 : i64} {
  func.func @_tcam_kernel(%arg0: i32, %arg1: memref<2xi32, #tpu.memory_space<smem>>, %arg2: memref<1x8x128xf32, #tpu.memory_space<vmem>>, %arg3: memref<1x8x128xf32, #tpu.memory_space<vmem>>, %arg4: memref<1x1x128xf32, #tpu.memory_space<vmem>>, %arg5: memref<1x1x128xf32, #tpu.memory_space<vmem>>, %arg6: memref<1x8x128xf32, #tpu.memory_space<vmem>>, %arg7: memref<1x8x128xf32, #tpu.memory_space<vmem>>) attributes {dimension_semantics = [#tpu.dimension_semantics<parallel>], iteration_bounds = array<i64: 2>, scalar_prefetch = 1 : i64, scratch_operands = 0 : i64, tpu.core_type = #tpu.core_type<tc>, window_params = [{transform_indices = @transform_0, window_bounds = array<i64: 1, 8, 128>}, {transform_indices = @transform_1, window_bounds = array<i64: 1, 8, 128>}, {pipeline_mode = #tpu.pipeline_mode<synchronous>, transform_indices = @transform_2, window_bounds = array<i64: 1, 1, 128>}, {pipeline_mode = #tpu.pipeline_mode<synchronous>, transform_indices = @transform_3, window_bounds = array<i64: 1, 1, 128>}, {transform_indices = @transform_4, window_bounds = array<i64: 1, 8, 128>}, {transform_indices = @transform_5, window_bounds = array<i64: 1, 8, 128>}]} {
    %c0 = arith.constant 0 : index
    %c0_0 = arith.constant 0 : index
    %c0_1 = arith.constant 0 : index
    %0 = vector.load %arg3[%c0, %c0_0, %c0_1] : memref<1x8x128xf32, #tpu.memory_space<vmem>>, vector<1x8x128xf32>
    %c0_2 = arith.constant 0 : index
    %c0_3 = arith.constant 0 : index
    %c0_4 = arith.constant 0 : index
    %1 = vector.load %arg5[%c0_2, %c0_3, %c0_4] : memref<1x1x128xf32, #tpu.memory_space<vmem>>, vector<1x1x128xf32>
    %2 = vector.broadcast %1 : vector<1x1x128xf32> to vector<1x8x128xf32>
    %3 = arith.mulf %0, %2 : vector<1x8x128xf32>
    %c0_5 = arith.constant 0 : index
    %c0_6 = arith.constant 0 : index
    %c0_7 = arith.constant 0 : index
    %4 = vector.load %arg2[%c0_5, %c0_6, %c0_7] : memref<1x8x128xf32, #tpu.memory_space<vmem>>, vector<1x8x128xf32>
    %c0_8 = arith.constant 0 : index
    %c0_9 = arith.constant 0 : index
    %c0_10 = arith.constant 0 : index
    %5 = vector.load %arg4[%c0_8, %c0_9, %c0_10] : memref<1x1x128xf32, #tpu.memory_space<vmem>>, vector<1x1x128xf32>
    %6 = vector.broadcast %5 : vector<1x1x128xf32> to vector<1x8x128xf32>
    %7 = arith.mulf %4, %6 : vector<1x8x128xf32>
    %8 = arith.addf %3, %7 : vector<1x8x128xf32>
    %9 = arith.index_cast %arg0 : i32 to index
    %10 = memref.load %arg1[%9] : memref<2xi32, #tpu.memory_space<smem>>
    %11 = tpu.iota {dimensions = array<i32: 1>} : vector<1x8x128xi32>
    %12 = vector.broadcast %10 : i32 to vector<1x8x128xi32>
    %13 = arith.cmpi slt, %11, %12 : vector<1x8x128xi32>
    %cst = arith.constant -3.000000e+38 : f32
    %14 = vector.broadcast %cst : f32 to vector<1x8x128xf32>
    %15 = arith.select %13, %8, %14 : vector<1x8x128xi1>, vector<1x8x128xf32>
    %cst_11 = arith.constant dense<0xFF800000> : vector<1x128xf32>
    %16 = vector.multi_reduction <maximumf>, %15, %cst_11 [1] : vector<1x8x128xf32> to vector<1x128xf32>
    %17 = vector.shape_cast %16 : vector<1x128xf32> to vector<1x1x128xf32>
    %18 = vector.broadcast %17 : vector<1x1x128xf32> to vector<1x8x128xf32>
    %19 = arith.subf %8, %18 : vector<1x8x128xf32>
    %20 = math.exp %19 : vector<1x8x128xf32>
    %cst_12 = arith.constant 0.000000e+00 : f32
    %21 = vector.broadcast %cst_12 : f32 to vector<1x8x128xf32>
    %22 = arith.select %13, %20, %21 : vector<1x8x128xi1>, vector<1x8x128xf32>
    %cst_13 = arith.constant dense<0.000000e+00> : vector<1x128xf32>
    %23 = vector.multi_reduction <add>, %22, %cst_13 [1] : vector<1x8x128xf32> to vector<1x128xf32>
    %24 = vector.shape_cast %23 : vector<1x128xf32> to vector<1x1x128xf32>
    %cst_14 = arith.constant 1.000000e-30 : f32
    %25 = vector.broadcast %cst_14 : f32 to vector<1x1x128xf32>
    %26 = arith.maximumf %24, %25 : vector<1x1x128xf32>
    %27 = vector.broadcast %26 : vector<1x1x128xf32> to vector<1x8x128xf32>
    %28 = arith.divf %22, %27 : vector<1x8x128xf32>
    %29 = arith.select %13, %28, %8 : vector<1x8x128xi1>, vector<1x8x128xf32>
    %c0_15 = arith.constant 0 : index
    %c0_16 = arith.constant 0 : index
    %c0_17 = arith.constant 0 : index
    %30 = vector.load %arg6[%c0_15, %c0_16, %c0_17] : memref<1x8x128xf32, #tpu.memory_space<vmem>>, vector<1x8x128xf32>
    tpu.vector_store %arg6[%c0_15, %c0_16, %c0_17], %8 {strides = array<i32>} : memref<1x8x128xf32, #tpu.memory_space<vmem>>, vector<1x8x128xf32>,
    %31 = arith.mulf %8, %29 : vector<1x8x128xf32>
    %c0_18 = arith.constant 0 : index
    %c0_19 = arith.constant 0 : index
    %c0_20 = arith.constant 0 : index
    %32 = vector.load %arg7[%c0_18, %c0_19, %c0_20] : memref<1x8x128xf32, #tpu.memory_space<vmem>>, vector<1x8x128xf32>
    tpu.vector_store %arg7[%c0_18, %c0_19, %c0_20], %31 {strides = array<i32>} : memref<1x8x128xf32, #tpu.memory_space<vmem>>, vector<1x8x128xf32>,
    return
  }
  func.func @transform_0(%arg0: i32, %arg1: memref<2xi32, #tpu.memory_space<smem>>) -> (i32, i32, i32) {
    %c0_i32 = arith.constant 0 : i32
    %c0_i32_0 = arith.constant 0 : i32
    %c0_i32_1 = arith.constant 0 : i32
    return %arg0, %c0_i32, %c0_i32_0 : i32, i32, i32
  }
  func.func @transform_1(%arg0: i32, %arg1: memref<2xi32, #tpu.memory_space<smem>>) -> (i32, i32, i32) {
    %c0_i32 = arith.constant 0 : i32
    %c0_i32_0 = arith.constant 0 : i32
    %c0_i32_1 = arith.constant 0 : i32
    return %arg0, %c0_i32, %c0_i32_0 : i32, i32, i32
  }
  func.func @transform_2(%arg0: i32, %arg1: memref<2xi32, #tpu.memory_space<smem>>) -> (i32, i32, i32) {
    %c0_i32 = arith.constant 0 : i32
    %c0_i32_0 = arith.constant 0 : i32
    %c0_i32_1 = arith.constant 0 : i32
    %c0_i32_2 = arith.constant 0 : i32
    return %c0_i32, %c0_i32_0, %c0_i32_1 : i32, i32, i32
  }
  func.func @transform_3(%arg0: i32, %arg1: memref<2xi32, #tpu.memory_space<smem>>) -> (i32, i32, i32) {
    %c0_i32 = arith.constant 0 : i32
    %c0_i32_0 = arith.constant 0 : i32
    %c0_i32_1 = arith.constant 0 : i32
    %c0_i32_2 = arith.constant 0 : i32
    return %c0_i32, %c0_i32_0, %c0_i32_1 : i32, i32, i32
  }
  func.func @transform_4(%arg0: i32, %arg1: memref<2xi32, #tpu.memory_space<smem>>) -> (i32, i32, i32) {
    %c0_i32 = arith.constant 0 : i32
    %c0_i32_0 = arith.constant 0 : i32
    %c0_i32_1 = arith.constant 0 : i32
    return %arg0, %c0_i32, %c0_i32_0 : i32, i32, i32
  }
  func.func @transform_5(%arg0: i32, %arg1: memref<2xi32, #tpu.memory_space<smem>>) -> (i32, i32, i32) {
    %c0_i32 = arith.constant 0 : i32
    %c0_i32_0 = arith.constant 0 : i32
    %c0_i32_1 = arith.constant 0 : i32
    return %arg0, %c0_i32, %c0_i32_0 : i32, i32, i32
  }
}

</mosaic_0001>

<bundles_post_ra>
// kernel: model_forward.3
= control target key start
LH: loop header
LB: loop body
LE: loop exit
PB: predicated region body
PF: predicated region fallthrough
CT: control target
= control target key end

     0   :  { %s815_s0 = inlined_call_operand.vmem [shape: s32[2], index: 0, kind: input, shape index: {}]   ;;  %s816_s1 = inlined_call_operand.vmem [shape: f32[2,8,128], index: 1, kind: input, shape index: {}]   ;;  %s817_s2 = inlined_call_operand.vmem [shape: f32[2,8,128], index: 2, kind: input, shape index: {}]   ;;  %s818_s3 = inlined_call_operand.vmem [shape: f32[1,1,128], index: 3, kind: input, shape index: {}]   ;;  %s819_s4 = inlined_call_operand.vmem [shape: f32[1,1,128], index: 4, kind: input, shape index: {}]   ;;  %s820_s5 = inlined_call_operand.hbm [shape: f32[2,8,128], index: 5, kind: output, shape index: {0}]   ;;  %s821_s6 = inlined_call_operand.hbm [shape: f32[2,8,128], index: 6, kind: output, shape index: {1}]  }
   0x1   :  { %s12_s23 = sshll.u32 %s815_s0, 4  ;;  %s13_s23 = int_to_ptr.vmem [resolvable:$true] %s12_s23 }
   0x2   :  { %s503_s24 = scalar_lea.vmem %s13_s23, 16  ;;  %p508_p1 = scmp.lt.s32.totalorder %s13_s23, %s13_s23 }
   0x3   :  { %p504_p0 = scmp.ne.s32.totalorder %s13_s23, %s503_s24  ;;  %p509_p2 = scmp.lt.s32.totalorder %s503_s24, %s503_s24 }
   0x5   :  { %p510_p3 = por %p509_p2, %p508_p1 }
   0x7   :  { %p511_p4 = pnand %p510_p3, %p504_p0 }
   0x9   :  { %514 = shalt.err (!%p511_p4)  }
   0xa   :  { %s613_s25 = smov [#allocation3]  }
   0xb   :  { %15 = dma.vmem_to_smem %s13_s23, 16, %s613_s25, [#allocation2] }
   0xc   :  { %587 = dma.done.wait [#allocation2], 16 }
   0xd   :  { %588 = vsyncadd [#allocation2], 4294967280 }
   0xe   :  { %17 = sfence }
   0xf   :  { %18 = vsyncpa [#allocation5], 0 }
  0x10   :  { %20 = vsyncpa [#allocation5 + $0x1], 0 }
  0x11   :  { %21 = vsyncpa [#allocation7], 0 }
  0x12   :  { %23 = vsyncpa [#allocation7 + $0x1], 0  ;;  %s654_s26 = smov 0   ;;  %s656_s0 = smov 0  }
  0x13   :  { %s658_s27 = smov 0   ;;  %s660_s28 = smov 0  }
  0x14 LB: > { %s675_s29 = sadd.s32 4294967295, %s611_s28   ;;  %s438_s30 = sadd.s32 4294967294, %s611_s28   ;;  %s611_s28 = sphi %s660_s28, %s829_s28   ;;  %s607_s27 = sphi %s658_s27, %s828_s27   ;;  %s603_s0 = sphi %s656_s0, %s827_s0   ;;  %s599_s26 = sphi %s654_s26, %s826_s26  }
  0x15   : > { %s679_s7 = sadd.s32 1, %s611_s28   ;;  %s130_s8 = sadd.s32 1, %s607_s27 }
  0x16   : > { %s127_s9 = ssub.s32 %s611_s28, %s679_s7  ;;  %p140_p5 = scmp.ne.s32.totalorder %s607_s27, %s603_s0 }
  0x17   : > { %p128_p6 = scmp.eq.s32.totalorder %s127_s9, 0  ;;  %p141_p7 = scmp.eq.s32.totalorder %s675_s29, 1 }
  0x18   : > { %p146_p8 = scmp.ne.s32.totalorder %s603_s0, %s599_s26  ;;  %p147_p9 = scmp.eq.s32.totalorder %s438_s30, 1 }
  0x19   : > { %s690_s10 = scalar_select %p128_p6, %s607_s27, %s130_s8  }
  0x1a   : > { %p692_p10 = por %p141_p7, %p140_p5  ;;  %p696_p11 = por %p147_p9, %p146_p8 }
  0x1b   : > { %p441_p12 = scmp.ge.s32.totalorder %s611_s28, 1  ;;  %p211_p13 = scmp.lt.s32.totalorder %s611_s28, 3 }
  0x1d   : > { %p212_p0 = pnand %p441_p12, %p211_p13 }
  0x1e   : > { %s703_s13 = sand.u32 (!%p212_p0), 1, %s603_s0   ;;  %p247_p1 = scmp.lt.s32.totalorder (!%p212_p0), %s675_s29, 1  ;;  %v275_v0 = vlaneseq (!%p212_p0)  ;;  %v446_v1 = vld [vmem:[%s819_s4] ss:$0 sm:$0xff] (!%p212_p0) }
  0x1f   : > { %215 = sbr.rel (%p212_p0) target bundleno = 132 (0x84), region = 36  ;;  %s442_s14 = sshll.u32 (!%p212_p0), %s703_s13, 3  ;;  %v447_v2 = vld [vmem:[%s818_s3] ss:$0 sm:$0xff] (!%p212_p0) }
  0x20   : > { %s274_s15 = sld [smem:[#allocation3 + %s675_s29]] (!%p212_p0)  ;;  %s239_s22 = scalar_lea.vmem (!%p212_p0), [#allocation4], %s442_s14  ;;  %v276_v3 = vshrl.u32 (!%p212_p0), %v275_v0, 7 }
  0x21   : > { %s322_s23 = sshll.u32 (!%p212_p0), %s239_s22, 4  ;;  %s614_s24 = smov (!%p212_p0), [#allocation4]   ;;  %s724_s23 = int_to_ptr.vmem [resolvable:$true] %s322_s23 }
  0x22   : > { %s515_s21 = scalar_lea.vmem (!%p212_p0), %s724_s23, 128  ;;  %s519_s25 = sshll.u32 (!%p212_p0), %s614_s24, 4  ;;  %s520_s25 = int_to_ptr.vmem [resolvable:$false] %s519_s25 }
  0x23   : > { %p516_p2 = scmp.ne.s32.totalorder (!%p212_p0), %s724_s23, %s515_s21  ;;  %p522_p5 = scmp.lt.s32.totalorder (!%p212_p0), %s724_s23, %s520_s25 }
  0x25   : > { %p517_p3 = pnand (!%p212_p0), %p516_p2, %p692_p10 }
  0x26   : > { %s248_s16 = scalar_select %p247_p1, %s675_s29, 1  ;;  %v277_v6 = vstv %s274_s15 }
  0x27   : > { %vm726_vm0 = vcmp.lt.s32.totalorder %v276_v3, %v277_v6  ;;  %s304_s15 = scalar_lea.sflag [#allocation5], %s703_s13  ;;  %p518_p4 = pneg %p517_p3 }
  0x28   : > { %s444_s19 = sshll.u32 %s248_s16, 3  ;;  %s450_s16 = sshll.u32 %s675_s29, 7 }
  0x29   : > { %s250_s30 = scalar_lea.vmem %s816_s1, %s444_s19  ;;  %s254_s17 = scalar_lea.vmem %s817_s2, %s444_s19 }
  0x2a   : > { %v255_v4 = vld [vmem:[%s254_s17] sm:$0xff]  ;;  %s735_s20 = scalar_lea.hbm %s820_s5, %s450_s16 }
  0x2b   : > { %v264_v5 = vld [vmem:[%s250_s30] sm:$0xff]  ;;  %v263_v7 = vmul.f32 %v446_v1, %v255_v4  ;;  %s521_s30 = scalar_lea.vmem %s520_s25, 256 }
  0x2c   : > { %v272_v8 = vmul.f32 %v447_v2, %v264_v5  ;;  %p523_p6 = scmp.lt.s32.totalorder %s521_s30, %s515_s21 }
  0x2e   : > { %v273_v10 = vadd.f32 %v272_v8, %v263_v7  ;;  %p524_p7 = por %p523_p6, %p522_p5 }
  0x30   : > { %300 = vst [vmem:[%s239_s22] sm:$0xff] %v273_v10  ;;  %v279_v11 = vsel %vm726_vm0, %v273_v10, -3e+38  ;;  %p525_p8 = pnand %p524_p7, %p518_p4 }
  0x31   : > { %v280_v12 = vrot.slane %v279_v11, 4 }
  0x32   : > { %528 = shalt.err (!%p525_p8)
}
  0x33   : > { %s529_s22 = scalar_lea.hbm %s735_s20, 128  ;;  %s533_s17 = scalar_lea.hbm %s820_s5, 256 }
  0x34   : > { %p530_p9 = scmp.ne.s32.totalorder %s735_s20, %s529_s22  ;;  %p534_p0 = scmp.lt.u32.totalorder %s735_s20, %s820_s5 }
  0x35   : > { %p535_p1 = scmp.lt.u32.totalorder %s533_s17, %s529_s22  ;;  %p537_p3 = scmp.lt.u32.totalorder %s529_s22, %s735_s20 }
  0x36   : > { %p531_p12 = pnand %p530_p9, %p692_p10 }
  0x37   : > { %p536_p2 = por %p535_p1, %p534_p0 }
  0x38   : > { %p532_p13 = pneg %p531_p12 }
  0x39   : > { %p538_p4 = por %p537_p3, %p536_p2 }
  0x3b   : > { %p539_p5 = pnand %p538_p4, %p532_p13 }
  0x3d   : > { %542 = shalt.err (!%p539_p5)
}
  0x3e   : > { %454 = dma.vmem_to_hbm [thread:$0]  (%p692_p10), %s724_s23, 128, %s735_s20, %s304_s15   ;;  %v281_v13 = vmax.f32 %v279_v11, %v280_v12 }
  0x3f   : > { %s246_s23 = scalar_lea.vmem [#allocation6], %s442_s14  ;;  %s774_s24 = scalar_lea.hbm %s821_s6, %s450_s16 }
  0x40   : > { %v282_v14 = vrot.slane %v281_v13, 2  ;;  %s335_s20 = sshll.u32 %s246_s23, 4  ;;  %s309_s25 = scalar_lea.sflag [#allocation7], %s703_s13  ;;  %s767_s20 = int_to_ptr.vmem [resolvable:$true] %s335_s20 }
  0x41   : > { %s543_s14 = scalar_lea.vmem %s767_s20, 128  ;;  %s615_s30 = smov [#allocation6]  }
  0x42   : > { %v283_v15 = vmax.f32 %v281_v13, %v282_v14  ;;  %p544_p6 = scmp.ne.s32.totalorder %s767_s20, %s543_s14  ;;  %s547_s22 = sshll.u32 %s615_s30, 4  ;;  %s548_s22 = int_to_ptr.vmem [resolvable:$false] %s547_s22 }
  0x43   : > { %s549_s8 = scalar_lea.vmem %s548_s22, 256  ;;  %p550_p9 = scmp.lt.s32.totalorder %s767_s20, %s548_s22 }
  0x44   : > { %v284_v16 = vrot.slane %v283_v15, 1  ;;  %p545_p7 = pnand %p544_p6, %p692_p10  ;;  %p551_p12 = scmp.lt.s32.totalorder %s549_s8, %s543_s14 }
  0x46   : > { %v285_v17 = vmax.f32 %v283_v15, %v284_v16  ;;  %p546_p8 = pneg %p545_p7  ;;  %p552_p13 = por %p551_p12, %p550_p9 }
  0x48   : > { %v286_v18 = vsub.f32 %v273_v10, %v285_v17  ;;  %p553_p0 = pnand %p552_p13, %p546_p8 }
  0x4a   : > { %v287_v19 = vmul.f32 1.442695, %v286_v18 }
  0x4c   : > { %499 = vpow2.f32 %v287_v19 }
  0x56   : > { %v500_v20 = vpop.eup %499 }
  0x57   : > { %v289_v21 = vsel %vm726_vm0, %v500_v20, 0.0 }
  0x58   : > { %v290_v22 = vrot.slane %v289_v21, 4 }
  0x5a   : > { %v291_v23 = vadd.f32 %v290_v22, %v289_v21 }
  0x5c   : > { %v292_v24 = vrot.slane %v291_v23, 2 }
  0x5e   : > { %v293_v25 = vadd.f32 %v292_v24, %v291_v23 }
  0x60   : > { %v294_v26 = vrot.slane %v293_v25, 1 }
  0x62   : > { %v295_v27 = vadd.f32 %v294_v26, %v293_v25 }
  0x64   : > { %v296_v28 = vmax.f32 %v295_v27, 1e-30 }
  0x66   : > { %501 = vrcp.f32 %v296_v28 }
  0x70   : > { %v502_v29 = vpop.eup %501 }
  0x71   : > { %v298_v30 = vmul.f32 %v502_v29, %v289_v21 }
  0x73   : > { %v299_v31 = vsel %vm726_vm0, %v298_v30, %v273_v10 }
  0x74   : > { %v301_v32 = vmul.f32 %v299_v31, %v273_v10 }
  0x76   : > { %302 = vst [vmem:[%s246_s23] sm:$0xff] %v301_v32 }
  0x77   : > { %556 = shalt.err (!%p553_p0)
}
  0x78   : > { %s557_s29 = scalar_lea.hbm %s774_s24, 128  ;;  %s561_s9 = scalar_lea.hbm %s821_s6, 256 }
  0x79   : > { %p558_p1 = scmp.ne.s32.totalorder %s774_s24, %s557_s29  ;;  %p562_p4 = scmp.lt.u32.totalorder %s774_s24, %s821_s6 }
  0x7a   : > { %p563_p5 = scmp.lt.u32.totalorder %s561_s9, %s557_s29  ;;  %p565_p7 = scmp.lt.u32.totalorder %s557_s29, %s774_s24 }
  0x7b   : > { %p559_p2 = pnand %p558_p1, %p692_p10 }
  0x7c   : > { %p564_p6 = por %p563_p5, %p562_p4 }
  0x7d   : > { %p560_p3 = pneg %p559_p2 }
  0x7e   : > { %p566_p8 = por %p565_p7, %p564_p6 }
  0x80   : > { %p567_p9 = pnand %p566_p8, %p560_p3 }
  0x82   : > { %570 = shalt.err (!%p567_p9)
}
  0x83   : > { %455 = dma.vmem_to_hbm [thread:$0]  (%p692_p10), %s767_s20, 128, %s774_s24, %s309_s25  }
  0x84 PF: > { %p465_p12 = scmp.ge.s32.totalorder %s611_s28, 2  ;;  %s347_s19 = sand.u32 1, %s599_s26  }
  0x85   : > { %s348_s23 = scalar_lea.sflag [#allocation5], %s347_s19 }
  0x86   : > { %p459_p13 = pnand %p465_p12, %p696_p11 }
  0x88   : > { %590 = dma.done.wait (!%p459_p13), %s348_s23, 128  }
  0x89   : > { %592 = vsyncadd (!%p459_p13), %s348_s23, 4294967168  ;;  %s357_s15 = scalar_lea.sflag [#allocation7], %s347_s19 }
  0x8a   : > { %594 = dma.done.wait (!%p459_p13), %s357_s15, 128  }
  0x8b   : > { %596 = vsyncadd (!%p459_p13), %s357_s15, 4294967168  ;;  %p26_p10 = scmp.ge.s32.totalorder %s679_s7, 4   ;;  %s826_s26 = smov %s603_s0 }
  0x8c   : > { %s827_s0 = smov %s607_s27  ;;  %s828_s27 = smov %s690_s10 }
  0x8d   : > { %s829_s28 = smov %s679_s7  ;;  %28 = sbr.rel (!%p26_p10) target bundleno = 20 (0x14), region = 91 }
  0x94   :  { %362 = vsyncpa [#allocation5], 1 }
  0x95   :  { %364 = vsyncpa [#allocation5 + $0x1], 1 }
  0x96   :  { %365 = vsyncpa [#allocation7], 1 }
  0x97   :  { %367 = vsyncpa [#allocation7 + $0x1], 1 }

// kernel: model_forward.2
= control target key start
LH: loop header
LB: loop body
LE: loop exit
PB: predicated region body
PF: predicated region fallthrough
CT: control target
= control target key end

     0   :  { %s12666_s0 = inlined_call_operand.<no memory space> [shape: s32[1], index: 0, kind: input, shape index: {}]   ;;  %s12667_s1 = inlined_call_operand.vmem [shape: f32[16,2048], index: 1, kind: input, shape index: {}]   ;;  %s12668_s2 = inlined_call_operand.vmem [shape: bf16[2,1024,1024], index: 2, kind: input, shape index: {}]   ;;  %s12669_s3 = inlined_call_operand.vmem [shape: f32[2,1,1024], index: 3, kind: input, shape index: {}]   ;;  %s12670_s4 = inlined_call_operand.vmem [shape: bf16[2,1024,1024], index: 4, kind: input, shape index: {}]   ;;  %s12671_s5 = inlined_call_operand.vmem [shape: f32[2,1,1024], index: 5, kind: input, shape index: {}]   ;;  %s12672_s6 = inlined_call_operand.vmem [shape: bf16[2,1024,128], index: 6, kind: input, shape index: {}]   ;;  %s12673_s7 = inlined_call_operand.vmem [shape: f32[2,1,128], index: 7, kind: input, shape index: {}]   ;;  %s12674_s8 = inlined_call_operand.vmem [shape: f32[2,16,1024], index: 8, kind: output, shape index: {0}]   ;;  %s12675_s9 = inlined_call_operand.vmem [shape: f32[2,16,128], index: 9, kind: output, shape index: {1}]  }
   0x1   :  { %15 = sst [smem:[#allocation3]] %s12666_s0 }
   0x2   :  { %s10888_s11 = smov 0   ;;  %s10890_s12 = smov 0  }
   0x3   :  { %s10892_s13 = smov 0   ;;  %s10894_s14 = smov 0  }
   0x4   :  { %s10896_s15 = smov 0  }
   0x5 LB: > { %s33_s0 = sadd.s32 1, %s10829_s14  ;;  %s37_s16 = ssub.s32 1, %s10829_s14  ;;  %s10833_s15 = sphi %s10896_s15, %s21_s15   ;;  %s10829_s14 = sphi %s10894_s14, %s12681_s14   ;;  %s10825_s13 = sphi %s10892_s13, %s12680_s13   ;;  %s10821_s12 = sphi %s10890_s12, %s12679_s12   ;;  %s10817_s11 = sphi %s10888_s11, %s12678_s11  }
   0x6   : > { %p35_p0 = scmp.ge.s32.totalorder %s33_s0, 2  ;;  %p51_p1 = scmp.ne.s32.totalorder %s10821_s12, %s10817_s11 }
   0x7   : > { %p52_p2 = scmp.eq.s32.totalorder %s10833_s15, 0  ;;  %s44_s19 = sadd.s32 1, %s10821_s12 }
   0x8   : > { %s12683_s0 = smov (%p35_p0, %s33_s0), 0  ;;  %p9335_p5 = scmp.ge.s32.totalorder %s10833_s15, 2 }
   0x9   : > { %p53_p3 = por %p52_p2, %p51_p1  ;;  %s38_s17 = ssub.s32 1, %s12683_s0 }
   0xa   : > { %s40_s18 = ssub.s32 %s37_s16, %s38_s17  ;;  %289 = sbr.rel (%p9335_p5) target bundleno = 29 (0x1d), region = 16 }
   0xb   : > { %p42_p4 = scmp.eq.s32.totalorder %s40_s18, 0 }
   0xd   : > { %s10923_s20 = scalar_select %p42_p4, %s10821_s12, %s44_s19  }
  0x11   : > { %292 = sbr.rel (!%p53_p3) target bundleno = 29 (0x1d), region = 20  ;;  %s294_s21 = sand.u32 (%p53_p3), 1, %s10821_s12  }
  0x12   : > { %s10468_s22 = sshll.u32 (%p53_p3), %s37_s16, 6  ;;  %s9336_s23 = sshll.u32 (%p53_p3), %s294_s21, 7 }
  0x13   : > { %s10930_s26 = scalar_lea.vmem (%p53_p3), %s12667_s1, %s10468_s22  ;;  %s296_s27 = scalar_lea.vmem (%p53_p3), [#allocation4], %s9336_s23 }
  0x14   : > { %v316_v0 = vld [vmem:[%s10930_s26] sm:$0xff] (%p53_p3)  ;;  %v318_v1 = vld [vmem:[%s10930_s26 + $0x8] sm:$0xff] (%p53_p3)  ;;  %v320_v2 = vld [vmem:[%s10930_s26 + $0x10] sm:$0xff] (%p53_p3) }
  0x15   : > { %317 = vst [vmem:[%s296_s27] sm:$0xff] (%p53_p3), %v316_v0  ;;  %319 = vst [vmem:[%s296_s27 + $0x8] sm:$0xff] (%p53_p3), %v318_v1  ;;  %v322_v3 = vld [vmem:[%s10930_s26 + $0x18] sm:$0xff] (%p53_p3)  ;;  %v324_v4 = vld [vmem:[%s10930_s26 + $0x20] sm:$0xff] (%p53_p3) }
  0x16   : > { %321 = vst [vmem:[%s296_s27 + $0x10] sm:$0xff] (%p53_p3), %v320_v2  ;;  %v326_v5 = vld [vmem:[%s10930_s26 + $0x28] sm:$0xff] (%p53_p3)  ;;  %323 = vst [vmem:[%s296_s27 + $0x18] sm:$0xff] (%p53_p3), %v322_v3  ;;  %v328_v6 = vld [vmem:[%s10930_s26 + $0x30] sm:$0xff] (%p53_p3) }
  0x17   : > { %325 = vst [vmem:[%s296_s27 + $0x20] sm:$0xff] (%p53_p3), %v324_v4  ;;  %327 = vst [vmem:[%s296_s27 + $0x28] sm:$0xff] (%p53_p3), %v326_v5  ;;  %v330_v7 = vld [vmem:[%s10930_s26 + $0x38] sm:$0xff] (%p53_p3)  ;;  %v332_v8 = vld [vmem:[%s10930_s26 + $0x80] sm:$0xff] (%p53_p3) }
  0x18   : > { %329 = vst [vmem:[%s296_s27 + $0x30] sm:$0xff] %v328_v6  ;;  %331 = vst [vmem:[%s296_s27 + $0x38] sm:$0xff] %v330_v7  ;;  %v334_v9 = vld [vmem:[%s10930_s26 + $0x88] sm:$0xff]  ;;  %v336_v10 = vld [vmem:[%s10930_s26 + $0x90] sm:$0xff] }
  0x19   : > { %333 = vst [vmem:[%s296_s27 + $0x40] sm:$0xff] %v332_v8  ;;  %v338_v11 = vld [vmem:[%s10930_s26 + $0x98] sm:$0xff]  ;;  %335 = vst [vmem:[%s296_s27 + $0x48] sm:$0xff] %v334_v9  ;;  %v340_v12 = vld [vmem:[%s10930_s26 + $0xa0] sm:$0xff] }
  0x1a   : > { %337 = vst [vmem:[%s296_s27 + $0x50] sm:$0xff] %v336_v10  ;;  %339 = vst [vmem:[%s296_s27 + $0x58] sm:$0xff] %v338_v11  ;;  %v342_v13 = vld [vmem:[%s10930_s26 + $0xa8] sm:$0xff]  ;;  %v344_v14 = vld [vmem:[%s10930_s26 + $0xb0] sm:$0xff] }
  0x1b   : > { %341 = vst [vmem:[%s296_s27 + $0x60] sm:$0xff] %v340_v12  ;;  %343 = vst [vmem:[%s296_s27 + $0x68] sm:$0xff] %v342_v13  ;;  %v346_v15 = vld [vmem:[%s10930_s26 + $0xb8] sm:$0xff] }
  0x1c   : > { %345 = vst [vmem:[%s296_s27 + $0x70] sm:$0xff] %v344_v14  ;;  %347 = vst [vmem:[%s296_s27 + $0x78] sm:$0xff] %v346_v15 }
  0x1d PF: > { %p9339_p6 = scmp.ge.s32.totalorder %s10833_s15, 1  ;;  %p396_p7 = scmp.lt.s32.totalorder %s10833_s15, 3 }
  0x1f   : > { %p397_p8 = pnand %p9339_p6, %p396_p7 }
  0x20   : > { %p479_p9 = scmp.lt.s32.totalorder (!%p397_p8), %s10825_s13, 1  ;;  %s403_s28 = sand.u32 (!%p397_p8), 1, %s10817_s11  }
  0x21   : > { %400 = sbr.rel (%p397_p8) target bundleno = 1549 (0x60d), region = 67  ;;  %s9340_s29 = sshll.u32 (!%p397_p8), %s403_s28, 7 }
  0x22   : > { %s10956_s16 = scalar_lea.vmem (!%p397_p8), [#allocation4], %s9340_s29  ;;  %s8197_s17 = smul.u32 (!%p397_p8), 2654435769, %s10825_s13 }
  0x23   : > { %v528_v16 = vld [vmem:[%s10956_s16 + $0x8] sm:$0xff] (!%p397_p8) }
  0x24   : > { %v536_v17 = vld [vmem:[%s10956_s16 + $0x48] sm:$0xff] (!%p397_p8) }
  0x25   : > { %v10967_v18 = vpack.c.bf16 (!%p397_p8), %v536_v17, %v528_v16 }
  0x27   : > { %3697 = vmatprep.mubr.bf16.mxu0 (!%p397_p8), %v10967_v18  ;;  %3869 = vmatprep.mubr.bf16.mxu1 (!%p397_p8), %v10967_v18 }
  0x28   : > { %s10953_s30 = scalar_select %p479_p9, %s10825_s13, 1 }
  0x2a   : > { %s10469_s10 = sshll.u32 %s10953_s30, 12  ;;  %s9343_s11 = sshll.u32 %s10953_s30, 3 }
  0x2b   : > { %s10965_s19 = scalar_lea.vmem %s12668_s2, %s10469_s10  ;;  %s11504_s23 = scalar_lea.vmem %s12669_s3, %s9343_s11 }
  0x2c   : > { %v551_v19 = vld [vmem:[%s10965_s19] sm:$0xff]  ;;  %v552_v21 = vld [vmem:[%s10965_s19 + $0x8] sm:$0xff]  ;;  %s11574_s26 = scalar_lea.vmem %s12670_s4, %s10469_s10  ;;  %s10471_s27 = sshll.u32 %s10953_s30, 9 }
  0x2d   : > { %v555_v20 = vld [vmem:[%s10965_s19 + $0x20] sm:$0xff]  ;;  %v556_v23 = vld [vmem:[%s10965_s19 + $0x28] sm:$0xff]  ;;  %s12038_s10 = scalar_lea.vmem %s12672_s6, %s10471_s27  ;;  %s496_s21 = scalar_lea.vmem %s12671_s5, %s9343_s11 }
  0x2e   : > { %v9354_v22 = vcombine.high %v551_v19, %v555_v20  ;;  %v9353_v24 = vcombine.low %v551_v19, %v555_v20  ;;  %v559_v25 = vld [vmem:[%s10965_s19 + $0x40] sm:$0xff]  ;;  %v9356_v27 = vcombine.high %v552_v21, %v556_v23  ;;  %v9355_v28 = vcombine.low %v552_v21, %v556_v23  ;;  %v560_v30 = vld [vmem:[%s10965_s19 + $0x48] sm:$0xff]  ;;  %s10472_s11 = sshll.u32 %s10953_s30, 7  ;;  %s504_s27 = scalar_lea.vmem %s12673_s7, %s10953_s30 }
  0x2f   : > { %v563_v26 = vld [vmem:[%s10965_s19 + $0x60] sm:$0xff]  ;;  %v564_v31 = vld [vmem:[%s10965_s19 + $0x68] sm:$0xff]  ;;  %s12377_s24 = scalar_lea.vmem %s12674_s8, %s10472_s11  ;;  %s10473_s28 = sshll.u32 %s10953_s30, 4 }
  0x30   : > { %v9362_v29 = vcombine.high %v559_v25, %v563_v26  ;;  %v567_v32 = vld [vmem:[%s10965_s19 + $0x80] sm:$0xff]  ;;  %3665 = vmatprep.subr.bf16.mxu0 %v9354_v22  ;;  %v9364_v33 = vcombine.high %v560_v30, %v564_v31  ;;  %v568_v35 = vld [vmem:[%s10965_s19 + $0x88] sm:$0xff]  ;;  %3837 = vmatprep.subr.bf16.mxu1 %v9356_v27  ;;  %v9361_v37 = vcombine.low %v559_v25, %v563_v26 }
  0x31   : > { %v571_v34 = vld [vmem:[%s10965_s19 + $0xa0] sm:$0xff]  ;;  %v572_v36 = vld [vmem:[%s10965_s19 + $0xa8] sm:$0xff]  ;;  %3666 = vmatpush1.bf16.msra.mxu0 %v9353_v24  ;;  %3838 = vmatpush1.bf16.msra.mxu1 %v9355_v28  ;;  %v9363_v38 = vcombine.low %v560_v30, %v564_v31 }
  0x32   : > { %3667 = vmatprep.subr.bf16.mxu0 %v9362_v29  ;;  %v9370_v39 = vcombine.high %v567_v32, %v571_v34  ;;  %3839 = vmatprep.subr.bf16.mxu1 %v9364_v33  ;;  %v9372_v40 = vcombine.high %v568_v35, %v572_v36  ;;  %v575_v41 = vld [vmem:[%s10965_s19 + $0xc0] sm:$0xff]  ;;  %v576_v43 = vld [vmem:[%s10965_s19 + $0xc8] sm:$0xff]  ;;  %v9369_v45 = vcombine.low %v567_v32, %v571_v34 }
  0x33   : > { %v579_v42 = vld [vmem:[%s10965_s19 + $0xe0] sm:$0xff]  ;;  %v580_v44 = vld [vmem:[%s10965_s19 + $0xe8] sm:$0xff]  ;;  %v9371_v46 = vcombine.low %v568_v35, %v572_v36 }
  0x34   : > { %v9378_v47 = vcombine.high %v575_v41, %v579_v42  ;;  %v9380_v48 = vcombine.high %v576_v43, %v580_v44  ;;  %v583_v49 = vld [vmem:[%s10965_s19 + $0x100] sm:$0xff]  ;;  %v584_v51 = vld [vmem:[%s10965_s19 + $0x108] sm:$0xff]  ;;  %v9377_v53 = vcombine.low %v575_v41, %v579_v42  ;;  %v9379_v54 = vcombine.low %v576_v43, %v580_v44 }
  0x35   : > { %3668 = vmatpush1.bf16.msra.mxu0 %v9361_v37  ;;  %3840 = vmatpush1.bf16.msra.mxu1 %v9363_v38  ;;  %v587_v50 = vld [vmem:[%s10965_s19 + $0x120] sm:$0xff]  ;;  %v588_v52 = vld [vmem:[%s10965_s19 + $0x128] sm:$0xff] }
  0x36   : > { %3669 = vmatprep.subr.bf16.mxu0 %v9370_v39  ;;  %3841 = vmatprep.subr.bf16.mxu1 %v9372_v40  ;;  %v9386_v55 = vcombine.high %v583_v49, %v587_v50  ;;  %v9388_v56 = vcombine.high %v584_v51, %v588_v52  ;;  %v591_v57 = vld [vmem:[%s10965_s19 + $0x140] sm:$0xff]  ;;  %v592_v59 = vld [vmem:[%s10965_s19 + $0x148] sm:$0xff]  ;;  %v9385_v61 = vcombine.low %v583_v49, %v587_v50 }
  0x37   : > { %v595_v58 = vld [vmem:[%s10965_s19 + $0x160] sm:$0xff]  ;;  %v596_v60 = vld [vmem:[%s10965_s19 + $0x168] sm:$0xff]  ;;  %v9387_v62 = vcombine.low %v584_v51, %v588_v52 }
  0x38   : > { %v9394_v63 = vcombine.high %v591_v57, %v595_v58  ;;  %v9396_v0 = vcombine.high %v592_v59, %v596_v60  ;;  %v599_v1 = vld [vmem:[%s10965_s19 + $0x180] sm:$0xff]  ;;  %v600_v3 = vld [vmem:[%s10965_s19 + $0x188] sm:$0xff]  ;;  %v9393_v5 = vcombine.low %v591_v57, %v595_v58  ;;  %v9395_v6 = vcombine.low %v592_v59, %v596_v60 }
  0x39   : > { %3670 = vmatpush1.bf16.msra.mxu0 %v9369_v45  ;;  %3842 = vmatpush1.bf16.msra.mxu1 %v9371_v46  ;;  %v603_v2 = vld [vmem:[%s10965_s19 + $0x1a0] sm:$0xff]  ;;  %v604_v4 = vld [vmem:[%s10965_s19 + $0x1a8] sm:$0xff] }
  0x3a   : > { %3671 = vmatprep.subr.bf16.mxu0 %v9378_v47  ;;  %3843 = vmatprep.subr.bf16.mxu1 %v9380_v48  ;;  %v9402_v7 = vcombine.high %v599_v1, %v603_v2  ;;  %v9404_v8 = vcombine.high %v600_v3, %v604_v4  ;;  %v607_v9 = vld [vmem:[%s10965_s19 + $0x1c0] sm:$0xff]  ;;  %v608_v11 = vld [vmem:[%s10965_s19 + $0x1c8] sm:$0xff]  ;;  %v9401_v13 = vcombine.low %v599_v1, %v603_v2 }
  0x3b   : > { %v611_v10 = vld [vmem:[%s10965_s19 + $0x1e0] sm:$0xff]  ;;  %v612_v12 = vld [vmem:[%s10965_s19 + $0x1e8] sm:$0xff]  ;;  %v9403_v14 = vcombine.low %v600_v3, %v604_v4 }
  0x3c   : > { %v9410_v15 = vcombine.high %v607_v9, %v611_v10  ;;  %v9412_v16 = vcombine.high %v608_v11, %v612_v12  ;;  %v615_v17 = vld [vmem:[%s10965_s19 + $0x200] sm:$0xff]  ;;  %v616_v20 = vld [vmem:[%s10965_s19 + $0x208] sm:$0xff]  ;;  %v9409_v22 = vcombine.low %v607_v9, %v611_v10  ;;  %v9411_v23 = vcombine.low %v608_v11, %v612_v12 }
  0x3d   : > { %3672 = vmatpush1.bf16.msra.mxu0 %v9377_v53  ;;  %3844 = vmatpush1.bf16.msra.mxu1 %v9379_v54  ;;  %v619_v19 = vld [vmem:[%s10965_s19 + $0x220] sm:$0xff]  ;;  %v620_v21 = vld [vmem:[%s10965_s19 + $0x228] sm:$0xff] }
  0x3e   : > { %3673 = vmatprep.subr.bf16.mxu0 %v9386_v55  ;;  %3845 = vmatprep.subr.bf16.mxu1 %v9388_v56  ;;  %v9418_v24 = vcombine.high %v615_v17, %v619_v19  ;;  %v9420_v25 = vcombine.high %v616_v20, %v620_v21  ;;  %v623_v26 = vld [vmem:[%s10965_s19 + $0x240] sm:$0xff]  ;;  %v624_v28 = vld [vmem:[%s10965_s19 + $0x248] sm:$0xff]  ;;  %v9417_v30 = vcombine.low %v615_v17, %v619_v19 }
  0x3f   : > { %v627_v27 = vld [vmem:[%s10965_s19 + $0x260] sm:$0xff]  ;;  %v628_v29 = vld [vmem:[%s10965_s19 + $0x268] sm:$0xff]  ;;  %v9419_v31 = vcombine.low %v616_v20, %v620_v21 }
  0x40   : > { %v9426_v32 = vcombine.high %v623_v26, %v627_v27  ;;  %v9428_v33 = vcombine.high %v624_v28, %v628_v29  ;;  %v631_v34 = vld [vmem:[%s10965_s19 + $0x280] sm:$0xff]  ;;  %v632_v36 = vld [vmem:[%s10965_s19 + $0x288] sm:$0xff]  ;;  %v9425_v38 = vcombine.low %v623_v26, %v627_v27  ;;  %v9427_v39 = vcombine.low %v624_v28, %v628_v29 }
  0x41   : > { %3674 = vmatpush1.bf16.msra.mxu0 %v9385_v61  ;;  %3846 = vmatpush1.bf16.msra.mxu1 %v9387_v62  ;;  %v635_v35 = vld [vmem:[%s10965_s19 + $0x2a0] sm:$0xff]  ;;  %v636_v37 = vld [vmem:[%s10965_s19 + $0x2a8] sm:$0xff] }
  0x42   : > { %3675 = vmatprep.subr.bf16.mxu0 %v9394_v63  ;;  %3847 = vmatprep.subr.bf16.mxu1 %v9396_v0  ;;  %v9434_v40 = vcombine.high %v631_v34, %v635_v35  ;;  %v9436_v41 = vcombine.high %v632_v36, %v636_v37  ;;  %v639_v42 = vld [vmem:[%s10965_s19 + $0x2c0] sm:$0xff]  ;;  %v640_v44 = vld [vmem:[%s10965_s19 + $0x2c8] sm:$0xff]  ;;  %v9433_v46 = vcombine.low %v631_v34, %v635_v35  ;;  %v530_v34 = vld [vmem:[%s10956_s16 + $0x18] sm:$0xff] }
  0x43   : > { %v643_v43 = vld [vmem:[%s10965_s19 + $0x2e0] sm:$0xff]  ;;  %v644_v45 = vld [vmem:[%s10965_s19 + $0x2e8] sm:$0xff]  ;;  %v9435_v47 = vcombine.low %v632_v36, %v636_v37  ;;  %v538_v35 = vld [vmem:[%s10956_s16 + $0x58] sm:$0xff] }
  0x44   : > { %v9442_v48 = vcombine.high %v639_v42, %v643_v43  ;;  %v9444_v49 = vcombine.high %v640_v44, %v644_v45  ;;  %v647_v50 = vld [vmem:[%s10965_s19 + $0x300] sm:$0xff]  ;;  %v648_v52 = vld [vmem:[%s10965_s19 + $0x308] sm:$0xff]  ;;  %v9441_v54 = vcombine.low %v639_v42, %v643_v43  ;;  %v9443_v55 = vcombine.low %v640_v44, %v644_v45 }
  0x45   : > { %3676 = vmatpush1.bf16.msra.mxu0 %v9393_v5  ;;  %3848 = vmatpush1.bf16.msra.mxu1 %v9395_v6  ;;  %v651_v51 = vld [vmem:[%s10965_s19 + $0x320] sm:$0xff]  ;;  %v652_v53 = vld [vmem:[%s10965_s19 + $0x328] sm:$0xff]  ;;  %v11051_v42 = vpack.c.bf16 %v538_v35, %v530_v34 }
  0x46   : > { %3677 = vmatprep.subr.bf16.mxu0 %v9402_v7  ;;  %3849 = vmatprep.subr.bf16.mxu1 %v9404_v8  ;;  %v9450_v56 = vcombine.high %v647_v50, %v651_v51  ;;  %v9452_v57 = vcombine.high %v648_v52, %v652_v53  ;;  %v655_v58 = vld [vmem:[%s10965_s19 + $0x340] sm:$0xff]  ;;  %v656_v60 = vld [vmem:[%s10965_s19 + $0x348] sm:$0xff]  ;;  %v9449_v62 = vcombine.low %v647_v50, %v651_v51 }
  0x47   : > { %v659_v59 = vld [vmem:[%s10965_s19 + $0x360] sm:$0xff]  ;;  %v660_v61 = vld [vmem:[%s10965_s19 + $0x368] sm:$0xff]  ;;  %v9451_v63 = vcombine.low %v648_v52, %v652_v53 }
  0x48   : > { %v9458_v0 = vcombine.high %v655_v58, %v659_v59  ;;  %v9460_v1 = vcombine.high %v656_v60, %v660_v61  ;;  %v663_v2 = vld [vmem:[%s10965_s19 + $0x380] sm:$0xff]  ;;  %v664_v4 = vld [vmem:[%s10965_s19 + $0x388] sm:$0xff]  ;;  %v9457_v6 = vcombine.low %v655_v58, %v659_v59  ;;  %v9459_v7 = vcombine.low %v656_v60, %v660_v61 }
  0x49   : > { %3678 = vmatpush1.bf16.msra.mxu0 %v9401_v13  ;;  %3850 = vmatpush1.bf16.msra.mxu1 %v9403_v14  ;;  %v667_v3 = vld [vmem:[%s10965_s19 + $0x3a0] sm:$0xff]  ;;  %v668_v5 = vld [vmem:[%s10965_s19 + $0x3a8] sm:$0xff] }
  0x4a   : > { %3679 = vmatprep.subr.bf16.mxu0 %v9410_v15  ;;  %3851 = vmatprep.subr.bf16.mxu1 %v9412_v16  ;;  %v9466_v8 = vcombine.high %v663_v2, %v667_v3  ;;  %v9468_v9 = vcombine.high %v664_v4, %v668_v5  ;;  %v671_v10 = vld [vmem:[%s10965_s19 + $0x3c0] sm:$0xff]  ;;  %v672_v12 = vld [vmem:[%s10965_s19 + $0x3c8] sm:$0xff]  ;;  %v9465_v14 = vcombine.low %v663_v2, %v667_v3 }
  0x4b   : > { %v675_v11 = vld [vmem:[%s10965_s19 + $0x3e0] sm:$0xff]  ;;  %v676_v13 = vld [vmem:[%s10965_s19 + $0x3e8] sm:$0xff]  ;;  %v9467_v15 = vcombine.low %v664_v4, %v668_v5 }
  0x4c   : > { %v9474_v16 = vcombine.high %v671_v10, %v675_v11  ;;  %v9476_v17 = vcombine.high %v672_v12, %v676_v13  ;;  %v679_v19 = vld [vmem:[%s10965_s19 + $0x400] sm:$0xff]  ;;  %v680_v21 = vld [vmem:[%s10965_s19 + $0x408] sm:$0xff]  ;;  %v9475_v26 = vcombine.low %v672_v12, %v676_v13 }
  0x4d   : > { %3680 = vmatpush1.bf16.msra.mxu0 %v9409_v22  ;;  %3852 = vmatpush1.bf16.msra.mxu1 %v9411_v23  ;;  %v683_v20 = vld [vmem:[%s10965_s19 + $0x420] sm:$0xff]  ;;  %v684_v22 = vld [vmem:[%s10965_s19 + $0x428] sm:$0xff]  ;;  %v9473_v23 = vcombine.low %v671_v10, %v675_v11 }
  0x4e   : > { %3681 = vmatprep.subr.bf16.mxu0 %v9418_v24  ;;  %3853 = vmatprep.subr.bf16.mxu1 %v9420_v25  ;;  %v527_v24 = vld [vmem:[%s10956_s16] sm:$0xff]  ;;  %v9482_v27 = vcombine.high %v679_v19, %v683_v20  ;;  %v9484_v28 = vcombine.high %v680_v21, %v684_v22  ;;  %v9481_v36 = vcombine.low %v679_v19, %v683_v20  ;;  %v696_v43 = vld [vmem:[%s10965_s19 + $0x488] sm:$0xff] }
  0x4f   : > { %v535_v25 = vld [vmem:[%s10956_s16 + $0x40] sm:$0xff]  ;;  %v9483_v37 = vcombine.low %v680_v21, %v684_v22  ;;  %v700_v44 = vld [vmem:[%s10965_s19 + $0x4a8] sm:$0xff] }
  0x50   : > { %v687_v29 = vld [vmem:[%s10965_s19 + $0x440] sm:$0xff]  ;;  %v704_v51 = vld [vmem:[%s10965_s19 + $0x4c8] sm:$0xff] }
  0x51   : > { %3682 = vmatpush1.bf16.msra.mxu0 %v9417_v30  ;;  %3854 = vmatpush1.bf16.msra.mxu1 %v9419_v31  ;;  %v691_v30 = vld [vmem:[%s10965_s19 + $0x460] sm:$0xff]  ;;  %v688_v31 = vld [vmem:[%s10965_s19 + $0x448] sm:$0xff] }
  0x52   : > { %3683 = vmatprep.subr.bf16.mxu0 %v9426_v32  ;;  %3855 = vmatprep.subr.bf16.mxu1 %v9428_v33  ;;  %v11044_v32 = vpack.c.bf16 %v535_v25, %v527_v24  ;;  %v692_v33 = vld [vmem:[%s10965_s19 + $0x468] sm:$0xff]  ;;  %v9489_v45 = vcombine.low %v687_v29, %v691_v30  ;;  %v707_v50 = vld [vmem:[%s10965_s19 + $0x4e0] sm:$0xff] }
  0x53   : > { %v708_v52 = vld [vmem:[%s10965_s19 + $0x4e8] sm:$0xff]  ;;  %v715_v58 = vld [vmem:[%s10965_s19 + $0x520] sm:$0xff] }
  0x54   : > { %v712_v59 = vld [vmem:[%s10965_s19 + $0x508] sm:$0xff]  ;;  %v723_v2 = vld [vmem:[%s10965_s19 + $0x560] sm:$0xff] }
  0x55   : > { %3684 = vmatpush1.bf16.msra.mxu0 %v9425_v38  ;;  %3856 = vmatpush1.bf16.msra.mxu1 %v9427_v39  ;;  %v9490_v38 = vcombine.high %v687_v29, %v691_v30  ;;  %v9492_v39 = vcombine.high %v688_v31, %v692_v33  ;;  %v716_v60 = vld [vmem:[%s10965_s19 + $0x528] sm:$0xff]  ;;  %v731_v10 = vld [vmem:[%s10965_s19 + $0x5a0] sm:$0xff] }
  0x56   : > { %3685 = vmatprep.subr.bf16.mxu0 %v9434_v40  ;;  %3857 = vmatprep.subr.bf16.mxu1 %v9436_v41  ;;  %v695_v40 = vld [vmem:[%s10965_s19 + $0x480] sm:$0xff]  ;;  %v720_v3 = vld [vmem:[%s10965_s19 + $0x548] sm:$0xff] }
  0x57   : > { %v699_v41 = vld [vmem:[%s10965_s19 + $0x4a0] sm:$0xff]  ;;  %v724_v4 = vld [vmem:[%s10965_s19 + $0x568] sm:$0xff] }
  0x58   : > { %v9497_v53 = vcombine.low %v695_v40, %v699_v41  ;;  %v728_v11 = vld [vmem:[%s10965_s19 + $0x588] sm:$0xff]  ;;  %v739_v19 = vld [vmem:[%s10965_s19 + $0x5e0] sm:$0xff] }
  0x59   : > { %3686 = vmatpush1.bf16.msra.mxu0 %v9433_v46  ;;  %3858 = vmatpush1.bf16.msra.mxu1 %v9435_v47  ;;  %v9491_v46 = vcombine.low %v688_v31, %v692_v33  ;;  %v9498_v47 = vcombine.high %v695_v40, %v699_v41  ;;  %v732_v12 = vld [vmem:[%s10965_s19 + $0x5a8] sm:$0xff]  ;;  %v751_v35 = vld [vmem:[%s10965_s19 + $0x640] sm:$0xff] }
  0x5a   : > { %3687 = vmatprep.subr.bf16.mxu0 %v9442_v48  ;;  %3859 = vmatprep.subr.bf16.mxu1 %v9444_v49  ;;  %v9500_v48 = vcombine.high %v696_v43, %v700_v44  ;;  %v703_v49 = vld [vmem:[%s10965_s19 + $0x4c0] sm:$0xff]  ;;  %v736_v20 = vld [vmem:[%s10965_s19 + $0x5c8] sm:$0xff] }
  0x5b   : > { %v9505_v61 = vcombine.low %v703_v49, %v707_v50  ;;  %v740_v21 = vld [vmem:[%s10965_s19 + $0x5e8] sm:$0xff] }
  0x5c   : > { %v9540_v25 = vcombine.high %v736_v20, %v740_v21  ;;  %v748_v29 = vld [vmem:[%s10965_s19 + $0x628] sm:$0xff]  ;;  %v9539_v31 = vcombine.low %v736_v20, %v740_v21  ;;  %v799_v21 = vld [vmem:[%s10965_s19 + $0x7c0] sm:$0xff] }
  0x5d   : > { %3688 = vmatpush1.bf16.msra.mxu0 %v9441_v54  ;;  %3860 = vmatpush1.bf16.msra.mxu1 %v9443_v55  ;;  %v9499_v54 = vcombine.low %v696_v43, %v700_v44  ;;  %v9506_v55 = vcombine.high %v703_v49, %v707_v50  ;;  %v759_v44 = vld [vmem:[%s10965_s19 + $0x680] sm:$0xff] }
  0x5e   : > { %3689 = vmatprep.subr.bf16.mxu0 %v9450_v56  ;;  %3861 = vmatprep.subr.bf16.mxu1 %v9452_v57  ;;  %v9508_v56 = vcombine.high %v704_v51, %v708_v52  ;;  %v711_v57 = vld [vmem:[%s10965_s19 + $0x500] sm:$0xff] }
  0x5f   : > { %v9513_v5 = vcombine.low %v711_v57, %v715_v58 }
  0x61   : > { %3690 = vmatpush1.bf16.msra.mxu0 %v9449_v62  ;;  %3862 = vmatpush1.bf16.msra.mxu1 %v9451_v63  ;;  %v9507_v62 = vcombine.low %v704_v51, %v708_v52  ;;  %v9514_v63 = vcombine.high %v711_v57, %v715_v58  ;;  %v767_v52 = vld [vmem:[%s10965_s19 + $0x6c0] sm:$0xff] }
  0x62   : > { %3691 = vmatprep.subr.bf16.mxu0 %v9458_v0  ;;  %3863 = vmatprep.subr.bf16.mxu1 %v9460_v1  ;;  %v9516_v0 = vcombine.high %v712_v59, %v716_v60  ;;  %v719_v1 = vld [vmem:[%s10965_s19 + $0x540] sm:$0xff] }
  0x63   : > { %v9521_v13 = vcombine.low %v719_v1, %v723_v2 }
  0x65   : > { %3692 = vmatpush1.bf16.msra.mxu0 %v9457_v6  ;;  %3864 = vmatpush1.bf16.msra.mxu1 %v9459_v7  ;;  %v9515_v6 = vcombine.low %v712_v59, %v716_v60  ;;  %v9522_v7 = vcombine.high %v719_v1, %v723_v2  ;;  %v775_v60 = vld [vmem:[%s10965_s19 + $0x700] sm:$0xff] }
  0x66   : > { %3693 = vmatprep.subr.bf16.mxu0 %v9466_v8  ;;  %3865 = vmatprep.subr.bf16.mxu1 %v9468_v9  ;;  %v9524_v8 = vcombine.high %v720_v3, %v724_v4  ;;  %v727_v9 = vld [vmem:[%s10965_s19 + $0x580] sm:$0xff] }
  0x67   : > { %v9529_v22 = vcombine.low %v727_v9, %v731_v10 }
  0x69   : > { %3694 = vmatpush1.bf16.msra.mxu0 %v9465_v14  ;;  %3866 = vmatpush1.bf16.msra.mxu1 %v9467_v15  ;;  %v9523_v14 = vcombine.low %v720_v3, %v724_v4  ;;  %v9530_v15 = vcombine.high %v727_v9, %v731_v10  ;;  %v783_v4 = vld [vmem:[%s10965_s19 + $0x740] sm:$0xff] }
  0x6a   : > { %3695 = vmatprep.subr.bf16.mxu0 %v9474_v16  ;;  %3867 = vmatprep.subr.bf16.mxu1 %v9476_v17  ;;  %v9532_v16 = vcombine.high %v728_v11, %v732_v12  ;;  %v735_v17 = vld [vmem:[%s10965_s19 + $0x5c0] sm:$0xff] }
  0x6b   : > { %v9538_v24 = vcombine.high %v735_v17, %v739_v19  ;;  %v9537_v30 = vcombine.low %v735_v17, %v739_v19 }
  0x6d   : > { %3696 = vmatpush1.bf16.msra.mxu0 %v9473_v23  ;;  %3868 = vmatpush1.bf16.msra.mxu1 %v9475_v26  ;;  %v9531_v23 = vcombine.low %v728_v11, %v732_v12  ;;  %v743_v26 = vld [vmem:[%s10965_s19 + $0x600] sm:$0xff] }
  0x6e   : > { %3708 = vmatprep.subr.bf16.mxu0 %v9482_v27  ;;  %3880 = vmatprep.subr.bf16.mxu1 %v9484_v28  ;;  %v747_v27 = vld [vmem:[%s10965_s19 + $0x620] sm:$0xff]  ;;  %v744_v28 = vld [vmem:[%s10965_s19 + $0x608] sm:$0xff] }
  0x6f   : > { %v9546_v33 = vcombine.high %v743_v26, %v747_v27  ;;  %v9548_v34 = vcombine.high %v744_v28, %v748_v29  ;;  %v9547_v40 = vcombine.low %v744_v28, %v748_v29  ;;  %v791_v12 = vld [vmem:[%s10965_s19 + $0x780] sm:$0xff] }
  0x70   : > { %3698 = vmatmul.mubr.bf16.vlgmr.msra.gmra.mrb[0].mxu0 %v11044_v32  ;;  %3870 = vmatmul.mubr.bf16.vlgmr.msra.gmra.mrb[0].mxu1 %v11044_v32  ;;  %v807_v29 = vld [vmem:[%s10965_s19 + $0x800] sm:$0xff] }
  0x71   : > { %3709 = vmatpush1.bf16.msra.mxu0 %v9481_v36  ;;  %3881 = vmatpush1.bf16.msra.mxu1 %v9483_v37  ;;  %v755_v36 = vld [vmem:[%s10965_s19 + $0x660] sm:$0xff]  ;;  %v752_v37 = vld [vmem:[%s10965_s19 + $0x648] sm:$0xff] }
  0x72   : > { %3710 = vmatprep.subr.bf16.mxu0 %v9490_v38  ;;  %3882 = vmatprep.subr.bf16.mxu1 %v9492_v39  ;;  %v756_v38 = vld [vmem:[%s10965_s19 + $0x668] sm:$0xff]  ;;  %v9545_v39 = vcombine.low %v743_v26, %v747_v27  ;;  %v9554_v41 = vcombine.high %v751_v35, %v755_v36 }
  0x73   : > { %3740 = vmatprep.mubr.bf16.mxu0 %v11051_v42  ;;  %3912 = vmatprep.mubr.bf16.mxu1 %v11051_v42  ;;  %v9556_v43 = vcombine.high %v752_v37, %v756_v38  ;;  %v9555_v49 = vcombine.low %v752_v37, %v756_v38 }
  0x75   : > { %3711 = vmatpush1.bf16.msra.mxu0 %v9489_v45  ;;  %3883 = vmatpush1.bf16.msra.mxu1 %v9491_v46  ;;  %v763_v45 = vld [vmem:[%s10965_s19 + $0x6a0] sm:$0xff]  ;;  %v760_v46 = vld [vmem:[%s10965_s19 + $0x688] sm:$0xff] }
  0x76   : > { %3712 = vmatprep.subr.bf16.mxu0 %v9498_v47  ;;  %3884 = vmatprep.subr.bf16.mxu1 %v9500_v48  ;;  %v764_v47 = vld [vmem:[%s10965_s19 + $0x6a8] sm:$0xff]  ;;  %v9553_v48 = vcombine.low %v751_v35, %v755_v36  ;;  %v9562_v50 = vcombine.high %v759_v44, %v763_v45  ;;  %v529_v35 = vld [vmem:[%s10956_s16 + $0x10] sm:$0xff] }
  0x77   : > { %v9564_v51 = vcombine.high %v760_v46, %v764_v47  ;;  %v9563_v57 = vcombine.low %v760_v46, %v764_v47  ;;  %v537_v36 = vld [vmem:[%s10956_s16 + $0x50] sm:$0xff]  ;;  %v532_v46 = vld [vmem:[%s10956_s16 + $0x28] sm:$0xff] }
  0x78   : > { %v540_v47 = vld [vmem:[%s10956_s16 + $0x68] sm:$0xff] }
  0x79   : > { %3713 = vmatpush1.bf16.msra.mxu0 %v9497_v53  ;;  %3885 = vmatpush1.bf16.msra.mxu1 %v9499_v54  ;;  %v771_v53 = vld [vmem:[%s10965_s19 + $0x6e0] sm:$0xff]  ;;  %v768_v54 = vld [vmem:[%s10965_s19 + $0x6c8] sm:$0xff] }
  0x7a   : > { %3714 = vmatprep.subr.bf16.mxu0 %v9506_v55  ;;  %3886 = vmatprep.subr.bf16.mxu1 %v9508_v56  ;;  %v772_v55 = vld [vmem:[%s10965_s19 + $0x6e8] sm:$0xff]  ;;  %v9561_v56 = vcombine.low %v759_v44, %v763_v45  ;;  %v9570_v58 = vcombine.high %v767_v52, %v771_v53  ;;  %v11120_v44 = vpack.c.bf16 %v537_v36, %v529_v35 }
  0x7b   : > { %v9572_v59 = vcombine.high %v768_v54, %v772_v55  ;;  %v9571_v1 = vcombine.low %v768_v54, %v772_v55  ;;  %v820_v45 = vld [vmem:[%s10965_s19 + $0x868] sm:$0xff]  ;;  %v11127_v54 = vpack.c.bf16 %v540_v47, %v532_v46 }
  0x7c   : > { %v824_v55 = vld [vmem:[%s10965_s19 + $0x888] sm:$0xff] }
  0x7d   : > { %3715 = vmatpush1.bf16.msra.mxu0 %v9505_v61  ;;  %3887 = vmatpush1.bf16.msra.mxu1 %v9507_v62  ;;  %v779_v61 = vld [vmem:[%s10965_s19 + $0x720] sm:$0xff]  ;;  %v776_v62 = vld [vmem:[%s10965_s19 + $0x708] sm:$0xff] }
  0x7e   : > { %3716 = vmatprep.subr.bf16.mxu0 %v9514_v63  ;;  %3888 = vmatprep.subr.bf16.mxu1 %v9516_v0  ;;  %v780_v63 = vld [vmem:[%s10965_s19 + $0x728] sm:$0xff]  ;;  %v9569_v0 = vcombine.low %v767_v52, %v771_v53  ;;  %v9578_v2 = vcombine.high %v775_v60, %v779_v61  ;;  %v823_v52 = vld [vmem:[%s10965_s19 + $0x880] sm:$0xff] }
  0x7f   : > { %v9580_v3 = vcombine.high %v776_v62, %v780_v63  ;;  %v9579_v9 = vcombine.low %v776_v62, %v780_v63  ;;  %v827_v53 = vld [vmem:[%s10965_s19 + $0x8a0] sm:$0xff]  ;;  %v832_v63 = vld [vmem:[%s10965_s19 + $0x8c8] sm:$0xff] }
  0x80   : > { %v835_v62 = vld [vmem:[%s10965_s19 + $0x8e0] sm:$0xff] }
  0x81   : > { %3717 = vmatpush1.bf16.msra.mxu0 %v9513_v5  ;;  %3889 = vmatpush1.bf16.msra.mxu1 %v9515_v6  ;;  %v787_v5 = vld [vmem:[%s10965_s19 + $0x760] sm:$0xff]  ;;  %v784_v6 = vld [vmem:[%s10965_s19 + $0x748] sm:$0xff] }
  0x82   : > { %3718 = vmatprep.subr.bf16.mxu0 %v9522_v7  ;;  %3890 = vmatprep.subr.bf16.mxu1 %v9524_v8  ;;  %v788_v7 = vld [vmem:[%s10965_s19 + $0x768] sm:$0xff]  ;;  %v9577_v8 = vcombine.low %v775_v60, %v779_v61  ;;  %v9586_v10 = vcombine.high %v783_v4, %v787_v5  ;;  %v831_v61 = vld [vmem:[%s10965_s19 + $0x8c0] sm:$0xff] }
  0x83   : > { %v9588_v11 = vcombine.high %v784_v6, %v788_v7  ;;  %v9587_v17 = vcombine.low %v784_v6, %v788_v7  ;;  %v843_v6 = vld [vmem:[%s10965_s19 + $0x920] sm:$0xff]  ;;  %v840_v7 = vld [vmem:[%s10965_s19 + $0x908] sm:$0xff] }
  0x85   : > { %3719 = vmatpush1.bf16.msra.mxu0 %v9521_v13  ;;  %3891 = vmatpush1.bf16.msra.mxu1 %v9523_v14  ;;  %v795_v13 = vld [vmem:[%s10965_s19 + $0x7a0] sm:$0xff]  ;;  %v792_v14 = vld [vmem:[%s10965_s19 + $0x788] sm:$0xff] }
  0x86   : > { %3720 = vmatprep.subr.bf16.mxu0 %v9530_v15  ;;  %3892 = vmatprep.subr.bf16.mxu1 %v9532_v16  ;;  %v796_v15 = vld [vmem:[%s10965_s19 + $0x7a8] sm:$0xff]  ;;  %v9585_v16 = vcombine.low %v783_v4, %v787_v5  ;;  %v9594_v19 = vcombine.high %v791_v12, %v795_v13  ;;  %v839_v5 = vld [vmem:[%s10965_s19 + $0x900] sm:$0xff] }
  0x87   : > { %v9596_v20 = vcombine.high %v792_v14, %v796_v15  ;;  %v9595_v26 = vcombine.low %v792_v14, %v796_v15  ;;  %v851_v14 = vld [vmem:[%s10965_s19 + $0x960] sm:$0xff]  ;;  %v848_v15 = vld [vmem:[%s10965_s19 + $0x948] sm:$0xff] }
  0x89   : > { %3721 = vmatpush1.bf16.msra.mxu0 %v9529_v22  ;;  %3893 = vmatpush1.bf16.msra.mxu1 %v9531_v23  ;;  %v803_v22 = vld [vmem:[%s10965_s19 + $0x7e0] sm:$0xff]  ;;  %v800_v23 = vld [vmem:[%s10965_s19 + $0x7c8] sm:$0xff] }
  0x8a   : > { %3722 = vmatprep.subr.bf16.mxu0 %v9538_v24  ;;  %3894 = vmatprep.subr.bf16.mxu1 %v9540_v25  ;;  %v804_v24 = vld [vmem:[%s10965_s19 + $0x7e8] sm:$0xff]  ;;  %v9593_v25 = vcombine.low %v791_v12, %v795_v13  ;;  %v9602_v27 = vcombine.high %v799_v21, %v803_v22  ;;  %v847_v13 = vld [vmem:[%s10965_s19 + $0x940] sm:$0xff] }
  0x8b   : > { %v9604_v28 = vcombine.high %v800_v23, %v804_v24  ;;  %v9603_v37 = vcombine.low %v800_v23, %v804_v24  ;;  %v859_v23 = vld [vmem:[%s10965_s19 + $0x9a0] sm:$0xff]  ;;  %v856_v24 = vld [vmem:[%s10965_s19 + $0x988] sm:$0xff] }
  0x8d   : > { %3723 = vmatpush1.bf16.msra.mxu0 %v9537_v30  ;;  %3895 = vmatpush1.bf16.msra.mxu1 %v9539_v31  ;;  %v811_v30 = vld [vmem:[%s10965_s19 + $0x820] sm:$0xff]  ;;  %v808_v31 = vld [vmem:[%s10965_s19 + $0x808] sm:$0xff] }
  0x8e   : > { %3724 = vmatprep.subr.bf16.mxu0 %v9546_v33  ;;  %3896 = vmatprep.subr.bf16.mxu1 %v9548_v34  ;;  %v812_v33 = vld [vmem:[%s10965_s19 + $0x828] sm:$0xff]  ;;  %v9601_v34 = vcombine.low %v799_v21, %v803_v22  ;;  %v9610_v38 = vcombine.high %v807_v29, %v811_v30  ;;  %v855_v22 = vld [vmem:[%s10965_s19 + $0x980] sm:$0xff] }
  0x8f   : > { %v9657_v35 = vcombine.low %v855_v22, %v859_v23 }
  0x91   : > { %3725 = vmatpush1.bf16.msra.mxu0 %v9545_v39  ;;  %3897 = vmatpush1.bf16.msra.mxu1 %v9547_v40  ;;  %v9612_v39 = vcombine.high %v808_v31, %v812_v33  ;;  %v815_v40 = vld [vmem:[%s10965_s19 + $0x840] sm:$0xff] }
  0x92   : > { %3726 = vmatprep.subr.bf16.mxu0 %v9554_v41  ;;  %3898 = vmatprep.subr.bf16.mxu1 %v9556_v43  ;;  %v819_v41 = vld [vmem:[%s10965_s19 + $0x860] sm:$0xff]  ;;  %v816_v43 = vld [vmem:[%s10965_s19 + $0x848] sm:$0xff] }
  0x95   : > { %3727 = vmatpush1.bf16.msra.mxu0 %v9553_v48  ;;  %3899 = vmatpush1.bf16.msra.mxu1 %v9555_v49  ;;  %v9609_v48 = vcombine.low %v807_v29, %v811_v30  ;;  %v9611_v49 = vcombine.low %v808_v31, %v812_v33  ;;  %v863_v30 = vld [vmem:[%s10965_s19 + $0x9c0] sm:$0xff]  ;;  %v864_v33 = vld [vmem:[%s10965_s19 + $0x9c8] sm:$0xff] }
  0x96   : > { %3728 = vmatprep.subr.bf16.mxu0 %v9562_v50  ;;  %3900 = vmatprep.subr.bf16.mxu1 %v9564_v51  ;;  %v9618_v50 = vcombine.high %v815_v40, %v819_v41  ;;  %v9620_v51 = vcombine.high %v816_v43, %v820_v45  ;;  %v867_v31 = vld [vmem:[%s10965_s19 + $0x9e0] sm:$0xff] }
  0x99   : > { %3729 = vmatpush1.bf16.msra.mxu0 %v9561_v56  ;;  %3901 = vmatpush1.bf16.msra.mxu1 %v9563_v57  ;;  %v828_v56 = vld [vmem:[%s10965_s19 + $0x8a8] sm:$0xff]  ;;  %v9617_v57 = vcombine.low %v815_v40, %v819_v41  ;;  %v875_v40 = vld [vmem:[%s10965_s19 + $0xa20] sm:$0xff] }
  0x9a   : > { %3730 = vmatprep.subr.bf16.mxu0 %v9570_v58  ;;  %3902 = vmatprep.subr.bf16.mxu1 %v9572_v59  ;;  %v9619_v58 = vcombine.low %v816_v43, %v820_v45  ;;  %v9626_v59 = vcombine.high %v823_v52, %v827_v53  ;;  %v9628_v60 = vcombine.high %v824_v55, %v828_v56  ;;  %v872_v41 = vld [vmem:[%s10965_s19 + $0xa08] sm:$0xff] }
  0x9b   : > { %v876_v43 = vld [vmem:[%s10965_s19 + $0xa28] sm:$0xff]  ;;  %v9665_v45 = vcombine.low %v863_v30, %v867_v31 }
  0x9d   : > { %3731 = vmatpush1.bf16.msra.mxu0 %v9569_v0  ;;  %3903 = vmatpush1.bf16.msra.mxu1 %v9571_v1  ;;  %v836_v0 = vld [vmem:[%s10965_s19 + $0x8e8] sm:$0xff]  ;;  %v9625_v1 = vcombine.low %v823_v52, %v827_v53 }
  0x9e   : > { %3732 = vmatprep.subr.bf16.mxu0 %v9578_v2  ;;  %3904 = vmatprep.subr.bf16.mxu1 %v9580_v3  ;;  %v9627_v2 = vcombine.low %v824_v55, %v828_v56  ;;  %v9634_v3 = vcombine.high %v831_v61, %v835_v62  ;;  %v9636_v4 = vcombine.high %v832_v63, %v836_v0  ;;  %v884_v52 = vld [vmem:[%s10965_s19 + $0xa68] sm:$0xff] }
  0x9f   : > { %v9675_v55 = vcombine.low %v872_v41, %v876_v43 }
  0xa1   : > { %3733 = vmatpush1.bf16.msra.mxu0 %v9577_v8  ;;  %3905 = vmatpush1.bf16.msra.mxu1 %v9579_v9  ;;  %v844_v8 = vld [vmem:[%s10965_s19 + $0x928] sm:$0xff]  ;;  %v9633_v9 = vcombine.low %v831_v61, %v835_v62 }
  0xa2   : > { %3734 = vmatprep.subr.bf16.mxu0 %v9586_v10  ;;  %3906 = vmatprep.subr.bf16.mxu1 %v9588_v11  ;;  %v9635_v10 = vcombine.low %v832_v63, %v836_v0  ;;  %v9642_v11 = vcombine.high %v839_v5, %v843_v6  ;;  %v9644_v12 = vcombine.high %v840_v7, %v844_v8  ;;  %v892_v61 = vld [vmem:[%s10965_s19 + $0xaa8] sm:$0xff] }
  0xa5   : > { %3735 = vmatpush1.bf16.msra.mxu0 %v9585_v16  ;;  %3907 = vmatpush1.bf16.msra.mxu1 %v9587_v17  ;;  %v852_v16 = vld [vmem:[%s10965_s19 + $0x968] sm:$0xff]  ;;  %v9641_v17 = vcombine.low %v839_v5, %v843_v6 }
  0xa6   : > { %3736 = vmatprep.subr.bf16.mxu0 %v9594_v19  ;;  %3908 = vmatprep.subr.bf16.mxu1 %v9596_v20  ;;  %v9643_v19 = vcombine.low %v840_v7, %v844_v8  ;;  %v9650_v20 = vcombine.high %v847_v13, %v851_v14  ;;  %v9652_v21 = vcombine.high %v848_v15, %v852_v16  ;;  %v900_v5 = vld [vmem:[%s10965_s19 + $0xae8] sm:$0xff] }
  0xa9   : > { %3737 = vmatpush1.bf16.msra.mxu0 %v9593_v25  ;;  %3909 = vmatpush1.bf16.msra.mxu1 %v9595_v26  ;;  %v860_v25 = vld [vmem:[%s10965_s19 + $0x9a8] sm:$0xff]  ;;  %v9649_v26 = vcombine.low %v847_v13, %v851_v14 }
  0xaa   : > { %3738 = vmatprep.subr.bf16.mxu0 %v9602_v27  ;;  %3910 = vmatprep.subr.bf16.mxu1 %v9604_v28  ;;  %v9651_v27 = vcombine.low %v848_v15, %v852_v16  ;;  %v9658_v28 = vcombine.high %v855_v22, %v859_v23  ;;  %v9660_v29 = vcombine.high %v856_v24, %v860_v25  ;;  %v908_v13 = vld [vmem:[%s10965_s19 + $0xb28] sm:$0xff] }
  0xab   : > { %v9659_v36 = vcombine.low %v856_v24, %v860_v25  ;;  %v916_v22 = vld [vmem:[%s10965_s19 + $0xb68] sm:$0xff] }
  0xad   : > { %3739 = vmatpush1.bf16.msra.mxu0 %v9601_v34  ;;  %3911 = vmatpush1.bf16.msra.mxu1 %v9603_v37  ;;  %v868_v34 = vld [vmem:[%s10965_s19 + $0x9e8] sm:$0xff]  ;;  %v9666_v37 = vcombine.high %v863_v30, %v867_v31 }
  0xae   : > { %3751 = vmatprep.subr.bf16.mxu0 %v9610_v38  ;;  %3923 = vmatprep.subr.bf16.mxu1 %v9612_v39  ;;  %v9668_v38 = vcombine.high %v864_v33, %v868_v34  ;;  %v871_v39 = vld [vmem:[%s10965_s19 + $0xa00] sm:$0xff]  ;;  %v9667_v46 = vcombine.low %v864_v33, %v868_v34  ;;  %v924_v30 = vld [vmem:[%s10965_s19 + $0xba8] sm:$0xff] }
  0xaf   : > { %v9674_v47 = vcombine.high %v871_v39, %v875_v40  ;;  %v9673_v53 = vcombine.low %v871_v39, %v875_v40  ;;  %v932_v39 = vld [vmem:[%s10965_s19 + $0xbe8] sm:$0xff] }
  0xb0   : > { %3741 = vmatmul.mubr.bf16.vlgmr.msra.gmra.mrb[0].mxu0 %v11120_v44  ;;  %3913 = vmatmul.mubr.bf16.vlgmr.msra.gmra.mrb[0].mxu1 %v11120_v44 }
  0xb1   : > { %3752 = vmatpush1.bf16.msra.mxu0 %v9609_v48  ;;  %3924 = vmatpush1.bf16.msra.mxu1 %v9611_v49  ;;  %v9676_v48 = vcombine.high %v872_v41, %v876_v43  ;;  %v879_v49 = vld [vmem:[%s10965_s19 + $0xa40] sm:$0xff] }
  0xb2   : > { %3753 = vmatprep.subr.bf16.mxu0 %v9618_v50  ;;  %3925 = vmatprep.subr.bf16.mxu1 %v9620_v51  ;;  %v883_v50 = vld [vmem:[%s10965_s19 + $0xa60] sm:$0xff]  ;;  %v880_v51 = vld [vmem:[%s10965_s19 + $0xa48] sm:$0xff] }
  0xb3   : > { %3783 = vmatprep.mubr.bf16.mxu0 %v11127_v54  ;;  %3955 = vmatprep.mubr.bf16.mxu1 %v11127_v54  ;;  %v9682_v56 = vcombine.high %v879_v49, %v883_v50  ;;  %v9681_v62 = vcombine.low %v879_v49, %v883_v50  ;;  %v9683_v63 = vcombine.low %v880_v51, %v884_v52  ;;  %v940_v49 = vld [vmem:[%s10965_s19 + $0xc28] sm:$0xff] }
  0xb5   : > { %3754 = vmatpush1.bf16.msra.mxu0 %v9617_v57  ;;  %3926 = vmatpush1.bf16.msra.mxu1 %v9619_v58  ;;  %v9684_v57 = vcombine.high %v880_v51, %v884_v52  ;;  %v887_v58 = vld [vmem:[%s10965_s19 + $0xa80] sm:$0xff] }
  0xb6   : > { %3755 = vmatprep.subr.bf16.mxu0 %v9626_v59  ;;  %3927 = vmatprep.subr.bf16.mxu1 %v9628_v60  ;;  %v891_v59 = vld [vmem:[%s10965_s19 + $0xaa0] sm:$0xff]  ;;  %v888_v60 = vld [vmem:[%s10965_s19 + $0xa88] sm:$0xff] }
  0xb7   : > { %v9690_v0 = vcombine.high %v887_v58, %v891_v59  ;;  %v9689_v6 = vcombine.low %v887_v58, %v891_v59  ;;  %v9691_v7 = vcombine.low %v888_v60, %v892_v61  ;;  %v531_v51 = vld [vmem:[%s10956_s16 + $0x20] sm:$0xff]  ;;  %v944_v59 = vld [vmem:[%s10965_s19 + $0xc48] sm:$0xff] }
  0xb8   : > { %v539_v52 = vld [vmem:[%s10956_s16 + $0x60] sm:$0xff] }
  0xb9   : > { %3756 = vmatpush1.bf16.msra.mxu0 %v9625_v1  ;;  %3928 = vmatpush1.bf16.msra.mxu1 %v9627_v2  ;;  %v9692_v1 = vcombine.high %v888_v60, %v892_v61  ;;  %v895_v2 = vld [vmem:[%s10965_s19 + $0xac0] sm:$0xff]  ;;  %v11196_v60 = vpack.c.bf16 %v539_v52, %v531_v51  ;;  %v948_v61 = vld [vmem:[%s10965_s19 + $0xc68] sm:$0xff] }
  0xba   : > { %3757 = vmatprep.subr.bf16.mxu0 %v9634_v3  ;;  %3929 = vmatprep.subr.bf16.mxu1 %v9636_v4  ;;  %v899_v3 = vld [vmem:[%s10965_s19 + $0xae0] sm:$0xff]  ;;  %v896_v4 = vld [vmem:[%s10965_s19 + $0xac8] sm:$0xff] }
  0xbb   : > { %v9698_v8 = vcombine.high %v895_v2, %v899_v3  ;;  %v9697_v14 = vcombine.low %v895_v2, %v899_v3  ;;  %v9699_v15 = vcombine.low %v896_v4, %v900_v5  ;;  %v947_v58 = vld [vmem:[%s10965_s19 + $0xc60] sm:$0xff]  ;;  %v9748_v3 = vcombine.high %v944_v59, %v948_v61  ;;  %v992_v51 = vld [vmem:[%s10965_s19 + $0xdc8] sm:$0xff] }
  0xbc   : > { %v996_v52 = vld [vmem:[%s10965_s19 + $0xde8] sm:$0xff] }
  0xbd   : > { %3758 = vmatpush1.bf16.msra.mxu0 %v9633_v9  ;;  %3930 = vmatpush1.bf16.msra.mxu1 %v9635_v10  ;;  %v9700_v9 = vcombine.high %v896_v4, %v900_v5  ;;  %v903_v10 = vld [vmem:[%s10965_s19 + $0xb00] sm:$0xff] }
  0xbe   : > { %3759 = vmatprep.subr.bf16.mxu0 %v9642_v11  ;;  %3931 = vmatprep.subr.bf16.mxu1 %v9644_v12  ;;  %v907_v11 = vld [vmem:[%s10965_s19 + $0xb20] sm:$0xff]  ;;  %v904_v12 = vld [vmem:[%s10965_s19 + $0xb08] sm:$0xff] }
  0xbf   : > { %v9706_v16 = vcombine.high %v903_v10, %v907_v11  ;;  %v9705_v23 = vcombine.low %v903_v10, %v907_v11  ;;  %v9707_v24 = vcombine.low %v904_v12, %v908_v13  ;;  %v951_v4 = vld [vmem:[%s10965_s19 + $0xc80] sm:$0xff]  ;;  %v9747_v10 = vcombine.low %v944_v59, %v948_v61  ;;  %v1000_v61 = vld [vmem:[%s10965_s19 + $0xe08] sm:$0xff] }
  0xc0   : > { %v955_v5 = vld [vmem:[%s10965_s19 + $0xca0] sm:$0xff] }
  0xc1   : > { %3760 = vmatpush1.bf16.msra.mxu0 %v9641_v17  ;;  %3932 = vmatpush1.bf16.msra.mxu1 %v9643_v19  ;;  %v9708_v17 = vcombine.high %v904_v12, %v908_v13  ;;  %v911_v19 = vld [vmem:[%s10965_s19 + $0xb40] sm:$0xff]  ;;  %v9754_v11 = vcombine.high %v951_v4, %v955_v5 }
  0xc2   : > { %3761 = vmatprep.subr.bf16.mxu0 %v9650_v20  ;;  %3933 = vmatprep.subr.bf16.mxu1 %v9652_v21  ;;  %v915_v20 = vld [vmem:[%s10965_s19 + $0xb60] sm:$0xff]  ;;  %v912_v21 = vld [vmem:[%s10965_s19 + $0xb48] sm:$0xff] }
  0xc3   : > { %v9714_v25 = vcombine.high %v911_v19, %v915_v20  ;;  %v9713_v31 = vcombine.low %v911_v19, %v915_v20  ;;  %v9715_v33 = vcombine.low %v912_v21, %v916_v22  ;;  %v959_v13 = vld [vmem:[%s10965_s19 + $0xcc0] sm:$0xff] }
  0xc4   : > { %v1003_v59 = vld [vmem:[%s10965_s19 + $0xe20] sm:$0xff] }
  0xc5   : > { %3762 = vmatpush1.bf16.msra.mxu0 %v9649_v26  ;;  %3934 = vmatpush1.bf16.msra.mxu1 %v9651_v27  ;;  %v9716_v26 = vcombine.high %v912_v21, %v916_v22  ;;  %v919_v27 = vld [vmem:[%s10965_s19 + $0xb80] sm:$0xff] }
  0xc6   : > { %3763 = vmatprep.subr.bf16.mxu0 %v9658_v28  ;;  %3935 = vmatprep.subr.bf16.mxu1 %v9660_v29  ;;  %v923_v28 = vld [vmem:[%s10965_s19 + $0xba0] sm:$0xff]  ;;  %v920_v29 = vld [vmem:[%s10965_s19 + $0xb88] sm:$0xff] }
  0xc7   : > { %v9722_v34 = vcombine.high %v919_v27, %v923_v28  ;;  %v9721_v40 = vcombine.low %v919_v27, %v923_v28  ;;  %v9723_v41 = vcombine.low %v920_v29, %v924_v30  ;;  %v967_v22 = vld [vmem:[%s10965_s19 + $0xd00] sm:$0xff] }
  0xc9   : > { %3764 = vmatpush1.bf16.msra.mxu0 %v9657_v35  ;;  %3936 = vmatpush1.bf16.msra.mxu1 %v9659_v36  ;;  %v9724_v35 = vcombine.high %v920_v29, %v924_v30  ;;  %v927_v36 = vld [vmem:[%s10965_s19 + $0xbc0] sm:$0xff] }
  0xca   : > { %3765 = vmatprep.subr.bf16.mxu0 %v9666_v37  ;;  %3937 = vmatprep.subr.bf16.mxu1 %v9668_v38  ;;  %v931_v37 = vld [vmem:[%s10965_s19 + $0xbe0] sm:$0xff]  ;;  %v928_v38 = vld [vmem:[%s10965_s19 + $0xbc8] sm:$0xff] }
  0xcb   : > { %v9730_v43 = vcombine.high %v927_v36, %v931_v37  ;;  %v9729_v50 = vcombine.low %v927_v36, %v931_v37  ;;  %v975_v30 = vld [vmem:[%s10965_s19 + $0xd40] sm:$0xff] }
  0xcd   : > { %3766 = vmatpush1.bf16.msra.mxu0 %v9665_v45  ;;  %3938 = vmatpush1.bf16.msra.mxu1 %v9667_v46  ;;  %v9732_v45 = vcombine.high %v928_v38, %v932_v39  ;;  %v935_v46 = vld [vmem:[%s10965_s19 + $0xc00] sm:$0xff] }
  0xce   : > { %3767 = vmatprep.subr.bf16.mxu0 %v9674_v47  ;;  %3939 = vmatprep.subr.bf16.mxu1 %v9676_v48  ;;  %v939_v47 = vld [vmem:[%s10965_s19 + $0xc20] sm:$0xff]  ;;  %v936_v48 = vld [vmem:[%s10965_s19 + $0xc08] sm:$0xff] }
  0xd1   : > { %3768 = vmatpush1.bf16.msra.mxu0 %v9673_v53  ;;  %3940 = vmatpush1.bf16.msra.mxu1 %v9675_v55  ;;  %v9731_v53 = vcombine.low %v928_v38, %v932_v39  ;;  %v9738_v55 = vcombine.high %v935_v46, %v939_v47  ;;  %v983_v39 = vld [vmem:[%s10965_s19 + $0xd80] sm:$0xff] }
  0xd2   : > { %3769 = vmatprep.subr.bf16.mxu0 %v9682_v56  ;;  %3941 = vmatprep.subr.bf16.mxu1 %v9684_v57  ;;  %v9740_v56 = vcombine.high %v936_v48, %v940_v49  ;;  %v943_v57 = vld [vmem:[%s10965_s19 + $0xc40] sm:$0xff] }
  0xd3   : > { %v9746_v2 = vcombine.high %v943_v57, %v947_v58 }
  0xd5   : > { %3770 = vmatpush1.bf16.msra.mxu0 %v9681_v62  ;;  %3942 = vmatpush1.bf16.msra.mxu1 %v9683_v63  ;;  %v534_v62 = vld [vmem:[%s10956_s16 + $0x38] sm:$0xff] }
  0xd6   : > { %3771 = vmatprep.subr.bf16.mxu0 %v9690_v0  ;;  %3943 = vmatprep.subr.bf16.mxu1 %v9692_v1  ;;  %v542_v63 = vld [vmem:[%s10956_s16 + $0x78] sm:$0xff]  ;;  %v9737_v0 = vcombine.low %v935_v46, %v939_v47  ;;  %v9739_v1 = vcombine.low %v936_v48, %v940_v49  ;;  %v991_v49 = vld [vmem:[%s10965_s19 + $0xdc0] sm:$0xff] }
  0xd9   : > { %3772 = vmatpush1.bf16.msra.mxu0 %v9689_v6  ;;  %3944 = vmatpush1.bf16.msra.mxu1 %v9691_v7  ;;  %v11203_v6 = vpack.c.bf16 %v542_v63, %v534_v62  ;;  %v952_v7 = vld [vmem:[%s10965_s19 + $0xc88] sm:$0xff] }
  0xda   : > { %3773 = vmatprep.subr.bf16.mxu0 %v9698_v8  ;;  %3945 = vmatprep.subr.bf16.mxu1 %v9700_v9  ;;  %v956_v8 = vld [vmem:[%s10965_s19 + $0xca8] sm:$0xff]  ;;  %v9745_v9 = vcombine.low %v943_v57, %v947_v58  ;;  %v9796_v57 = vcombine.high %v992_v51, %v996_v52  ;;  %v999_v58 = vld [vmem:[%s10965_s19 + $0xe00] sm:$0xff] }
  0xdb   : > { %v9756_v12 = vcombine.high %v952_v7, %v956_v8  ;;  %v9755_v19 = vcombine.low %v952_v7, %v956_v8  ;;  %v1004_v62 = vld [vmem:[%s10965_s19 + $0xe28] sm:$0xff]  ;;  %v9801_v8 = vcombine.low %v999_v58, %v1003_v59 }
  0xdc   : > { %v1012_v7 = vld [vmem:[%s10965_s19 + $0xe68] sm:$0xff] }
  0xdd   : > { %3774 = vmatpush1.bf16.msra.mxu0 %v9697_v14  ;;  %3946 = vmatpush1.bf16.msra.mxu1 %v9699_v15  ;;  %v963_v14 = vld [vmem:[%s10965_s19 + $0xce0] sm:$0xff]  ;;  %v960_v15 = vld [vmem:[%s10965_s19 + $0xcc8] sm:$0xff] }
  0xde   : > { %3775 = vmatprep.subr.bf16.mxu0 %v9706_v16  ;;  %3947 = vmatprep.subr.bf16.mxu1 %v9708_v17  ;;  %v964_v16 = vld [vmem:[%s10965_s19 + $0xce8] sm:$0xff]  ;;  %v9753_v17 = vcombine.low %v951_v4, %v955_v5  ;;  %v9762_v20 = vcombine.high %v959_v13, %v963_v14  ;;  %v1011_v4 = vld [vmem:[%s10965_s19 + $0xe60] sm:$0xff] }
  0xdf   : > { %v9764_v21 = vcombine.high %v960_v15, %v964_v16  ;;  %v9763_v27 = vcombine.low %v960_v15, %v964_v16  ;;  %v1008_v5 = vld [vmem:[%s10965_s19 + $0xe48] sm:$0xff] }
  0xe0   : > { %v1020_v15 = vld [vmem:[%s10965_s19 + $0xea8] sm:$0xff] }
  0xe1   : > { %3776 = vmatpush1.bf16.msra.mxu0 %v9705_v23  ;;  %3948 = vmatpush1.bf16.msra.mxu1 %v9707_v24  ;;  %v971_v23 = vld [vmem:[%s10965_s19 + $0xd20] sm:$0xff]  ;;  %v968_v24 = vld [vmem:[%s10965_s19 + $0xd08] sm:$0xff] }
  0xe2   : > { %3777 = vmatprep.subr.bf16.mxu0 %v9714_v25  ;;  %3949 = vmatprep.subr.bf16.mxu1 %v9716_v26  ;;  %v972_v25 = vld [vmem:[%s10965_s19 + $0xd28] sm:$0xff]  ;;  %v9761_v26 = vcombine.low %v959_v13, %v963_v14  ;;  %v9770_v28 = vcombine.high %v967_v22, %v971_v23  ;;  %v1019_v13 = vld [vmem:[%s10965_s19 + $0xea0] sm:$0xff] }
  0xe3   : > { %v9772_v29 = vcombine.high %v968_v24, %v972_v25  ;;  %v9771_v36 = vcombine.low %v968_v24, %v972_v25  ;;  %v1016_v14 = vld [vmem:[%s10965_s19 + $0xe88] sm:$0xff] }
  0xe4   : > { %v1028_v24 = vld [vmem:[%s10965_s19 + $0xee8] sm:$0xff] }
  0xe5   : > { %3778 = vmatpush1.bf16.msra.mxu0 %v9713_v31  ;;  %3950 = vmatpush1.bf16.msra.mxu1 %v9715_v33  ;;  %v979_v31 = vld [vmem:[%s10965_s19 + $0xd60] sm:$0xff]  ;;  %v976_v33 = vld [vmem:[%s10965_s19 + $0xd48] sm:$0xff] }
  0xe6   : > { %3779 = vmatprep.subr.bf16.mxu0 %v9722_v34  ;;  %3951 = vmatprep.subr.bf16.mxu1 %v9724_v35  ;;  %v980_v34 = vld [vmem:[%s10965_s19 + $0xd68] sm:$0xff]  ;;  %v9769_v35 = vcombine.low %v967_v22, %v971_v23  ;;  %v9778_v37 = vcombine.high %v975_v30, %v979_v31  ;;  %v1027_v22 = vld [vmem:[%s10965_s19 + $0xee0] sm:$0xff] }
  0xe7   : > { %v9780_v38 = vcombine.high %v976_v33, %v980_v34  ;;  %v9779_v46 = vcombine.low %v976_v33, %v980_v34  ;;  %v1024_v23 = vld [vmem:[%s10965_s19 + $0xec8] sm:$0xff] }
  0xe8   : > { %v1036_v33 = vld [vmem:[%s10965_s19 + $0xf28] sm:$0xff] }
  0xe9   : > { %3780 = vmatpush1.bf16.msra.mxu0 %v9721_v40  ;;  %3952 = vmatpush1.bf16.msra.mxu1 %v9723_v41  ;;  %v987_v40 = vld [vmem:[%s10965_s19 + $0xda0] sm:$0xff]  ;;  %v984_v41 = vld [vmem:[%s10965_s19 + $0xd88] sm:$0xff] }
  0xea   : > { %3781 = vmatprep.subr.bf16.mxu0 %v9730_v43  ;;  %3953 = vmatprep.subr.bf16.mxu1 %v9732_v45  ;;  %v988_v43 = vld [vmem:[%s10965_s19 + $0xda8] sm:$0xff]  ;;  %v9777_v45 = vcombine.low %v975_v30, %v979_v31  ;;  %v9786_v47 = vcombine.high %v983_v39, %v987_v40  ;;  %v1035_v30 = vld [vmem:[%s10965_s19 + $0xf20] sm:$0xff] }
  0xeb   : > { %v9788_v48 = vcombine.high %v984_v41, %v988_v43  ;;  %v1032_v31 = vld [vmem:[%s10965_s19 + $0xf08] sm:$0xff] }
  0xed   : > { %3782 = vmatpush1.bf16.msra.mxu0 %v9729_v50  ;;  %3954 = vmatpush1.bf16.msra.mxu1 %v9731_v53  ;;  %v995_v50 = vld [vmem:[%s10965_s19 + $0xde0] sm:$0xff]  ;;  %v9785_v53 = vcombine.low %v983_v39, %v987_v40  ;;  %v1040_v40 = vld [vmem:[%s10965_s19 + $0xf48] sm:$0xff] }
  0xee   : > { %3794 = vmatprep.subr.bf16.mxu0 %v9738_v55  ;;  %3966 = vmatprep.subr.bf16.mxu1 %v9740_v56  ;;  %v9787_v55 = vcombine.low %v984_v41, %v988_v43  ;;  %v9794_v56 = vcombine.high %v991_v49, %v995_v50  ;;  %v9793_v63 = vcombine.low %v991_v49, %v995_v50  ;;  %v1043_v39 = vld [vmem:[%s10965_s19 + $0xf60] sm:$0xff]  ;;  %v1044_v41 = vld [vmem:[%s10965_s19 + $0xf68] sm:$0xff] }
  0xef   : > { %v1051_v49 = vld [vmem:[%s10965_s19 + $0xfa0] sm:$0xff]  ;;  %v1048_v50 = vld [vmem:[%s10965_s19 + $0xf88] sm:$0xff] }
  0xf0   : > { %3784 = vmatmul.mubr.bf16.vlgmr.msra.gmra.mrb[0].mxu0 %v11196_v60  ;;  %3956 = vmatmul.mubr.bf16.vlgmr.msra.gmra.mrb[0].mxu1 %v11196_v60 }
  0xf1   : > { %3795 = vmatpush1.bf16.msra.mxu0 %v9737_v0  ;;  %3967 = vmatpush1.bf16.msra.mxu1 %v9739_v1  ;;  %v9795_v0 = vcombine.low %v992_v51, %v996_v52  ;;  %v9802_v1 = vcombine.high %v999_v58, %v1003_v59  ;;  %v1052_v51 = vld [vmem:[%s10965_s19 + $0xfa8] sm:$0xff]  ;;  %v1059_v58 = vld [vmem:[%s10965_s19 + $0xfe0] sm:$0xff] }
  0xf2   : > { %3796 = vmatprep.subr.bf16.mxu0 %v9746_v2  ;;  %3968 = vmatprep.subr.bf16.mxu1 %v9748_v3  ;;  %v9804_v2 = vcombine.high %v1000_v61, %v1004_v62  ;;  %v1007_v3 = vld [vmem:[%s10965_s19 + $0xe40] sm:$0xff]  ;;  %v1056_v59 = vld [vmem:[%s10965_s19 + $0xfc8] sm:$0xff] }
  0xf3   : > { %3826 = vmatprep.mubr.bf16.mxu0 %v11203_v6  ;;  %3998 = vmatprep.mubr.bf16.mxu1 %v11203_v6  ;;  %v9809_v16 = vcombine.low %v1007_v3, %v1011_v4 }
  0xf5   : > { %3797 = vmatpush1.bf16.msra.mxu0 %v9745_v9  ;;  %3969 = vmatpush1.bf16.msra.mxu1 %v9747_v10  ;;  %v9803_v9 = vcombine.low %v1000_v61, %v1004_v62  ;;  %v9810_v10 = vcombine.high %v1007_v3, %v1011_v4  ;;  %v1060_v61 = vld [vmem:[%s10965_s19 + $0xfe8] sm:$0xff]  ;;  %v557_v3 = vld [vmem:[%s10965_s19 + $0x30] sm:$0xff]  ;;  %v554_v4 = vld [vmem:[%s10965_s19 + $0x18] sm:$0xff] }
  0xf6   : > { %3798 = vmatprep.subr.bf16.mxu0 %v9754_v11  ;;  %3970 = vmatprep.subr.bf16.mxu1 %v9756_v12  ;;  %v9812_v11 = vcombine.high %v1008_v5, %v1012_v7  ;;  %v1015_v12 = vld [vmem:[%s10965_s19 + $0xe80] sm:$0xff] }
  0xf7   : > { %v9817_v25 = vcombine.low %v1015_v12, %v1019_v13 }
  0xf9   : > { %3799 = vmatpush1.bf16.msra.mxu0 %v9753_v17  ;;  %3971 = vmatpush1.bf16.msra.mxu1 %v9755_v19  ;;  %v9811_v17 = vcombine.low %v1008_v5, %v1012_v7  ;;  %v9818_v19 = vcombine.high %v1015_v12, %v1019_v13  ;;  %v558_v5 = vld [vmem:[%s10965_s19 + $0x38] sm:$0xff]  ;;  %v561_v13 = vld [vmem:[%s10965_s19 + $0x50] sm:$0xff] }
  0xfa   : > { %3800 = vmatprep.subr.bf16.mxu0 %v9762_v20  ;;  %3972 = vmatprep.subr.bf16.mxu1 %v9764_v21  ;;  %v9820_v20 = vcombine.high %v1016_v14, %v1020_v15  ;;  %v1023_v21 = vld [vmem:[%s10965_s19 + $0xec0] sm:$0xff]  ;;  %v9360_v12 = vcombine.high %v554_v4, %v558_v5 }
  0xfb   : > { %v9825_v34 = vcombine.low %v1023_v21, %v1027_v22 }
  0xfd   : > { %3801 = vmatpush1.bf16.msra.mxu0 %v9761_v26  ;;  %3973 = vmatpush1.bf16.msra.mxu1 %v9763_v27  ;;  %v9819_v26 = vcombine.low %v1016_v14, %v1020_v15  ;;  %v9826_v27 = vcombine.high %v1023_v21, %v1027_v22  ;;  %v565_v14 = vld [vmem:[%s10965_s19 + $0x70] sm:$0xff] }
  0xfe   : > { %3802 = vmatprep.subr.bf16.mxu0 %v9770_v28  ;;  %3974 = vmatprep.subr.bf16.mxu1 %v9772_v29  ;;  %v9828_v28 = vcombine.high %v1024_v23, %v1028_v24  ;;  %v1031_v29 = vld [vmem:[%s10965_s19 + $0xf00] sm:$0xff]  ;;  %v9366_v21 = vcombine.high %v561_v13, %v565_v14 }
  0xff   : > { %v9833_v43 = vcombine.low %v1031_v29, %v1035_v30 }
 0x101   : > { %3803 = vmatpush1.bf16.msra.mxu0 %v9769_v35  ;;  %3975 = vmatpush1.bf16.msra.mxu1 %v9771_v36  ;;  %v9827_v35 = vcombine.low %v1024_v23, %v1028_v24  ;;  %v9834_v36 = vcombine.high %v1031_v29, %v1035_v30  ;;  %v569_v23 = vld [vmem:[%s10965_s19 + $0x90] sm:$0xff] }
 0x102   : > { %3804 = vmatprep.subr.bf16.mxu0 %v9778_v37  ;;  %3976 = vmatprep.subr.bf16.mxu1 %v9780_v38  ;;  %v9836_v37 = vcombine.high %v1032_v31, %v1036_v33  ;;  %v1039_v38 = vld [vmem:[%s10965_s19 + $0xf40] sm:$0xff]  ;;  %v573_v24 = vld [vmem:[%s10965_s19 + $0xb0] sm:$0xff] }
 0x103   : > { %v9841_v52 = vcombine.low %v1039_v38, %v1043_v39  ;;  %v9374_v29 = vcombine.high %v569_v23, %v573_v24 }
 0x105   : > { %3805 = vmatpush1.bf16.msra.mxu0 %v9777_v45  ;;  %3977 = vmatpush1.bf16.msra.mxu1 %v9779_v46  ;;  %v9835_v45 = vcombine.low %v1032_v31, %v1036_v33  ;;  %v9842_v46 = vcombine.high %v1039_v38, %v1043_v39  ;;  %v577_v31 = vld [vmem:[%s10965_s19 + $0xd0] sm:$0xff] }
 0x106   : > { %3806 = vmatprep.subr.bf16.mxu0 %v9786_v47  ;;  %3978 = vmatprep.subr.bf16.mxu1 %v9788_v48  ;;  %v9844_v47 = vcombine.high %v1040_v40, %v1044_v41  ;;  %v1047_v48 = vld [vmem:[%s10965_s19 + $0xf80] sm:$0xff]  ;;  %v581_v33 = vld [vmem:[%s10965_s19 + $0xf0] sm:$0xff] }
 0x107   : > { %v9849_v62 = vcombine.low %v1047_v48, %v1051_v49  ;;  %v9382_v38 = vcombine.high %v577_v31, %v581_v33 }
 0x109   : > { %3807 = vmatpush1.bf16.msra.mxu0 %v9785_v53  ;;  %3979 = vmatpush1.bf16.msra.mxu1 %v9787_v55  ;;  %v9843_v53 = vcombine.low %v1040_v40, %v1044_v41  ;;  %v9850_v55 = vcombine.high %v1047_v48, %v1051_v49  ;;  %v585_v40 = vld [vmem:[%s10965_s19 + $0x110] sm:$0xff] }
 0x10a   : > { %3808 = vmatprep.subr.bf16.mxu0 %v9794_v56  ;;  %3980 = vmatprep.subr.bf16.mxu1 %v9796_v57  ;;  %v9852_v56 = vcombine.high %v1048_v50, %v1052_v51  ;;  %v1055_v57 = vld [vmem:[%s10965_s19 + $0xfc0] sm:$0xff]  ;;  %v589_v41 = vld [vmem:[%s10965_s19 + $0x130] sm:$0xff] }
 0x10b   : > { %v9857_v7 = vcombine.low %v1055_v57, %v1059_v58  ;;  %v593_v49 = vld [vmem:[%s10965_s19 + $0x150] sm:$0xff] }
 0x10d   : > { %3809 = vmatpush1.bf16.msra.mxu0 %v9793_v63  ;;  %3981 = vmatpush1.bf16.msra.mxu1 %v9795_v0  ;;  %v9851_v63 = vcombine.low %v1048_v50, %v1052_v51  ;;  %v9858_v0 = vcombine.high %v1055_v57, %v1059_v58  ;;  %v597_v50 = vld [vmem:[%s10965_s19 + $0x170] sm:$0xff]  ;;  %v594_v51 = vld [vmem:[%s10965_s19 + $0x158] sm:$0xff] }
 0x10e   : > { %3810 = vmatprep.subr.bf16.mxu0 %v9802_v1  ;;  %3982 = vmatprep.subr.bf16.mxu1 %v9804_v2  ;;  %v9860_v1 = vcombine.high %v1056_v59, %v1060_v61  ;;  %v553_v2 = vld [vmem:[%s10965_s19 + $0x10] sm:$0xff] }
 0x10f   : > { %v601_v58 = vld [vmem:[%s10965_s19 + $0x190] sm:$0xff] }
 0x111   : > { %3811 = vmatpush1.bf16.msra.mxu0 %v9801_v8  ;;  %3983 = vmatpush1.bf16.msra.mxu1 %v9803_v9  ;;  %v533_v8 = vld [vmem:[%s10956_s16 + $0x30] sm:$0xff] }
 0x112   : > { %3812 = vmatprep.subr.bf16.mxu0 %v9810_v10  ;;  %3984 = vmatprep.subr.bf16.mxu1 %v9812_v11  ;;  %v541_v9 = vld [vmem:[%s10956_s16 + $0x70] sm:$0xff]  ;;  %v9859_v10 = vcombine.low %v1056_v59, %v1060_v61  ;;  %v9358_v11 = vcombine.high %v553_v2, %v557_v3  ;;  %v602_v61 = vld [vmem:[%s10965_s19 + $0x198] sm:$0xff]  ;;  %s8195_s16 = sld [smem:[#allocation3]] }
 0x113   : > { %v11271_v15 = vpack.c.bf16 %v541_v9, %v533_v8  ;;  %v605_v59 = vld [vmem:[%s10965_s19 + $0x1b0] sm:$0xff] }
 0x114   : > { %v9405_v8 = vcombine.low %v601_v58, %v605_v59 }
 0x115   : > { %3813 = vmatpush1.bf16.msra.mxu0 %v9809_v16  ;;  %3985 = vmatpush1.bf16.msra.mxu1 %v9811_v17  ;;  %v562_v16 = vld [vmem:[%s10965_s19 + $0x58] sm:$0xff] }
 0x116   : > { %3814 = vmatprep.subr.bf16.mxu0 %v9818_v19  ;;  %3986 = vmatprep.subr.bf16.mxu1 %v9820_v20  ;;  %v566_v17 = vld [vmem:[%s10965_s19 + $0x78] sm:$0xff]  ;;  %v9357_v19 = vcombine.low %v553_v2, %v557_v3  ;;  %v9359_v20 = vcombine.low %v554_v4, %v558_v5  ;;  %v609_v3 = vld [vmem:[%s10965_s19 + $0x1d0] sm:$0xff] }
 0x117   : > { %v9368_v22 = vcombine.high %v562_v16, %v566_v17  ;;  %v613_v4 = vld [vmem:[%s10965_s19 + $0x1f0] sm:$0xff]  ;;  %v610_v5 = vld [vmem:[%s10965_s19 + $0x1d8] sm:$0xff] }
 0x118   : > { %s12067_s18 = sadd.s32 %s8197_s17, %s8195_s16  ;;  %s524_s16 = scalar_lea.vmem %s12675_s9, %s10473_s28 }
 0x119   : > { %3815 = vmatpush1.bf16.msra.mxu0 %v9817_v25  ;;  %3987 = vmatpush1.bf16.msra.mxu1 %v9819_v26  ;;  %v570_v25 = vld [vmem:[%s10965_s19 + $0x98] sm:$0xff] }
 0x11a   : > { %3816 = vmatprep.subr.bf16.mxu0 %v9826_v27  ;;  %3988 = vmatprep.subr.bf16.mxu1 %v9828_v28  ;;  %v574_v26 = vld [vmem:[%s10965_s19 + $0xb8] sm:$0xff]  ;;  %v9365_v27 = vcombine.low %v561_v13, %v565_v14  ;;  %v9367_v28 = vcombine.low %v562_v16, %v566_v17  ;;  %v621_v13 = vld [vmem:[%s10965_s19 + $0x230] sm:$0xff]  ;;  %v9413_v17 = vcombine.low %v609_v3, %v613_v4 }
 0x11b   : > { %v9376_v30 = vcombine.high %v570_v25, %v574_v26  ;;  %v618_v14 = vld [vmem:[%s10965_s19 + $0x218] sm:$0xff] }
 0x11c   : > { %v622_v16 = vld [vmem:[%s10965_s19 + $0x238] sm:$0xff] }
 0x11d   : > { %3817 = vmatpush1.bf16.msra.mxu0 %v9825_v34  ;;  %3989 = vmatpush1.bf16.msra.mxu1 %v9827_v35  ;;  %v578_v34 = vld [vmem:[%s10965_s19 + $0xd8] sm:$0xff] }
 0x11e   : > { %3818 = vmatprep.subr.bf16.mxu0 %v9834_v36  ;;  %3990 = vmatprep.subr.bf16.mxu1 %v9836_v37  ;;  %v582_v35 = vld [vmem:[%s10965_s19 + $0xf8] sm:$0xff]  ;;  %v9373_v36 = vcombine.low %v569_v23, %v573_v24  ;;  %v9375_v37 = vcombine.low %v570_v25, %v574_v26  ;;  %v629_v23 = vld [vmem:[%s10965_s19 + $0x270] sm:$0xff] }
 0x11f   : > { %v9384_v39 = vcombine.high %v578_v34, %v582_v35  ;;  %v626_v24 = vld [vmem:[%s10965_s19 + $0x258] sm:$0xff] }
 0x120   : > { %v630_v25 = vld [vmem:[%s10965_s19 + $0x278] sm:$0xff] }
 0x121   : > { %3819 = vmatpush1.bf16.msra.mxu0 %v9833_v43  ;;  %3991 = vmatpush1.bf16.msra.mxu1 %v9835_v45  ;;  %v586_v43 = vld [vmem:[%s10965_s19 + $0x118] sm:$0xff] }
 0x122   : > { %3820 = vmatprep.subr.bf16.mxu0 %v9842_v46  ;;  %3992 = vmatprep.subr.bf16.mxu1 %v9844_v47  ;;  %v590_v45 = vld [vmem:[%s10965_s19 + $0x138] sm:$0xff]  ;;  %v9381_v46 = vcombine.low %v577_v31, %v581_v33  ;;  %v9390_v47 = vcombine.high %v585_v40, %v589_v41  ;;  %v637_v31 = vld [vmem:[%s10965_s19 + $0x2b0] sm:$0xff] }
 0x123   : > { %v9392_v48 = vcombine.high %v586_v43, %v590_v45  ;;  %v634_v33 = vld [vmem:[%s10965_s19 + $0x298] sm:$0xff] }
 0x125   : > { %3821 = vmatpush1.bf16.msra.mxu0 %v9841_v52  ;;  %3993 = vmatpush1.bf16.msra.mxu1 %v9843_v53  ;;  %v598_v52 = vld [vmem:[%s10965_s19 + $0x178] sm:$0xff]  ;;  %v9389_v53 = vcombine.low %v585_v40, %v589_v41  ;;  %v645_v40 = vld [vmem:[%s10965_s19 + $0x2f0] sm:$0xff] }
 0x126   : > { %3822 = vmatprep.subr.bf16.mxu0 %v9850_v55  ;;  %3994 = vmatprep.subr.bf16.mxu1 %v9852_v56  ;;  %v9391_v55 = vcombine.low %v586_v43, %v590_v45  ;;  %v9398_v56 = vcombine.high %v593_v49, %v597_v50  ;;  %v9400_v57 = vcombine.high %v594_v51, %v598_v52  ;;  %v642_v41 = vld [vmem:[%s10965_s19 + $0x2d8] sm:$0xff] }
 0x127   : > { %v646_v43 = vld [vmem:[%s10965_s19 + $0x2f8] sm:$0xff] }
 0x129   : > { %3823 = vmatpush1.bf16.msra.mxu0 %v9849_v62  ;;  %3995 = vmatpush1.bf16.msra.mxu1 %v9851_v63  ;;  %v606_v62 = vld [vmem:[%s10965_s19 + $0x1b8] sm:$0xff]  ;;  %v9397_v63 = vcombine.low %v593_v49, %v597_v50  ;;  %v653_v49 = vld [vmem:[%s10965_s19 + $0x330] sm:$0xff] }
 0x12a   : > { %3824 = vmatprep.subr.bf16.mxu0 %v9858_v0  ;;  %3996 = vmatprep.subr.bf16.mxu1 %v9860_v1  ;;  %v9399_v0 = vcombine.low %v594_v51, %v598_v52  ;;  %v9406_v1 = vcombine.high %v601_v58, %v605_v59  ;;  %v9408_v2 = vcombine.high %v602_v61, %v606_v62  ;;  %v650_v50 = vld [vmem:[%s10965_s19 + $0x318] sm:$0xff]  ;;  %v661_v58 = vld [vmem:[%s10965_s19 + $0x370] sm:$0xff] }
 0x12b   : > { %v9407_v9 = vcombine.low %v602_v61, %v606_v62  ;;  %v654_v51 = vld [vmem:[%s10965_s19 + $0x338] sm:$0xff] }
 0x12c   : > { %v658_v59 = vld [vmem:[%s10965_s19 + $0x358] sm:$0xff] }
 0x12d   : > { %3825 = vmatpush1.bf16.msra.mxu0 %v9857_v7  ;;  %3997 = vmatpush1.bf16.msra.mxu1 %v9859_v10  ;;  %v614_v7 = vld [vmem:[%s10965_s19 + $0x1f8] sm:$0xff]  ;;  %v9414_v10 = vcombine.high %v609_v3, %v613_v4  ;;  %v669_v3 = vld [vmem:[%s10965_s19 + $0x3b0] sm:$0xff] }
 0x12e   : > { %4009 = vmatprep.subr.bf16.mxu0 %v9358_v11  ;;  %4181 = vmatprep.subr.bf16.mxu1 %v9360_v12  ;;  %v9416_v11 = vcombine.high %v610_v5, %v614_v7  ;;  %v617_v12 = vld [vmem:[%s10965_s19 + $0x210] sm:$0xff]  ;;  %v662_v61 = vld [vmem:[%s10965_s19 + $0x378] sm:$0xff] }
 0x12f   : > { %v9421_v26 = vcombine.low %v617_v12, %v621_v13  ;;  %v666_v4 = vld [vmem:[%s10965_s19 + $0x398] sm:$0xff] }
 0x130   : > { %3827 = vmatmul.mubr.bf16.vlgmr.msra.gmra.mrb[0].mxu0 %v11271_v15  ;;  %3999 = vmatmul.mubr.bf16.vlgmr.msra.gmra.mrb[0].mxu1 %v11271_v15 }
 0x131   : > { %4010 = vmatpush1.bf16.msra.mxu0 %v9357_v19  ;;  %4182 = vmatpush1.bf16.msra.mxu1 %v9359_v20  ;;  %v9415_v19 = vcombine.low %v610_v5, %v614_v7  ;;  %v9422_v20 = vcombine.high %v617_v12, %v621_v13  ;;  %v670_v5 = vld [vmem:[%s10965_s19 + $0x3b8] sm:$0xff]  ;;  %v677_v12 = vld [vmem:[%s10965_s19 + $0x3f0] sm:$0xff] }
 0x132   : > { %4011 = vmatprep.subr.bf16.mxu0 %v9366_v21  ;;  %4183 = vmatprep.subr.bf16.mxu1 %v9368_v22  ;;  %v9424_v21 = vcombine.high %v618_v14, %v622_v16  ;;  %v625_v22 = vld [vmem:[%s10965_s19 + $0x250] sm:$0xff]  ;;  %v674_v13 = vld [vmem:[%s10965_s19 + $0x3d8] sm:$0xff] }
 0x133   : > { %4041 = vmatprep.mubr.bf16.mxu0 %v10967_v18  ;;  %4213 = vmatprep.mubr.bf16.mxu1 %v10967_v18  ;;  %v9383_v18 = vcombine.low %v578_v34, %v582_v35  ;;  %v638_v34 = vld [vmem:[%s10965_s19 + $0x2b8] sm:$0xff]  ;;  %v9429_v35 = vcombine.low %v625_v22, %v629_v23 }
 0x135   : > { %4012 = vmatpush1.bf16.msra.mxu0 %v9365_v27  ;;  %4184 = vmatpush1.bf16.msra.mxu1 %v9367_v28  ;;  %v9423_v27 = vcombine.low %v618_v14, %v622_v16  ;;  %v9430_v28 = vcombine.high %v625_v22, %v629_v23  ;;  %v678_v14 = vld [vmem:[%s10965_s19 + $0x3f8] sm:$0xff]  ;;  %v685_v22 = vld [vmem:[%s10965_s19 + $0x430] sm:$0xff] }
 0x136   : > { %4013 = vmatprep.subr.bf16.mxu0 %v9374_v29  ;;  %4185 = vmatprep.subr.bf16.mxu1 %v9376_v30  ;;  %v9432_v29 = vcombine.high %v626_v24, %v630_v25  ;;  %v633_v30 = vld [vmem:[%s10965_s19 + $0x290] sm:$0xff]  ;;  %v682_v23 = vld [vmem:[%s10965_s19 + $0x418] sm:$0xff] }
 0x137   : > { %v9437_v45 = vcombine.low %v633_v30, %v637_v31 }
 0x139   : > { %4014 = vmatpush1.bf16.msra.mxu0 %v9373_v36  ;;  %4186 = vmatpush1.bf16.msra.mxu1 %v9375_v37  ;;  %v9431_v36 = vcombine.low %v626_v24, %v630_v25  ;;  %v9438_v37 = vcombine.high %v633_v30, %v637_v31  ;;  %v686_v24 = vld [vmem:[%s10965_s19 + $0x438] sm:$0xff]  ;;  %v693_v30 = vld [vmem:[%s10965_s19 + $0x470] sm:$0xff] }
 0x13a   : > { %4015 = vmatprep.subr.bf16.mxu0 %v9382_v38  ;;  %4187 = vmatprep.subr.bf16.mxu1 %v9384_v39  ;;  %v9440_v38 = vcombine.high %v634_v33, %v638_v34  ;;  %v641_v39 = vld [vmem:[%s10965_s19 + $0x2d0] sm:$0xff]  ;;  %v690_v31 = vld [vmem:[%s10965_s19 + $0x458] sm:$0xff] }
 0x13b   : > { %v9445_v52 = vcombine.low %v641_v39, %v645_v40 }
 0x13d   : > { %4016 = vmatpush1.bf16.msra.mxu0 %v9381_v46  ;;  %4188 = vmatpush1.bf16.msra.mxu1 %v9383_v18  ;;  %v9439_v46 = vcombine.low %v634_v33, %v638_v34  ;;  %v9446_v18 = vcombine.high %v641_v39, %v645_v40  ;;  %v694_v33 = vld [vmem:[%s10965_s19 + $0x478] sm:$0xff]  ;;  %v701_v39 = vld [vmem:[%s10965_s19 + $0x4b0] sm:$0xff] }
 0x13e   : > { %4017 = vmatprep.subr.bf16.mxu0 %v9390_v47  ;;  %4189 = vmatprep.subr.bf16.mxu1 %v9392_v48  ;;  %v9448_v47 = vcombine.high %v642_v41, %v646_v43  ;;  %v649_v48 = vld [vmem:[%s10965_s19 + $0x310] sm:$0xff]  ;;  %v698_v40 = vld [vmem:[%s10965_s19 + $0x498] sm:$0xff] }
 0x13f   : > { %v9453_v62 = vcombine.low %v649_v48, %v653_v49 }
 0x141   : > { %4018 = vmatpush1.bf16.msra.mxu0 %v9389_v53  ;;  %4190 = vmatpush1.bf16.msra.mxu1 %v9391_v55  ;;  %v9447_v53 = vcombine.low %v642_v41, %v646_v43  ;;  %v9454_v55 = vcombine.high %v649_v48, %v653_v49  ;;  %v702_v41 = vld [vmem:[%s10965_s19 + $0x4b8] sm:$0xff]  ;;  %v709_v48 = vld [vmem:[%s10965_s19 + $0x4f0] sm:$0xff] }
 0x142   : > { %4019 = vmatprep.subr.bf16.mxu0 %v9398_v56  ;;  %4191 = vmatprep.subr.bf16.mxu1 %v9400_v57  ;;  %v9456_v56 = vcombine.high %v650_v50, %v654_v51  ;;  %v657_v57 = vld [vmem:[%s10965_s19 + $0x350] sm:$0xff]  ;;  %v706_v49 = vld [vmem:[%s10965_s19 + $0x4d8] sm:$0xff] }
 0x143   : > { %v9461_v7 = vcombine.low %v657_v57, %v661_v58 }
 0x145   : > { %4020 = vmatpush1.bf16.msra.mxu0 %v9397_v63  ;;  %4192 = vmatpush1.bf16.msra.mxu1 %v9399_v0  ;;  %v9455_v63 = vcombine.low %v650_v50, %v654_v51  ;;  %v9462_v0 = vcombine.high %v657_v57, %v661_v58  ;;  %v710_v50 = vld [vmem:[%s10965_s19 + $0x4f8] sm:$0xff]  ;;  %v9503_v51 = vcombine.low %v698_v40, %v702_v41 }
 0x146   : > { %4021 = vmatprep.subr.bf16.mxu0 %v9406_v1  ;;  %4193 = vmatprep.subr.bf16.mxu1 %v9408_v2  ;;  %v9464_v1 = vcombine.high %v658_v59, %v662_v61  ;;  %v665_v2 = vld [vmem:[%s10965_s19 + $0x390] sm:$0xff]  ;;  %v714_v57 = vld [vmem:[%s10965_s19 + $0x518] sm:$0xff] }
 0x147   : > { %v9469_v16 = vcombine.low %v665_v2, %v669_v3  ;;  %v718_v58 = vld [vmem:[%s10965_s19 + $0x538] sm:$0xff] }
 0x149   : > { %4022 = vmatpush1.bf16.msra.mxu0 %v9405_v8  ;;  %4194 = vmatpush1.bf16.msra.mxu1 %v9407_v9  ;;  %v9463_v8 = vcombine.low %v658_v59, %v662_v61  ;;  %v9470_v9 = vcombine.high %v665_v2, %v669_v3  ;;  %v726_v2 = vld [vmem:[%s10965_s19 + $0x578] sm:$0xff] }
 0x14a   : > { %4023 = vmatprep.subr.bf16.mxu0 %v9414_v10  ;;  %4195 = vmatprep.subr.bf16.mxu1 %v9416_v11  ;;  %v9472_v10 = vcombine.high %v666_v4, %v670_v5  ;;  %v673_v11 = vld [vmem:[%s10965_s19 + $0x3d0] sm:$0xff] }
 0x14b   : > { %v9477_v25 = vcombine.low %v673_v11, %v677_v12 }
 0x14d   : > { %4024 = vmatpush1.bf16.msra.mxu0 %v9413_v17  ;;  %4196 = vmatpush1.bf16.msra.mxu1 %v9415_v19  ;;  %v9471_v17 = vcombine.low %v666_v4, %v670_v5  ;;  %v9478_v19 = vcombine.high %v673_v11, %v677_v12  ;;  %v9519_v4 = vcombine.low %v714_v57, %v718_v58  ;;  %v734_v11 = vld [vmem:[%s10965_s19 + $0x5b8] sm:$0xff] }
 0x14e   : > { %4025 = vmatprep.subr.bf16.mxu0 %v9422_v20  ;;  %4197 = vmatprep.subr.bf16.mxu1 %v9424_v21  ;;  %v9480_v20 = vcombine.high %v674_v13, %v678_v14  ;;  %v681_v21 = vld [vmem:[%s10965_s19 + $0x410] sm:$0xff] }
 0x14f   : > { %v9485_v34 = vcombine.low %v681_v21, %v685_v22 }
 0x151   : > { %4026 = vmatpush1.bf16.msra.mxu0 %v9421_v26  ;;  %4198 = vmatpush1.bf16.msra.mxu1 %v9423_v27  ;;  %v9479_v26 = vcombine.low %v674_v13, %v678_v14  ;;  %v9486_v27 = vcombine.high %v681_v21, %v685_v22  ;;  %v742_v21 = vld [vmem:[%s10965_s19 + $0x5f8] sm:$0xff] }
 0x152   : > { %4027 = vmatprep.subr.bf16.mxu0 %v9430_v28  ;;  %4199 = vmatprep.subr.bf16.mxu1 %v9432_v29  ;;  %v9488_v28 = vcombine.high %v682_v23, %v686_v24  ;;  %v689_v29 = vld [vmem:[%s10965_s19 + $0x450] sm:$0xff] }
 0x153   : > { %v9493_v43 = vcombine.low %v689_v29, %v693_v30 }
 0x155   : > { %4028 = vmatpush1.bf16.msra.mxu0 %v9429_v35  ;;  %4200 = vmatpush1.bf16.msra.mxu1 %v9431_v36  ;;  %v9487_v35 = vcombine.low %v682_v23, %v686_v24  ;;  %v9494_v36 = vcombine.high %v689_v29, %v693_v30  ;;  %v750_v29 = vld [vmem:[%s10965_s19 + $0x638] sm:$0xff] }
 0x156   : > { %4029 = vmatprep.subr.bf16.mxu0 %v9438_v37  ;;  %4201 = vmatprep.subr.bf16.mxu1 %v9440_v38  ;;  %v9496_v37 = vcombine.high %v690_v31, %v694_v33  ;;  %v697_v38 = vld [vmem:[%s10965_s19 + $0x490] sm:$0xff] }
 0x159   : > { %4030 = vmatpush1.bf16.msra.mxu0 %v9437_v45  ;;  %4202 = vmatpush1.bf16.msra.mxu1 %v9439_v46  ;;  %v9495_v45 = vcombine.low %v690_v31, %v694_v33  ;;  %v9502_v46 = vcombine.high %v697_v38, %v701_v39 }
 0x15a   : > { %4031 = vmatprep.subr.bf16.mxu0 %v9446_v18  ;;  %4203 = vmatprep.subr.bf16.mxu1 %v9448_v47  ;;  %v9504_v18 = vcombine.high %v698_v40, %v702_v41  ;;  %v705_v47 = vld [vmem:[%s10965_s19 + $0x4d0] sm:$0xff] }
 0x15b   : > { %v9509_v59 = vcombine.low %v705_v47, %v709_v48 }
 0x15d   : > { %4032 = vmatpush1.bf16.msra.mxu0 %v9445_v52  ;;  %4204 = vmatpush1.bf16.msra.mxu1 %v9447_v53  ;;  %v9510_v52 = vcombine.high %v705_v47, %v709_v48  ;;  %v9512_v53 = vcombine.high %v706_v49, %v710_v50  ;;  %v766_v47 = vld [vmem:[%s10965_s19 + $0x6b8] sm:$0xff] }
 0x15e   : > { %4033 = vmatprep.subr.bf16.mxu0 %v9454_v55  ;;  %4205 = vmatprep.subr.bf16.mxu1 %v9456_v56  ;;  %v713_v55 = vld [vmem:[%s10965_s19 + $0x510] sm:$0xff] }
 0x15f   : > { %v717_v56 = vld [vmem:[%s10965_s19 + $0x530] sm:$0xff] }
 0x160   : > { %v9518_v61 = vcombine.high %v713_v55, %v717_v56  ;;  %v9517_v3 = vcombine.low %v713_v55, %v717_v56  ;;  %v774_v55 = vld [vmem:[%s10965_s19 + $0x6f8] sm:$0xff] }
 0x161   : > { %4034 = vmatpush1.bf16.msra.mxu0 %v9453_v62  ;;  %4206 = vmatpush1.bf16.msra.mxu1 %v9455_v63  ;;  %v9520_v62 = vcombine.high %v714_v57, %v718_v58  ;;  %v721_v63 = vld [vmem:[%s10965_s19 + $0x550] sm:$0xff] }
 0x162   : > { %4035 = vmatprep.subr.bf16.mxu0 %v9462_v0  ;;  %4207 = vmatprep.subr.bf16.mxu1 %v9464_v1  ;;  %v725_v0 = vld [vmem:[%s10965_s19 + $0x570] sm:$0xff]  ;;  %v722_v1 = vld [vmem:[%s10965_s19 + $0x558] sm:$0xff] }
 0x163   : > { %v9526_v5 = vcombine.high %v721_v63, %v725_v0  ;;  %v9525_v12 = vcombine.low %v721_v63, %v725_v0  ;;  %v9527_v13 = vcombine.low %v722_v1, %v726_v2  ;;  %v782_v63 = vld [vmem:[%s10965_s19 + $0x738] sm:$0xff] }
 0x165   : > { %4036 = vmatpush1.bf16.msra.mxu0 %v9461_v7  ;;  %4208 = vmatpush1.bf16.msra.mxu1 %v9463_v8  ;;  %v9528_v7 = vcombine.high %v722_v1, %v726_v2  ;;  %v729_v8 = vld [vmem:[%s10965_s19 + $0x590] sm:$0xff] }
 0x166   : > { %4037 = vmatprep.subr.bf16.mxu0 %v9470_v9  ;;  %4209 = vmatprep.subr.bf16.mxu1 %v9472_v10  ;;  %v733_v9 = vld [vmem:[%s10965_s19 + $0x5b0] sm:$0xff]  ;;  %v730_v10 = vld [vmem:[%s10965_s19 + $0x598] sm:$0xff] }
 0x167   : > { %v9534_v14 = vcombine.high %v729_v8, %v733_v9  ;;  %v9533_v22 = vcombine.low %v729_v8, %v733_v9  ;;  %v9535_v23 = vcombine.low %v730_v10, %v734_v11  ;;  %v790_v8 = vld [vmem:[%s10965_s19 + $0x778] sm:$0xff] }
 0x169   : > { %4038 = vmatpush1.bf16.msra.mxu0 %v9469_v16  ;;  %4210 = vmatpush1.bf16.msra.mxu1 %v9471_v17  ;;  %v9536_v16 = vcombine.high %v730_v10, %v734_v11  ;;  %v737_v17 = vld [vmem:[%s10965_s19 + $0x5d0] sm:$0xff] }
 0x16a   : > { %4039 = vmatprep.subr.bf16.mxu0 %v9478_v19  ;;  %4211 = vmatprep.subr.bf16.mxu1 %v9480_v20  ;;  %v741_v19 = vld [vmem:[%s10965_s19 + $0x5f0] sm:$0xff]  ;;  %v738_v20 = vld [vmem:[%s10965_s19 + $0x5d8] sm:$0xff] }
 0x16b   : > { %v9542_v24 = vcombine.high %v737_v17, %v741_v19  ;;  %v9541_v30 = vcombine.low %v737_v17, %v741_v19  ;;  %v9543_v31 = vcombine.low %v738_v20, %v742_v21  ;;  %v798_v17 = vld [vmem:[%s10965_s19 + $0x7b8] sm:$0xff] }
 0x16d   : > { %4040 = vmatpush1.bf16.msra.mxu0 %v9477_v25  ;;  %4212 = vmatpush1.bf16.msra.mxu1 %v9479_v26  ;;  %v9544_v25 = vcombine.high %v738_v20, %v742_v21  ;;  %v745_v26 = vld [vmem:[%s10965_s19 + $0x610] sm:$0xff] }
 0x16e   : > { %4052 = vmatprep.subr.bf16.mxu0 %v9486_v27  ;;  %4224 = vmatprep.subr.bf16.mxu1 %v9488_v28  ;;  %v749_v27 = vld [vmem:[%s10965_s19 + $0x630] sm:$0xff]  ;;  %v746_v28 = vld [vmem:[%s10965_s19 + $0x618] sm:$0xff] }
 0x16f   : > { %v9550_v33 = vcombine.high %v745_v26, %v749_v27  ;;  %v9551_v40 = vcombine.low %v746_v28, %v750_v29 }
 0x170   : > { %4042 = vmatmul.mubr.bf16.vlgmr.msra.gmra.mrb[4].mxu0 %v11044_v32  ;;  %4214 = vmatmul.mubr.bf16.vlgmr.msra.gmra.mrb[4].mxu1 %v11044_v32  ;;  %v9501_v32 = vcombine.low %v697_v38, %v701_v39  ;;  %v758_v38 = vld [vmem:[%s10965_s19 + $0x678] sm:$0xff]  ;;  %v9549_v39 = vcombine.low %v745_v26, %v749_v27 }
 0x171   : > { %4053 = vmatpush1.bf16.msra.mxu0 %v9485_v34  ;;  %4225 = vmatpush1.bf16.msra.mxu1 %v9487_v35  ;;  %v9552_v34 = vcombine.high %v746_v28, %v750_v29  ;;  %v753_v35 = vld [vmem:[%s10965_s19 + $0x650] sm:$0xff]  ;;  %v806_v26 = vld [vmem:[%s10965_s19 + $0x7f8] sm:$0xff] }
 0x172   : > { %4054 = vmatprep.subr.bf16.mxu0 %v9494_v36  ;;  %4226 = vmatprep.subr.bf16.mxu1 %v9496_v37  ;;  %v757_v36 = vld [vmem:[%s10965_s19 + $0x670] sm:$0xff]  ;;  %v754_v37 = vld [vmem:[%s10965_s19 + $0x658] sm:$0xff] }
 0x173   : > { %4084 = vmatprep.mubr.bf16.mxu0 %v11051_v42  ;;  %4256 = vmatprep.mubr.bf16.mxu1 %v11051_v42  ;;  %v9511_v42 = vcombine.low %v706_v49, %v710_v50  ;;  %v9558_v41 = vcombine.high %v753_v35, %v757_v36  ;;  %v9557_v48 = vcombine.low %v753_v35, %v757_v36  ;;  %v814_v35 = vld [vmem:[%s10965_s19 + $0x838] sm:$0xff] }
 0x174   : > { %v9559_v49 = vcombine.low %v754_v37, %v758_v38 }
 0x175   : > { %4055 = vmatpush1.bf16.msra.mxu0 %v9493_v43  ;;  %4227 = vmatpush1.bf16.msra.mxu1 %v9495_v45  ;;  %v9560_v43 = vcombine.high %v754_v37, %v758_v38  ;;  %v761_v45 = vld [vmem:[%s10965_s19 + $0x690] sm:$0xff] }
 0x176   : > { %4056 = vmatprep.subr.bf16.mxu0 %v9502_v46  ;;  %4228 = vmatprep.subr.bf16.mxu1 %v9504_v18  ;;  %v765_v46 = vld [vmem:[%s10965_s19 + $0x6b0] sm:$0xff]  ;;  %v762_v18 = vld [vmem:[%s10965_s19 + $0x698] sm:$0xff] }
 0x177   : > { %v9566_v50 = vcombine.high %v761_v45, %v765_v46  ;;  %v9565_v56 = vcombine.low %v761_v45, %v765_v46  ;;  %v9567_v57 = vcombine.low %v762_v18, %v766_v47  ;;  %v822_v45 = vld [vmem:[%s10965_s19 + $0x878] sm:$0xff] }
 0x179   : > { %4057 = vmatpush1.bf16.msra.mxu0 %v9501_v32  ;;  %4229 = vmatpush1.bf16.msra.mxu1 %v9503_v51  ;;  %v9568_v32 = vcombine.high %v762_v18, %v766_v47  ;;  %v769_v51 = vld [vmem:[%s10965_s19 + $0x6d0] sm:$0xff] }
 0x17a   : > { %4058 = vmatprep.subr.bf16.mxu0 %v9510_v52  ;;  %4230 = vmatprep.subr.bf16.mxu1 %v9512_v53  ;;  %v773_v52 = vld [vmem:[%s10965_s19 + $0x6f0] sm:$0xff]  ;;  %v770_v53 = vld [vmem:[%s10965_s19 + $0x6d8] sm:$0xff] }
 0x17b   : > { %v9574_v58 = vcombine.high %v769_v51, %v773_v52  ;;  %v9573_v0 = vcombine.low %v769_v51, %v773_v52  ;;  %v9575_v1 = vcombine.low %v770_v53, %v774_v55  ;;  %v830_v51 = vld [vmem:[%s10965_s19 + $0x8b8] sm:$0xff] }
 0x17d   : > { %4059 = vmatpush1.bf16.msra.mxu0 %v9509_v59  ;;  %4231 = vmatpush1.bf16.msra.mxu1 %v9511_v42  ;;  %v9576_v59 = vcombine.high %v770_v53, %v774_v55  ;;  %v777_v42 = vld [vmem:[%s10965_s19 + $0x710] sm:$0xff] }
 0x17e   : > { %4060 = vmatprep.subr.bf16.mxu0 %v9518_v61  ;;  %4232 = vmatprep.subr.bf16.mxu1 %v9520_v62  ;;  %v781_v61 = vld [vmem:[%s10965_s19 + $0x730] sm:$0xff]  ;;  %v778_v62 = vld [vmem:[%s10965_s19 + $0x718] sm:$0xff] }
 0x17f   : > { %v9582_v2 = vcombine.high %v777_v42, %v781_v61  ;;  %v9581_v9 = vcombine.low %v777_v42, %v781_v61  ;;  %v9583_v10 = vcombine.low %v778_v62, %v782_v63  ;;  %v838_v42 = vld [vmem:[%s10965_s19 + $0x8f8] sm:$0xff] }
 0x181   : > { %4061 = vmatpush1.bf16.msra.mxu0 %v9517_v3  ;;  %4233 = vmatpush1.bf16.msra.mxu1 %v9519_v4  ;;  %v9584_v3 = vcombine.high %v778_v62, %v782_v63  ;;  %v785_v4 = vld [vmem:[%s10965_s19 + $0x750] sm:$0xff] }
 0x182   : > { %4062 = vmatprep.subr.bf16.mxu0 %v9526_v5  ;;  %4234 = vmatprep.subr.bf16.mxu1 %v9528_v7  ;;  %v789_v5 = vld [vmem:[%s10965_s19 + $0x770] sm:$0xff]  ;;  %v786_v7 = vld [vmem:[%s10965_s19 + $0x758] sm:$0xff] }
 0x183   : > { %v9590_v11 = vcombine.high %v785_v4, %v789_v5  ;;  %v9589_v19 = vcombine.low %v785_v4, %v789_v5  ;;  %v9591_v20 = vcombine.low %v786_v7, %v790_v8 }
 0x185   : > { %4063 = vmatpush1.bf16.msra.mxu0 %v9525_v12  ;;  %4235 = vmatpush1.bf16.msra.mxu1 %v9527_v13  ;;  %v9592_v12 = vcombine.high %v786_v7, %v790_v8  ;;  %v793_v13 = vld [vmem:[%s10965_s19 + $0x790] sm:$0xff] }
 0x186   : > { %4064 = vmatprep.subr.bf16.mxu0 %v9534_v14  ;;  %4236 = vmatprep.subr.bf16.mxu1 %v9536_v16  ;;  %v797_v14 = vld [vmem:[%s10965_s19 + $0x7b0] sm:$0xff]  ;;  %v794_v16 = vld [vmem:[%s10965_s19 + $0x798] sm:$0xff] }
 0x187   : > { %v9598_v21 = vcombine.high %v793_v13, %v797_v14  ;;  %v9597_v27 = vcombine.low %v793_v13, %v797_v14  ;;  %v9599_v28 = vcombine.low %v794_v16, %v798_v17  ;;  %v849_v8 = vld [vmem:[%s10965_s19 + $0x950] sm:$0xff] }
 0x189   : > { %4065 = vmatpush1.bf16.msra.mxu0 %v9533_v22  ;;  %4237 = vmatpush1.bf16.msra.mxu1 %v9535_v23  ;;  %v9600_v22 = vcombine.high %v794_v16, %v798_v17  ;;  %v801_v23 = vld [vmem:[%s10965_s19 + $0x7d0] sm:$0xff] }
 0x18a   : > { %4066 = vmatprep.subr.bf16.mxu0 %v9542_v24  ;;  %4238 = vmatprep.subr.bf16.mxu1 %v9544_v25  ;;  %v805_v24 = vld [vmem:[%s10965_s19 + $0x7f0] sm:$0xff]  ;;  %v802_v25 = vld [vmem:[%s10965_s19 + $0x7d8] sm:$0xff] }
 0x18b   : > { %v9606_v29 = vcombine.high %v801_v23, %v805_v24  ;;  %v9605_v36 = vcombine.low %v801_v23, %v805_v24  ;;  %v9607_v37 = vcombine.low %v802_v25, %v806_v26  ;;  %v857_v17 = vld [vmem:[%s10965_s19 + $0x990] sm:$0xff] }
 0x18d   : > { %4067 = vmatpush1.bf16.msra.mxu0 %v9541_v30  ;;  %4239 = vmatpush1.bf16.msra.mxu1 %v9543_v31  ;;  %v9608_v30 = vcombine.high %v802_v25, %v806_v26  ;;  %v809_v31 = vld [vmem:[%s10965_s19 + $0x810] sm:$0xff] }
 0x18e   : > { %4068 = vmatprep.subr.bf16.mxu0 %v9550_v33  ;;  %4240 = vmatprep.subr.bf16.mxu1 %v9552_v34  ;;  %v813_v33 = vld [vmem:[%s10965_s19 + $0x830] sm:$0xff]  ;;  %v810_v34 = vld [vmem:[%s10965_s19 + $0x818] sm:$0xff] }
 0x18f   : > { %v9614_v38 = vcombine.high %v809_v31, %v813_v33  ;;  %v9613_v46 = vcombine.low %v809_v31, %v813_v33  ;;  %v9615_v18 = vcombine.low %v810_v34, %v814_v35  ;;  %v865_v26 = vld [vmem:[%s10965_s19 + $0x9d0] sm:$0xff] }
 0x191   : > { %4069 = vmatpush1.bf16.msra.mxu0 %v9549_v39  ;;  %4241 = vmatpush1.bf16.msra.mxu1 %v9551_v40  ;;  %v9616_v39 = vcombine.high %v810_v34, %v814_v35  ;;  %v817_v40 = vld [vmem:[%s10965_s19 + $0x850] sm:$0xff] }
 0x192   : > { %4070 = vmatprep.subr.bf16.mxu0 %v9558_v41  ;;  %4242 = vmatprep.subr.bf16.mxu1 %v9560_v43  ;;  %v821_v41 = vld [vmem:[%s10965_s19 + $0x870] sm:$0xff]  ;;  %v818_v43 = vld [vmem:[%s10965_s19 + $0x858] sm:$0xff] }
 0x193   : > { %v9622_v47 = vcombine.high %v817_v40, %v821_v41  ;;  %v9621_v52 = vcombine.low %v817_v40, %v821_v41  ;;  %v9623_v53 = vcombine.low %v818_v43, %v822_v45  ;;  %v873_v35 = vld [vmem:[%s10965_s19 + $0xa10] sm:$0xff] }
 0x195   : > { %4071 = vmatpush1.bf16.msra.mxu0 %v9557_v48  ;;  %4243 = vmatpush1.bf16.msra.mxu1 %v9559_v49  ;;  %v9624_v48 = vcombine.high %v818_v43, %v822_v45  ;;  %v825_v49 = vld [vmem:[%s10965_s19 + $0x890] sm:$0xff] }
 0x196   : > { %4072 = vmatprep.subr.bf16.mxu0 %v9566_v50  ;;  %4244 = vmatprep.subr.bf16.mxu1 %v9568_v32  ;;  %v829_v50 = vld [vmem:[%s10965_s19 + $0x8b0] sm:$0xff]  ;;  %v826_v32 = vld [vmem:[%s10965_s19 + $0x898] sm:$0xff] }
 0x197   : > { %v9630_v55 = vcombine.high %v825_v49, %v829_v50  ;;  %v9631_v61 = vcombine.low %v826_v32, %v830_v51  ;;  %v881_v45 = vld [vmem:[%s10965_s19 + $0xa50] sm:$0xff] }
 0x199   : > { %4073 = vmatpush1.bf16.msra.mxu0 %v9565_v56  ;;  %4245 = vmatpush1.bf16.msra.mxu1 %v9567_v57  ;;  %v9632_v56 = vcombine.high %v826_v32, %v830_v51  ;;  %v833_v57 = vld [vmem:[%s10965_s19 + $0x8d0] sm:$0xff] }
 0x19a   : > { %4074 = vmatprep.subr.bf16.mxu0 %v9574_v58  ;;  %4246 = vmatprep.subr.bf16.mxu1 %v9576_v59  ;;  %v837_v58 = vld [vmem:[%s10965_s19 + $0x8f0] sm:$0xff]  ;;  %v834_v59 = vld [vmem:[%s10965_s19 + $0x8d8] sm:$0xff] }
 0x19b   : > { %v9638_v62 = vcombine.high %v833_v57, %v837_v58  ;;  %v9640_v63 = vcombine.high %v834_v59, %v838_v42  ;;  %v9637_v4 = vcombine.low %v833_v57, %v837_v58  ;;  %v889_v51 = vld [vmem:[%s10965_s19 + $0xa90] sm:$0xff] }
 0x19d   : > { %4075 = vmatpush1.bf16.msra.mxu0 %v9573_v0  ;;  %4247 = vmatpush1.bf16.msra.mxu1 %v9575_v1  ;;  %v841_v0 = vld [vmem:[%s10965_s19 + $0x910] sm:$0xff] }
 0x19e   : > { %4076 = vmatprep.subr.bf16.mxu0 %v9582_v2  ;;  %4248 = vmatprep.subr.bf16.mxu1 %v9584_v3  ;;  %v845_v1 = vld [vmem:[%s10965_s19 + $0x930] sm:$0xff]  ;;  %v842_v2 = vld [vmem:[%s10965_s19 + $0x918] sm:$0xff] }
 0x19f   : > { %v846_v3 = vld [vmem:[%s10965_s19 + $0x938] sm:$0xff]  ;;  %v9646_v5 = vcombine.high %v841_v0, %v845_v1 }
 0x1a0   : > { %v9648_v7 = vcombine.high %v842_v2, %v846_v3  ;;  %v9647_v13 = vcombine.low %v842_v2, %v846_v3  ;;  %v905_v3 = vld [vmem:[%s10965_s19 + $0xb10] sm:$0xff] }
 0x1a1   : > { %4077 = vmatpush1.bf16.msra.mxu0 %v9581_v9  ;;  %4249 = vmatpush1.bf16.msra.mxu1 %v9583_v10  ;;  %v853_v9 = vld [vmem:[%s10965_s19 + $0x970] sm:$0xff]  ;;  %v850_v10 = vld [vmem:[%s10965_s19 + $0x958] sm:$0xff] }
 0x1a2   : > { %4078 = vmatprep.subr.bf16.mxu0 %v9590_v11  ;;  %4250 = vmatprep.subr.bf16.mxu1 %v9592_v12  ;;  %v854_v11 = vld [vmem:[%s10965_s19 + $0x978] sm:$0xff]  ;;  %v9645_v12 = vcombine.low %v841_v0, %v845_v1  ;;  %v9654_v14 = vcombine.high %v849_v8, %v853_v9 }
 0x1a3   : > { %v9656_v16 = vcombine.high %v850_v10, %v854_v11  ;;  %v9655_v23 = vcombine.low %v850_v10, %v854_v11  ;;  %v913_v11 = vld [vmem:[%s10965_s19 + $0xb50] sm:$0xff] }
 0x1a5   : > { %4079 = vmatpush1.bf16.msra.mxu0 %v9589_v19  ;;  %4251 = vmatpush1.bf16.msra.mxu1 %v9591_v20  ;;  %v861_v19 = vld [vmem:[%s10965_s19 + $0x9b0] sm:$0xff]  ;;  %v858_v20 = vld [vmem:[%s10965_s19 + $0x998] sm:$0xff] }
 0x1a6   : > { %4080 = vmatprep.subr.bf16.mxu0 %v9598_v21  ;;  %4252 = vmatprep.subr.bf16.mxu1 %v9600_v22  ;;  %v862_v21 = vld [vmem:[%s10965_s19 + $0x9b8] sm:$0xff]  ;;  %v9653_v22 = vcombine.low %v849_v8, %v853_v9  ;;  %v9662_v24 = vcombine.high %v857_v17, %v861_v19 }
 0x1a7   : > { %v9664_v25 = vcombine.high %v858_v20, %v862_v21  ;;  %v9663_v31 = vcombine.low %v858_v20, %v862_v21  ;;  %v921_v21 = vld [vmem:[%s10965_s19 + $0xb90] sm:$0xff] }
 0x1a9   : > { %4081 = vmatpush1.bf16.msra.mxu0 %v9597_v27  ;;  %4253 = vmatpush1.bf16.msra.mxu1 %v9599_v28  ;;  %v869_v27 = vld [vmem:[%s10965_s19 + $0x9f0] sm:$0xff]  ;;  %v866_v28 = vld [vmem:[%s10965_s19 + $0x9d8] sm:$0xff] }
 0x1aa   : > { %4082 = vmatprep.subr.bf16.mxu0 %v9606_v29  ;;  %4254 = vmatprep.subr.bf16.mxu1 %v9608_v30  ;;  %v870_v29 = vld [vmem:[%s10965_s19 + $0x9f8] sm:$0xff]  ;;  %v9661_v30 = vcombine.low %v857_v17, %v861_v19  ;;  %v9670_v33 = vcombine.high %v865_v26, %v869_v27 }
 0x1ab   : > { %v9672_v34 = vcombine.high %v866_v28, %v870_v29  ;;  %v9671_v40 = vcombine.low %v866_v28, %v870_v29  ;;  %v929_v29 = vld [vmem:[%s10965_s19 + $0xbd0] sm:$0xff] }
 0x1ad   : > { %4083 = vmatpush1.bf16.msra.mxu0 %v9605_v36  ;;  %4255 = vmatpush1.bf16.msra.mxu1 %v9607_v37  ;;  %v877_v36 = vld [vmem:[%s10965_s19 + $0xa30] sm:$0xff]  ;;  %v874_v37 = vld [vmem:[%s10965_s19 + $0xa18] sm:$0xff] }
 0x1ae   : > { %4095 = vmatprep.subr.bf16.mxu0 %v9614_v38  ;;  %4267 = vmatprep.subr.bf16.mxu1 %v9616_v39  ;;  %v878_v38 = vld [vmem:[%s10965_s19 + $0xa38] sm:$0xff]  ;;  %v9669_v39 = vcombine.low %v865_v26, %v869_v27  ;;  %v9678_v41 = vcombine.high %v873_v35, %v877_v36 }
 0x1af   : > { %v9680_v43 = vcombine.high %v874_v37, %v878_v38 }
 0x1b0   : > { %4085 = vmatmul.mubr.bf16.vlgmr.msra.gmra.mrb[4].mxu0 %v11120_v44  ;;  %4257 = vmatmul.mubr.bf16.vlgmr.msra.gmra.mrb[4].mxu1 %v11120_v44  ;;  %v9629_v44 = vcombine.low %v825_v49, %v829_v50  ;;  %v9679_v49 = vcombine.low %v874_v37, %v878_v38  ;;  %v937_v38 = vld [vmem:[%s10965_s19 + $0xc10] sm:$0xff] }
 0x1b1   : > { %4096 = vmatpush1.bf16.msra.mxu0 %v9613_v46  ;;  %4268 = vmatpush1.bf16.msra.mxu1 %v9615_v18  ;;  %v885_v46 = vld [vmem:[%s10965_s19 + $0xa70] sm:$0xff]  ;;  %v882_v18 = vld [vmem:[%s10965_s19 + $0xa58] sm:$0xff] }
 0x1b2   : > { %4097 = vmatprep.subr.bf16.mxu0 %v9622_v47  ;;  %4269 = vmatprep.subr.bf16.mxu1 %v9624_v48  ;;  %v886_v47 = vld [vmem:[%s10965_s19 + $0xa78] sm:$0xff]  ;;  %v9677_v48 = vcombine.low %v873_v35, %v877_v36  ;;  %v9686_v50 = vcombine.high %v881_v45, %v885_v46 }
 0x1b3   : > { %4127 = vmatprep.mubr.bf16.mxu0 %v11127_v54  ;;  %4299 = vmatprep.mubr.bf16.mxu1 %v11127_v54  ;;  %v9639_v54 = vcombine.low %v834_v59, %v838_v42  ;;  %v9688_v32 = vcombine.high %v882_v18, %v886_v47  ;;  %v9687_v57 = vcombine.low %v882_v18, %v886_v47  ;;  %v897_v42 = vld [vmem:[%s10965_s19 + $0xad0] sm:$0xff] }
 0x1b4   : > { %v945_v47 = vld [vmem:[%s10965_s19 + $0xc50] sm:$0xff] }
 0x1b5   : > { %4098 = vmatpush1.bf16.msra.mxu0 %v9621_v52  ;;  %4270 = vmatpush1.bf16.msra.mxu1 %v9623_v53  ;;  %v893_v52 = vld [vmem:[%s10965_s19 + $0xab0] sm:$0xff]  ;;  %v890_v53 = vld [vmem:[%s10965_s19 + $0xa98] sm:$0xff] }
 0x1b6   : > { %4099 = vmatprep.subr.bf16.mxu0 %v9630_v55  ;;  %4271 = vmatprep.subr.bf16.mxu1 %v9632_v56  ;;  %v894_v55 = vld [vmem:[%s10965_s19 + $0xab8] sm:$0xff]  ;;  %v9685_v56 = vcombine.low %v881_v45, %v885_v46  ;;  %v9694_v58 = vcombine.high %v889_v51, %v893_v52 }
 0x1b7   : > { %v9696_v59 = vcombine.high %v890_v53, %v894_v55  ;;  %v9695_v0 = vcombine.low %v890_v53, %v894_v55  ;;  %v953_v55 = vld [vmem:[%s10965_s19 + $0xc90] sm:$0xff] }
 0x1b9   : > { %4100 = vmatpush1.bf16.msra.mxu0 %v9629_v44  ;;  %4272 = vmatpush1.bf16.msra.mxu1 %v9631_v61  ;;  %v901_v44 = vld [vmem:[%s10965_s19 + $0xaf0] sm:$0xff]  ;;  %v898_v61 = vld [vmem:[%s10965_s19 + $0xad8] sm:$0xff] }
 0x1ba   : > { %4101 = vmatprep.subr.bf16.mxu0 %v9638_v62  ;;  %4273 = vmatprep.subr.bf16.mxu1 %v9640_v63  ;;  %v902_v62 = vld [vmem:[%s10965_s19 + $0xaf8] sm:$0xff]  ;;  %v9693_v63 = vcombine.low %v889_v51, %v893_v52  ;;  %v9702_v1 = vcombine.high %v897_v42, %v901_v44 }
 0x1bb   : > { %v9704_v2 = vcombine.high %v898_v61, %v902_v62  ;;  %v9703_v8 = vcombine.low %v898_v61, %v902_v62  ;;  %v961_v62 = vld [vmem:[%s10965_s19 + $0xcd0] sm:$0xff] }
 0x1bd   : > { %4102 = vmatpush1.bf16.msra.mxu0 %v9637_v4  ;;  %4274 = vmatpush1.bf16.msra.mxu1 %v9639_v54  ;;  %v909_v4 = vld [vmem:[%s10965_s19 + $0xb30] sm:$0xff]  ;;  %v906_v54 = vld [vmem:[%s10965_s19 + $0xb18] sm:$0xff] }
 0x1be   : > { %4103 = vmatprep.subr.bf16.mxu0 %v9646_v5  ;;  %4275 = vmatprep.subr.bf16.mxu1 %v9648_v7  ;;  %v910_v5 = vld [vmem:[%s10965_s19 + $0xb38] sm:$0xff]  ;;  %v9701_v7 = vcombine.low %v897_v42, %v901_v44  ;;  %v9710_v9 = vcombine.high %v905_v3, %v909_v4 }
 0x1bf   : > { %v9712_v10 = vcombine.high %v906_v54, %v910_v5  ;;  %v9711_v17 = vcombine.low %v906_v54, %v910_v5  ;;  %v969_v5 = vld [vmem:[%s10965_s19 + $0xd10] sm:$0xff] }
 0x1c1   : > { %4104 = vmatpush1.bf16.msra.mxu0 %v9645_v12  ;;  %4276 = vmatpush1.bf16.msra.mxu1 %v9647_v13  ;;  %v917_v12 = vld [vmem:[%s10965_s19 + $0xb70] sm:$0xff]  ;;  %v914_v13 = vld [vmem:[%s10965_s19 + $0xb58] sm:$0xff] }
 0x1c2   : > { %4105 = vmatprep.subr.bf16.mxu0 %v9654_v14  ;;  %4277 = vmatprep.subr.bf16.mxu1 %v9656_v16  ;;  %v918_v14 = vld [vmem:[%s10965_s19 + $0xb78] sm:$0xff]  ;;  %v9709_v16 = vcombine.low %v905_v3, %v909_v4  ;;  %v9718_v19 = vcombine.high %v913_v11, %v917_v12 }
 0x1c3   : > { %v9720_v20 = vcombine.high %v914_v13, %v918_v14  ;;  %v9719_v26 = vcombine.low %v914_v13, %v918_v14  ;;  %v977_v14 = vld [vmem:[%s10965_s19 + $0xd50] sm:$0xff] }
 0x1c5   : > { %4106 = vmatpush1.bf16.msra.mxu0 %v9653_v22  ;;  %4278 = vmatpush1.bf16.msra.mxu1 %v9655_v23  ;;  %v925_v22 = vld [vmem:[%s10965_s19 + $0xbb0] sm:$0xff]  ;;  %v922_v23 = vld [vmem:[%s10965_s19 + $0xb98] sm:$0xff] }
 0x1c6   : > { %4107 = vmatprep.subr.bf16.mxu0 %v9662_v24  ;;  %4279 = vmatprep.subr.bf16.mxu1 %v9664_v25  ;;  %v926_v24 = vld [vmem:[%s10965_s19 + $0xbb8] sm:$0xff]  ;;  %v9717_v25 = vcombine.low %v913_v11, %v917_v12  ;;  %v9726_v27 = vcombine.high %v921_v21, %v925_v22 }
 0x1c7   : > { %v9728_v28 = vcombine.high %v922_v23, %v926_v24  ;;  %v9727_v35 = vcombine.low %v922_v23, %v926_v24 }
 0x1c9   : > { %4108 = vmatpush1.bf16.msra.mxu0 %v9661_v30  ;;  %4280 = vmatpush1.bf16.msra.mxu1 %v9663_v31  ;;  %v933_v30 = vld [vmem:[%s10965_s19 + $0xbf0] sm:$0xff]  ;;  %v930_v31 = vld [vmem:[%s10965_s19 + $0xbd8] sm:$0xff] }
 0x1ca   : > { %4109 = vmatprep.subr.bf16.mxu0 %v9670_v33  ;;  %4281 = vmatprep.subr.bf16.mxu1 %v9672_v34  ;;  %v934_v33 = vld [vmem:[%s10965_s19 + $0xbf8] sm:$0xff]  ;;  %v9725_v34 = vcombine.low %v921_v21, %v925_v22  ;;  %v9734_v36 = vcombine.high %v929_v29, %v933_v30  ;;  %v1063_v22 = vld [vmem:[%s11504_s23] sm:$0xff] }
 0x1cb   : > { %v9736_v37 = vcombine.high %v930_v31, %v934_v33  ;;  %v9735_v45 = vcombine.low %v930_v31, %v934_v33  ;;  %v986_v33 = vld [vmem:[%s10965_s19 + $0xd98] sm:$0xff] }
 0x1cd   : > { %4110 = vmatpush1.bf16.msra.mxu0 %v9669_v39  ;;  %4282 = vmatpush1.bf16.msra.mxu1 %v9671_v40  ;;  %v941_v39 = vld [vmem:[%s10965_s19 + $0xc30] sm:$0xff]  ;;  %v938_v40 = vld [vmem:[%s10965_s19 + $0xc18] sm:$0xff] }
 0x1ce   : > { %4111 = vmatprep.subr.bf16.mxu0 %v9678_v41  ;;  %4283 = vmatprep.subr.bf16.mxu1 %v9680_v43  ;;  %v942_v41 = vld [vmem:[%s10965_s19 + $0xc38] sm:$0xff]  ;;  %v9733_v43 = vcombine.low %v929_v29, %v933_v30  ;;  %v9742_v46 = vcombine.high %v937_v38, %v941_v39  ;;  %v985_v29 = vld [vmem:[%s10965_s19 + $0xd90] sm:$0xff] }
 0x1cf   : > { %v9744_v18 = vcombine.high %v938_v40, %v942_v41  ;;  %v9743_v51 = vcombine.low %v938_v40, %v942_v41  ;;  %v989_v30 = vld [vmem:[%s10965_s19 + $0xdb0] sm:$0xff] }
 0x1d0   : > { %v9790_v40 = vcombine.high %v985_v29, %v989_v30 }
 0x1d1   : > { %4112 = vmatpush1.bf16.msra.mxu0 %v9677_v48  ;;  %4284 = vmatpush1.bf16.msra.mxu1 %v9679_v49  ;;  %v949_v48 = vld [vmem:[%s10965_s19 + $0xc70] sm:$0xff]  ;;  %v946_v49 = vld [vmem:[%s10965_s19 + $0xc58] sm:$0xff] }
 0x1d2   : > { %4113 = vmatprep.subr.bf16.mxu0 %v9686_v50  ;;  %4285 = vmatprep.subr.bf16.mxu1 %v9688_v32  ;;  %v950_v50 = vld [vmem:[%s10965_s19 + $0xc78] sm:$0xff]  ;;  %v9741_v32 = vcombine.low %v937_v38, %v941_v39  ;;  %v9750_v52 = vcombine.high %v945_v47, %v949_v48 }
 0x1d3   : > { %v9752_v53 = vcombine.high %v946_v49, %v950_v50  ;;  %v9751_v42 = vcombine.low %v946_v49, %v950_v50  ;;  %v994_v49 = vld [vmem:[%s10965_s19 + $0xdd8] sm:$0xff] }
 0x1d4   : > { %v998_v50 = vld [vmem:[%s10965_s19 + $0xdf8] sm:$0xff] }
 0x1d5   : > { %4114 = vmatpush1.bf16.msra.mxu0 %v9685_v56  ;;  %4286 = vmatpush1.bf16.msra.mxu1 %v9687_v57  ;;  %v957_v56 = vld [vmem:[%s10965_s19 + $0xcb0] sm:$0xff]  ;;  %v954_v57 = vld [vmem:[%s10965_s19 + $0xc98] sm:$0xff] }
 0x1d6   : > { %4115 = vmatprep.subr.bf16.mxu0 %v9694_v58  ;;  %4287 = vmatprep.subr.bf16.mxu1 %v9696_v59  ;;  %v958_v58 = vld [vmem:[%s10965_s19 + $0xcb8] sm:$0xff]  ;;  %v9749_v59 = vcombine.low %v945_v47, %v949_v48  ;;  %v9758_v44 = vcombine.high %v953_v55, %v957_v56 }
 0x1d7   : > { %v9760_v61 = vcombine.high %v954_v57, %v958_v58  ;;  %v9759_v3 = vcombine.low %v954_v57, %v958_v58 }
 0x1d9   : > { %4116 = vmatpush1.bf16.msra.mxu0 %v9693_v63  ;;  %4288 = vmatpush1.bf16.msra.mxu1 %v9695_v0  ;;  %v965_v63 = vld [vmem:[%s10965_s19 + $0xcf0] sm:$0xff]  ;;  %v962_v0 = vld [vmem:[%s10965_s19 + $0xcd8] sm:$0xff] }
 0x1da   : > { %4117 = vmatprep.subr.bf16.mxu0 %v9702_v1  ;;  %4289 = vmatprep.subr.bf16.mxu1 %v9704_v2  ;;  %v966_v1 = vld [vmem:[%s10965_s19 + $0xcf8] sm:$0xff]  ;;  %v1065_v2 = vlaneseq  ;;  %v9766_v4 = vcombine.high %v961_v62, %v965_v63 }
 0x1db   : > { %v9768_v54 = vcombine.high %v962_v0, %v966_v1  ;;  %v9767_v11 = vcombine.low %v962_v0, %v966_v1  ;;  %v9800_v1 = vcombine.high %v994_v49, %v998_v50 }
 0x1dd   : > { %4118 = vmatpush1.bf16.msra.mxu0 %v9701_v7  ;;  %4290 = vmatpush1.bf16.msra.mxu1 %v9703_v8  ;;  %v973_v7 = vld [vmem:[%s10965_s19 + $0xd30] sm:$0xff]  ;;  %v970_v8 = vld [vmem:[%s10965_s19 + $0xd18] sm:$0xff] }
 0x1de   : > { %4119 = vmatprep.subr.bf16.mxu0 %v9710_v9  ;;  %4291 = vmatprep.subr.bf16.mxu1 %v9712_v10  ;;  %v974_v9 = vld [vmem:[%s10965_s19 + $0xd38] sm:$0xff]  ;;  %v9765_v10 = vcombine.low %v961_v62, %v965_v63  ;;  %v9774_v12 = vcombine.high %v969_v5, %v973_v7  ;;  %v9773_v21 = vcombine.low %v969_v5, %v973_v7 }
 0x1df   : > { %v9776_v13 = vcombine.high %v970_v8, %v974_v9  ;;  %v9799_v7 = vcombine.low %v994_v49, %v998_v50  ;;  %v1030_v49 = vld [vmem:[%s10965_s19 + $0xef8] sm:$0xff] }
 0x1e1   : > { %4120 = vmatpush1.bf16.msra.mxu0 %v9709_v16  ;;  %4292 = vmatpush1.bf16.msra.mxu1 %v9711_v17  ;;  %v981_v16 = vld [vmem:[%s10965_s19 + $0xd70] sm:$0xff] }
 0x1e2   : > { %4121 = vmatprep.subr.bf16.mxu0 %v9718_v19  ;;  %4293 = vmatprep.subr.bf16.mxu1 %v9720_v20  ;;  %v978_v19 = vld [vmem:[%s10965_s19 + $0xd58] sm:$0xff] }
 0x1e3   : > { %v982_v20 = vld [vmem:[%s10965_s19 + $0xd78] sm:$0xff] }
 0x1e4   : > { %v9783_v39 = vcombine.low %v978_v19, %v982_v20 }
 0x1e5   : > { %4122 = vmatpush1.bf16.msra.mxu0 %v9717_v25  ;;  %4294 = vmatpush1.bf16.msra.mxu1 %v9719_v26  ;;  %v9775_v25 = vcombine.low %v970_v8, %v974_v9  ;;  %v1002_v8 = vld [vmem:[%s10965_s19 + $0xe18] sm:$0xff] }
 0x1e6   : > { %4123 = vmatprep.subr.bf16.mxu0 %v9726_v27  ;;  %4295 = vmatprep.subr.bf16.mxu1 %v9728_v28  ;;  %v9782_v27 = vcombine.high %v977_v14, %v981_v16  ;;  %v9784_v28 = vcombine.high %v978_v19, %v982_v20  ;;  %v1006_v9 = vld [vmem:[%s10965_s19 + $0xe38] sm:$0xff] }
 0x1e9   : > { %4124 = vmatpush1.bf16.msra.mxu0 %v9725_v34  ;;  %4296 = vmatpush1.bf16.msra.mxu1 %v9727_v35  ;;  %v990_v34 = vld [vmem:[%s10965_s19 + $0xdb8] sm:$0xff] }
 0x1ea   : > { %4125 = vmatprep.subr.bf16.mxu0 %v9734_v36  ;;  %4297 = vmatprep.subr.bf16.mxu1 %v9736_v37  ;;  %v9781_v37 = vcombine.low %v977_v14, %v981_v16 }
 0x1ed   : > { %4126 = vmatpush1.bf16.msra.mxu0 %v9733_v43  ;;  %4298 = vmatpush1.bf16.msra.mxu1 %v9735_v45  ;;  %v9792_v43 = vcombine.high %v986_v33, %v990_v34  ;;  %v993_v45 = vld [vmem:[%s10965_s19 + $0xdd0] sm:$0xff] }
 0x1ee   : > { %4138 = vmatprep.subr.bf16.mxu0 %v9742_v46  ;;  %4310 = vmatprep.subr.bf16.mxu1 %v9744_v18  ;;  %v997_v46 = vld [vmem:[%s10965_s19 + $0xdf0] sm:$0xff] }
 0x1ef   : > { %v9797_v0 = vcombine.low %v993_v45, %v997_v46 }
 0x1f0   : > { %4128 = vmatmul.mubr.bf16.vlgmr.msra.gmra.mrb[4].mxu0 %v11196_v60  ;;  %4300 = vmatmul.mubr.bf16.vlgmr.msra.gmra.mrb[4].mxu1 %v11196_v60  ;;  %v9757_v60 = vcombine.low %v953_v55, %v957_v56  ;;  %v9789_v55 = vcombine.low %v985_v29, %v989_v30  ;;  %v9791_v56 = vcombine.low %v986_v33, %v990_v34  ;;  %v1010_v30 = vld [vmem:[%s10965_s19 + $0xe58] sm:$0xff] }
 0x1f1   : > { %4139 = vmatpush1.bf16.msra.mxu0 %v9741_v32  ;;  %4311 = vmatpush1.bf16.msra.mxu1 %v9743_v51  ;;  %v9807_v34 = vcombine.low %v1002_v8, %v1006_v9 }
 0x1f2   : > { %4140 = vmatprep.subr.bf16.mxu0 %v9750_v52  ;;  %4312 = vmatprep.subr.bf16.mxu1 %v9752_v53 }
 0x1f3   : > { %4170 = vmatprep.mubr.bf16.mxu0 %v11203_v6  ;;  %4342 = vmatprep.mubr.bf16.mxu1 %v11203_v6  ;;  %v11497_v6 = vshrl.u32 %v1065_v2, 7 }
 0x1f5   : > { %4141 = vmatpush1.bf16.msra.mxu0 %v9749_v59  ;;  %4313 = vmatpush1.bf16.msra.mxu1 %v9751_v42  ;;  %v1067_v17 = vsub.s32 0, %v11497_v6  ;;  %v1075_v23 = vsub.s32 2, %v11497_v6  ;;  %v1071_v24 = vsub.s32 1, %v11497_v6  ;;  %v1079_v26 = vsub.s32 3, %v11497_v6 }
 0x1f6   : > { %4142 = vmatprep.subr.bf16.mxu0 %v9758_v44  ;;  %4314 = vmatprep.subr.bf16.mxu1 %v9760_v61  ;;  %v9798_v44 = vcombine.high %v993_v45, %v997_v46 }
 0x1f7   : > { %v1068_v31 = vrot.slane %v1063_v22, %v1067_v17  ;;  %v1076_v35 = vrot.slane %v1063_v22, %v1075_v23  ;;  %v1072_v36 = vrot.slane %v1063_v22, %v1071_v24  ;;  %v1080_v38 = vrot.slane %v1063_v22, %v1079_v26 }
 0x1f9   : > { %4143 = vmatpush1.bf16.msra.mxu0 %v9757_v60  ;;  %4315 = vmatpush1.bf16.msra.mxu1 %v9759_v3  ;;  %v1001_v60 = vld [vmem:[%s10965_s19 + $0xe10] sm:$0xff] }
 0x1fa   : > { %4144 = vmatprep.subr.bf16.mxu0 %v9766_v4  ;;  %4316 = vmatprep.subr.bf16.mxu1 %v9768_v54  ;;  %v1005_v3 = vld [vmem:[%s10965_s19 + $0xe30] sm:$0xff] }
 0x1fb   : > { %v9806_v20 = vcombine.high %v1001_v60, %v1005_v3  ;;  %v9805_v33 = vcombine.low %v1001_v60, %v1005_v3 }
 0x1fd   : > { %4145 = vmatpush1.bf16.msra.mxu0 %v9765_v10  ;;  %4317 = vmatpush1.bf16.msra.mxu1 %v9767_v11 }
 0x1fe   : > { %4146 = vmatprep.subr.bf16.mxu0 %v9774_v12  ;;  %4318 = vmatprep.subr.bf16.mxu1 %v9776_v13 }
 0x201   : > { %4147 = vmatpush1.bf16.msra.mxu0 %v9773_v21  ;;  %4319 = vmatpush1.bf16.msra.mxu1 %v9775_v25  ;;  %v9808_v25 = vcombine.high %v1002_v8, %v1006_v9  ;;  %v1054_v8 = vld [vmem:[%s10965_s19 + $0xfb8] sm:$0xff] }
 0x202   : > { %4148 = vmatprep.subr.bf16.mxu0 %v9782_v27  ;;  %4320 = vmatprep.subr.bf16.mxu1 %v9784_v28  ;;  %v1009_v27 = vld [vmem:[%s10965_s19 + $0xe50] sm:$0xff] }
 0x203   : > { %v3828_v41 = vpop.f32.mrb[0].mxu0  ;;  %v4000_v47 = vpop.f32.mrb[0].mxu1  ;;  %v1013_v28 = vld [vmem:[%s10965_s19 + $0xe70] sm:$0xff] }
 0x204   : > { %v10562_v18 = vadd.f32 %v3828_v41, %v1068_v31  ;;  %v3830_v48 = vpop.f32.mrb[1].mxu0  ;;  %v10566_v32 = vadd.f32 %v4000_v47, %v1076_v35  ;;  %v4002_v52 = vpop.f32.mrb[1].mxu1  ;;  %v9813_v41 = vcombine.low %v1009_v27, %v1013_v28  ;;  %v1029_v47 = vld [vmem:[%s10965_s19 + $0xef0] sm:$0xff] }
 0x205   : > { %v10563_v51 = vadd.f32 %v3830_v48, %v1072_v36  ;;  %v3832_v53 = vpop.f32.mrb[2].mxu0  ;;  %4149 = vmatpush1.bf16.msra.mxu0 %v9781_v37  ;;  %v10567_v57 = vadd.f32 %v4002_v52, %v1080_v38  ;;  %v4004_v59 = vpop.f32.mrb[2].mxu1  ;;  %4321 = vmatpush1.bf16.msra.mxu1 %v9783_v39  ;;  %v1017_v37 = vld [vmem:[%s10965_s19 + $0xe90] sm:$0xff]  ;;  %v1018_v39 = vld [vmem:[%s10965_s19 + $0xe98] sm:$0xff] }
 0x206   : > { %v10564_v58 = vadd.f32 %v3832_v53, %v1068_v31  ;;  %v3834_v42 = vpop.f32.mrb[3].mxu0  ;;  %4150 = vmatprep.subr.bf16.mxu0 %v9790_v40  ;;  %v10568_v61 = vadd.f32 %v4004_v59, %v1076_v35  ;;  %v4006_v63 = vpop.f32.mrb[3].mxu1  ;;  %4322 = vmatprep.subr.bf16.mxu1 %v9792_v43  ;;  %v4353_v4 = vmax.f32 %v10562_v18, 0.0  ;;  %v4355_v10 = vmax.f32 %v10566_v32, 0.0  ;;  %v1014_v31 = vld [vmem:[%s10965_s19 + $0xe78] sm:$0xff]  ;;  %v1025_v18 = vld [vmem:[%s10965_s19 + $0xed0] sm:$0xff] }
 0x207   : > { %v10565_v62 = vadd.f32 %v3834_v42, %v1072_v36  ;;  %v10569_v5 = vadd.f32 %v4006_v63, %v1080_v38  ;;  %v4354_v11 = vmax.f32 %v10563_v51, 0.0  ;;  %v4356_v14 = vmax.f32 %v10567_v57, 0.0  ;;  %v1021_v38 = vld [vmem:[%s10965_s19 + $0xeb0] sm:$0xff]  ;;  %v1022_v40 = vld [vmem:[%s10965_s19 + $0xeb8] sm:$0xff] }
 0x208   : > { %v4361_v54 = vmax.f32 %v10564_v58, 0.0  ;;  %v4363_v12 = vmax.f32 %v10568_v61, 0.0  ;;  %v9814_v35 = vcombine.high %v1009_v27, %v1013_v28  ;;  %v9816_v36 = vcombine.high %v1010_v30, %v1014_v31  ;;  %v1026_v48 = vld [vmem:[%s10965_s19 + $0xed8] sm:$0xff]  ;;  %v1033_v53 = vld [vmem:[%s10965_s19 + $0xf10] sm:$0xff] }
 0x209   : > { %v4362_v13 = vmax.f32 %v10565_v62, 0.0  ;;  %4151 = vmatpush1.bf16.msra.mxu0 %v9789_v55  ;;  %v4364_v19 = vmax.f32 %v10569_v5, 0.0  ;;  %4323 = vmatpush1.bf16.msra.mxu1 %v9791_v56  ;;  %v9815_v43 = vcombine.low %v1010_v30, %v1014_v31  ;;  %v9822_v45 = vcombine.high %v1017_v37, %v1021_v38  ;;  %v1037_v55 = vld [vmem:[%s10965_s19 + $0xf30] sm:$0xff]  ;;  %v1034_v56 = vld [vmem:[%s10965_s19 + $0xf18] sm:$0xff]  ;;  %v4377_v31 = vld [vmem:[%s11574_s26] sm:$0xff] }
 0x20a   : > { %v11535_v16 = vpack.c.bf16 %v4361_v54, %v4353_v4  ;;  %4152 = vmatprep.subr.bf16.mxu0 %v9798_v44  ;;  %v11537_v21 = vpack.c.bf16 %v4363_v12, %v4355_v10  ;;  %4324 = vmatprep.subr.bf16.mxu1 %v9800_v1  ;;  %v9824_v46 = vcombine.high %v1018_v39, %v1022_v40  ;;  %v1038_v57 = vld [vmem:[%s10965_s19 + $0xf38] sm:$0xff]  ;;  %v1041_v61 = vld [vmem:[%s10965_s19 + $0xf50] sm:$0xff] }
 0x20b   : > { %v11539_v22 = vpack.c.bf16 %v4362_v13, %v4354_v11  ;;  %v11543_v29 = vpack.c.bf16 %v4364_v19, %v4356_v14  ;;  %v9821_v50 = vcombine.low %v1017_v37, %v1021_v38  ;;  %v9823_v32 = vcombine.low %v1018_v39, %v1022_v40  ;;  %v1045_v62 = vld [vmem:[%s10965_s19 + $0xf70] sm:$0xff]  ;;  %v1042_v63 = vld [vmem:[%s10965_s19 + $0xf58] sm:$0xff]  ;;  %v4385_v40 = vld [vmem:[%s11574_s26 + $0x40] sm:$0xff] }
 0x20c   : > { %v9830_v51 = vcombine.high %v1025_v18, %v1029_v47  ;;  %v9832_v52 = vcombine.high %v1026_v48, %v1030_v49  ;;  %v9829_v58 = vcombine.low %v1025_v18, %v1029_v47  ;;  %v9831_v59 = vcombine.low %v1026_v48, %v1030_v49  ;;  %v1049_v54 = vld [vmem:[%s10965_s19 + $0xf90] sm:$0xff]  ;;  %v1058_v19 = vld [vmem:[%s10965_s19 + $0xfd8] sm:$0xff]  ;;  %v4393_v48 = vld [vmem:[%s11574_s26 + $0x80] sm:$0xff] }
 0x20d   : > { %4153 = vmatpush1.bf16.msra.mxu0 %v9797_v0  ;;  %4325 = vmatpush1.bf16.msra.mxu1 %v9799_v7  ;;  %v9838_v42 = vcombine.high %v1033_v53, %v1037_v55  ;;  %v9840_v44 = vcombine.high %v1034_v56, %v1038_v57  ;;  %v1046_v0 = vld [vmem:[%s10965_s19 + $0xf78] sm:$0xff]  ;;  %v9837_v1 = vcombine.low %v1033_v53, %v1037_v55  ;;  %v1053_v5 = vld [vmem:[%s10965_s19 + $0xfb0] sm:$0xff]  ;;  %v4397_v49 = vld [vmem:[%s11574_s26 + $0xa0] sm:$0xff] }
 0x20e   : > { %4154 = vmatprep.subr.bf16.mxu0 %v9806_v20  ;;  %4326 = vmatprep.subr.bf16.mxu1 %v9808_v25  ;;  %v9839_v60 = vcombine.low %v1034_v56, %v1038_v57  ;;  %v9846_v3 = vcombine.high %v1041_v61, %v1045_v62  ;;  %v9848_v4 = vcombine.high %v1042_v63, %v1046_v0  ;;  %v1050_v7 = vld [vmem:[%s10965_s19 + $0xf98] sm:$0xff]  ;;  %v1057_v13 = vld [vmem:[%s10965_s19 + $0xfd0] sm:$0xff]  ;;  %v4401_v57 = vld [vmem:[%s11574_s26 + $0xc0] sm:$0xff] }
 0x20f   : > { %v9845_v9 = vcombine.low %v1041_v61, %v1045_v62  ;;  %v9847_v10 = vcombine.low %v1042_v63, %v1046_v0  ;;  %v9854_v11 = vcombine.high %v1049_v54, %v1053_v5  ;;  %v9856_v12 = vcombine.high %v1050_v7, %v1054_v8  ;;  %v1061_v14 = vld [vmem:[%s10965_s19 + $0xff0] sm:$0xff]  ;;  %v1062_v20 = vld [vmem:[%s10965_s19 + $0xff8] sm:$0xff]  ;;  %v4409_v63 = vld [vmem:[%s11574_s26 + $0x100] sm:$0xff] }
 0x210   : > { %v9853_v25 = vcombine.low %v1049_v54, %v1053_v5  ;;  %v9855_v27 = vcombine.low %v1050_v7, %v1054_v8  ;;  %v9862_v28 = vcombine.high %v1057_v13, %v1061_v14  ;;  %v9864_v30 = vcombine.high %v1058_v19, %v1062_v20  ;;  %v4413_v0 = vld [vmem:[%s11574_s26 + $0x120] sm:$0xff] }
 0x211   : > { %4155 = vmatpush1.bf16.msra.mxu0 %v9805_v33  ;;  %4327 = vmatpush1.bf16.msra.mxu1 %v9807_v34  ;;  %v4381_v33 = vld [vmem:[%s11574_s26 + $0x20] sm:$0xff]  ;;  %v4378_v34 = vld [vmem:[%s11574_s26 + $0x8] sm:$0xff]  ;;  %v9863_v37 = vcombine.low %v1058_v19, %v1062_v20  ;;  %v9882_v55 = vcombine.high %v4393_v48, %v4397_v49  ;;  %v9898_v54 = vcombine.high %v4409_v63, %v4413_v0 }
 0x212   : > { %4156 = vmatprep.subr.bf16.mxu0 %v9814_v35  ;;  %4328 = vmatprep.subr.bf16.mxu1 %v9816_v36  ;;  %v4382_v35 = vld [vmem:[%s11574_s26 + $0x28] sm:$0xff]  ;;  %v9861_v36 = vcombine.low %v1057_v13, %v1061_v14  ;;  %v9866_v38 = vcombine.high %v4377_v31, %v4381_v33  ;;  %v4417_v7 = vld [vmem:[%s11574_s26 + $0x140] sm:$0xff] }
 0x213   : > { %v9868_v39 = vcombine.high %v4378_v34, %v4382_v35  ;;  %v9867_v18 = vcombine.low %v4378_v34, %v4382_v35  ;;  %v4421_v8 = vld [vmem:[%s11574_s26 + $0x160] sm:$0xff] }
 0x214   : > { %v9906_v13 = vcombine.high %v4417_v7, %v4421_v8  ;;  %v4425_v19 = vld [vmem:[%s11574_s26 + $0x180] sm:$0xff] }
 0x215   : > { %4157 = vmatpush1.bf16.msra.mxu0 %v9813_v41  ;;  %4329 = vmatpush1.bf16.msra.mxu1 %v9815_v43  ;;  %v4389_v41 = vld [vmem:[%s11574_s26 + $0x60] sm:$0xff]  ;;  %v9865_v43 = vcombine.low %v4377_v31, %v4381_v33 }
 0x216   : > { %4158 = vmatprep.subr.bf16.mxu0 %v9822_v45  ;;  %4330 = vmatprep.subr.bf16.mxu1 %v9824_v46  ;;  %v4386_v45 = vld [vmem:[%s11574_s26 + $0x48] sm:$0xff]  ;;  %v9874_v47 = vcombine.high %v4385_v40, %v4389_v41  ;;  %v4429_v20 = vld [vmem:[%s11574_s26 + $0x1a0] sm:$0xff] }
 0x217   : > { %v4390_v46 = vld [vmem:[%s11574_s26 + $0x68] sm:$0xff]  ;;  %v9914_v31 = vcombine.high %v4425_v19, %v4429_v20  ;;  %v4433_v34 = vld [vmem:[%s11574_s26 + $0x1c0] sm:$0xff] }
 0x218   : > { %v9875_v53 = vcombine.low %v4386_v45, %v4390_v46  ;;  %v4437_v35 = vld [vmem:[%s11574_s26 + $0x1e0] sm:$0xff] }
 0x219   : > { %4159 = vmatpush1.bf16.msra.mxu0 %v9821_v50  ;;  %4331 = vmatpush1.bf16.msra.mxu1 %v9823_v32  ;;  %v9876_v50 = vcombine.high %v4386_v45, %v4390_v46  ;;  %v4394_v32 = vld [vmem:[%s11574_s26 + $0x88] sm:$0xff]  ;;  %v4445_v45 = vld [vmem:[%s11574_s26 + $0x220] sm:$0xff] }
 0x21a   : > { %4160 = vmatprep.subr.bf16.mxu0 %v9830_v51  ;;  %4332 = vmatprep.subr.bf16.mxu1 %v9832_v52  ;;  %v4398_v51 = vld [vmem:[%s11574_s26 + $0xa8] sm:$0xff]  ;;  %v9873_v52 = vcombine.low %v4385_v40, %v4389_v41  ;;  %v9922_v40 = vcombine.high %v4433_v34, %v4437_v35 }
 0x21b   : > { %v9884_v56 = vcombine.high %v4394_v32, %v4398_v51  ;;  %v4442_v46 = vld [vmem:[%s11574_s26 + $0x208] sm:$0xff] }
 0x21d   : > { %4161 = vmatpush1.bf16.msra.mxu0 %v9829_v58  ;;  %4333 = vmatpush1.bf16.msra.mxu1 %v9831_v59  ;;  %v4405_v58 = vld [vmem:[%s11574_s26 + $0xe0] sm:$0xff]  ;;  %v4402_v59 = vld [vmem:[%s11574_s26 + $0xc8] sm:$0xff] }
 0x21e   : > { %4162 = vmatprep.subr.bf16.mxu0 %v9838_v42  ;;  %4334 = vmatprep.subr.bf16.mxu1 %v9840_v44  ;;  %v9881_v42 = vcombine.low %v4393_v48, %v4397_v49  ;;  %v9883_v44 = vcombine.low %v4394_v32, %v4398_v51  ;;  %v9890_v61 = vcombine.high %v4401_v57, %v4405_v58  ;;  %v4449_v32 = vld [vmem:[%s11574_s26 + $0x240] sm:$0xff] }
 0x21f   : > { %v4453_v51 = vld [vmem:[%s11574_s26 + $0x260] sm:$0xff] }
 0x221   : > { %4163 = vmatpush1.bf16.msra.mxu0 %v9837_v1  ;;  %4335 = vmatpush1.bf16.msra.mxu1 %v9839_v60  ;;  %v4410_v1 = vld [vmem:[%s11574_s26 + $0x108] sm:$0xff] }
 0x222   : > { %4164 = vmatprep.subr.bf16.mxu0 %v9846_v3  ;;  %4336 = vmatprep.subr.bf16.mxu1 %v9848_v4  ;;  %v4414_v60 = vld [vmem:[%s11574_s26 + $0x128] sm:$0xff]  ;;  %v9889_v3 = vcombine.low %v4401_v57, %v4405_v58  ;;  %v9938_v57 = vcombine.high %v4449_v32, %v4453_v51 }
 0x223   : > { %v9900_v5 = vcombine.high %v4410_v1, %v4414_v60 }
 0x225   : > { %4165 = vmatpush1.bf16.msra.mxu0 %v9845_v9  ;;  %4337 = vmatpush1.bf16.msra.mxu1 %v9847_v10  ;;  %v4418_v9 = vld [vmem:[%s11574_s26 + $0x148] sm:$0xff] }
 0x226   : > { %4166 = vmatprep.subr.bf16.mxu0 %v9854_v11  ;;  %4338 = vmatprep.subr.bf16.mxu1 %v9856_v12  ;;  %v4422_v10 = vld [vmem:[%s11574_s26 + $0x168] sm:$0xff]  ;;  %v9897_v11 = vcombine.low %v4409_v63, %v4413_v0  ;;  %v9899_v12 = vcombine.low %v4410_v1, %v4414_v60  ;;  %v4465_v1 = vld [vmem:[%s11574_s26 + $0x2c0] sm:$0xff] }
 0x227   : > { %v9908_v14 = vcombine.high %v4418_v9, %v4422_v10  ;;  %v4469_v60 = vld [vmem:[%s11574_s26 + $0x2e0] sm:$0xff] }
 0x229   : > { %4167 = vmatpush1.bf16.msra.mxu0 %v9853_v25  ;;  %4339 = vmatpush1.bf16.msra.mxu1 %v9855_v27  ;;  %v4426_v25 = vld [vmem:[%s11574_s26 + $0x188] sm:$0xff] }
 0x22a   : > { %4168 = vmatprep.subr.bf16.mxu0 %v9862_v28  ;;  %4340 = vmatprep.subr.bf16.mxu1 %v9864_v30  ;;  %v4430_v27 = vld [vmem:[%s11574_s26 + $0x1a8] sm:$0xff]  ;;  %v9905_v28 = vcombine.low %v4417_v7, %v4421_v8  ;;  %v9907_v30 = vcombine.low %v4418_v9, %v4422_v10  ;;  %v9954_v7 = vcombine.high %v4465_v1, %v4469_v60  ;;  %v4473_v9 = vld [vmem:[%s11574_s26 + $0x300] sm:$0xff] }
 0x22b   : > { %v9916_v33 = vcombine.high %v4426_v25, %v4430_v27  ;;  %v4477_v10 = vld [vmem:[%s11574_s26 + $0x320] sm:$0xff] }
 0x22d   : > { %4169 = vmatpush1.bf16.msra.mxu0 %v9861_v36  ;;  %4341 = vmatpush1.bf16.msra.mxu1 %v9863_v37  ;;  %v4434_v36 = vld [vmem:[%s11574_s26 + $0x1c8] sm:$0xff] }
 0x22e   : > { %7491 = vmatprep.subr.bf16.mxu0 %v9866_v38  ;;  %7663 = vmatprep.subr.bf16.mxu1 %v9868_v39  ;;  %v4438_v37 = vld [vmem:[%s11574_s26 + $0x1e8] sm:$0xff]  ;;  %v9913_v38 = vcombine.low %v4425_v19, %v4429_v20  ;;  %v9915_v39 = vcombine.low %v4426_v25, %v4430_v27  ;;  %v9962_v19 = vcombine.high %v4473_v9, %v4477_v10  ;;  %v4481_v25 = vld [vmem:[%s11574_s26 + $0x340] sm:$0xff] }
 0x22f   : > { %v9924_v41 = vcombine.high %v4434_v36, %v4438_v37  ;;  %v9923_v48 = vcombine.low %v4434_v36, %v4438_v37  ;;  %v4485_v27 = vld [vmem:[%s11574_s26 + $0x360] sm:$0xff] }
 0x230   : > { %4171 = vmatmul.mubr.bf16.vlgmr.msra.gmra.mrb[4].mxu0 %v11271_v15  ;;  %4343 = vmatmul.mubr.bf16.vlgmr.msra.gmra.mrb[4].mxu1 %v11271_v15  ;;  %v4406_v15 = vld [vmem:[%s11574_s26 + $0xe8] sm:$0xff]  ;;  %v4489_v36 = vld [vmem:[%s11574_s26 + $0x380] sm:$0xff] }
 0x231   : > { %7492 = vmatpush1.bf16.msra.mxu0 %v9865_v43  ;;  %7523 = vmatprep.mubr.bf16.mxu0 %v11539_v22  ;;  %v9892_v62 = vcombine.high %v4402_v59, %v4406_v15  ;;  %v9891_v4 = vcombine.low %v4402_v59, %v4406_v15  ;;  %v4441_v43 = vld [vmem:[%s11574_s26 + $0x200] sm:$0xff] }
 0x232   : > { %7664 = vmatpush1.bf16.msra.mxu1 %v9867_v18  ;;  %7695 = vmatprep.mubr.bf16.mxu1 %v11539_v22  ;;  %v4446_v18 = vld [vmem:[%s11574_s26 + $0x228] sm:$0xff]  ;;  %v9930_v49 = vcombine.high %v4441_v43, %v4445_v45  ;;  %v4457_v59 = vld [vmem:[%s11574_s26 + $0x280] sm:$0xff] }
 0x233   : > { %7493 = vmatprep.subr.bf16.mxu0 %v9874_v47  ;;  %7665 = vmatprep.subr.bf16.mxu1 %v9876_v50  ;;  %v9921_v47 = vcombine.low %v4433_v34, %v4437_v35  ;;  %v9932_v50 = vcombine.high %v4442_v46, %v4446_v18  ;;  %v4461_v15 = vld [vmem:[%s11574_s26 + $0x2a0] sm:$0xff]  ;;  %v9970_v34 = vcombine.high %v4481_v25, %v4485_v27 }
 0x234   : > { %v9946_v63 = vcombine.high %v4457_v59, %v4461_v15  ;;  %v4493_v37 = vld [vmem:[%s11574_s26 + $0x3a0] sm:$0xff] }
 0x235   : > { %7494 = vmatpush1.bf16.msra.mxu0 %v9873_v52  ;;  %v4450_v52 = vld [vmem:[%s11574_s26 + $0x248] sm:$0xff] }
 0x236   : > { %7666 = vmatpush1.bf16.msra.mxu1 %v9875_v53  ;;  %7495 = vmatprep.subr.bf16.mxu0 %v9882_v55  ;;  %v4454_v53 = vld [vmem:[%s11574_s26 + $0x268] sm:$0xff]  ;;  %v9929_v55 = vcombine.low %v4441_v43, %v4445_v45  ;;  %v9978_v43 = vcombine.high %v4489_v36, %v4493_v37 }
 0x237   : > { %7667 = vmatprep.subr.bf16.mxu1 %v9884_v56  ;;  %v9931_v56 = vcombine.low %v4442_v46, %v4446_v18  ;;  %v9940_v58 = vcombine.high %v4450_v52, %v4454_v53  ;;  %v4497_v46 = vld [vmem:[%s11574_s26 + $0x3c0] sm:$0xff] }
 0x238   : > { %v4501_v18 = vld [vmem:[%s11574_s26 + $0x3e0] sm:$0xff] }
 0x239   : > { %7496 = vmatpush1.bf16.msra.mxu0 %v9881_v42  ;;  %v4458_v42 = vld [vmem:[%s11574_s26 + $0x288] sm:$0xff] }
 0x23a   : > { %7668 = vmatpush1.bf16.msra.mxu1 %v9883_v44  ;;  %7497 = vmatprep.subr.bf16.mxu0 %v9890_v61  ;;  %v4462_v44 = vld [vmem:[%s11574_s26 + $0x2a8] sm:$0xff]  ;;  %v9937_v61 = vcombine.low %v4449_v32, %v4453_v51  ;;  %v9986_v32 = vcombine.high %v4497_v46, %v4501_v18 }
 0x23b   : > { %7669 = vmatprep.subr.bf16.mxu1 %v9892_v62  ;;  %v9939_v62 = vcombine.low %v4450_v52, %v4454_v53  ;;  %v9948_v0 = vcombine.high %v4458_v42, %v4462_v44  ;;  %v4505_v52 = vld [vmem:[%s11574_s26 + $0x400] sm:$0xff] }
 0x23c   : > { %v4509_v53 = vld [vmem:[%s11574_s26 + $0x420] sm:$0xff] }
 0x23d   : > { %7498 = vmatpush1.bf16.msra.mxu0 %v9889_v3  ;;  %v4466_v3 = vld [vmem:[%s11574_s26 + $0x2c8] sm:$0xff] }
 0x23e   : > { %7670 = vmatpush1.bf16.msra.mxu1 %v9891_v4  ;;  %7499 = vmatprep.subr.bf16.mxu0 %v9898_v54  ;;  %v4470_v4 = vld [vmem:[%s11574_s26 + $0x2e8] sm:$0xff]  ;;  %v9945_v54 = vcombine.low %v4457_v59, %v4461_v15  ;;  %v9994_v59 = vcombine.high %v4505_v52, %v4509_v53 }
 0x23f   : > { %7671 = vmatprep.subr.bf16.mxu1 %v9900_v5  ;;  %v9947_v5 = vcombine.low %v4458_v42, %v4462_v44  ;;  %v9956_v8 = vcombine.high %v4466_v3, %v4470_v4  ;;  %v4513_v42 = vld [vmem:[%s11574_s26 + $0x440] sm:$0xff] }
 0x240   : > { %v4517_v44 = vld [vmem:[%s11574_s26 + $0x460] sm:$0xff] }
 0x241   : > { %7500 = vmatpush1.bf16.msra.mxu0 %v9897_v11  ;;  %v4474_v11 = vld [vmem:[%s11574_s26 + $0x308] sm:$0xff] }
 0x242   : > { %7672 = vmatpush1.bf16.msra.mxu1 %v9899_v12  ;;  %7501 = vmatprep.subr.bf16.mxu0 %v9906_v13  ;;  %v4478_v12 = vld [vmem:[%s11574_s26 + $0x328] sm:$0xff]  ;;  %v9953_v13 = vcombine.low %v4465_v1, %v4469_v60  ;;  %v10002_v1 = vcombine.high %v4513_v42, %v4517_v44  ;;  %v4521_v60 = vld [vmem:[%s11574_s26 + $0x480] sm:$0xff] }
 0x243   : > { %7673 = vmatprep.subr.bf16.mxu1 %v9908_v14  ;;  %v9955_v14 = vcombine.low %v4466_v3, %v4470_v4  ;;  %v9964_v20 = vcombine.high %v4474_v11, %v4478_v12  ;;  %v4525_v3 = vld [vmem:[%s11574_s26 + $0x4a0] sm:$0xff] }
 0x245   : > { %7502 = vmatpush1.bf16.msra.mxu0 %v9905_v28  ;;  %v4482_v28 = vld [vmem:[%s11574_s26 + $0x348] sm:$0xff] }
 0x246   : > { %7674 = vmatpush1.bf16.msra.mxu1 %v9907_v30  ;;  %7503 = vmatprep.subr.bf16.mxu0 %v9914_v31  ;;  %v4486_v30 = vld [vmem:[%s11574_s26 + $0x368] sm:$0xff]  ;;  %v9961_v31 = vcombine.low %v4473_v9, %v4477_v10  ;;  %v10010_v9 = vcombine.high %v4521_v60, %v4525_v3 }
 0x247   : > { %7675 = vmatprep.subr.bf16.mxu1 %v9916_v33  ;;  %v9963_v33 = vcombine.low %v4474_v11, %v4478_v12  ;;  %v9972_v35 = vcombine.high %v4482_v28, %v4486_v30  ;;  %v4529_v11 = vld [vmem:[%s11574_s26 + $0x4c0] sm:$0xff] }
 0x248   : > { %v4533_v12 = vld [vmem:[%s11574_s26 + $0x4e0] sm:$0xff] }
 0x249   : > { %7504 = vmatpush1.bf16.msra.mxu0 %v9913_v38  ;;  %v4490_v38 = vld [vmem:[%s11574_s26 + $0x388] sm:$0xff] }
 0x24a   : > { %7676 = vmatpush1.bf16.msra.mxu1 %v9915_v39  ;;  %7505 = vmatprep.subr.bf16.mxu0 %v9922_v40  ;;  %v4494_v39 = vld [vmem:[%s11574_s26 + $0x3a8] sm:$0xff]  ;;  %v9969_v40 = vcombine.low %v4481_v25, %v4485_v27  ;;  %v10018_v25 = vcombine.high %v4529_v11, %v4533_v12 }
 0x24b   : > { %7677 = vmatprep.subr.bf16.mxu1 %v9924_v41  ;;  %v9971_v41 = vcombine.low %v4482_v28, %v4486_v30  ;;  %v9980_v45 = vcombine.high %v4490_v38, %v4494_v39  ;;  %v4537_v28 = vld [vmem:[%s11574_s26 + $0x500] sm:$0xff] }
 0x24c   : > { %v4541_v30 = vld [vmem:[%s11574_s26 + $0x520] sm:$0xff] }
 0x24d   : > { %7506 = vmatpush1.bf16.msra.mxu0 %v9921_v47  ;;  %v4498_v47 = vld [vmem:[%s11574_s26 + $0x3c8] sm:$0xff] }
 0x24e   : > { %7678 = vmatpush1.bf16.msra.mxu1 %v9923_v48  ;;  %7507 = vmatprep.subr.bf16.mxu0 %v9930_v49  ;;  %v4502_v48 = vld [vmem:[%s11574_s26 + $0x3e8] sm:$0xff]  ;;  %v9977_v49 = vcombine.low %v4489_v36, %v4493_v37  ;;  %v10026_v36 = vcombine.high %v4537_v28, %v4541_v30 }
 0x24f   : > { %7679 = vmatprep.subr.bf16.mxu1 %v9932_v50  ;;  %v9979_v50 = vcombine.low %v4490_v38, %v4494_v39  ;;  %v9988_v51 = vcombine.high %v4498_v47, %v4502_v48  ;;  %v4545_v38 = vld [vmem:[%s11574_s26 + $0x540] sm:$0xff] }
 0x250   : > { %v4549_v39 = vld [vmem:[%s11574_s26 + $0x560] sm:$0xff] }
 0x251   : > { %7508 = vmatpush1.bf16.msra.mxu0 %v9929_v55  ;;  %v4506_v55 = vld [vmem:[%s11574_s26 + $0x408] sm:$0xff] }
 0x252   : > { %7680 = vmatpush1.bf16.msra.mxu1 %v9931_v56  ;;  %7509 = vmatprep.subr.bf16.mxu0 %v9938_v57  ;;  %v4510_v56 = vld [vmem:[%s11574_s26 + $0x428] sm:$0xff]  ;;  %v9985_v57 = vcombine.low %v4497_v46, %v4501_v18  ;;  %v10034_v46 = vcombine.high %v4545_v38, %v4549_v39 }
 0x253   : > { %7681 = vmatprep.subr.bf16.mxu1 %v9940_v58  ;;  %v9987_v58 = vcombine.low %v4498_v47, %v4502_v48  ;;  %v9996_v15 = vcombine.high %v4506_v55, %v4510_v56  ;;  %v4553_v47 = vld [vmem:[%s11574_s26 + $0x580] sm:$0xff] }
 0x254   : > { %v4557_v48 = vld [vmem:[%s11574_s26 + $0x5a0] sm:$0xff] }
 0x255   : > { %7510 = vmatpush1.bf16.msra.mxu0 %v9937_v61  ;;  %v9993_v61 = vcombine.low %v4505_v52, %v4509_v53  ;;  %v10042_v52 = vcombine.high %v4553_v47, %v4557_v48 }
 0x256   : > { %7682 = vmatpush1.bf16.msra.mxu1 %v9939_v62  ;;  %7511 = vmatprep.subr.bf16.mxu0 %v9946_v63  ;;  %v4514_v62 = vld [vmem:[%s11574_s26 + $0x448] sm:$0xff] }
 0x257   : > { %7683 = vmatprep.subr.bf16.mxu1 %v9948_v0  ;;  %v4518_v63 = vld [vmem:[%s11574_s26 + $0x468] sm:$0xff]  ;;  %v9995_v0 = vcombine.low %v4506_v55, %v4510_v56  ;;  %v4561_v55 = vld [vmem:[%s11574_s26 + $0x5c0] sm:$0xff] }
 0x258   : > { %v10004_v4 = vcombine.high %v4514_v62, %v4518_v63  ;;  %v4565_v56 = vld [vmem:[%s11574_s26 + $0x5e0] sm:$0xff] }
 0x259   : > { %7512 = vmatpush1.bf16.msra.mxu0 %v9945_v54  ;;  %v4522_v54 = vld [vmem:[%s11574_s26 + $0x488] sm:$0xff] }
 0x25a   : > { %7684 = vmatpush1.bf16.msra.mxu1 %v9947_v5  ;;  %7513 = vmatprep.subr.bf16.mxu0 %v9954_v7  ;;  %v4526_v5 = vld [vmem:[%s11574_s26 + $0x4a8] sm:$0xff]  ;;  %v10001_v7 = vcombine.low %v4513_v42, %v4517_v44  ;;  %v10050_v42 = vcombine.high %v4561_v55, %v4565_v56 }
 0x25b   : > { %7685 = vmatprep.subr.bf16.mxu1 %v9956_v8  ;;  %v10003_v8 = vcombine.low %v4514_v62, %v4518_v63  ;;  %v10012_v10 = vcombine.high %v4522_v54, %v4526_v5  ;;  %v4573_v62 = vld [vmem:[%s11574_s26 + $0x620] sm:$0xff]  ;;  %v4570_v63 = vld [vmem:[%s11574_s26 + $0x608] sm:$0xff] }
 0x25d   : > { %7514 = vmatpush1.bf16.msra.mxu0 %v9953_v13  ;;  %v4530_v13 = vld [vmem:[%s11574_s26 + $0x4c8] sm:$0xff] }
 0x25e   : > { %7686 = vmatpush1.bf16.msra.mxu1 %v9955_v14  ;;  %7515 = vmatprep.subr.bf16.mxu0 %v9962_v19  ;;  %v4534_v14 = vld [vmem:[%s11574_s26 + $0x4e8] sm:$0xff]  ;;  %v10009_v19 = vcombine.low %v4521_v60, %v4525_v3 }
 0x25f   : > { %7687 = vmatprep.subr.bf16.mxu1 %v9964_v20  ;;  %v10011_v20 = vcombine.low %v4522_v54, %v4526_v5  ;;  %v10020_v27 = vcombine.high %v4530_v13, %v4534_v14  ;;  %v4577_v54 = vld [vmem:[%s11574_s26 + $0x640] sm:$0xff] }
 0x260   : > { %v4581_v5 = vld [vmem:[%s11574_s26 + $0x660] sm:$0xff] }
 0x261   : > { %7516 = vmatpush1.bf16.msra.mxu0 %v9961_v31  ;;  %v4538_v31 = vld [vmem:[%s11574_s26 + $0x508] sm:$0xff] }
 0x262   : > { %7688 = vmatpush1.bf16.msra.mxu1 %v9963_v33  ;;  %7517 = vmatprep.subr.bf16.mxu0 %v9970_v34  ;;  %v4542_v33 = vld [vmem:[%s11574_s26 + $0x528] sm:$0xff]  ;;  %v10017_v34 = vcombine.low %v4529_v11, %v4533_v12  ;;  %v10066_v11 = vcombine.high %v4577_v54, %v4581_v5 }
 0x263   : > { %7689 = vmatprep.subr.bf16.mxu1 %v9972_v35  ;;  %v10019_v35 = vcombine.low %v4530_v13, %v4534_v14  ;;  %v10028_v37 = vcombine.high %v4538_v31, %v4542_v33  ;;  %v4585_v13 = vld [vmem:[%s11574_s26 + $0x680] sm:$0xff] }
 0x264   : > { %v4589_v14 = vld [vmem:[%s11574_s26 + $0x6a0] sm:$0xff] }
 0x265   : > { %7518 = vmatpush1.bf16.msra.mxu0 %v9969_v40  ;;  %v4546_v40 = vld [vmem:[%s11574_s26 + $0x548] sm:$0xff] }
 0x266   : > { %7690 = vmatpush1.bf16.msra.mxu1 %v9971_v41  ;;  %7519 = vmatprep.subr.bf16.mxu0 %v9978_v43  ;;  %v4550_v41 = vld [vmem:[%s11574_s26 + $0x568] sm:$0xff]  ;;  %v10025_v43 = vcombine.low %v4537_v28, %v4541_v30  ;;  %v10074_v28 = vcombine.high %v4585_v13, %v4589_v14 }
 0x267   : > { %7691 = vmatprep.subr.bf16.mxu1 %v9980_v45  ;;  %v10027_v45 = vcombine.low %v4538_v31, %v4542_v33  ;;  %v10036_v18 = vcombine.high %v4546_v40, %v4550_v41  ;;  %v4593_v31 = vld [vmem:[%s11574_s26 + $0x6c0] sm:$0xff] }
 0x268   : > { %v4597_v33 = vld [vmem:[%s11574_s26 + $0x6e0] sm:$0xff] }
 0x269   : > { %7520 = vmatpush1.bf16.msra.mxu0 %v9977_v49  ;;  %v4554_v49 = vld [vmem:[%s11574_s26 + $0x588] sm:$0xff] }
 0x26a   : > { %7692 = vmatpush1.bf16.msra.mxu1 %v9979_v50  ;;  %7521 = vmatprep.subr.bf16.mxu0 %v9986_v32  ;;  %v4558_v50 = vld [vmem:[%s11574_s26 + $0x5a8] sm:$0xff]  ;;  %v10033_v32 = vcombine.low %v4545_v38, %v4549_v39  ;;  %v10082_v38 = vcombine.high %v4593_v31, %v4597_v33 }
 0x26b   : > { %7693 = vmatprep.subr.bf16.mxu1 %v9988_v51  ;;  %v10035_v51 = vcombine.low %v4546_v40, %v4550_v41  ;;  %v10044_v53 = vcombine.high %v4554_v49, %v4558_v50  ;;  %v4601_v40 = vld [vmem:[%s11574_s26 + $0x700] sm:$0xff] }
 0x26c   : > { %v4605_v41 = vld [vmem:[%s11574_s26 + $0x720] sm:$0xff] }
 0x26d   : > { %7522 = vmatpush1.bf16.msra.mxu0 %v9985_v57  ;;  %v4562_v57 = vld [vmem:[%s11574_s26 + $0x5c8] sm:$0xff] }
 0x26e   : > { %7694 = vmatpush1.bf16.msra.mxu1 %v9987_v58  ;;  %7534 = vmatprep.subr.bf16.mxu0 %v9994_v59  ;;  %v4566_v58 = vld [vmem:[%s11574_s26 + $0x5e8] sm:$0xff]  ;;  %v10041_v59 = vcombine.low %v4553_v47, %v4557_v48  ;;  %v10090_v47 = vcombine.high %v4601_v40, %v4605_v41 }
 0x26f   : > { %7706 = vmatprep.subr.bf16.mxu1 %v9996_v15  ;;  %v10043_v15 = vcombine.low %v4554_v49, %v4558_v50  ;;  %v10052_v44 = vcombine.high %v4562_v57, %v4566_v58  ;;  %v10051_v60 = vcombine.low %v4562_v57, %v4566_v58  ;;  %v4609_v49 = vld [vmem:[%s11574_s26 + $0x740] sm:$0xff] }
 0x270   : > { %7524 = vmatmul.mubr.bf16.vlgmr.msra.gmra.mrb[8].mxu0 %v11535_v16  ;;  %v4613_v50 = vld [vmem:[%s11574_s26 + $0x760] sm:$0xff] }
 0x271   : > { %7696 = vmatmul.mubr.bf16.vlgmr.msra.gmra.mrb[8].mxu1 %v11535_v16  ;;  %7535 = vmatpush1.bf16.msra.mxu0 %v9993_v61  ;;  %v4569_v61 = vld [vmem:[%s11574_s26 + $0x600] sm:$0xff] }
 0x272   : > { %7566 = vmatprep.mubr.bf16.mxu0 %v11543_v29  ;;  %7707 = vmatpush1.bf16.msra.mxu1 %v9995_v0  ;;  %v4574_v0 = vld [vmem:[%s11574_s26 + $0x628] sm:$0xff]  ;;  %v10058_v3 = vcombine.high %v4569_v61, %v4573_v62  ;;  %v4617_v57 = vld [vmem:[%s11574_s26 + $0x780] sm:$0xff] }
 0x273   : > { %7738 = vmatprep.mubr.bf16.mxu1 %v11543_v29  ;;  %7536 = vmatprep.subr.bf16.mxu0 %v10002_v1  ;;  %v10049_v1 = vcombine.low %v4561_v55, %v4565_v56  ;;  %v10098_v55 = vcombine.high %v4609_v49, %v4613_v50  ;;  %v4621_v58 = vld [vmem:[%s11574_s26 + $0x7a0] sm:$0xff] }
 0x274   : > { %7708 = vmatprep.subr.bf16.mxu1 %v10004_v4  ;;  %v10060_v4 = vcombine.high %v4570_v63, %v4574_v0 }
 0x275   : > { %7537 = vmatpush1.bf16.msra.mxu0 %v10001_v7  ;;  %v4578_v7 = vld [vmem:[%s11574_s26 + $0x648] sm:$0xff] }
 0x276   : > { %7709 = vmatpush1.bf16.msra.mxu1 %v10003_v8  ;;  %7538 = vmatprep.subr.bf16.mxu0 %v10010_v9  ;;  %v4582_v8 = vld [vmem:[%s11574_s26 + $0x668] sm:$0xff]  ;;  %v10057_v9 = vcombine.low %v4569_v61, %v4573_v62  ;;  %v10106_v61 = vcombine.high %v4617_v57, %v4621_v58 }
 0x277   : > { %7710 = vmatprep.subr.bf16.mxu1 %v10012_v10  ;;  %v10059_v10 = vcombine.low %v4570_v63, %v4574_v0  ;;  %v10068_v12 = vcombine.high %v4578_v7, %v4582_v8  ;;  %v4625_v63 = vld [vmem:[%s11574_s26 + $0x7c0] sm:$0xff] }
 0x278   : > { %v4629_v0 = vld [vmem:[%s11574_s26 + $0x7e0] sm:$0xff] }
 0x279   : > { %7539 = vmatpush1.bf16.msra.mxu0 %v10009_v19  ;;  %v4586_v19 = vld [vmem:[%s11574_s26 + $0x688] sm:$0xff] }
 0x27a   : > { %7711 = vmatpush1.bf16.msra.mxu1 %v10011_v20  ;;  %7540 = vmatprep.subr.bf16.mxu0 %v10018_v25  ;;  %v4590_v20 = vld [vmem:[%s11574_s26 + $0x6a8] sm:$0xff]  ;;  %v10065_v25 = vcombine.low %v4577_v54, %v4581_v5  ;;  %v10114_v54 = vcombine.high %v4625_v63, %v4629_v0 }
 0x27b   : > { %7712 = vmatprep.subr.bf16.mxu1 %v10020_v27  ;;  %v10067_v27 = vcombine.low %v4578_v7, %v4582_v8  ;;  %v10076_v30 = vcombine.high %v4586_v19, %v4590_v20  ;;  %v4633_v7 = vld [vmem:[%s11574_s26 + $0x800] sm:$0xff] }
 0x27c   : > { %v4637_v8 = vld [vmem:[%s11574_s26 + $0x820] sm:$0xff] }
 0x27d   : > { %7541 = vmatpush1.bf16.msra.mxu0 %v10017_v34  ;;  %v4594_v34 = vld [vmem:[%s11574_s26 + $0x6c8] sm:$0xff] }
 0x27e   : > { %7713 = vmatpush1.bf16.msra.mxu1 %v10019_v35  ;;  %7542 = vmatprep.subr.bf16.mxu0 %v10026_v36  ;;  %v4598_v35 = vld [vmem:[%s11574_s26 + $0x6e8] sm:$0xff]  ;;  %v10073_v36 = vcombine.low %v4585_v13, %v4589_v14  ;;  %v10122_v13 = vcombine.high %v4633_v7, %v4637_v8 }
 0x27f   : > { %7714 = vmatprep.subr.bf16.mxu1 %v10028_v37  ;;  %v10075_v37 = vcombine.low %v4586_v19, %v4590_v20  ;;  %v10084_v39 = vcombine.high %v4594_v34, %v4598_v35  ;;  %v4641_v19 = vld [vmem:[%s11574_s26 + $0x840] sm:$0xff] }
 0x280   : > { %v4645_v20 = vld [vmem:[%s11574_s26 + $0x860] sm:$0xff] }
 0x281   : > { %7543 = vmatpush1.bf16.msra.mxu0 %v10025_v43  ;;  %v4602_v43 = vld [vmem:[%s11574_s26 + $0x708] sm:$0xff] }
 0x282   : > { %7715 = vmatpush1.bf16.msra.mxu1 %v10027_v45  ;;  %7544 = vmatprep.subr.bf16.mxu0 %v10034_v46  ;;  %v4606_v45 = vld [vmem:[%s11574_s26 + $0x728] sm:$0xff]  ;;  %v10081_v46 = vcombine.low %v4593_v31, %v4597_v33  ;;  %v10130_v31 = vcombine.high %v4641_v19, %v4645_v20 }
 0x283   : > { %7716 = vmatprep.subr.bf16.mxu1 %v10036_v18  ;;  %v10083_v18 = vcombine.low %v4594_v34, %v4598_v35  ;;  %v10092_v48 = vcombine.high %v4602_v43, %v4606_v45  ;;  %v4649_v34 = vld [vmem:[%s11574_s26 + $0x880] sm:$0xff] }
 0x284   : > { %v4653_v35 = vld [vmem:[%s11574_s26 + $0x8a0] sm:$0xff] }
 0x285   : > { %7545 = vmatpush1.bf16.msra.mxu0 %v10033_v32  ;;  %v4610_v32 = vld [vmem:[%s11574_s26 + $0x748] sm:$0xff] }
 0x286   : > { %7717 = vmatpush1.bf16.msra.mxu1 %v10035_v51  ;;  %7546 = vmatprep.subr.bf16.mxu0 %v10042_v52  ;;  %v4614_v51 = vld [vmem:[%s11574_s26 + $0x768] sm:$0xff]  ;;  %v10089_v52 = vcombine.low %v4601_v40, %v4605_v41  ;;  %v10138_v40 = vcombine.high %v4649_v34, %v4653_v35 }
 0x287   : > { %7718 = vmatprep.subr.bf16.mxu1 %v10044_v53  ;;  %v10091_v53 = vcombine.low %v4602_v43, %v4606_v45  ;;  %v10100_v56 = vcombine.high %v4610_v32, %v4614_v51  ;;  %v4657_v43 = vld [vmem:[%s11574_s26 + $0x8c0] sm:$0xff] }
 0x288   : > { %v4661_v45 = vld [vmem:[%s11574_s26 + $0x8e0] sm:$0xff] }
 0x289   : > { %7547 = vmatpush1.bf16.msra.mxu0 %v10041_v59  ;;  %v4618_v59 = vld [vmem:[%s11574_s26 + $0x788] sm:$0xff] }
 0x28a   : > { %7719 = vmatpush1.bf16.msra.mxu1 %v10043_v15  ;;  %7548 = vmatprep.subr.bf16.mxu0 %v10050_v42  ;;  %v4622_v15 = vld [vmem:[%s11574_s26 + $0x7a8] sm:$0xff]  ;;  %v10097_v42 = vcombine.low %v4609_v49, %v4613_v50  ;;  %v10146_v49 = vcombine.high %v4657_v43, %v4661_v45 }
 0x28b   : > { %7720 = vmatprep.subr.bf16.mxu1 %v10052_v44  ;;  %v10099_v44 = vcombine.low %v4610_v32, %v4614_v51  ;;  %v10108_v62 = vcombine.high %v4618_v59, %v4622_v15  ;;  %v4665_v32 = vld [vmem:[%s11574_s26 + $0x900] sm:$0xff] }
 0x28c   : > { %v4669_v51 = vld [vmem:[%s11574_s26 + $0x920] sm:$0xff] }
 0x28d   : > { %7549 = vmatpush1.bf16.msra.mxu0 %v10049_v1  ;;  %v4626_v1 = vld [vmem:[%s11574_s26 + $0x7c8] sm:$0xff] }
 0x28e   : > { %7721 = vmatpush1.bf16.msra.mxu1 %v10051_v60  ;;  %7550 = vmatprep.subr.bf16.mxu0 %v10058_v3  ;;  %v4630_v60 = vld [vmem:[%s11574_s26 + $0x7e8] sm:$0xff]  ;;  %v10105_v3 = vcombine.low %v4617_v57, %v4621_v58  ;;  %v10154_v57 = vcombine.high %v4665_v32, %v4669_v51 }
 0x28f   : > { %7722 = vmatprep.subr.bf16.mxu1 %v10060_v4  ;;  %v10107_v4 = vcombine.low %v4618_v59, %v4622_v15  ;;  %v10116_v5 = vcombine.high %v4626_v1, %v4630_v60  ;;  %v4673_v59 = vld [vmem:[%s11574_s26 + $0x940] sm:$0xff] }
 0x290   : > { %v4677_v15 = vld [vmem:[%s11574_s26 + $0x960] sm:$0xff] }
 0x291   : > { %7551 = vmatpush1.bf16.msra.mxu0 %v10057_v9  ;;  %v4634_v9 = vld [vmem:[%s11574_s26 + $0x808] sm:$0xff] }
 0x292   : > { %7723 = vmatpush1.bf16.msra.mxu1 %v10059_v10  ;;  %7552 = vmatprep.subr.bf16.mxu0 %v10066_v11  ;;  %v4638_v10 = vld [vmem:[%s11574_s26 + $0x828] sm:$0xff]  ;;  %v10113_v11 = vcombine.low %v4625_v63, %v4629_v0  ;;  %v10162_v63 = vcombine.high %v4673_v59, %v4677_v15 }
 0x293   : > { %7724 = vmatprep.subr.bf16.mxu1 %v10068_v12  ;;  %v10115_v12 = vcombine.low %v4626_v1, %v4630_v60  ;;  %v10124_v14 = vcombine.high %v4634_v9, %v4638_v10  ;;  %v4681_v1 = vld [vmem:[%s11574_s26 + $0x980] sm:$0xff] }
 0x294   : > { %v4685_v60 = vld [vmem:[%s11574_s26 + $0x9a0] sm:$0xff] }
 0x295   : > { %7553 = vmatpush1.bf16.msra.mxu0 %v10065_v25  ;;  %v4642_v25 = vld [vmem:[%s11574_s26 + $0x848] sm:$0xff] }
 0x296   : > { %7725 = vmatpush1.bf16.msra.mxu1 %v10067_v27  ;;  %7554 = vmatprep.subr.bf16.mxu0 %v10074_v28  ;;  %v4646_v27 = vld [vmem:[%s11574_s26 + $0x868] sm:$0xff]  ;;  %v10121_v28 = vcombine.low %v4633_v7, %v4637_v8  ;;  %v10170_v7 = vcombine.high %v4681_v1, %v4685_v60 }
 0x297   : > { %7726 = vmatprep.subr.bf16.mxu1 %v10076_v30  ;;  %v10123_v30 = vcombine.low %v4634_v9, %v4638_v10  ;;  %v10132_v33 = vcombine.high %v4642_v25, %v4646_v27  ;;  %v4689_v9 = vld [vmem:[%s11574_s26 + $0x9c0] sm:$0xff] }
 0x298   : > { %v4693_v10 = vld [vmem:[%s11574_s26 + $0x9e0] sm:$0xff] }
 0x299   : > { %7555 = vmatpush1.bf16.msra.mxu0 %v10073_v36  ;;  %v4650_v36 = vld [vmem:[%s11574_s26 + $0x888] sm:$0xff] }
 0x29a   : > { %7727 = vmatpush1.bf16.msra.mxu1 %v10075_v37  ;;  %7556 = vmatprep.subr.bf16.mxu0 %v10082_v38  ;;  %v4654_v37 = vld [vmem:[%s11574_s26 + $0x8a8] sm:$0xff]  ;;  %v10129_v38 = vcombine.low %v4641_v19, %v4645_v20  ;;  %v10178_v19 = vcombine.high %v4689_v9, %v4693_v10 }
 0x29b   : > { %7728 = vmatprep.subr.bf16.mxu1 %v10084_v39  ;;  %v10131_v39 = vcombine.low %v4642_v25, %v4646_v27  ;;  %v10140_v41 = vcombine.high %v4650_v36, %v4654_v37  ;;  %v4697_v25 = vld [vmem:[%s11574_s26 + $0xa00] sm:$0xff] }
 0x29c   : > { %v4701_v27 = vld [vmem:[%s11574_s26 + $0xa20] sm:$0xff] }
 0x29d   : > { %7557 = vmatpush1.bf16.msra.mxu0 %v10081_v46  ;;  %v4658_v46 = vld [vmem:[%s11574_s26 + $0x8c8] sm:$0xff] }
 0x29e   : > { %7729 = vmatpush1.bf16.msra.mxu1 %v10083_v18  ;;  %7558 = vmatprep.subr.bf16.mxu0 %v10090_v47  ;;  %v4662_v18 = vld [vmem:[%s11574_s26 + $0x8e8] sm:$0xff]  ;;  %v10137_v47 = vcombine.low %v4649_v34, %v4653_v35  ;;  %v10186_v34 = vcombine.high %v4697_v25, %v4701_v27 }
 0x29f   : > { %7730 = vmatprep.subr.bf16.mxu1 %v10092_v48  ;;  %v10139_v48 = vcombine.low %v4650_v36, %v4654_v37  ;;  %v10148_v50 = vcombine.high %v4658_v46, %v4662_v18  ;;  %v4705_v36 = vld [vmem:[%s11574_s26 + $0xa40] sm:$0xff] }
 0x2a0   : > { %v4709_v37 = vld [vmem:[%s11574_s26 + $0xa60] sm:$0xff] }
 0x2a1   : > { %7559 = vmatpush1.bf16.msra.mxu0 %v10089_v52  ;;  %v4666_v52 = vld [vmem:[%s11574_s26 + $0x908] sm:$0xff] }
 0x2a2   : > { %7731 = vmatpush1.bf16.msra.mxu1 %v10091_v53  ;;  %7560 = vmatprep.subr.bf16.mxu0 %v10098_v55  ;;  %v4670_v53 = vld [vmem:[%s11574_s26 + $0x928] sm:$0xff]  ;;  %v10145_v55 = vcombine.low %v4657_v43, %v4661_v45  ;;  %v10194_v43 = vcombine.high %v4705_v36, %v4709_v37 }
 0x2a3   : > { %7732 = vmatprep.subr.bf16.mxu1 %v10100_v56  ;;  %v10147_v56 = vcombine.low %v4658_v46, %v4662_v18  ;;  %v10156_v58 = vcombine.high %v4666_v52, %v4670_v53  ;;  %v4713_v46 = vld [vmem:[%s11574_s26 + $0xa80] sm:$0xff] }
 0x2a4   : > { %v4717_v18 = vld [vmem:[%s11574_s26 + $0xaa0] sm:$0xff] }
 0x2a5   : > { %7561 = vmatpush1.bf16.msra.mxu0 %v10097_v42  ;;  %v4674_v42 = vld [vmem:[%s11574_s26 + $0x948] sm:$0xff] }
 0x2a6   : > { %7733 = vmatpush1.bf16.msra.mxu1 %v10099_v44  ;;  %7562 = vmatprep.subr.bf16.mxu0 %v10106_v61  ;;  %v4678_v44 = vld [vmem:[%s11574_s26 + $0x968] sm:$0xff]  ;;  %v10153_v61 = vcombine.low %v4665_v32, %v4669_v51  ;;  %v10202_v32 = vcombine.high %v4713_v46, %v4717_v18 }
 0x2a7   : > { %7734 = vmatprep.subr.bf16.mxu1 %v10108_v62  ;;  %v10155_v62 = vcombine.low %v4666_v52, %v4670_v53  ;;  %v10164_v0 = vcombine.high %v4674_v42, %v4678_v44  ;;  %v4721_v52 = vld [vmem:[%s11574_s26 + $0xac0] sm:$0xff] }
 0x2a8   : > { %v4725_v53 = vld [vmem:[%s11574_s26 + $0xae0] sm:$0xff] }
 0x2a9   : > { %7563 = vmatpush1.bf16.msra.mxu0 %v10105_v3  ;;  %v4682_v3 = vld [vmem:[%s11574_s26 + $0x988] sm:$0xff] }
 0x2aa   : > { %7735 = vmatpush1.bf16.msra.mxu1 %v10107_v4  ;;  %7564 = vmatprep.subr.bf16.mxu0 %v10114_v54  ;;  %v4686_v4 = vld [vmem:[%s11574_s26 + $0x9a8] sm:$0xff]  ;;  %v10161_v54 = vcombine.low %v4673_v59, %v4677_v15  ;;  %v10210_v59 = vcombine.high %v4721_v52, %v4725_v53 }
 0x2ab   : > { %7736 = vmatprep.subr.bf16.mxu1 %v10116_v5  ;;  %v10163_v5 = vcombine.low %v4674_v42, %v4678_v44  ;;  %v10172_v8 = vcombine.high %v4682_v3, %v4686_v4  ;;  %v4729_v42 = vld [vmem:[%s11574_s26 + $0xb00] sm:$0xff] }
 0x2ac   : > { %v4733_v44 = vld [vmem:[%s11574_s26 + $0xb20] sm:$0xff] }
 0x2ad   : > { %7565 = vmatpush1.bf16.msra.mxu0 %v10113_v11  ;;  %v4690_v11 = vld [vmem:[%s11574_s26 + $0x9c8] sm:$0xff] }
 0x2ae   : > { %7737 = vmatpush1.bf16.msra.mxu1 %v10115_v12  ;;  %7577 = vmatprep.subr.bf16.mxu0 %v10122_v13  ;;  %v4694_v12 = vld [vmem:[%s11574_s26 + $0x9e8] sm:$0xff]  ;;  %v10169_v13 = vcombine.low %v4681_v1, %v4685_v60  ;;  %v10218_v1 = vcombine.high %v4729_v42, %v4733_v44 }
 0x2af   : > { %7749 = vmatprep.subr.bf16.mxu1 %v10124_v14  ;;  %v10171_v14 = vcombine.low %v4682_v3, %v4686_v4  ;;  %v10180_v20 = vcombine.high %v4690_v11, %v4694_v12  ;;  %v4737_v3 = vld [vmem:[%s11574_s26 + $0xb40] sm:$0xff] }
 0x2b0   : > { %7567 = vmatmul.mubr.bf16.vlgmr.msra.gmra.mrb[8].mxu0 %v11537_v21  ;;  %v4741_v4 = vld [vmem:[%s11574_s26 + $0xb60] sm:$0xff] }
 0x2b1   : > { %7739 = vmatmul.mubr.bf16.vlgmr.msra.gmra.mrb[8].mxu1 %v11537_v21  ;;  %7578 = vmatpush1.bf16.msra.mxu0 %v10121_v28  ;;  %v4698_v28 = vld [vmem:[%s11574_s26 + $0xa08] sm:$0xff] }
 0x2b2   : > { %7750 = vmatpush1.bf16.msra.mxu1 %v10123_v30  ;;  %7579 = vmatprep.subr.bf16.mxu0 %v10130_v31  ;;  %v4702_v30 = vld [vmem:[%s11574_s26 + $0xa28] sm:$0xff]  ;;  %v10177_v31 = vcombine.low %v4689_v9, %v4693_v10  ;;  %v10226_v9 = vcombine.high %v4737_v3, %v4741_v4 }
 0x2b3   : > { %7751 = vmatprep.subr.bf16.mxu1 %v10132_v33  ;;  %v10179_v33 = vcombine.low %v4690_v11, %v4694_v12  ;;  %v10188_v35 = vcombine.high %v4698_v28, %v4702_v30  ;;  %v4745_v11 = vld [vmem:[%s11574_s26 + $0xb80] sm:$0xff] }
 0x2b4   : > { %v4749_v12 = vld [vmem:[%s11574_s26 + $0xba0] sm:$0xff] }
 0x2b5   : > { %7580 = vmatpush1.bf16.msra.mxu0 %v10129_v38  ;;  %v4706_v38 = vld [vmem:[%s11574_s26 + $0xa48] sm:$0xff] }
 0x2b6   : > { %7752 = vmatpush1.bf16.msra.mxu1 %v10131_v39  ;;  %7581 = vmatprep.subr.bf16.mxu0 %v10138_v40  ;;  %v4710_v39 = vld [vmem:[%s11574_s26 + $0xa68] sm:$0xff]  ;;  %v10185_v40 = vcombine.low %v4697_v25, %v4701_v27  ;;  %v10234_v25 = vcombine.high %v4745_v11, %v4749_v12 }
 0x2b7   : > { %7753 = vmatprep.subr.bf16.mxu1 %v10140_v41  ;;  %v10187_v41 = vcombine.low %v4698_v28, %v4702_v30  ;;  %v10196_v45 = vcombine.high %v4706_v38, %v4710_v39  ;;  %v4753_v28 = vld [vmem:[%s11574_s26 + $0xbc0] sm:$0xff] }
 0x2b8   : > { %v4757_v30 = vld [vmem:[%s11574_s26 + $0xbe0] sm:$0xff] }
 0x2b9   : > { %7582 = vmatpush1.bf16.msra.mxu0 %v10137_v47  ;;  %v4714_v47 = vld [vmem:[%s11574_s26 + $0xa88] sm:$0xff] }
 0x2ba   : > { %7754 = vmatpush1.bf16.msra.mxu1 %v10139_v48  ;;  %7583 = vmatprep.subr.bf16.mxu0 %v10146_v49  ;;  %v4718_v48 = vld [vmem:[%s11574_s26 + $0xaa8] sm:$0xff]  ;;  %v10193_v49 = vcombine.low %v4705_v36, %v4709_v37  ;;  %v10242_v36 = vcombine.high %v4753_v28, %v4757_v30 }
 0x2bb   : > { %7755 = vmatprep.subr.bf16.mxu1 %v10148_v50  ;;  %v10195_v50 = vcombine.low %v4706_v38, %v4710_v39  ;;  %v10204_v51 = vcombine.high %v4714_v47, %v4718_v48  ;;  %v11781_v38 = vld [vmem:[%s11574_s26 + $0xc00] sm:$0xff] }
 0x2bc   : > { %v11784_v39 = vld [vmem:[%s11574_s26 + $0xc20] sm:$0xff] }
 0x2bd   : > { %7584 = vmatpush1.bf16.msra.mxu0 %v10145_v55  ;;  %v4722_v55 = vld [vmem:[%s11574_s26 + $0xac8] sm:$0xff] }
 0x2be   : > { %7756 = vmatpush1.bf16.msra.mxu1 %v10147_v56  ;;  %7585 = vmatprep.subr.bf16.mxu0 %v10154_v57  ;;  %v4726_v56 = vld [vmem:[%s11574_s26 + $0xae8] sm:$0xff]  ;;  %v10201_v57 = vcombine.low %v4713_v46, %v4717_v18  ;;  %v10250_v46 = vcombine.high %v11781_v38, %v11784_v39 }
 0x2bf   : > { %7757 = vmatprep.subr.bf16.mxu1 %v10156_v58  ;;  %v10203_v58 = vcombine.low %v4714_v47, %v4718_v48  ;;  %v10212_v15 = vcombine.high %v4722_v55, %v4726_v56  ;;  %v1083_v47 = vsub.s32 4, %v11497_v6  ;;  %v1091_v48 = vsub.s32 6, %v11497_v6 }
 0x2c1   : > { %7586 = vmatpush1.bf16.msra.mxu0 %v10153_v61  ;;  %v4730_v61 = vld [vmem:[%s11574_s26 + $0xb08] sm:$0xff] }
 0x2c2   : > { %7758 = vmatpush1.bf16.msra.mxu1 %v10155_v62  ;;  %7587 = vmatprep.subr.bf16.mxu0 %v10162_v63  ;;  %v4734_v62 = vld [vmem:[%s11574_s26 + $0xb28] sm:$0xff]  ;;  %v10209_v63 = vcombine.low %v4721_v52, %v4725_v53 }
 0x2c3   : > { %7759 = vmatprep.subr.bf16.mxu1 %v10164_v0  ;;  %v10211_v0 = vcombine.low %v4722_v55, %v4726_v56  ;;  %v10220_v60 = vcombine.high %v4730_v61, %v4734_v62 }
 0x2c5   : > { %7588 = vmatpush1.bf16.msra.mxu0 %v10161_v54  ;;  %v4738_v54 = vld [vmem:[%s11574_s26 + $0xb48] sm:$0xff] }
 0x2c6   : > { %7760 = vmatpush1.bf16.msra.mxu1 %v10163_v5  ;;  %7589 = vmatprep.subr.bf16.mxu0 %v10170_v7  ;;  %v4742_v5 = vld [vmem:[%s11574_s26 + $0xb68] sm:$0xff]  ;;  %v10217_v7 = vcombine.low %v4729_v42, %v4733_v44 }
 0x2c7   : > { %7761 = vmatprep.subr.bf16.mxu1 %v10172_v8  ;;  %v10219_v8 = vcombine.low %v4730_v61, %v4734_v62  ;;  %v10228_v10 = vcombine.high %v4738_v54, %v4742_v5 }
 0x2c9   : > { %7590 = vmatpush1.bf16.msra.mxu0 %v10169_v13  ;;  %v4746_v13 = vld [vmem:[%s11574_s26 + $0xb88] sm:$0xff] }
 0x2ca   : > { %7762 = vmatpush1.bf16.msra.mxu1 %v10171_v14  ;;  %7591 = vmatprep.subr.bf16.mxu0 %v10178_v19  ;;  %v4750_v14 = vld [vmem:[%s11574_s26 + $0xba8] sm:$0xff]  ;;  %v10225_v19 = vcombine.low %v4737_v3, %v4741_v4 }
 0x2cb   : > { %7763 = vmatprep.subr.bf16.mxu1 %v10180_v20  ;;  %v10227_v20 = vcombine.low %v4738_v54, %v4742_v5  ;;  %v10236_v27 = vcombine.high %v4746_v13, %v4750_v14 }
 0x2cd   : > { %7592 = vmatpush1.bf16.msra.mxu0 %v10177_v31  ;;  %v4754_v31 = vld [vmem:[%s11574_s26 + $0xbc8] sm:$0xff] }
 0x2ce   : > { %7764 = vmatpush1.bf16.msra.mxu1 %v10179_v33  ;;  %7593 = vmatprep.subr.bf16.mxu0 %v10186_v34  ;;  %v4758_v33 = vld [vmem:[%s11574_s26 + $0xbe8] sm:$0xff]  ;;  %v10233_v34 = vcombine.low %v4745_v11, %v4749_v12  ;;  %v4769_v12 = vld [vmem:[%s11574_s26 + $0xc40] sm:$0xff] }
 0x2cf   : > { %7765 = vmatprep.subr.bf16.mxu1 %v10188_v35  ;;  %v10235_v35 = vcombine.low %v4746_v13, %v4750_v14  ;;  %v10244_v37 = vcombine.high %v4754_v31, %v4758_v33 }
 0x2d1   : > { %7594 = vmatpush1.bf16.msra.mxu0 %v10185_v40  ;;  %v11787_v40 = vld [vmem:[%s11574_s26 + $0xc08] sm:$0xff] }
 0x2d2   : > { %7766 = vmatpush1.bf16.msra.mxu1 %v10187_v41  ;;  %7595 = vmatprep.subr.bf16.mxu0 %v10194_v43  ;;  %v11790_v41 = vld [vmem:[%s11574_s26 + $0xc28] sm:$0xff]  ;;  %v10241_v43 = vcombine.low %v4753_v28, %v4757_v30 }
 0x2d3   : > { %7767 = vmatprep.subr.bf16.mxu1 %v10196_v45  ;;  %v10243_v45 = vcombine.low %v4754_v31, %v4758_v33  ;;  %v10252_v18 = vcombine.high %v11787_v40, %v11790_v41  ;;  %v10249_v31 = vcombine.low %v11781_v38, %v11784_v39  ;;  %v10251_v33 = vcombine.low %v11787_v40, %v11790_v41 }
 0x2d5   : > { %7596 = vmatpush1.bf16.msra.mxu0 %v10193_v49  ;;  %v1087_v49 = vsub.s32 5, %v11497_v6 }
 0x2d6   : > { %7768 = vmatpush1.bf16.msra.mxu1 %v10195_v50  ;;  %7597 = vmatprep.subr.bf16.mxu0 %v10202_v32  ;;  %v1095_v50 = vsub.s32 7, %v11497_v6  ;;  %v10794_v32 = vld [vmem:[%s11504_s23] sm:$0xff] }
 0x2d7   : > { %7769 = vmatprep.subr.bf16.mxu1 %v10204_v51  ;;  %v1084_v51 = vrot.slane %v10794_v32, %v1083_v47  ;;  %v1092_v52 = vrot.slane %v10794_v32, %v1091_v48  ;;  %v1088_v53 = vrot.slane %v10794_v32, %v1087_v49 }
 0x2d8   : > { %v1096_v55 = vrot.slane %v10794_v32, %v1095_v50  ;;  %v4789_v32 = vld [vmem:[%s11574_s26 + $0xce0] sm:$0xff] }
 0x2d9   : > { %7598 = vmatpush1.bf16.msra.mxu0 %v10201_v57 }
 0x2da   : > { %7770 = vmatpush1.bf16.msra.mxu1 %v10203_v58  ;;  %7599 = vmatprep.subr.bf16.mxu0 %v10210_v59 }
 0x2db   : > { %7771 = vmatprep.subr.bf16.mxu1 %v10212_v15 }
 0x2dd   : > { %7600 = vmatpush1.bf16.msra.mxu0 %v10209_v63 }
 0x2de   : > { %7772 = vmatpush1.bf16.msra.mxu1 %v10211_v0  ;;  %7601 = vmatprep.subr.bf16.mxu0 %v10218_v1 }
 0x2df   : > { %7773 = vmatprep.subr.bf16.mxu1 %v10220_v60 }
 0x2e1   : > { %7602 = vmatpush1.bf16.msra.mxu0 %v10217_v7 }
 0x2e2   : > { %7774 = vmatpush1.bf16.msra.mxu1 %v10219_v8  ;;  %7603 = vmatprep.subr.bf16.mxu0 %v10226_v9 }
 0x2e3   : > { %7775 = vmatprep.subr.bf16.mxu1 %v10228_v10 }
 0x2e5   : > { %7604 = vmatpush1.bf16.msra.mxu0 %v10225_v19 }
 0x2e6   : > { %7776 = vmatpush1.bf16.msra.mxu1 %v10227_v20  ;;  %7605 = vmatprep.subr.bf16.mxu0 %v10234_v25  ;;  %v4773_v20 = vld [vmem:[%s11574_s26 + $0xc60] sm:$0xff]  ;;  %v4770_v25 = vld [vmem:[%s11574_s26 + $0xc48] sm:$0xff] }
 0x2e7   : > { %7777 = vmatprep.subr.bf16.mxu1 %v10236_v27  ;;  %v4774_v27 = vld [vmem:[%s11574_s26 + $0xc68] sm:$0xff]  ;;  %v10257_v38 = vcombine.low %v4769_v12, %v4773_v20 }
 0x2e8   : > { %v10259_v39 = vcombine.low %v4770_v25, %v4774_v27 }
 0x2e9   : > { %7606 = vmatpush1.bf16.msra.mxu0 %v10233_v34 }
 0x2ea   : > { %7778 = vmatpush1.bf16.msra.mxu1 %v10235_v35  ;;  %7607 = vmatprep.subr.bf16.mxu0 %v10242_v36  ;;  %v4777_v35 = vld [vmem:[%s11574_s26 + $0xc80] sm:$0xff]  ;;  %v10258_v36 = vcombine.high %v4769_v12, %v4773_v20 }
 0x2eb   : > { %7779 = vmatprep.subr.bf16.mxu1 %v10244_v37  ;;  %v10260_v37 = vcombine.high %v4770_v25, %v4774_v27  ;;  %v4817_v25 = vld [vmem:[%s11574_s26 + $0xdc0] sm:$0xff] }
 0x2ec   : > { %v4821_v27 = vld [vmem:[%s11574_s26 + $0xde0] sm:$0xff] }
 0x2ed   : > { %7608 = vmatpush1.bf16.msra.mxu0 %v10241_v43  ;;  %v4781_v43 = vld [vmem:[%s11574_s26 + $0xca0] sm:$0xff] }
 0x2ee   : > { %7780 = vmatpush1.bf16.msra.mxu1 %v10243_v45  ;;  %7620 = vmatprep.subr.bf16.mxu0 %v10250_v46  ;;  %v4778_v45 = vld [vmem:[%s11574_s26 + $0xc88] sm:$0xff]  ;;  %v10266_v40 = vcombine.high %v4777_v35, %v4781_v43 }
 0x2ef   : > { %7792 = vmatprep.subr.bf16.mxu1 %v10252_v18  ;;  %v4782_v46 = vld [vmem:[%s11574_s26 + $0xca8] sm:$0xff]  ;;  %v4785_v18 = vld [vmem:[%s11574_s26 + $0xcc0] sm:$0xff] }
 0x2f0   : > { %v10268_v41 = vcombine.high %v4778_v45, %v4782_v46 }
 0x303   : > { %v4172_v56 = vpop.f32.mrb[4].mxu0  ;;  %v4344_v58 = vpop.f32.mrb[4].mxu1 }
 0x304   : > { %v10570_v57 = vadd.f32 %v4172_v56, %v1084_v51  ;;  %v4174_v59 = vpop.f32.mrb[5].mxu0  ;;  %v10574_v15 = vadd.f32 %v4344_v58, %v1092_v52  ;;  %v4346_v44 = vpop.f32.mrb[5].mxu1  ;;  %v10274_v56 = vcombine.high %v4785_v18, %v4789_v32  ;;  %v4793_v58 = vld [vmem:[%s11574_s26 + $0xd00] sm:$0xff] }
 0x305   : > { %v10571_v42 = vadd.f32 %v4174_v59, %v1088_v53  ;;  %v4176_v61 = vpop.f32.mrb[6].mxu0  ;;  %v10575_v62 = vadd.f32 %v4346_v44, %v1096_v55  ;;  %v4348_v0 = vpop.f32.mrb[6].mxu1  ;;  %v4797_v59 = vld [vmem:[%s11574_s26 + $0xd20] sm:$0xff]  ;;  %v10273_v44 = vcombine.low %v4785_v18, %v4789_v32 }
 0x306   : > { %v10572_v63 = vadd.f32 %v4176_v61, %v1084_v51  ;;  %v4178_v1 = vpop.f32.mrb[7].mxu0  ;;  %v10576_v60 = vadd.f32 %v4348_v0, %v1092_v52  ;;  %v4350_v4 = vpop.f32.mrb[7].mxu1  ;;  %v4357_v54 = vmax.f32 %v10570_v57, 0.0  ;;  %v4359_v8 = vmax.f32 %v10574_v15, 0.0  ;;  %v4786_v51 = vld [vmem:[%s11574_s26 + $0xcc8] sm:$0xff]  ;;  %v4801_v0 = vld [vmem:[%s11574_s26 + $0xd40] sm:$0xff] }
 0x307   : > { %v10573_v3 = vadd.f32 %v4178_v1, %v1088_v53  ;;  %v10577_v7 = vadd.f32 %v4350_v4, %v1096_v55  ;;  %v4358_v9 = vmax.f32 %v10571_v42, 0.0  ;;  %v4360_v13 = vmax.f32 %v10575_v62, 0.0  ;;  %v4790_v52 = vld [vmem:[%s11574_s26 + $0xce8] sm:$0xff]  ;;  %v4805_v1 = vld [vmem:[%s11574_s26 + $0xd60] sm:$0xff] }
 0x308   : > { %v4365_v5 = vmax.f32 %v10572_v63, 0.0  ;;  %v4367_v10 = vmax.f32 %v10576_v60, 0.0  ;;  %v10265_v53 = vcombine.low %v4777_v35, %v4781_v43  ;;  %v10267_v55 = vcombine.low %v4778_v45, %v4782_v46  ;;  %v4794_v15 = vld [vmem:[%s11574_s26 + $0xd08] sm:$0xff]  ;;  %v4825_v45 = vld [vmem:[%s11574_s26 + $0xe00] sm:$0xff] }
 0x309   : > { %v4366_v11 = vmax.f32 %v10573_v3, 0.0  ;;  %v4368_v19 = vmax.f32 %v10577_v7, 0.0  ;;  %v10276_v57 = vcombine.high %v4786_v51, %v4790_v52  ;;  %v4798_v42 = vld [vmem:[%s11574_s26 + $0xd28] sm:$0xff]  ;;  %v10275_v61 = vcombine.low %v4786_v51, %v4790_v52  ;;  %v4829_v46 = vld [vmem:[%s11574_s26 + $0xe20] sm:$0xff] }
 0x30a   : > { %v11810_v14 = vpack.c.bf16 %v4365_v5, %v4357_v54  ;;  %v11815_v28 = vpack.c.bf16 %v4367_v10, %v4359_v8  ;;  %v10282_v62 = vcombine.high %v4793_v58, %v4797_v59  ;;  %v10284_v63 = vcombine.high %v4794_v15, %v4798_v42  ;;  %v4802_v60 = vld [vmem:[%s11574_s26 + $0xd48] sm:$0xff]  ;;  %v4809_v8 = vld [vmem:[%s11574_s26 + $0xd80] sm:$0xff] }
 0x30b   : > { %v11817_v30 = vpack.c.bf16 %v4366_v11, %v4358_v9  ;;  %v11823_v34 = vpack.c.bf16 %v4368_v19, %v4360_v13  ;;  %v4806_v3 = vld [vmem:[%s11574_s26 + $0xd68] sm:$0xff]  ;;  %v10281_v4 = vcombine.low %v4793_v58, %v4797_v59  ;;  %v10283_v54 = vcombine.low %v4794_v15, %v4798_v42  ;;  %v4813_v9 = vld [vmem:[%s11574_s26 + $0xda0] sm:$0xff] }
 0x30c   : > { %v10290_v5 = vcombine.high %v4801_v0, %v4805_v1  ;;  %v10292_v7 = vcombine.high %v4802_v60, %v4806_v3  ;;  %v4810_v10 = vld [vmem:[%s11574_s26 + $0xd88] sm:$0xff]  ;;  %v10289_v12 = vcombine.low %v4801_v0, %v4805_v1  ;;  %v10291_v13 = vcombine.low %v4802_v60, %v4806_v3  ;;  %v4833_v51 = vld [vmem:[%s11574_s26 + $0xe40] sm:$0xff] }
 0x30d   : > { %7609 = vmatprep.mubr.bf16.mxu0 %v11817_v30  ;;  %7781 = vmatprep.mubr.bf16.mxu1 %v11817_v30  ;;  %v4814_v11 = vld [vmem:[%s11574_s26 + $0xda8] sm:$0xff]  ;;  %v10298_v19 = vcombine.high %v4809_v8, %v4813_v9  ;;  %v10297_v35 = vcombine.low %v4809_v8, %v4813_v9  ;;  %v10314_v18 = vcombine.high %v4825_v45, %v4829_v46  ;;  %v4837_v52 = vld [vmem:[%s11574_s26 + $0xe60] sm:$0xff] }
 0x30e   : > { %7610 = vmatmul.mubr.bf16.vlgmr.msra.gmra.mrb[8].mxu0 %v11810_v14  ;;  %7782 = vmatmul.mubr.bf16.vlgmr.msra.gmra.mrb[8].mxu1 %v11810_v14  ;;  %v10300_v20 = vcombine.high %v4810_v10, %v4814_v11  ;;  %v10322_v58 = vcombine.high %v4833_v51, %v4837_v52  ;;  %v4841_v15 = vld [vmem:[%s11574_s26 + $0xe80] sm:$0xff] }
 0x30f   : > { %7621 = vmatpush1.bf16.msra.mxu0 %v10249_v31  ;;  %7793 = vmatpush1.bf16.msra.mxu1 %v10251_v33  ;;  %v4818_v31 = vld [vmem:[%s11574_s26 + $0xdc8] sm:$0xff]  ;;  %v4845_v42 = vld [vmem:[%s11574_s26 + $0xea0] sm:$0xff] }
 0x310   : > { %7652 = vmatprep.mubr.bf16.mxu0 %v11823_v34  ;;  %7824 = vmatprep.mubr.bf16.mxu1 %v11823_v34  ;;  %v4822_v33 = vld [vmem:[%s11574_s26 + $0xde8] sm:$0xff]  ;;  %v10330_v0 = vcombine.high %v4841_v15, %v4845_v42  ;;  %v4849_v60 = vld [vmem:[%s11574_s26 + $0xec0] sm:$0xff] }
 0x311   : > { %7622 = vmatprep.subr.bf16.mxu0 %v10258_v36  ;;  %7794 = vmatprep.subr.bf16.mxu1 %v10260_v37  ;;  %v10299_v36 = vcombine.low %v4810_v10, %v4814_v11  ;;  %v10306_v37 = vcombine.high %v4817_v25, %v4821_v27  ;;  %v10308_v43 = vcombine.high %v4818_v31, %v4822_v33  ;;  %v4853_v3 = vld [vmem:[%s11574_s26 + $0xee0] sm:$0xff] }
 0x312   : > { %v10338_v8 = vcombine.high %v4849_v60, %v4853_v3  ;;  %v4857_v10 = vld [vmem:[%s11574_s26 + $0xf00] sm:$0xff] }
 0x313   : > { %7623 = vmatpush1.bf16.msra.mxu0 %v10257_v38  ;;  %7795 = vmatpush1.bf16.msra.mxu1 %v10259_v39  ;;  %v4826_v38 = vld [vmem:[%s11574_s26 + $0xe08] sm:$0xff]  ;;  %v4861_v11 = vld [vmem:[%s11574_s26 + $0xf20] sm:$0xff] }
 0x314   : > { %7624 = vmatprep.subr.bf16.mxu0 %v10266_v40  ;;  %7796 = vmatprep.subr.bf16.mxu1 %v10268_v41  ;;  %v4830_v39 = vld [vmem:[%s11574_s26 + $0xe28] sm:$0xff]  ;;  %v10305_v40 = vcombine.low %v4817_v25, %v4821_v27  ;;  %v10307_v41 = vcombine.low %v4818_v31, %v4822_v33  ;;  %v10346_v25 = vcombine.high %v4857_v10, %v4861_v11  ;;  %v4865_v31 = vld [vmem:[%s11574_s26 + $0xf40] sm:$0xff] }
 0x315   : > { %v10316_v32 = vcombine.high %v4826_v38, %v4830_v39  ;;  %v4869_v33 = vld [vmem:[%s11574_s26 + $0xf60] sm:$0xff] }
 0x317   : > { %7625 = vmatpush1.bf16.msra.mxu0 %v10265_v53  ;;  %7797 = vmatpush1.bf16.msra.mxu1 %v10267_v55  ;;  %v4834_v53 = vld [vmem:[%s11574_s26 + $0xe48] sm:$0xff] }
 0x318   : > { %7626 = vmatprep.subr.bf16.mxu0 %v10274_v56  ;;  %7798 = vmatprep.subr.bf16.mxu1 %v10276_v57  ;;  %v4838_v55 = vld [vmem:[%s11574_s26 + $0xe68] sm:$0xff]  ;;  %v10313_v56 = vcombine.low %v4825_v45, %v4829_v46  ;;  %v10315_v57 = vcombine.low %v4826_v38, %v4830_v39  ;;  %v10354_v45 = vcombine.high %v4865_v31, %v4869_v33  ;;  %v4873_v38 = vld [vmem:[%s11574_s26 + $0xf80] sm:$0xff] }
 0x319   : > { %v10324_v59 = vcombine.high %v4834_v53, %v4838_v55  ;;  %v4877_v39 = vld [vmem:[%s11574_s26 + $0xfa0] sm:$0xff] }
 0x31b   : > { %7627 = vmatpush1.bf16.msra.mxu0 %v10273_v44  ;;  %7799 = vmatpush1.bf16.msra.mxu1 %v10275_v61  ;;  %v4842_v44 = vld [vmem:[%s11574_s26 + $0xe88] sm:$0xff] }
 0x31c   : > { %7628 = vmatprep.subr.bf16.mxu0 %v10282_v62  ;;  %7800 = vmatprep.subr.bf16.mxu1 %v10284_v63  ;;  %v4846_v61 = vld [vmem:[%s11574_s26 + $0xea8] sm:$0xff]  ;;  %v10321_v62 = vcombine.low %v4833_v51, %v4837_v52  ;;  %v10323_v63 = vcombine.low %v4834_v53, %v4838_v55  ;;  %v10362_v51 = vcombine.high %v4873_v38, %v4877_v39  ;;  %v4881_v53 = vld [vmem:[%s11574_s26 + $0xfc0] sm:$0xff] }
 0x31d   : > { %v10332_v1 = vcombine.high %v4842_v44, %v4846_v61  ;;  %v4885_v55 = vld [vmem:[%s11574_s26 + $0xfe0] sm:$0xff] }
 0x31f   : > { %7629 = vmatpush1.bf16.msra.mxu0 %v10281_v4  ;;  %7801 = vmatpush1.bf16.msra.mxu1 %v10283_v54  ;;  %v4850_v4 = vld [vmem:[%s11574_s26 + $0xec8] sm:$0xff] }
 0x320   : > { %7630 = vmatprep.subr.bf16.mxu0 %v10290_v5  ;;  %7802 = vmatprep.subr.bf16.mxu1 %v10292_v7  ;;  %v4854_v54 = vld [vmem:[%s11574_s26 + $0xee8] sm:$0xff]  ;;  %v10329_v5 = vcombine.low %v4841_v15, %v4845_v42  ;;  %v10331_v7 = vcombine.low %v4842_v44, %v4846_v61  ;;  %v10370_v15 = vcombine.high %v4881_v53, %v4885_v55  ;;  %v4379_v44 = vld [vmem:[%s11574_s26 + $0x10] sm:$0xff] }
 0x321   : > { %v10340_v9 = vcombine.high %v4850_v4, %v4854_v54  ;;  %v4383_v61 = vld [vmem:[%s11574_s26 + $0x30] sm:$0xff] }
 0x323   : > { %7631 = vmatpush1.bf16.msra.mxu0 %v10289_v12  ;;  %7803 = vmatpush1.bf16.msra.mxu1 %v10291_v13  ;;  %v4858_v12 = vld [vmem:[%s11574_s26 + $0xf08] sm:$0xff] }
 0x324   : > { %7632 = vmatprep.subr.bf16.mxu0 %v10298_v19  ;;  %7804 = vmatprep.subr.bf16.mxu1 %v10300_v20  ;;  %v4862_v13 = vld [vmem:[%s11574_s26 + $0xf28] sm:$0xff]  ;;  %v10337_v19 = vcombine.low %v4849_v60, %v4853_v3  ;;  %v10339_v20 = vcombine.low %v4850_v4, %v4854_v54  ;;  %v9870_v60 = vcombine.high %v4379_v44, %v4383_v61  ;;  %v4387_v4 = vld [vmem:[%s11574_s26 + $0x50] sm:$0xff] }
 0x325   : > { %v10348_v27 = vcombine.high %v4858_v12, %v4862_v13  ;;  %v4391_v54 = vld [vmem:[%s11574_s26 + $0x70] sm:$0xff] }
 0x327   : > { %7633 = vmatpush1.bf16.msra.mxu0 %v10297_v35  ;;  %7805 = vmatpush1.bf16.msra.mxu1 %v10299_v36  ;;  %v4866_v35 = vld [vmem:[%s11574_s26 + $0xf48] sm:$0xff] }
 0x328   : > { %7634 = vmatprep.subr.bf16.mxu0 %v10306_v37  ;;  %7806 = vmatprep.subr.bf16.mxu1 %v10308_v43  ;;  %v4870_v36 = vld [vmem:[%s11574_s26 + $0xf68] sm:$0xff]  ;;  %v10345_v37 = vcombine.low %v4857_v10, %v4861_v11  ;;  %v10347_v43 = vcombine.low %v4858_v12, %v4862_v13  ;;  %v9878_v10 = vcombine.high %v4387_v4, %v4391_v54  ;;  %v4395_v12 = vld [vmem:[%s11574_s26 + $0x90] sm:$0xff] }
 0x329   : > { %v10356_v46 = vcombine.high %v4866_v35, %v4870_v36  ;;  %v4399_v13 = vld [vmem:[%s11574_s26 + $0xb0] sm:$0xff] }
 0x32b   : > { %7635 = vmatpush1.bf16.msra.mxu0 %v10305_v40  ;;  %7807 = vmatpush1.bf16.msra.mxu1 %v10307_v41  ;;  %v4874_v40 = vld [vmem:[%s11574_s26 + $0xf88] sm:$0xff] }
 0x32c   : > { %7636 = vmatprep.subr.bf16.mxu0 %v10314_v18  ;;  %7808 = vmatprep.subr.bf16.mxu1 %v10316_v32  ;;  %v4878_v41 = vld [vmem:[%s11574_s26 + $0xfa8] sm:$0xff]  ;;  %v10353_v18 = vcombine.low %v4865_v31, %v4869_v33  ;;  %v10355_v32 = vcombine.low %v4866_v35, %v4870_v36  ;;  %v9886_v31 = vcombine.high %v4395_v12, %v4399_v13  ;;  %v4403_v35 = vld [vmem:[%s11574_s26 + $0xd0] sm:$0xff] }
 0x32d   : > { %v10364_v52 = vcombine.high %v4874_v40, %v4878_v41  ;;  %v4407_v36 = vld [vmem:[%s11574_s26 + $0xf0] sm:$0xff] }
 0x32f   : > { %7637 = vmatpush1.bf16.msra.mxu0 %v10313_v56  ;;  %7809 = vmatpush1.bf16.msra.mxu1 %v10315_v57  ;;  %v4882_v56 = vld [vmem:[%s11574_s26 + $0xfc8] sm:$0xff] }
 0x330   : > { %7638 = vmatprep.subr.bf16.mxu0 %v10322_v58  ;;  %7810 = vmatprep.subr.bf16.mxu1 %v10324_v59  ;;  %v4886_v57 = vld [vmem:[%s11574_s26 + $0xfe8] sm:$0xff]  ;;  %v10361_v58 = vcombine.low %v4873_v38, %v4877_v39  ;;  %v10363_v59 = vcombine.low %v4874_v40, %v4878_v41  ;;  %v4411_v39 = vld [vmem:[%s11574_s26 + $0x110] sm:$0xff]  ;;  %v4412_v41 = vld [vmem:[%s11574_s26 + $0x118] sm:$0xff] }
 0x331   : > { %v10372_v42 = vcombine.high %v4882_v56, %v4886_v57  ;;  %v4415_v40 = vld [vmem:[%s11574_s26 + $0x130] sm:$0xff] }
 0x333   : > { %7639 = vmatpush1.bf16.msra.mxu0 %v10321_v62  ;;  %7811 = vmatpush1.bf16.msra.mxu1 %v10323_v63  ;;  %v4380_v62 = vld [vmem:[%s11574_s26 + $0x18] sm:$0xff] }
 0x334   : > { %7640 = vmatprep.subr.bf16.mxu0 %v10330_v0  ;;  %7812 = vmatprep.subr.bf16.mxu1 %v10332_v1  ;;  %v4384_v63 = vld [vmem:[%s11574_s26 + $0x38] sm:$0xff]  ;;  %v10369_v0 = vcombine.low %v4881_v53, %v4885_v55  ;;  %v10371_v1 = vcombine.low %v4882_v56, %v4886_v57  ;;  %v4419_v55 = vld [vmem:[%s11574_s26 + $0x150] sm:$0xff] }
 0x335   : > { %v9872_v3 = vcombine.high %v4380_v62, %v4384_v63  ;;  %v4423_v56 = vld [vmem:[%s11574_s26 + $0x170] sm:$0xff]  ;;  %v4420_v57 = vld [vmem:[%s11574_s26 + $0x158] sm:$0xff] }
 0x337   : > { %7641 = vmatpush1.bf16.msra.mxu0 %v10329_v5  ;;  %7813 = vmatpush1.bf16.msra.mxu1 %v10331_v7  ;;  %v4388_v5 = vld [vmem:[%s11574_s26 + $0x58] sm:$0xff] }
 0x338   : > { %7642 = vmatprep.subr.bf16.mxu0 %v10338_v8  ;;  %7814 = vmatprep.subr.bf16.mxu1 %v10340_v9  ;;  %v4392_v7 = vld [vmem:[%s11574_s26 + $0x78] sm:$0xff]  ;;  %v9869_v8 = vcombine.low %v4379_v44, %v4383_v61  ;;  %v9871_v9 = vcombine.low %v4380_v62, %v4384_v63  ;;  %v4427_v61 = vld [vmem:[%s11574_s26 + $0x190] sm:$0xff] }
 0x339   : > { %v9880_v11 = vcombine.high %v4388_v5, %v4392_v7  ;;  %v4431_v62 = vld [vmem:[%s11574_s26 + $0x1b0] sm:$0xff]  ;;  %v4428_v63 = vld [vmem:[%s11574_s26 + $0x198] sm:$0xff] }
 0x33b   : > { %7643 = vmatpush1.bf16.msra.mxu0 %v10337_v19  ;;  %7815 = vmatpush1.bf16.msra.mxu1 %v10339_v20  ;;  %v4396_v19 = vld [vmem:[%s11574_s26 + $0x98] sm:$0xff] }
 0x33c   : > { %7644 = vmatprep.subr.bf16.mxu0 %v10346_v25  ;;  %7816 = vmatprep.subr.bf16.mxu1 %v10348_v27  ;;  %v4400_v20 = vld [vmem:[%s11574_s26 + $0xb8] sm:$0xff]  ;;  %v9877_v25 = vcombine.low %v4387_v4, %v4391_v54  ;;  %v9879_v27 = vcombine.low %v4388_v5, %v4392_v7  ;;  %v4435_v54 = vld [vmem:[%s11574_s26 + $0x1d0] sm:$0xff] }
 0x33d   : > { %v9888_v33 = vcombine.high %v4396_v19, %v4400_v20  ;;  %v4439_v5 = vld [vmem:[%s11574_s26 + $0x1f0] sm:$0xff]  ;;  %v4436_v7 = vld [vmem:[%s11574_s26 + $0x1d8] sm:$0xff] }
 0x33f   : > { %7645 = vmatpush1.bf16.msra.mxu0 %v10345_v37  ;;  %7817 = vmatpush1.bf16.msra.mxu1 %v10347_v43  ;;  %v4404_v37 = vld [vmem:[%s11574_s26 + $0xd8] sm:$0xff] }
 0x340   : > { %7646 = vmatprep.subr.bf16.mxu0 %v10354_v45  ;;  %7818 = vmatprep.subr.bf16.mxu1 %v10356_v46  ;;  %v4408_v43 = vld [vmem:[%s11574_s26 + $0xf8] sm:$0xff]  ;;  %v9885_v45 = vcombine.low %v4395_v12, %v4399_v13  ;;  %v9887_v46 = vcombine.low %v4396_v19, %v4400_v20  ;;  %v4443_v13 = vld [vmem:[%s11574_s26 + $0x210] sm:$0xff] }
 0x341   : > { %v9896_v38 = vcombine.high %v4404_v37, %v4408_v43  ;;  %v4447_v19 = vld [vmem:[%s11574_s26 + $0x230] sm:$0xff]  ;;  %v4444_v20 = vld [vmem:[%s11574_s26 + $0x218] sm:$0xff] }
 0x343   : > { %7647 = vmatpush1.bf16.msra.mxu0 %v10353_v18  ;;  %7819 = vmatpush1.bf16.msra.mxu1 %v10355_v32  ;;  %v4416_v18 = vld [vmem:[%s11574_s26 + $0x138] sm:$0xff]  ;;  %v9893_v32 = vcombine.low %v4403_v35, %v4407_v36 }
 0x344   : > { %7648 = vmatprep.subr.bf16.mxu0 %v10362_v51  ;;  %7820 = vmatprep.subr.bf16.mxu1 %v10364_v52  ;;  %v9895_v51 = vcombine.low %v4404_v37, %v4408_v43  ;;  %v9902_v52 = vcombine.high %v4411_v39, %v4415_v40  ;;  %v9904_v53 = vcombine.high %v4412_v41, %v4416_v18  ;;  %v4455_v37 = vld [vmem:[%s11574_s26 + $0x270] sm:$0xff]  ;;  %v4452_v43 = vld [vmem:[%s11574_s26 + $0x258] sm:$0xff] }
 0x347   : > { %7649 = vmatpush1.bf16.msra.mxu0 %v10361_v58  ;;  %7821 = vmatpush1.bf16.msra.mxu1 %v10363_v59  ;;  %v4424_v58 = vld [vmem:[%s11574_s26 + $0x178] sm:$0xff]  ;;  %v9901_v59 = vcombine.low %v4411_v39, %v4415_v40  ;;  %v4459_v40 = vld [vmem:[%s11574_s26 + $0x290] sm:$0xff] }
 0x348   : > { %7650 = vmatprep.subr.bf16.mxu0 %v10370_v15  ;;  %7822 = vmatprep.subr.bf16.mxu1 %v10372_v42  ;;  %v9903_v15 = vcombine.low %v4412_v41, %v4416_v18  ;;  %v9910_v42 = vcombine.high %v4419_v55, %v4423_v56  ;;  %v9912_v44 = vcombine.high %v4420_v57, %v4424_v58  ;;  %v4463_v41 = vld [vmem:[%s11574_s26 + $0x2b0] sm:$0xff]  ;;  %v4460_v18 = vld [vmem:[%s11574_s26 + $0x298] sm:$0xff] }
 0x34b   : > { %7651 = vmatpush1.bf16.msra.mxu0 %v10369_v0  ;;  %7823 = vmatpush1.bf16.msra.mxu1 %v10371_v1  ;;  %v4432_v0 = vld [vmem:[%s11574_s26 + $0x1b8] sm:$0xff]  ;;  %v9909_v1 = vcombine.low %v4419_v55, %v4423_v56  ;;  %v4467_v56 = vld [vmem:[%s11574_s26 + $0x2d0] sm:$0xff] }
 0x34c   : > { %7835 = vmatprep.subr.bf16.mxu0 %v9870_v60  ;;  %8007 = vmatprep.subr.bf16.mxu1 %v9872_v3  ;;  %v9911_v60 = vcombine.low %v4420_v57, %v4424_v58  ;;  %v9918_v3 = vcombine.high %v4427_v61, %v4431_v62  ;;  %v9920_v4 = vcombine.high %v4428_v63, %v4432_v0  ;;  %v4471_v57 = vld [vmem:[%s11574_s26 + $0x2f0] sm:$0xff]  ;;  %v4468_v58 = vld [vmem:[%s11574_s26 + $0x2d8] sm:$0xff] }
 0x34e   : > { %7653 = vmatmul.mubr.bf16.vlgmr.msra.gmra.mrb[8].mxu0 %v11815_v28  ;;  %7825 = vmatmul.mubr.bf16.vlgmr.msra.gmra.mrb[8].mxu1 %v11815_v28 }
 0x34f   : > { %7836 = vmatpush1.bf16.msra.mxu0 %v9869_v8  ;;  %7867 = vmatprep.mubr.bf16.mxu0 %v11539_v22  ;;  %v4440_v8 = vld [vmem:[%s11574_s26 + $0x1f8] sm:$0xff] }
 0x350   : > { %8008 = vmatpush1.bf16.msra.mxu1 %v9871_v9  ;;  %8039 = vmatprep.mubr.bf16.mxu1 %v11539_v22  ;;  %v9894_v22 = vcombine.high %v4403_v35, %v4407_v36  ;;  %v9917_v9 = vcombine.low %v4427_v61, %v4431_v62  ;;  %v9928_v12 = vcombine.high %v4436_v7, %v4440_v8  ;;  %v4451_v36 = vld [vmem:[%s11574_s26 + $0x250] sm:$0xff] }
 0x351   : > { %7837 = vmatprep.subr.bf16.mxu0 %v9878_v10  ;;  %8009 = vmatprep.subr.bf16.mxu1 %v9880_v11  ;;  %v9919_v10 = vcombine.low %v4428_v63, %v4432_v0  ;;  %v9926_v11 = vcombine.high %v4435_v54, %v4439_v5  ;;  %v4475_v62 = vld [vmem:[%s11574_s26 + $0x310] sm:$0xff]  ;;  %v4476_v0 = vld [vmem:[%s11574_s26 + $0x318] sm:$0xff] }
 0x352   : > { %v4479_v63 = vld [vmem:[%s11574_s26 + $0x330] sm:$0xff] }
 0x353   : > { %7838 = vmatpush1.bf16.msra.mxu0 %v9877_v25  ;;  %v4448_v25 = vld [vmem:[%s11574_s26 + $0x238] sm:$0xff] }
 0x354   : > { %8010 = vmatpush1.bf16.msra.mxu1 %v9879_v27  ;;  %7839 = vmatprep.subr.bf16.mxu0 %v9886_v31  ;;  %v9925_v27 = vcombine.low %v4435_v54, %v4439_v5  ;;  %v9927_v31 = vcombine.low %v4436_v7, %v4440_v8  ;;  %v9936_v35 = vcombine.high %v4444_v20, %v4448_v25  ;;  %v4483_v5 = vld [vmem:[%s11574_s26 + $0x350] sm:$0xff]  ;;  %v4484_v8 = vld [vmem:[%s11574_s26 + $0x358] sm:$0xff] }
 0x355   : > { %8011 = vmatprep.subr.bf16.mxu1 %v9888_v33  ;;  %v9934_v33 = vcombine.high %v4443_v13, %v4447_v19  ;;  %v4487_v7 = vld [vmem:[%s11574_s26 + $0x370] sm:$0xff] }
 0x357   : > { %7840 = vmatpush1.bf16.msra.mxu0 %v9885_v45  ;;  %v4456_v45 = vld [vmem:[%s11574_s26 + $0x278] sm:$0xff] }
 0x358   : > { %8012 = vmatpush1.bf16.msra.mxu1 %v9887_v46  ;;  %7841 = vmatprep.subr.bf16.mxu0 %v9894_v22  ;;  %v9933_v46 = vcombine.low %v4443_v13, %v4447_v19  ;;  %v9935_v22 = vcombine.low %v4444_v20, %v4448_v25  ;;  %v9944_v39 = vcombine.high %v4452_v43, %v4456_v45  ;;  %v4491_v19 = vld [vmem:[%s11574_s26 + $0x390] sm:$0xff]  ;;  %v4492_v25 = vld [vmem:[%s11574_s26 + $0x398] sm:$0xff] }
 0x359   : > { %8013 = vmatprep.subr.bf16.mxu1 %v9896_v38  ;;  %v9942_v38 = vcombine.high %v4451_v36, %v4455_v37  ;;  %v4495_v20 = vld [vmem:[%s11574_s26 + $0x3b0] sm:$0xff] }
 0x35b   : > { %7842 = vmatpush1.bf16.msra.mxu0 %v9893_v32  ;;  %v4464_v32 = vld [vmem:[%s11574_s26 + $0x2b8] sm:$0xff] }
 0x35c   : > { %8014 = vmatpush1.bf16.msra.mxu1 %v9895_v51  ;;  %7843 = vmatprep.subr.bf16.mxu0 %v9902_v52  ;;  %v9941_v51 = vcombine.low %v4451_v36, %v4455_v37  ;;  %v9943_v52 = vcombine.low %v4452_v43, %v4456_v45  ;;  %v9952_v55 = vcombine.high %v4460_v18, %v4464_v32  ;;  %v4499_v37 = vld [vmem:[%s11574_s26 + $0x3d0] sm:$0xff]  ;;  %v4500_v45 = vld [vmem:[%s11574_s26 + $0x3d8] sm:$0xff] }
 0x35d   : > { %8015 = vmatprep.subr.bf16.mxu1 %v9904_v53  ;;  %v9950_v53 = vcombine.high %v4459_v40, %v4463_v41  ;;  %v4503_v43 = vld [vmem:[%s11574_s26 + $0x3f0] sm:$0xff] }
 0x35f   : > { %7844 = vmatpush1.bf16.msra.mxu0 %v9901_v59  ;;  %v4472_v59 = vld [vmem:[%s11574_s26 + $0x2f8] sm:$0xff] }
 0x360   : > { %8016 = vmatpush1.bf16.msra.mxu1 %v9903_v15  ;;  %7845 = vmatprep.subr.bf16.mxu0 %v9910_v42  ;;  %v9949_v15 = vcombine.low %v4459_v40, %v4463_v41  ;;  %v9951_v42 = vcombine.low %v4460_v18, %v4464_v32  ;;  %v9960_v61 = vcombine.high %v4468_v58, %v4472_v59  ;;  %v4507_v41 = vld [vmem:[%s11574_s26 + $0x410] sm:$0xff]  ;;  %v4508_v32 = vld [vmem:[%s11574_s26 + $0x418] sm:$0xff] }
 0x361   : > { %8017 = vmatprep.subr.bf16.mxu1 %v9912_v44  ;;  %v9958_v44 = vcombine.high %v4467_v56, %v4471_v57  ;;  %v4511_v18 = vld [vmem:[%s11574_s26 + $0x430] sm:$0xff] }
 0x363   : > { %7846 = vmatpush1.bf16.msra.mxu0 %v9909_v1  ;;  %v4480_v1 = vld [vmem:[%s11574_s26 + $0x338] sm:$0xff] }
 0x364   : > { %8018 = vmatpush1.bf16.msra.mxu1 %v9911_v60  ;;  %7847 = vmatprep.subr.bf16.mxu0 %v9918_v3  ;;  %v9957_v60 = vcombine.low %v4467_v56, %v4471_v57  ;;  %v9959_v3 = vcombine.low %v4468_v58, %v4472_v59  ;;  %v9968_v54 = vcombine.high %v4476_v0, %v4480_v1  ;;  %v4515_v57 = vld [vmem:[%s11574_s26 + $0x450] sm:$0xff] }
 0x365   : > { %8019 = vmatprep.subr.bf16.mxu1 %v9920_v4  ;;  %v9966_v4 = vcombine.high %v4475_v62, %v4479_v63  ;;  %v4519_v58 = vld [vmem:[%s11574_s26 + $0x470] sm:$0xff]  ;;  %v9997_v59 = vcombine.low %v4507_v41, %v4511_v18 }
 0x367   : > { %7848 = vmatpush1.bf16.msra.mxu0 %v9917_v9  ;;  %v4488_v9 = vld [vmem:[%s11574_s26 + $0x378] sm:$0xff] }
 0x368   : > { %8020 = vmatpush1.bf16.msra.mxu1 %v9919_v10  ;;  %7849 = vmatprep.subr.bf16.mxu0 %v9926_v11  ;;  %v9965_v10 = vcombine.low %v4475_v62, %v4479_v63  ;;  %v9967_v11 = vcombine.low %v4476_v0, %v4480_v1  ;;  %v9976_v13 = vcombine.high %v4484_v8, %v4488_v9  ;;  %v4523_v62 = vld [vmem:[%s11574_s26 + $0x490] sm:$0xff]  ;;  %v4524_v1 = vld [vmem:[%s11574_s26 + $0x498] sm:$0xff] }
 0x369   : > { %8021 = vmatprep.subr.bf16.mxu1 %v9928_v12  ;;  %v9974_v12 = vcombine.high %v4483_v5, %v4487_v7  ;;  %v4527_v63 = vld [vmem:[%s11574_s26 + $0x4b0] sm:$0xff] }
 0x36b   : > { %7850 = vmatpush1.bf16.msra.mxu0 %v9925_v27  ;;  %v4496_v27 = vld [vmem:[%s11574_s26 + $0x3b8] sm:$0xff] }
 0x36c   : > { %8022 = vmatpush1.bf16.msra.mxu1 %v9927_v31  ;;  %7851 = vmatprep.subr.bf16.mxu0 %v9934_v33  ;;  %v9973_v31 = vcombine.low %v4483_v5, %v4487_v7  ;;  %v9975_v33 = vcombine.low %v4484_v8, %v4488_v9  ;;  %v9984_v36 = vcombine.high %v4492_v25, %v4496_v27  ;;  %v4531_v7 = vld [vmem:[%s11574_s26 + $0x4d0] sm:$0xff]  ;;  %v4532_v9 = vld [vmem:[%s11574_s26 + $0x4d8] sm:$0xff] }
 0x36d   : > { %8023 = vmatprep.subr.bf16.mxu1 %v9936_v35  ;;  %v9982_v35 = vcombine.high %v4491_v19, %v4495_v20  ;;  %v4535_v8 = vld [vmem:[%s11574_s26 + $0x4f0] sm:$0xff] }
 0x36f   : > { %7852 = vmatpush1.bf16.msra.mxu0 %v9933_v46  ;;  %v4504_v46 = vld [vmem:[%s11574_s26 + $0x3f8] sm:$0xff] }
 0x370   : > { %8024 = vmatpush1.bf16.msra.mxu1 %v9935_v22  ;;  %7853 = vmatprep.subr.bf16.mxu0 %v9942_v38  ;;  %v9981_v22 = vcombine.low %v4491_v19, %v4495_v20  ;;  %v9983_v38 = vcombine.low %v4492_v25, %v4496_v27  ;;  %v9992_v40 = vcombine.high %v4500_v45, %v4504_v46  ;;  %v4543_v19 = vld [vmem:[%s11574_s26 + $0x530] sm:$0xff]  ;;  %v4540_v20 = vld [vmem:[%s11574_s26 + $0x518] sm:$0xff] }
 0x371   : > { %8025 = vmatprep.subr.bf16.mxu1 %v9944_v39  ;;  %v9990_v39 = vcombine.high %v4499_v37, %v4503_v43  ;;  %v4544_v25 = vld [vmem:[%s11574_s26 + $0x538] sm:$0xff]  ;;  %v10021_v27 = vcombine.low %v4531_v7, %v4535_v8 }
 0x373   : > { %7854 = vmatpush1.bf16.msra.mxu0 %v9941_v51  ;;  %v4512_v51 = vld [vmem:[%s11574_s26 + $0x438] sm:$0xff] }
 0x374   : > { %8026 = vmatpush1.bf16.msra.mxu1 %v9943_v52  ;;  %7855 = vmatprep.subr.bf16.mxu0 %v9950_v53  ;;  %v9989_v52 = vcombine.low %v4499_v37, %v4503_v43  ;;  %v9991_v53 = vcombine.low %v4500_v45, %v4504_v46  ;;  %v10000_v56 = vcombine.high %v4508_v32, %v4512_v51  ;;  %v4551_v37 = vld [vmem:[%s11574_s26 + $0x570] sm:$0xff]  ;;  %v4548_v43 = vld [vmem:[%s11574_s26 + $0x558] sm:$0xff] }
 0x375   : > { %8027 = vmatprep.subr.bf16.mxu1 %v9952_v55  ;;  %v9998_v55 = vcombine.high %v4507_v41, %v4511_v18  ;;  %v4552_v45 = vld [vmem:[%s11574_s26 + $0x578] sm:$0xff]  ;;  %v4559_v41 = vld [vmem:[%s11574_s26 + $0x5b0] sm:$0xff] }
 0x376   : > { %v4556_v18 = vld [vmem:[%s11574_s26 + $0x598] sm:$0xff] }
 0x377   : > { %7856 = vmatpush1.bf16.msra.mxu0 %v9949_v15  ;;  %v4516_v15 = vld [vmem:[%s11574_s26 + $0x458] sm:$0xff] }
 0x378   : > { %8028 = vmatpush1.bf16.msra.mxu1 %v9951_v42  ;;  %7857 = vmatprep.subr.bf16.mxu0 %v9958_v44  ;;  %v4520_v42 = vld [vmem:[%s11574_s26 + $0x478] sm:$0xff]  ;;  %v9999_v44 = vcombine.low %v4508_v32, %v4512_v51 }
 0x379   : > { %8029 = vmatprep.subr.bf16.mxu1 %v9960_v61  ;;  %v10006_v61 = vcombine.high %v4515_v57, %v4519_v58  ;;  %v10008_v0 = vcombine.high %v4516_v15, %v4520_v42  ;;  %v4560_v32 = vld [vmem:[%s11574_s26 + $0x5b8] sm:$0xff] }
 0x37b   : > { %7858 = vmatpush1.bf16.msra.mxu0 %v9957_v60  ;;  %v4528_v60 = vld [vmem:[%s11574_s26 + $0x4b8] sm:$0xff] }
 0x37c   : > { %8030 = vmatpush1.bf16.msra.mxu1 %v9959_v3  ;;  %7859 = vmatprep.subr.bf16.mxu0 %v9966_v4  ;;  %v10005_v3 = vcombine.low %v4515_v57, %v4519_v58  ;;  %v10007_v4 = vcombine.low %v4516_v15, %v4520_v42  ;;  %v10016_v5 = vcombine.high %v4524_v1, %v4528_v60  ;;  %v4567_v57 = vld [vmem:[%s11574_s26 + $0x5f0] sm:$0xff]  ;;  %v4564_v58 = vld [vmem:[%s11574_s26 + $0x5d8] sm:$0xff] }
 0x37d   : > { %8031 = vmatprep.subr.bf16.mxu1 %v9968_v54  ;;  %v10014_v54 = vcombine.high %v4523_v62, %v4527_v63  ;;  %v10047_v42 = vcombine.low %v4556_v18, %v4560_v32 }
 0x37f   : > { %7860 = vmatpush1.bf16.msra.mxu0 %v9965_v10  ;;  %v10013_v10 = vcombine.low %v4523_v62, %v4527_v63  ;;  %v4571_v62 = vld [vmem:[%s11574_s26 + $0x610] sm:$0xff] }
 0x380   : > { %8032 = vmatpush1.bf16.msra.mxu1 %v9967_v11  ;;  %7861 = vmatprep.subr.bf16.mxu0 %v9974_v12  ;;  %v10015_v11 = vcombine.low %v4524_v1, %v4528_v60  ;;  %v10022_v12 = vcombine.high %v4531_v7, %v4535_v8  ;;  %v4575_v63 = vld [vmem:[%s11574_s26 + $0x630] sm:$0xff]  ;;  %v4576_v1 = vld [vmem:[%s11574_s26 + $0x638] sm:$0xff] }
 0x381   : > { %8033 = vmatprep.subr.bf16.mxu1 %v9976_v13  ;;  %v4539_v13 = vld [vmem:[%s11574_s26 + $0x510] sm:$0xff]  ;;  %v4580_v8 = vld [vmem:[%s11574_s26 + $0x658] sm:$0xff] }
 0x382   : > { %v10029_v46 = vcombine.low %v4539_v13, %v4543_v19  ;;  %v4583_v7 = vld [vmem:[%s11574_s26 + $0x670] sm:$0xff] }
 0x383   : > { %7862 = vmatpush1.bf16.msra.mxu0 %v9973_v31 }
 0x384   : > { %8034 = vmatpush1.bf16.msra.mxu1 %v9975_v33  ;;  %7863 = vmatprep.subr.bf16.mxu0 %v9982_v35  ;;  %v10030_v33 = vcombine.high %v4539_v13, %v4543_v19  ;;  %v10032_v35 = vcombine.high %v4540_v20, %v4544_v25  ;;  %v4591_v13 = vld [vmem:[%s11574_s26 + $0x6b0] sm:$0xff]  ;;  %v4588_v19 = vld [vmem:[%s11574_s26 + $0x698] sm:$0xff] }
 0x385   : > { %8035 = vmatprep.subr.bf16.mxu1 %v9984_v36  ;;  %v4547_v36 = vld [vmem:[%s11574_s26 + $0x550] sm:$0xff] }
 0x386   : > { %v10037_v51 = vcombine.low %v4547_v36, %v4551_v37 }
 0x387   : > { %7864 = vmatpush1.bf16.msra.mxu0 %v9981_v22  ;;  %v10031_v22 = vcombine.low %v4540_v20, %v4544_v25  ;;  %v4592_v20 = vld [vmem:[%s11574_s26 + $0x6b8] sm:$0xff] }
 0x388   : > { %8036 = vmatpush1.bf16.msra.mxu1 %v9983_v38  ;;  %7865 = vmatprep.subr.bf16.mxu0 %v9990_v39  ;;  %v10038_v38 = vcombine.high %v4547_v36, %v4551_v37  ;;  %v10040_v39 = vcombine.high %v4548_v43, %v4552_v45  ;;  %v4599_v36 = vld [vmem:[%s11574_s26 + $0x6f0] sm:$0xff]  ;;  %v4596_v37 = vld [vmem:[%s11574_s26 + $0x6d8] sm:$0xff] }
 0x389   : > { %8037 = vmatprep.subr.bf16.mxu1 %v9992_v40  ;;  %v4555_v40 = vld [vmem:[%s11574_s26 + $0x590] sm:$0xff] }
 0x38a   : > { %v10045_v15 = vcombine.low %v4555_v40, %v4559_v41 }
 0x38b   : > { %7866 = vmatpush1.bf16.msra.mxu0 %v9989_v52  ;;  %v10039_v52 = vcombine.low %v4548_v43, %v4552_v45  ;;  %v4600_v43 = vld [vmem:[%s11574_s26 + $0x6f8] sm:$0xff] }
 0x38c   : > { %8038 = vmatpush1.bf16.msra.mxu1 %v9991_v53  ;;  %7878 = vmatprep.subr.bf16.mxu0 %v9998_v55  ;;  %v10046_v53 = vcombine.high %v4555_v40, %v4559_v41  ;;  %v10048_v55 = vcombine.high %v4556_v18, %v4560_v32  ;;  %v4607_v40 = vld [vmem:[%s11574_s26 + $0x730] sm:$0xff]  ;;  %v4604_v41 = vld [vmem:[%s11574_s26 + $0x718] sm:$0xff] }
 0x38d   : > { %8050 = vmatprep.subr.bf16.mxu1 %v10000_v56  ;;  %v4563_v56 = vld [vmem:[%s11574_s26 + $0x5d0] sm:$0xff]  ;;  %v4608_v18 = vld [vmem:[%s11574_s26 + $0x738] sm:$0xff] }
 0x38e   : > { %7868 = vmatmul.mubr.bf16.vlgmr.msra.gmra.mrb[12].mxu0 %v11535_v16  ;;  %v10053_v60 = vcombine.low %v4563_v56, %v4567_v57 }
 0x38f   : > { %8040 = vmatmul.mubr.bf16.vlgmr.msra.gmra.mrb[12].mxu1 %v11535_v16  ;;  %7879 = vmatpush1.bf16.msra.mxu0 %v9997_v59  ;;  %v4536_v16 = vld [vmem:[%s11574_s26 + $0x4f8] sm:$0xff] }
 0x390   : > { %7910 = vmatprep.mubr.bf16.mxu0 %v11543_v29  ;;  %8051 = vmatpush1.bf16.msra.mxu1 %v9999_v44  ;;  %v10023_v31 = vcombine.low %v4532_v9, %v4536_v16  ;;  %v4568_v59 = vld [vmem:[%s11574_s26 + $0x5f8] sm:$0xff]  ;;  %v10054_v44 = vcombine.high %v4563_v56, %v4567_v57  ;;  %v4615_v56 = vld [vmem:[%s11574_s26 + $0x770] sm:$0xff] }
 0x391   : > { %8082 = vmatprep.mubr.bf16.mxu1 %v11543_v29  ;;  %7880 = vmatprep.subr.bf16.mxu0 %v10006_v61  ;;  %v10024_v29 = vcombine.high %v4532_v9, %v4536_v16  ;;  %v10056_v61 = vcombine.high %v4564_v58, %v4568_v59  ;;  %v4584_v9 = vld [vmem:[%s11574_s26 + $0x678] sm:$0xff]  ;;  %v10061_v16 = vcombine.low %v4571_v62, %v4575_v63 }
 0x392   : > { %8052 = vmatprep.subr.bf16.mxu1 %v10008_v0  ;;  %v4572_v0 = vld [vmem:[%s11574_s26 + $0x618] sm:$0xff] }
 0x393   : > { %7881 = vmatpush1.bf16.msra.mxu0 %v10005_v3  ;;  %v10055_v3 = vcombine.low %v4564_v58, %v4568_v59  ;;  %v4612_v57 = vld [vmem:[%s11574_s26 + $0x758] sm:$0xff] }
 0x394   : > { %8053 = vmatpush1.bf16.msra.mxu1 %v10007_v4  ;;  %7882 = vmatprep.subr.bf16.mxu0 %v10014_v54  ;;  %v10062_v4 = vcombine.high %v4571_v62, %v4575_v63  ;;  %v10064_v54 = vcombine.high %v4572_v0, %v4576_v1  ;;  %v4616_v58 = vld [vmem:[%s11574_s26 + $0x778] sm:$0xff]  ;;  %v4623_v62 = vld [vmem:[%s11574_s26 + $0x7b0] sm:$0xff] }
 0x395   : > { %8054 = vmatprep.subr.bf16.mxu1 %v10016_v5  ;;  %v4579_v5 = vld [vmem:[%s11574_s26 + $0x650] sm:$0xff]  ;;  %v4620_v63 = vld [vmem:[%s11574_s26 + $0x798] sm:$0xff] }
 0x396   : > { %v10069_v25 = vcombine.low %v4579_v5, %v4583_v7 }
 0x397   : > { %7883 = vmatpush1.bf16.msra.mxu0 %v10013_v10  ;;  %v10063_v10 = vcombine.low %v4572_v0, %v4576_v1  ;;  %v4624_v0 = vld [vmem:[%s11574_s26 + $0x7b8] sm:$0xff] }
 0x398   : > { %8055 = vmatpush1.bf16.msra.mxu1 %v10015_v11  ;;  %7884 = vmatprep.subr.bf16.mxu0 %v10022_v12  ;;  %v10070_v11 = vcombine.high %v4579_v5, %v4583_v7  ;;  %v10072_v12 = vcombine.high %v4580_v8, %v4584_v9  ;;  %v4631_v5 = vld [vmem:[%s11574_s26 + $0x7f0] sm:$0xff]  ;;  %v4628_v7 = vld [vmem:[%s11574_s26 + $0x7d8] sm:$0xff] }
 0x399   : > { %8056 = vmatprep.subr.bf16.mxu1 %v10024_v29  ;;  %v4587_v29 = vld [vmem:[%s11574_s26 + $0x690] sm:$0xff] }
 0x39a   : > { %v10077_v45 = vcombine.low %v4587_v29, %v4591_v13 }
 0x39b   : > { %7885 = vmatpush1.bf16.msra.mxu0 %v10021_v27  ;;  %v10071_v27 = vcombine.low %v4580_v8, %v4584_v9  ;;  %v4632_v8 = vld [vmem:[%s11574_s26 + $0x7f8] sm:$0xff] }
 0x39c   : > { %8057 = vmatpush1.bf16.msra.mxu1 %v10023_v31  ;;  %7886 = vmatprep.subr.bf16.mxu0 %v10030_v33  ;;  %v10078_v31 = vcombine.high %v4587_v29, %v4591_v13  ;;  %v10080_v33 = vcombine.high %v4588_v19, %v4592_v20  ;;  %v4639_v29 = vld [vmem:[%s11574_s26 + $0x830] sm:$0xff]  ;;  %v4636_v13 = vld [vmem:[%s11574_s26 + $0x818] sm:$0xff] }
 0x39d   : > { %8058 = vmatprep.subr.bf16.mxu1 %v10032_v35  ;;  %v4595_v35 = vld [vmem:[%s11574_s26 + $0x6d0] sm:$0xff] }
 0x39e   : > { %v10085_v32 = vcombine.low %v4595_v35, %v4599_v36 }
 0x39f   : > { %7887 = vmatpush1.bf16.msra.mxu0 %v10029_v46  ;;  %v10079_v46 = vcombine.low %v4588_v19, %v4592_v20  ;;  %v4640_v19 = vld [vmem:[%s11574_s26 + $0x838] sm:$0xff] }
 0x3a0   : > { %8059 = vmatpush1.bf16.msra.mxu1 %v10031_v22  ;;  %7888 = vmatprep.subr.bf16.mxu0 %v10038_v38  ;;  %v10086_v22 = vcombine.high %v4595_v35, %v4599_v36  ;;  %v10088_v38 = vcombine.high %v4596_v37, %v4600_v43  ;;  %v4647_v35 = vld [vmem:[%s11574_s26 + $0x870] sm:$0xff] }
 0x3a1   : > { %8060 = vmatprep.subr.bf16.mxu1 %v10040_v39  ;;  %v4603_v39 = vld [vmem:[%s11574_s26 + $0x710] sm:$0xff] }
 0x3a2   : > { %v10093_v59 = vcombine.low %v4603_v39, %v4607_v40 }
 0x3a3   : > { %7889 = vmatpush1.bf16.msra.mxu0 %v10037_v51  ;;  %v10087_v51 = vcombine.low %v4596_v37, %v4600_v43  ;;  %v4644_v37 = vld [vmem:[%s11574_s26 + $0x858] sm:$0xff] }
 0x3a4   : > { %8061 = vmatpush1.bf16.msra.mxu1 %v10039_v52  ;;  %7890 = vmatprep.subr.bf16.mxu0 %v10046_v53  ;;  %v10094_v52 = vcombine.high %v4603_v39, %v4607_v40  ;;  %v10096_v53 = vcombine.high %v4604_v41, %v4608_v18  ;;  %v4648_v43 = vld [vmem:[%s11574_s26 + $0x878] sm:$0xff] }
 0x3a5   : > { %8062 = vmatprep.subr.bf16.mxu1 %v10048_v55  ;;  %v4611_v55 = vld [vmem:[%s11574_s26 + $0x750] sm:$0xff]  ;;  %v4652_v39 = vld [vmem:[%s11574_s26 + $0x898] sm:$0xff]  ;;  %v10136_v40 = vcombine.high %v4644_v37, %v4648_v43 }
 0x3a6   : > { %v10101_v1 = vcombine.low %v4611_v55, %v4615_v56 }
 0x3a7   : > { %7891 = vmatpush1.bf16.msra.mxu0 %v10045_v15  ;;  %v10095_v15 = vcombine.low %v4604_v41, %v4608_v18  ;;  %v4656_v41 = vld [vmem:[%s11574_s26 + $0x8b8] sm:$0xff] }
 0x3a8   : > { %8063 = vmatpush1.bf16.msra.mxu1 %v10047_v42  ;;  %7892 = vmatprep.subr.bf16.mxu0 %v10054_v44  ;;  %v10102_v42 = vcombine.high %v4611_v55, %v4615_v56  ;;  %v10104_v44 = vcombine.high %v4612_v57, %v4616_v58  ;;  %v4663_v55 = vld [vmem:[%s11574_s26 + $0x8f0] sm:$0xff]  ;;  %v4660_v56 = vld [vmem:[%s11574_s26 + $0x8d8] sm:$0xff] }
 0x3a9   : > { %8064 = vmatprep.subr.bf16.mxu1 %v10056_v61  ;;  %v4619_v61 = vld [vmem:[%s11574_s26 + $0x790] sm:$0xff] }
 0x3aa   : > { %v10109_v9 = vcombine.low %v4619_v61, %v4623_v62 }
 0x3ab   : > { %7893 = vmatpush1.bf16.msra.mxu0 %v10053_v60  ;;  %v10103_v60 = vcombine.low %v4612_v57, %v4616_v58  ;;  %v4667_v58 = vld [vmem:[%s11574_s26 + $0x910] sm:$0xff] }
 0x3ac   : > { %8065 = vmatpush1.bf16.msra.mxu1 %v10055_v3  ;;  %7894 = vmatprep.subr.bf16.mxu0 %v10062_v4  ;;  %v10110_v3 = vcombine.high %v4619_v61, %v4623_v62  ;;  %v10112_v4 = vcombine.high %v4620_v63, %v4624_v0  ;;  %v4672_v61 = vld [vmem:[%s11574_s26 + $0x938] sm:$0xff] }
 0x3ad   : > { %8066 = vmatprep.subr.bf16.mxu1 %v10064_v54  ;;  %v4627_v54 = vld [vmem:[%s11574_s26 + $0x7d0] sm:$0xff] }
 0x3ae   : > { %v10117_v20 = vcombine.low %v4627_v54, %v4631_v5 }
 0x3af   : > { %7895 = vmatpush1.bf16.msra.mxu0 %v10061_v16  ;;  %v10111_v16 = vcombine.low %v4620_v63, %v4624_v0  ;;  %v4675_v63 = vld [vmem:[%s11574_s26 + $0x950] sm:$0xff] }
 0x3b0   : > { %8067 = vmatpush1.bf16.msra.mxu1 %v10063_v10  ;;  %7896 = vmatprep.subr.bf16.mxu0 %v10070_v11  ;;  %v10118_v10 = vcombine.high %v4627_v54, %v4631_v5  ;;  %v10120_v11 = vcombine.high %v4628_v7, %v4632_v8  ;;  %v4680_v54 = vld [vmem:[%s11574_s26 + $0x978] sm:$0xff] }
 0x3b1   : > { %8068 = vmatprep.subr.bf16.mxu1 %v10072_v12  ;;  %v4635_v12 = vld [vmem:[%s11574_s26 + $0x810] sm:$0xff] }
 0x3b2   : > { %v10125_v36 = vcombine.low %v4635_v12, %v4639_v29 }
 0x3b3   : > { %7897 = vmatpush1.bf16.msra.mxu0 %v10069_v25  ;;  %v10119_v25 = vcombine.low %v4628_v7, %v4632_v8  ;;  %v4683_v7 = vld [vmem:[%s11574_s26 + $0x990] sm:$0xff] }
 0x3b4   : > { %8069 = vmatpush1.bf16.msra.mxu1 %v10071_v27  ;;  %7898 = vmatprep.subr.bf16.mxu0 %v10078_v31  ;;  %v10126_v27 = vcombine.high %v4635_v12, %v4639_v29  ;;  %v10128_v31 = vcombine.high %v4636_v13, %v4640_v19  ;;  %v4688_v12 = vld [vmem:[%s11574_s26 + $0x9b8] sm:$0xff] }
 0x3b5   : > { %8070 = vmatprep.subr.bf16.mxu1 %v10080_v33  ;;  %v4643_v33 = vld [vmem:[%s11574_s26 + $0x850] sm:$0xff] }
 0x3b6   : > { %v10133_v18 = vcombine.low %v4643_v33, %v4647_v35 }
 0x3b7   : > { %7899 = vmatpush1.bf16.msra.mxu0 %v10077_v45  ;;  %v10127_v45 = vcombine.low %v4636_v13, %v4640_v19  ;;  %v4691_v13 = vld [vmem:[%s11574_s26 + $0x9d0] sm:$0xff] }
 0x3b8   : > { %8071 = vmatpush1.bf16.msra.mxu1 %v10079_v46  ;;  %7900 = vmatprep.subr.bf16.mxu0 %v10086_v22  ;;  %v10134_v46 = vcombine.high %v4643_v33, %v4647_v35  ;;  %v4651_v22 = vld [vmem:[%s11574_s26 + $0x890] sm:$0xff]  ;;  %v4696_v33 = vld [vmem:[%s11574_s26 + $0x9f8] sm:$0xff] }
 0x3b9   : > { %8072 = vmatprep.subr.bf16.mxu1 %v10088_v38  ;;  %v4655_v38 = vld [vmem:[%s11574_s26 + $0x8b0] sm:$0xff] }
 0x3ba   : > { %v10141_v57 = vcombine.low %v4651_v22, %v4655_v38 }
 0x3bb   : > { %7901 = vmatpush1.bf16.msra.mxu0 %v10085_v32  ;;  %v10135_v32 = vcombine.low %v4644_v37, %v4648_v43 }
 0x3bc   : > { %8073 = vmatpush1.bf16.msra.mxu1 %v10087_v51  ;;  %7902 = vmatprep.subr.bf16.mxu0 %v10094_v52  ;;  %v10142_v51 = vcombine.high %v4651_v22, %v4655_v38  ;;  %v4659_v52 = vld [vmem:[%s11574_s26 + $0x8d0] sm:$0xff]  ;;  %v4700_v22 = vld [vmem:[%s11574_s26 + $0xa18] sm:$0xff]  ;;  %v8202_v38 = vmul.u32 1024, %v11497_v6 }
 0x3bd   : > { %8074 = vmatprep.subr.bf16.mxu1 %v10096_v53  ;;  %v10144_v53 = vcombine.high %v4652_v39, %v4656_v41  ;;  %v10149_v62 = vcombine.low %v4659_v52, %v4663_v55 }
 0x3bf   : > { %7903 = vmatpush1.bf16.msra.mxu0 %v10093_v59  ;;  %v10143_v59 = vcombine.low %v4652_v39, %v4656_v41  ;;  %v4704_v39 = vld [vmem:[%s11574_s26 + $0xa38] sm:$0xff] }
 0x3c0   : > { %8075 = vmatpush1.bf16.msra.mxu1 %v10095_v15  ;;  %7904 = vmatprep.subr.bf16.mxu0 %v10102_v42  ;;  %v10150_v15 = vcombine.high %v4659_v52, %v4663_v55  ;;  %v4671_v42 = vld [vmem:[%s11574_s26 + $0x930] sm:$0xff]  ;;  %v10192_v55 = vcombine.high %v4700_v22, %v4704_v39 }
 0x3c1   : > { %8076 = vmatprep.subr.bf16.mxu1 %v10104_v44  ;;  %v4668_v44 = vld [vmem:[%s11574_s26 + $0x918] sm:$0xff]  ;;  %v10157_v5 = vcombine.low %v4667_v58, %v4671_v42 }
 0x3c2   : > { %v10159_v8 = vcombine.low %v4668_v44, %v4672_v61 }
 0x3c3   : > { %7905 = vmatpush1.bf16.msra.mxu0 %v10101_v1  ;;  %v10158_v1 = vcombine.high %v4667_v58, %v4671_v42  ;;  %v8201_v58 = vadd.s32 8, %v11497_v6 }
 0x3c4   : > { %8077 = vmatpush1.bf16.msra.mxu1 %v10103_v60  ;;  %7906 = vmatprep.subr.bf16.mxu0 %v10110_v3  ;;  %v4679_v60 = vld [vmem:[%s11574_s26 + $0x970] sm:$0xff]  ;;  %v10160_v3 = vcombine.high %v4668_v44, %v4672_v61  ;;  %v4716_v61 = vld [vmem:[%s11574_s26 + $0xa98] sm:$0xff] }
 0x3c5   : > { %8078 = vmatprep.subr.bf16.mxu1 %v10112_v4  ;;  %v4676_v4 = vld [vmem:[%s11574_s26 + $0x958] sm:$0xff]  ;;  %v10165_v29 = vcombine.low %v4675_v63, %v4679_v60 }
 0x3c6   : > { %v10167_v19 = vcombine.low %v4676_v4, %v4680_v54 }
 0x3c7   : > { %7907 = vmatpush1.bf16.msra.mxu0 %v10109_v9  ;;  %v10166_v9 = vcombine.high %v4675_v63, %v4679_v60 }
 0x3c8   : > { %8079 = vmatpush1.bf16.msra.mxu1 %v10111_v16  ;;  %7908 = vmatprep.subr.bf16.mxu0 %v10118_v10  ;;  %v4687_v16 = vld [vmem:[%s11574_s26 + $0x9b0] sm:$0xff]  ;;  %v10168_v10 = vcombine.high %v4676_v4, %v4680_v54 }
 0x3c9   : > { %8080 = vmatprep.subr.bf16.mxu1 %v10120_v11  ;;  %v4684_v11 = vld [vmem:[%s11574_s26 + $0x998] sm:$0xff]  ;;  %v10173_v35 = vcombine.low %v4683_v7, %v4687_v16  ;;  %v4723_v54 = vld [vmem:[%s11574_s26 + $0xad0] sm:$0xff] }
 0x3ca   : > { %v10175_v37 = vcombine.low %v4684_v11, %v4688_v12 }
 0x3cb   : > { %7909 = vmatpush1.bf16.msra.mxu0 %v10117_v20  ;;  %v10174_v20 = vcombine.high %v4683_v7, %v4687_v16 }
 0x3cc   : > { %8081 = vmatpush1.bf16.msra.mxu1 %v10119_v25  ;;  %7921 = vmatprep.subr.bf16.mxu0 %v10126_v27  ;;  %v4695_v25 = vld [vmem:[%s11574_s26 + $0x9f0] sm:$0xff]  ;;  %v10176_v27 = vcombine.high %v4684_v11, %v4688_v12  ;;  %v4724_v11 = vld [vmem:[%s11574_s26 + $0xad8] sm:$0xff] }
 0x3cd   : > { %8093 = vmatprep.subr.bf16.mxu1 %v10128_v31  ;;  %v4692_v31 = vld [vmem:[%s11574_s26 + $0x9d8] sm:$0xff]  ;;  %v10182_v43 = vcombine.high %v4691_v13, %v4695_v25  ;;  %v10181_v41 = vcombine.low %v4691_v13, %v4695_v25  ;;  %v4731_v25 = vld [vmem:[%s11574_s26 + $0xb10] sm:$0xff] }
 0x3ce   : > { %7911 = vmatmul.mubr.bf16.vlgmr.msra.gmra.mrb[12].mxu0 %v11537_v21 }
 0x3cf   : > { %8083 = vmatmul.mubr.bf16.vlgmr.msra.gmra.mrb[12].mxu1 %v11537_v21  ;;  %7922 = vmatpush1.bf16.msra.mxu0 %v10125_v36  ;;  %v4664_v21 = vld [vmem:[%s11574_s26 + $0x8f8] sm:$0xff]  ;;  %v4699_v36 = vld [vmem:[%s11574_s26 + $0xa10] sm:$0xff] }
 0x3d0   : > { %7953 = vmatprep.mubr.bf16.mxu0 %v11817_v30  ;;  %8094 = vmatpush1.bf16.msra.mxu1 %v10127_v45  ;;  %v10151_v0 = vcombine.low %v4660_v56, %v4664_v21  ;;  %v4703_v45 = vld [vmem:[%s11574_s26 + $0xa30] sm:$0xff] }
 0x3d1   : > { %8125 = vmatprep.mubr.bf16.mxu1 %v11817_v30  ;;  %7923 = vmatprep.subr.bf16.mxu0 %v10134_v46  ;;  %v10152_v30 = vcombine.high %v4660_v56, %v4664_v21  ;;  %v10184_v46 = vcombine.high %v4692_v31, %v4696_v33  ;;  %v10190_v52 = vcombine.high %v4699_v36, %v4703_v45  ;;  %v4708_v56 = vld [vmem:[%s11574_s26 + $0xa58] sm:$0xff] }
 0x3d2   : > { %8095 = vmatprep.subr.bf16.mxu1 %v10136_v40  ;;  %v8204_v40 = vstv %s12067_s18 }
 0x3d3   : > { %7924 = vmatpush1.bf16.msra.mxu0 %v10133_v18  ;;  %v4707_v18 = vld [vmem:[%s11574_s26 + $0xa50] sm:$0xff]  ;;  %v12080_v21 = vadd.s32 %v8204_v40, %v8202_v38 }
 0x3d4   : > { %8096 = vmatpush1.bf16.msra.mxu1 %v10135_v32  ;;  %7925 = vmatprep.subr.bf16.mxu0 %v10142_v51  ;;  %v12076_v32 = vand.u32 127, %v1065_v2  ;;  %v10183_v51 = vcombine.low %v4692_v31, %v4696_v33  ;;  %v4719_v2 = vld [vmem:[%s11574_s26 + $0xab0] sm:$0xff] }
 0x3d5   : > { %8097 = vmatprep.subr.bf16.mxu1 %v10144_v53  ;;  %v4711_v53 = vld [vmem:[%s11574_s26 + $0xa70] sm:$0xff] }
 0x3d6   : > { %v12087_v42 = vadd.s32 256, %v12076_v32  ;;  %v10198_v44 = vcombine.high %v4707_v18, %v4711_v53  ;;  %v12097_v60 = vadd.s32 384, %v12076_v32  ;;  %v10197_v4 = vcombine.low %v4707_v18, %v4711_v53  ;;  %v4740_v53 = vld [vmem:[%s11574_s26 + $0xb58] sm:$0xff] }
 0x3d7   : > { %7926 = vmatpush1.bf16.msra.mxu0 %v10141_v57  ;;  %v4712_v57 = vld [vmem:[%s11574_s26 + $0xa78] sm:$0xff] }
 0x3d8   : > { %8098 = vmatpush1.bf16.msra.mxu1 %v10143_v59  ;;  %7927 = vmatprep.subr.bf16.mxu0 %v10150_v15  ;;  %v10189_v59 = vcombine.low %v4699_v36, %v4703_v45  ;;  %v4715_v15 = vld [vmem:[%s11574_s26 + $0xa90] sm:$0xff]  ;;  %v10200_v63 = vcombine.high %v4708_v56, %v4712_v57  ;;  %v10199_v7 = vcombine.low %v4708_v56, %v4712_v57 }
 0x3d9   : > { %8099 = vmatprep.subr.bf16.mxu1 %v10152_v30  ;;  %v10191_v30 = vcombine.low %v4700_v22, %v4704_v39  ;;  %v8219_v13 = vadd.s32 %v12097_v60, %v12080_v21 }
 0x3db   : > { %7928 = vmatpush1.bf16.msra.mxu0 %v10149_v62  ;;  %v12091_v62 = vadd.s32 128, %v12076_v32  ;;  %v8235_v22 = vshrl.u32 %v8219_v13, 16 }
 0x3dc   : > { %8100 = vmatpush1.bf16.msra.mxu1 %v10151_v0  ;;  %7929 = vmatprep.subr.bf16.mxu0 %v10158_v1  ;;  %v4720_v0 = vld [vmem:[%s11574_s26 + $0xab8] sm:$0xff]  ;;  %v8216_v1 = vadd.s32 %v12076_v32, %v12080_v21 }
 0x3dd   : > { %8101 = vmatprep.subr.bf16.mxu1 %v10160_v3  ;;  %v8203_v3 = vmul.u32 1024, %v8201_v58  ;;  %v8217_v16 = vadd.s32 %v12091_v62, %v12080_v21  ;;  %v10207_v31 = vcombine.low %v4716_v61, %v4720_v0  ;;  %v4744_v58 = vld [vmem:[%s11574_s26 + $0xb78] sm:$0xff] }
 0x3de   : > { %v8232_v12 = vshrl.u32 %v8216_v1, 16 }
 0x3df   : > { %7930 = vmatpush1.bf16.msra.mxu0 %v10157_v5  ;;  %v8218_v5 = vadd.s32 %v12087_v42, %v12080_v21  ;;  %v8233_v36 = vshrl.u32 %v8217_v16, 16 }
 0x3e0   : > { %8102 = vmatpush1.bf16.msra.mxu1 %v10159_v8  ;;  %7931 = vmatprep.subr.bf16.mxu0 %v10166_v9  ;;  %v10206_v8 = vcombine.high %v4715_v15, %v4719_v2  ;;  %v4727_v9 = vld [vmem:[%s11574_s26 + $0xaf0] sm:$0xff]  ;;  %v12114_v45 = vxor.u32 %v8232_v12, %v8216_v1  ;;  %v4748_v1 = vld [vmem:[%s11574_s26 + $0xb98] sm:$0xff] }
 0x3e1   : > { %8103 = vmatprep.subr.bf16.mxu1 %v10168_v10  ;;  %v10208_v10 = vcombine.high %v4716_v61, %v4720_v0  ;;  %v10214_v33 = vcombine.high %v4723_v54, %v4727_v9  ;;  %v10213_v39 = vcombine.low %v4723_v54, %v4727_v9  ;;  %v10232_v54 = vcombine.high %v4740_v53, %v4744_v58  ;;  %v4759_v12 = vld [vmem:[%s11574_s26 + $0xbf0] sm:$0xff] }
 0x3e2   : > { %v8264_v57 = vmul.u32 2146121005, %v12114_v45 }
 0x3e3   : > { %7932 = vmatpush1.bf16.msra.mxu0 %v10165_v29  ;;  %v4728_v29 = vld [vmem:[%s11574_s26 + $0xaf8] sm:$0xff] }
 0x3e4   : > { %8104 = vmatpush1.bf16.msra.mxu1 %v10167_v19  ;;  %7933 = vmatprep.subr.bf16.mxu0 %v10174_v20  ;;  %v12109_v19 = vadd.s32 %v8204_v40, %v8203_v3  ;;  %v10205_v20 = vcombine.low %v4715_v15, %v4719_v2  ;;  %v4739_v40 = vld [vmem:[%s11574_s26 + $0xb50] sm:$0xff] }
 0x3e5   : > { %8105 = vmatprep.subr.bf16.mxu1 %v10176_v27  ;;  %v8234_v27 = vshrl.u32 %v8218_v5, 16 }
 0x3e6   : > { %v8224_v38 = vadd.s32 %v12076_v32, %v12109_v19 }
 0x3e7   : > { %7934 = vmatpush1.bf16.msra.mxu0 %v10173_v35  ;;  %v4735_v35 = vld [vmem:[%s11574_s26 + $0xb30] sm:$0xff]  ;;  %v12121_v18 = vxor.u32 %v8234_v27, %v8218_v5  ;;  %v4752_v5 = vld [vmem:[%s11574_s26 + $0xbb8] sm:$0xff] }
 0x3e8   : > { %8106 = vmatpush1.bf16.msra.mxu1 %v10175_v37  ;;  %7935 = vmatprep.subr.bf16.mxu0 %v10182_v43  ;;  %v10216_v37 = vcombine.high %v4724_v11, %v4728_v29  ;;  %v4732_v43 = vld [vmem:[%s11574_s26 + $0xb18] sm:$0xff]  ;;  %v8240_v15 = vshrl.u32 %v8224_v38, 16  ;;  %v10221_v2 = vcombine.low %v4731_v25, %v4735_v35 }
 0x3e9   : > { %8107 = vmatprep.subr.bf16.mxu1 %v10184_v46  ;;  %v4736_v46 = vld [vmem:[%s11574_s26 + $0xb38] sm:$0xff]  ;;  %v8266_v61 = vmul.u32 2146121005, %v12121_v18 }
 0x3ea   : > { %v10224_v56 = vcombine.high %v4732_v43, %v4736_v46 }
 0x3eb   : > { %7936 = vmatpush1.bf16.msra.mxu0 %v10181_v41  ;;  %v4743_v41 = vld [vmem:[%s11574_s26 + $0xb70] sm:$0xff] }
 0x3ec   : > { %8108 = vmatpush1.bf16.msra.mxu1 %v10183_v51  ;;  %7937 = vmatprep.subr.bf16.mxu0 %v10190_v52  ;;  %v10215_v51 = vcombine.low %v4724_v11, %v4728_v29  ;;  %v10222_v52 = vcombine.high %v4731_v25, %v4735_v35  ;;  %v10230_v0 = vcombine.high %v4739_v40, %v4743_v41  ;;  %v4755_v11 = vld [vmem:[%s11574_s26 + $0xbd0] sm:$0xff]  ;;  %v8282_v29 = vshrl.u32 %v8266_v61, 15 }
 0x3ed   : > { %8109 = vmatprep.subr.bf16.mxu1 %v10192_v55  ;;  %v12124_v55 = vxor.u32 %v8233_v36, %v8217_v16  ;;  %v12143_v16 = vxor.u32 %v8240_v15, %v8224_v38  ;;  %v10246_v38 = vcombine.high %v4755_v11, %v4759_v12 }
 0x3ef   : > { %7938 = vmatpush1.bf16.msra.mxu0 %v10189_v59  ;;  %v12128_v59 = vxor.u32 %v8235_v22, %v8219_v13  ;;  %v8265_v3 = vmul.u32 2146121005, %v12124_v55  ;;  %v4756_v13 = vld [vmem:[%s11574_s26 + $0xbd8] sm:$0xff]  ;;  %v8272_v36 = vmul.u32 2146121005, %v12143_v16  ;;  %v10239_v22 = vcombine.low %v4748_v1, %v4752_v5 }
 0x3f0   : > { %8110 = vmatpush1.bf16.msra.mxu1 %v10191_v30  ;;  %7939 = vmatprep.subr.bf16.mxu0 %v10198_v44  ;;  %v4747_v30 = vld [vmem:[%s11574_s26 + $0xb90] sm:$0xff] }
 0x3f1   : > { %8111 = vmatprep.subr.bf16.mxu1 %v10200_v63  ;;  %v4751_v44 = vld [vmem:[%s11574_s26 + $0xbb0] sm:$0xff]  ;;  %v10223_v63 = vcombine.low %v4732_v43, %v4736_v46  ;;  %v8267_v9 = vmul.u32 2146121005, %v12128_v59  ;;  %v8281_v25 = vshrl.u32 %v8265_v3, 15 }
 0x3f2   : > { %v4763_v43 = vld [vmem:[%s11574_s26 + $0xc10] sm:$0xff] }
 0x3f3   : > { %7940 = vmatpush1.bf16.msra.mxu0 %v10197_v4  ;;  %v8226_v4 = vadd.s32 %v12087_v42, %v12109_v19  ;;  %v8280_v42 = vshrl.u32 %v8264_v57, 15  ;;  %v4767_v46 = vld [vmem:[%s11574_s26 + $0xc30] sm:$0xff] }
 0x3f4   : > { %8112 = vmatpush1.bf16.msra.mxu1 %v10199_v7  ;;  %7941 = vmatprep.subr.bf16.mxu0 %v10206_v8  ;;  %v8225_v7 = vadd.s32 %v12091_v62, %v12109_v19  ;;  %v8227_v8 = vadd.s32 %v12097_v60, %v12109_v19  ;;  %v10231_v62 = vcombine.low %v4740_v53, %v4744_v58 }
 0x3f5   : > { %8113 = vmatprep.subr.bf16.mxu1 %v10208_v10  ;;  %v10229_v10 = vcombine.low %v4739_v40, %v4743_v41  ;;  %v10238_v60 = vcombine.high %v4747_v30, %v4751_v44  ;;  %v8242_v27 = vshrl.u32 %v8226_v4, 16  ;;  %v4768_v40 = vld [vmem:[%s11574_s26 + $0xc38] sm:$0xff]  ;;  %v10254_v15 = vcombine.high %v4763_v43, %v4767_v46 }
 0x3f6   : > { %v8243_v35 = vshrl.u32 %v8227_v8, 16 }
 0x3f7   : > { %7942 = vmatpush1.bf16.msra.mxu0 %v10205_v20  ;;  %v4760_v20 = vld [vmem:[%s11574_s26 + $0xbf8] sm:$0xff] }
 0x3f8   : > { %8114 = vmatpush1.bf16.msra.mxu1 %v10207_v31  ;;  %7943 = vmatprep.subr.bf16.mxu0 %v10214_v33  ;;  %v10240_v31 = vcombine.high %v4748_v1, %v4752_v5  ;;  %v8241_v33 = vshrl.u32 %v8225_v7, 16  ;;  %v10248_v41 = vcombine.high %v4756_v13, %v4760_v20  ;;  %v10247_v58 = vcombine.low %v4756_v13, %v4760_v20  ;;  %v4772_v1 = vld [vmem:[%s11574_s26 + $0xc58] sm:$0xff] }
 0x3f9   : > { %8115 = vmatprep.subr.bf16.mxu1 %v10216_v37  ;;  %v10237_v37 = vcombine.low %v4747_v30, %v4751_v44  ;;  %v4775_v30 = vld [vmem:[%s11574_s26 + $0xc70] sm:$0xff]  ;;  %v4780_v20 = vld [vmem:[%s11574_s26 + $0xc98] sm:$0xff] }
 0x3fa   : > { %v8257_v53 = vxor.u32 %v8241_v33, %v8225_v7  ;;  %v8288_v33 = vshrl.u32 %v8272_v36, 15 }
 0x3fb   : > { %7944 = vmatpush1.bf16.msra.mxu0 %v10213_v39  ;;  %v4764_v39 = vld [vmem:[%s11574_s26 + $0xc18] sm:$0xff] }
 0x3fc   : > { %8116 = vmatpush1.bf16.msra.mxu1 %v10215_v51  ;;  %7945 = vmatprep.subr.bf16.mxu0 %v10222_v52  ;;  %v8258_v51 = vxor.u32 %v8242_v27, %v8226_v4  ;;  %v10245_v52 = vcombine.low %v4755_v11, %v4759_v12  ;;  %v10256_v44 = vcombine.high %v4764_v39, %v4768_v40  ;;  %v4776_v4 = vld [vmem:[%s11574_s26 + $0xc78] sm:$0xff]  ;;  %v4779_v11 = vld [vmem:[%s11574_s26 + $0xc90] sm:$0xff] }
 0x3fd   : > { %8117 = vmatprep.subr.bf16.mxu1 %v10224_v56  ;;  %v8259_v56 = vxor.u32 %v8243_v35, %v8227_v8  ;;  %v10255_v7 = vcombine.low %v4764_v39, %v4768_v40  ;;  %v8283_v8 = vshrl.u32 %v8267_v9, 15  ;;  %v4783_v12 = vld [vmem:[%s11574_s26 + $0xcb0] sm:$0xff]  ;;  %v10264_v13 = vcombine.high %v4772_v1, %v4776_v4  ;;  %v4784_v27 = vld [vmem:[%s11574_s26 + $0xcb8] sm:$0xff] }
 0x3fe   : > { %v10263_v55 = vcombine.low %v4772_v1, %v4776_v4  ;;  %v12201_v59 = vxor.u32 %v8288_v33, %v8272_v36  ;;  %v10271_v40 = vcombine.low %v4780_v20, %v4784_v27  ;;  %v12262_v33 = vld [vmem:[%s11574_s26 + $0xd78] sm:$0xff] }
 0x3ff   : > { %7946 = vmatpush1.bf16.msra.mxu0 %v10221_v2  ;;  %v4771_v2 = vld [vmem:[%s11574_s26 + $0xc50] sm:$0xff]  ;;  %v8275_v5 = vmul.u32 2146121005, %v8259_v56 }
 0x400   : > { %8118 = vmatpush1.bf16.msra.mxu1 %v10223_v63  ;;  %7947 = vmatprep.subr.bf16.mxu0 %v10230_v0  ;;  %v8274_v63 = vmul.u32 2146121005, %v8258_v51  ;;  %v10253_v0 = vcombine.low %v4763_v43, %v4767_v46  ;;  %v10261_v18 = vcombine.low %v4771_v2, %v4775_v30  ;;  %v4788_v43 = vld [vmem:[%s11574_s26 + $0xcd8] sm:$0xff]  ;;  %v12216_v51 = vld [vmem:[%s11574_s26 + $0xd10] sm:$0xff] }
 0x401   : > { %8119 = vmatprep.subr.bf16.mxu1 %v10232_v54  ;;  %v8273_v54 = vmul.u32 2146121005, %v8257_v53  ;;  %v4792_v46 = vld [vmem:[%s11574_s26 + $0xcf8] sm:$0xff] }
 0x402   : > { %v8290_v45 = vshrl.u32 %v8274_v63, 15  ;;  %v10280_v36 = vcombine.high %v4788_v43, %v4792_v46  ;;  %v12222_v53 = vld [vmem:[%s11574_s26 + $0xd18] sm:$0xff] }
 0x403   : > { %7948 = vmatpush1.bf16.msra.mxu0 %v10229_v10  ;;  %v10262_v10 = vcombine.high %v4771_v2, %v4775_v30  ;;  %v8320_v30 = vmul.u32 2221713035, %v12201_v59  ;;  %v12313_v59 = vld [vmem:[%s11574_s26 + $0xdf8] sm:$0xff] }
 0x404   : > { %8120 = vmatpush1.bf16.msra.mxu1 %v10231_v62  ;;  %7949 = vmatprep.subr.bf16.mxu0 %v10238_v60  ;;  %v12170_v62 = vxor.u32 %v8280_v42, %v8264_v57  ;;  %v12174_v60 = vxor.u32 %v8282_v29, %v8266_v61  ;;  %v8289_v57 = vshrl.u32 %v8273_v54, 15  ;;  %v8291_v61 = vshrl.u32 %v8275_v5, 15 }
 0x405   : > { %8121 = vmatprep.subr.bf16.mxu1 %v10240_v31  ;;  %v12181_v31 = vxor.u32 %v8281_v25, %v8265_v3  ;;  %v10270_v3 = vcombine.high %v4779_v11, %v4783_v12  ;;  %v12189_v42 = vxor.u32 %v8283_v8, %v8267_v9  ;;  %v10272_v29 = vcombine.high %v4780_v20, %v4784_v27  ;;  %v4791_v25 = vld [vmem:[%s11574_s26 + $0xcf0] sm:$0xff] }
 0x406   : > { %v8312_v35 = vmul.u32 2221713035, %v12170_v62  ;;  %v10269_v9 = vcombine.low %v4779_v11, %v4783_v12  ;;  %v12207_v39 = vxor.u32 %v8291_v61, %v8275_v5 }
 0x407   : > { %7950 = vmatpush1.bf16.msra.mxu0 %v10237_v37  ;;  %v8314_v37 = vmul.u32 2221713035, %v12174_v60  ;;  %v8315_v16 = vmul.u32 2221713035, %v12189_v42  ;;  %v12246_v60 = vld [vmem:[%s11574_s26 + $0xd50] sm:$0xff] }
 0x408   : > { %8122 = vmatpush1.bf16.msra.mxu1 %v10239_v22  ;;  %7951 = vmatprep.subr.bf16.mxu0 %v10246_v38  ;;  %v8313_v22 = vmul.u32 2221713035, %v12181_v31  ;;  %v12205_v38 = vxor.u32 %v8289_v57, %v8273_v54  ;;  %v8328_v56 = vshrl.u32 %v8312_v35, 16  ;;  %v8323_v4 = vmul.u32 2221713035, %v12207_v39  ;;  %v12259_v31 = vld [vmem:[%s11574_s26 + $0xd58] sm:$0xff] }
 0x409   : > { %8123 = vmatprep.subr.bf16.mxu1 %v10248_v41  ;;  %v10279_v54 = vcombine.low %v4788_v43, %v4792_v46  ;;  %v8331_v8 = vshrl.u32 %v8315_v16, 16  ;;  %v12278_v42 = vld [vmem:[%s11574_s26 + $0xdb0] sm:$0xff]  ;;  %v10295_v43 = vcombine.low %v12259_v31, %v12262_v33  ;;  %v10296_v46 = vcombine.high %v12259_v31, %v12262_v33 }
 0x40a   : > { %v8329_v2 = vshrl.u32 %v8313_v22, 16  ;;  %v8321_v1 = vmul.u32 2221713035, %v12205_v38  ;;  %v12241_v12 = vxor.u32 %v8328_v56, %v8312_v35  ;;  %v12296_v35 = vld [vmem:[%s11574_s26 + $0xdd0] sm:$0xff] }
 0x40b   : > { %7952 = vmatpush1.bf16.msra.mxu0 %v10245_v52  ;;  %v12219_v52 = vld [vmem:[%s11574_s26 + $0xd30] sm:$0xff] }
 0x40c   : > { %8124 = vmatpush1.bf16.msra.mxu1 %v10247_v58  ;;  %7964 = vmatprep.subr.bf16.mxu0 %v10254_v15  ;;  %v8330_v58 = vshrl.u32 %v8314_v37, 16  ;;  %v12225_v15 = vld [vmem:[%s11574_s26 + $0xd38] sm:$0xff]  ;;  %v10285_v5 = vcombine.low %v12216_v51, %v12219_v52  ;;  %v12256_v27 = vxor.u32 %v8329_v2, %v8313_v22  ;;  %v8337_v61 = vshrl.u32 %v8321_v1, 16 }
 0x40d   : > { %8136 = vmatprep.subr.bf16.mxu1 %v10256_v44  ;;  %v10288_v11 = vcombine.high %v12222_v53, %v12225_v15  ;;  %vm8360_vm0 = vcmp.lt.u32.totalorder %v12241_v12, 1288490188  ;;  %v12310_v22 = vld [vmem:[%s11574_s26 + $0xdd8] sm:$0xff]  ;;  %v10767_v12 = vld [vmem:[%s12038_s10 + $0x1c8] sm:$0xff]  }
 0x40e   : > { %7954 = vmatmul.mubr.bf16.vlgmr.msra.gmra.mrb[12].mxu0 %v11810_v14  ;;  %v12243_v62 = vxor.u32 %v8330_v58, %v8314_v37  ;;  %v12299_v37 = vld [vmem:[%s11574_s26 + $0xdf0] sm:$0xff]  ;;  %vm8361_vm2 = vcmp.lt.u32.totalorder %v12256_v27, 1288490188  ;;  %v10311_v2 = vcombine.low %v12310_v22, %v12313_v59  ;;  %v10737_v27 = vld [vmem:[%s12038_s10 + $0x88] sm:$0xff]  }
 0x40f   : > { %8126 = vmatmul.mubr.bf16.vlgmr.msra.gmra.mrb[12].mxu1 %v11810_v14  ;;  %7965 = vmatpush1.bf16.msra.mxu0 %v10253_v0  ;;  %v4787_v14 = vld [vmem:[%s11574_s26 + $0xcd0] sm:$0xff]  ;;  %v12229_v0 = vld [vmem:[%s496_s21] sm:$0xff]  ;;  %v10309_v58 = vcombine.low %v12296_v35, %v12299_v37 }
 0x410   : > { %7996 = vmatprep.mubr.bf16.mxu0 %v11823_v34  ;;  %8137 = vmatpush1.bf16.msra.mxu1 %v10255_v7  ;;  %v10278_v41 = vcombine.high %v4787_v14, %v4791_v25  ;;  %v10286_v7 = vcombine.high %v12216_v51, %v12219_v52  ;;  %v12254_v20 = vrot.slane %v12229_v0, %v1067_v17  ;;  %vm8362_vm1 = vcmp.lt.u32.totalorder %v12243_v62, 1288490188  ;;  %v10768_v62 = vld [vmem:[%s12038_s10 + $0x108] sm:$0xff]  }
 0x411   : > { %8168 = vmatprep.mubr.bf16.mxu1 %v11823_v34  ;;  %7966 = vmatprep.subr.bf16.mxu0 %v10262_v10  ;;  %v12203_v34 = vxor.u32 %v8290_v45, %v8274_v63  ;;  %v10277_v63 = vcombine.low %v4787_v14, %v4791_v25  ;;  %v10287_v10 = vcombine.low %v12222_v53, %v12225_v15  ;;  %v8336_v45 = vshrl.u32 %v8320_v30, 16  ;;  %v12293_v25 = vld [vmem:[%s11574_s26 + $0xdb8] sm:$0xff] }
 0x412   : > { %8138 = vmatprep.subr.bf16.mxu1 %v10264_v13  ;;  %v12249_v13 = vld [vmem:[%s11574_s26 + $0xd70] sm:$0xff]  ;;  %v12267_v57 = vrot.slane %v12229_v0, %v1075_v23  ;;  %v12272_v17 = vrot.slane %v12229_v0, %v1071_v24  ;;  %v12286_v23 = vrot.slane %v12229_v0, %v1079_v26  ;;  %v12288_v24 = vxor.u32 %v8331_v8, %v8315_v16  ;;  %v12331_v16 = vld [vmem:[%s11574_s26 + $0xe18] sm:$0xff] }
 0x413   : > { %7967 = vmatpush1.bf16.msra.mxu0 %v10261_v18  ;;  %v8322_v44 = vmul.u32 2221713035, %v12203_v34  ;;  %v10294_v14 = vcombine.high %v12246_v60, %v12249_v13  ;;  %v10293_v26 = vcombine.low %v12246_v60, %v12249_v13  ;;  %v12316_v34 = vld [vmem:[%s11574_s26 + $0xe10] sm:$0xff]  ;;  %v12336_v51 = vxor.u32 %v8337_v61, %v8321_v1 }
 0x414   : > { %8139 = vmatpush1.bf16.msra.mxu1 %v10263_v55  ;;  %7968 = vmatprep.subr.bf16.mxu0 %v10270_v3  ;;  %v8339_v55 = vshrl.u32 %v8323_v4, 16  ;;  %v12275_v3 = vld [vmem:[%s11574_s26 + $0xd90] sm:$0xff]  ;;  %vm8363_vm3 = vcmp.lt.u32.totalorder %v12288_v24, 1288490188  ;;  %v10310_v15 = vcombine.high %v12296_v35, %v12299_v37 }
 0x415   : > { %8140 = vmatprep.subr.bf16.mxu1 %v10272_v29  ;;  %v8338_v18 = vshrl.u32 %v8322_v44, 16  ;;  %v12281_v29 = vld [vmem:[%s11574_s26 + $0xd98] sm:$0xff]  ;;  %v10301_v39 = vcombine.low %v12275_v3, %v12278_v42  ;;  %vm8369_vm6 = vcmp.lt.u32.totalorder %v12336_v51, 1288490188  ;;  %v4843_v37 = vld [vmem:[%s11574_s26 + $0xe90] sm:$0xff] }
 0x416   : > { %v12338_v52 = vxor.u32 %v8339_v55, %v8323_v4  ;;  %v10303_v53 = vcombine.low %v12281_v29, %v12293_v25  ;;  %v10304_v56 = vcombine.high %v12281_v29, %v12293_v25  ;;  %vm10442_vm8 = vmpackc.low %vm8369_vm6, %vm8361_vm2  ;;  %v10738_v51 = vld [vmem:[%s12038_s10 + $0x50] sm:$0xff]  }
 0x417   : > { %7969 = vmatpush1.bf16.msra.mxu0 %v10269_v9  ;;  %v12319_v9 = vxor.u32 %v8336_v45, %v8320_v30  ;;  %v12321_v38 = vxor.u32 %v8338_v18, %v8322_v44  ;;  %v10740_v24 = vld [vmem:[%s12038_s10 + $0x10] sm:$0xff]  }
 0x418   : > { %8141 = vmatpush1.bf16.msra.mxu1 %v10271_v40  ;;  %7970 = vmatprep.subr.bf16.mxu0 %v10278_v41  ;;  %v10302_v40 = vcombine.high %v12275_v3, %v12278_v42  ;;  %v12328_v41 = vld [vmem:[%s11574_s26 + $0xe30] sm:$0xff]  ;;  %vm8371_vm7 = vcmp.lt.u32.totalorder %v12338_v52, 1288490188 }
 0x419   : > { %8142 = vmatprep.subr.bf16.mxu1 %v10280_v36  ;;  %v12334_v36 = vld [vmem:[%s11574_s26 + $0xe38] sm:$0xff]  ;;  %v10317_v1 = vcombine.low %v12316_v34, %v12328_v41  ;;  %v10318_v4 = vcombine.high %v12316_v34, %v12328_v41  ;;  %vm8368_vm4 = vcmp.lt.u32.totalorder %v12319_v9, 1288490188  ;;  %vm8370_vm5 = vcmp.lt.u32.totalorder %v12321_v38, 1288490188  ;;  %vm10448_vm9 = vmpackc.low %vm8371_vm7, %vm8363_vm3  ;;  %v10741_v52 = vld [vmem:[%s12038_s10 + $0x90] sm:$0xff]  }
 0x41a   : > { %vm10445_vm10 = vmpackc.low %vm8368_vm4, %vm8360_vm0  ;;  %v10769_v9 = vld [vmem:[%s12038_s10 + $0x188] sm:$0xff]   ;;  %v10770_v38 = vld [vmem:[%s12038_s10 + $0x150] sm:$0xff]  }
 0x41b   : > { %7971 = vmatpush1.bf16.msra.mxu0 %v10277_v63  ;;  %v10312_v63 = vcombine.high %v12310_v22, %v12313_v59  ;;  %v4847_v22 = vld [vmem:[%s11574_s26 + $0xeb0] sm:$0xff]  ;;  %v4844_v59 = vld [vmem:[%s11574_s26 + $0xe98] sm:$0xff]  ;;  %vm10451_vm11 = vmpackc.low %vm8370_vm5, %vm8362_vm1 }
 0x41c   : > { %8143 = vmatpush1.bf16.msra.mxu1 %v10279_v54  ;;  %7972 = vmatprep.subr.bf16.mxu0 %v10286_v7  ;;  %v10320_v54 = vcombine.high %v12331_v16, %v12334_v36 }
 0x41d   : > { %8144 = vmatprep.subr.bf16.mxu1 %v10288_v11 }
 0x41f   : > { %7973 = vmatpush1.bf16.msra.mxu0 %v10285_v5 }
 0x420   : > { %8145 = vmatpush1.bf16.msra.mxu1 %v10287_v10  ;;  %7974 = vmatprep.subr.bf16.mxu0 %v10294_v14 }
 0x421   : > { %v7654_v30 = vpop.f32.mrb[8].mxu0  ;;  %v7826_v44 = vpop.f32.mrb[8].mxu1  ;;  %8146 = vmatprep.subr.bf16.mxu1 %v10296_v46 }
 0x422   : > { %v10578_v5 = vadd.f32 %v7654_v30, %v12254_v20  ;;  %v10582_v7 = vadd.f32 %v7826_v44, %v12267_v57  ;;  %v7656_v8 = vpop.f32.mrb[9].mxu0  ;;  %v7828_v10 = vpop.f32.mrb[9].mxu1  ;;  %v4839_v30 = vld [vmem:[%s11574_s26 + $0xe70] sm:$0xff] }
 0x423   : > { %v10579_v11 = vadd.f32 %v7656_v8, %v12272_v17  ;;  %v10583_v60 = vadd.f32 %v7828_v10, %v12286_v23  ;;  %v7658_v13 = vpop.f32.mrb[10].mxu0  ;;  %v7830_v31 = vpop.f32.mrb[10].mxu1  ;;  %7975 = vmatpush1.bf16.msra.mxu0 %v10293_v26 }
 0x424   : > { %v8179_v33 = vmax.f32 %v10578_v5, 0.0  ;;  %v8181_v45 = vmax.f32 %v10582_v7, 0.0  ;;  %v10580_v18 = vadd.f32 %v7658_v13, %v12254_v20  ;;  %v10584_v61 = vadd.f32 %v7830_v31, %v12267_v57  ;;  %8147 = vmatpush1.bf16.msra.mxu1 %v10295_v43  ;;  %v7660_v55 = vpop.f32.mrb[11].mxu0  ;;  %v7832_v3 = vpop.f32.mrb[11].mxu1  ;;  %7976 = vmatprep.subr.bf16.mxu0 %v10302_v40 }
 0x425   : > { %v8180_v42 = vmax.f32 %v10579_v11, 0.0  ;;  %v8182_v29 = vmax.f32 %v10583_v60, 0.0  ;;  %v10581_v14 = vadd.f32 %v7660_v55, %v12272_v17  ;;  %v10585_v25 = vadd.f32 %v7832_v3, %v12286_v23  ;;  %8148 = vmatprep.subr.bf16.mxu1 %v10304_v56  ;;  %v4835_v56 = vld [vmem:[%s11574_s26 + $0xe50] sm:$0xff] }
 0x426   : > { %v12379_v20 = vmul.f32 3.3333333, %v8179_v33  ;;  %v12381_v57 = vmul.f32 3.3333333, %v8181_v45  ;;  %v8187_v26 = vmax.f32 %v10580_v18, 0.0  ;;  %v8189_v43 = vmax.f32 %v10584_v61, 0.0 }
 0x427   : > { %v12383_v46 = vmul.f32 3.3333333, %v8180_v42  ;;  %v12385_v17 = vmul.f32 3.3333333, %v8182_v29  ;;  %v8188_v23 = vmax.f32 %v10581_v14, 0.0  ;;  %v8190_v40 = vmax.f32 %v10585_v25, 0.0  ;;  %7977 = vmatpush1.bf16.msra.mxu0 %v10301_v39 }
 0x428   : > { %v8392_v44 = vsel %vm8360_vm0, %v12379_v20, 0.0  ;;  %v8394_v5 = vsel %vm8362_vm1, %v12381_v57, 0.0  ;;  %v12395_v7 = vmul.f32 3.3333333, %v8187_v26  ;;  %v12397_v8 = vmul.f32 3.3333333, %v8189_v43  ;;  %8149 = vmatpush1.bf16.msra.mxu1 %v10303_v53  ;;  %7978 = vmatprep.subr.bf16.mxu0 %v10310_v15 }
 0x429   : > { %8408 = vst [vmem:[%s12377_s24] sm:$0xff] %v8392_v44  ;;  %8410 = vst [vmem:[%s12377_s24 + $0x10] sm:$0xff] %v8394_v5  ;;  %v8393_v39 = vsel %vm8361_vm2, %v12383_v46, 0.0  ;;  %v8395_v10 = vsel %vm8363_vm3, %v12385_v17, 0.0  ;;  %v12407_v11 = vmul.f32 3.3333333, %v8188_v23  ;;  %8150 = vmatprep.subr.bf16.mxu1 %v10312_v63  ;;  %v4836_v33 = vld [vmem:[%s11574_s26 + $0xe58] sm:$0xff]  ;;  %v10319_v3 = vcombine.low %v12331_v16, %v12334_v36 }
 0x42a   : > { %v12409_v60 = vmul.f32 3.3333333, %v8190_v40  ;;  %8409 = vst [vmem:[%s12377_s24 + $0x8] sm:$0xff] %v8393_v39  ;;  %8411 = vst [vmem:[%s12377_s24 + $0x18] sm:$0xff] %v8395_v10  ;;  %v8400_v53 = vsel %vm8368_vm4, %v12395_v7, 0.0  ;;  %v10446_v15 = vpack.c.bf16 %v12395_v7, %v12379_v20  ;;  %v8402_v13 = vsel %vm8370_vm5, %v12397_v8, 0.0 }
 0x42b   : > { %v10452_v31 = vpack.c.bf16 %v12397_v8, %v12381_v57  ;;  %v4840_v63 = vld [vmem:[%s11574_s26 + $0xe78] sm:$0xff]  ;;  %8416 = vst [vmem:[%s12377_s24 + $0x40] sm:$0xff] %v8400_v53  ;;  %8418 = vst [vmem:[%s12377_s24 + $0x50] sm:$0xff] %v8402_v13  ;;  %v8401_v45 = vsel %vm8369_vm6, %v12407_v11, 0.0  ;;  %v10443_v18 = vpack.c.bf16 %v12407_v11, %v12383_v46  ;;  %7979 = vmatpush1.bf16.msra.mxu0 %v10309_v58  ;;  %v4851_v36 = vld [vmem:[%s11574_s26 + $0xed0] sm:$0xff] }
 0x42c   : > { %v8403_v61 = vsel %vm8371_vm7, %v12409_v60, 0.0  ;;  %v10449_v55 = vpack.c.bf16 %v12409_v60, %v12385_v17  ;;  %8417 = vst [vmem:[%s12377_s24 + $0x48] sm:$0xff] %v8401_v45  ;;  %8151 = vmatpush1.bf16.msra.mxu1 %v10311_v2  ;;  %7980 = vmatprep.subr.bf16.mxu0 %v10318_v4  ;;  %v10326_v42 = vcombine.high %v4835_v56, %v4839_v30  ;;  %v4848_v58 = vld [vmem:[%s11574_s26 + $0xeb8] sm:$0xff]  ;;  %v4859_v43 = vld [vmem:[%s11574_s26 + $0xf10] sm:$0xff] }
 0x42d   : > { %8419 = vst [vmem:[%s12377_s24 + $0x58] sm:$0xff] %v8403_v61  ;;  %8152 = vmatprep.subr.bf16.mxu1 %v10320_v54  ;;  %v10328_v35 = vcombine.high %v4836_v33, %v4840_v63  ;;  %v10325_v2 = vcombine.low %v4835_v56, %v4839_v30  ;;  %v10327_v4 = vcombine.low %v4836_v33, %v4840_v63  ;;  %v4855_v54 = vld [vmem:[%s11574_s26 + $0xef0] sm:$0xff]  ;;  %v4852_v14 = vld [vmem:[%s11574_s26 + $0xed8] sm:$0xff] }
 0x42e   : > { %v10334_v29 = vcombine.high %v4843_v37, %v4847_v22  ;;  %v10336_v16 = vcombine.high %v4844_v59, %v4848_v58  ;;  %v4856_v25 = vld [vmem:[%s11574_s26 + $0xef8] sm:$0xff]  ;;  %v10333_v26 = vcombine.low %v4843_v37, %v4847_v22  ;;  %v10335_v34 = vcombine.low %v4844_v59, %v4848_v58  ;;  %v4863_v23 = vld [vmem:[%s11574_s26 + $0xf30] sm:$0xff] }
 0x42f   : > { %7981 = vmatpush1.bf16.msra.mxu0 %v10317_v1  ;;  %v10342_v41 = vcombine.high %v4851_v36, %v4855_v54  ;;  %v10344_v1 = vcombine.high %v4852_v14, %v4856_v25  ;;  %v4860_v40 = vld [vmem:[%s11574_s26 + $0xf18] sm:$0xff]  ;;  %v10341_v30 = vcombine.low %v4851_v36, %v4855_v54  ;;  %v10343_v44 = vcombine.low %v4852_v14, %v4856_v25  ;;  %v4867_v10 = vld [vmem:[%s11574_s26 + $0xf50] sm:$0xff] }
 0x430   : > { %8153 = vmatpush1.bf16.msra.mxu1 %v10319_v3  ;;  %7982 = vmatprep.subr.bf16.mxu0 %v10326_v42  ;;  %v4864_v56 = vld [vmem:[%s11574_s26 + $0xf38] sm:$0xff]  ;;  %v10350_v5 = vcombine.high %v4859_v43, %v4863_v23  ;;  %v4871_v53 = vld [vmem:[%s11574_s26 + $0xf70] sm:$0xff]  ;;  %v10349_v63 = vcombine.low %v4859_v43, %v4863_v23  ;;  %v10730_v43 = vld [vmem:[%s12038_s10 + $0x40] sm:$0xff]  }
 0x431   : > { %8154 = vmatprep.subr.bf16.mxu1 %v10328_v35  ;;  %v10352_v39 = vcombine.high %v4860_v40, %v4864_v56  ;;  %v4868_v13 = vld [vmem:[%s11574_s26 + $0xf58] sm:$0xff]  ;;  %v10351_v45 = vcombine.low %v4860_v40, %v4864_v56  ;;  %v10358_v61 = vcombine.high %v4867_v10, %v4871_v53  ;;  %v4875_v42 = vld [vmem:[%s11574_s26 + $0xf90] sm:$0xff]  ;;  %v10357_v59 = vcombine.low %v4867_v10, %v4871_v53  ;;  %v10731_v23 = vld [vmem:[%s12038_s10 + $0xc0] sm:$0xff]  }
 0x432   : > { %v4872_v33 = vld [vmem:[%s11574_s26 + $0xf78] sm:$0xff]  ;;  %v4879_v35 = vld [vmem:[%s11574_s26 + $0xfb0] sm:$0xff]  ;;  %v10732_v40 = vld [vmem:[%s12038_s10] sm:$0xff]  }
 0x433   : > { %7983 = vmatpush1.bf16.msra.mxu0 %v10325_v2  ;;  %v10360_v3 = vcombine.high %v4868_v13, %v4872_v33  ;;  %v4876_v37 = vld [vmem:[%s11574_s26 + $0xf98] sm:$0xff]  ;;  %v10359_v58 = vcombine.low %v4868_v13, %v4872_v33  ;;  %v10366_v2 = vcombine.high %v4875_v42, %v4879_v35  ;;  %v10365_v14 = vcombine.low %v4875_v42, %v4879_v35  ;;  %v10733_v56 = vld [vmem:[%s12038_s10 + $0x80] sm:$0xff]   ;;  %v10750_v53 = vld [vmem:[%s12038_s10 + $0x68] sm:$0xff]  }
 0x434   : > { %8155 = vmatpush1.bf16.msra.mxu1 %v10327_v4  ;;  %7984 = vmatprep.subr.bf16.mxu0 %v10334_v29  ;;  %v4880_v22 = vld [vmem:[%s11574_s26 + $0xfb8] sm:$0xff]  ;;  %v4883_v29 = vld [vmem:[%s11574_s26 + $0xfd0] sm:$0xff]  ;;  %v10749_v10 = vld [vmem:[%s12038_s10 + $0xa0] sm:$0xff]  }
 0x435   : > { %8156 = vmatprep.subr.bf16.mxu1 %v10336_v16  ;;  %v10368_v4 = vcombine.high %v4876_v37, %v4880_v22  ;;  %v4887_v16 = vld [vmem:[%s11574_s26 + $0xff0] sm:$0xff]  ;;  %v4884_v36 = vld [vmem:[%s11574_s26 + $0xfd8] sm:$0xff]  ;;  %v10367_v25 = vcombine.low %v4876_v37, %v4880_v22  ;;  %v10751_v13 = vld [vmem:[%s12038_s10 + $0xe8] sm:$0xff]  }
 0x436   : > { %v4888_v54 = vld [vmem:[%s11574_s26 + $0xff8] sm:$0xff]  ;;  %v10752_v33 = vld [vmem:[%s12038_s10 + $0x28] sm:$0xff]   ;;  %v10757_v42 = vld [vmem:[%s12038_s10 + $0xb0] sm:$0xff]  }
 0x437   : > { %7985 = vmatpush1.bf16.msra.mxu0 %v10333_v26  ;;  %v10374_v26 = vcombine.high %v4883_v29, %v4887_v16  ;;  %v10742_v46 = vld [vmem:[%s12038_s10 + $0x58] sm:$0xff]   ;;  %v10772_v20 = vld [vmem:[%s12038_s10 + $0x110] sm:$0xff]  }
 0x438   : > { %8157 = vmatpush1.bf16.msra.mxu1 %v10335_v34  ;;  %7986 = vmatprep.subr.bf16.mxu0 %v10342_v41  ;;  %v10376_v34 = vcombine.high %v4884_v36, %v4888_v54  ;;  %v10373_v41 = vcombine.low %v4883_v29, %v4887_v16  ;;  %v10743_v11 = vld [vmem:[%s12038_s10 + $0xd8] sm:$0xff]   ;;  %v10765_v29 = vld [vmem:[%s12038_s10 + $0x180] sm:$0xff]   ;;  %v10766_v16 = vld [vmem:[%s12038_s10 + $0x148] sm:$0xff]  }
 0x439   : > { %8158 = vmatprep.subr.bf16.mxu1 %v10344_v1  ;;  %v10375_v1 = vcombine.low %v4884_v36, %v4888_v54  ;;  %v10744_v17 = vld [vmem:[%s12038_s10 + $0x18] sm:$0xff]   ;;  %v10771_v36 = vld [vmem:[%s12038_s10 + $0x1d0] sm:$0xff]   ;;  %v10778_v54 = vld [vmem:[%s12038_s10 + $0x160] sm:$0xff]  }
 0x43a   : > { %v10745_v60 = vld [vmem:[%s12038_s10 + $0x98] sm:$0xff]   ;;  %v10773_v57 = vld [vmem:[%s12038_s10 + $0x190] sm:$0xff]  }
 0x43b   : > { %7987 = vmatpush1.bf16.msra.mxu0 %v10341_v30  ;;  %v10734_v30 = vld [vmem:[%s12038_s10 + $0x48] sm:$0xff]   ;;  %v10758_v35 = vld [vmem:[%s12038_s10 + $0x78] sm:$0xff]  }
 0x43c   : > { %8159 = vmatpush1.bf16.msra.mxu1 %v10343_v44  ;;  %7988 = vmatprep.subr.bf16.mxu0 %v10350_v5  ;;  %v10735_v44 = vld [vmem:[%s12038_s10 + $0xc8] sm:$0xff]   ;;  %v10759_v37 = vld [vmem:[%s12038_s10 + $0xf8] sm:$0xff]  }
 0x43d   : > { %8160 = vmatprep.subr.bf16.mxu1 %v10352_v39  ;;  %v10736_v5 = vld [vmem:[%s12038_s10 + $0x8] sm:$0xff]   ;;  %v10748_v39 = vld [vmem:[%s12038_s10 + $0x20] sm:$0xff]   ;;  %v10760_v22 = vld [vmem:[%s12038_s10 + $0x38] sm:$0xff]  }
 0x43e   : > { %v10774_v7 = vld [vmem:[%s12038_s10 + $0x158] sm:$0xff]  }
 0x43f   : > { %7989 = vmatpush1.bf16.msra.mxu0 %v10349_v63  ;;  %v10753_v63 = vld [vmem:[%s12038_s10 + $0xa8] sm:$0xff]   ;;  %v10775_v8 = vld [vmem:[%s12038_s10 + $0x1d8] sm:$0xff]  }
 0x440   : > { %8161 = vmatpush1.bf16.msra.mxu1 %v10351_v45  ;;  %7990 = vmatprep.subr.bf16.mxu0 %v10358_v61  ;;  %v10754_v45 = vld [vmem:[%s12038_s10 + $0x70] sm:$0xff]  }
 0x441   : > { %8162 = vmatprep.subr.bf16.mxu1 %v10360_v3  ;;  %v10755_v61 = vld [vmem:[%s12038_s10 + $0xf0] sm:$0xff]  }
 0x442   : > { %v10756_v3 = vld [vmem:[%s12038_s10 + $0x30] sm:$0xff]  }
 0x443   : > { %7991 = vmatpush1.bf16.msra.mxu0 %v10357_v59  ;;  %v10761_v59 = vld [vmem:[%s12038_s10 + $0xb8] sm:$0xff]  }
 0x444   : > { %8163 = vmatpush1.bf16.msra.mxu1 %v10359_v58  ;;  %7992 = vmatprep.subr.bf16.mxu0 %v10366_v2  ;;  %v10762_v58 = vld [vmem:[%s12038_s10 + $0x140] sm:$0xff]  }
 0x445   : > { %8164 = vmatprep.subr.bf16.mxu1 %v10368_v4  ;;  %v10763_v2 = vld [vmem:[%s12038_s10 + $0x1c0] sm:$0xff]  }
 0x446   : > { %v10764_v4 = vld [vmem:[%s12038_s10 + $0x100] sm:$0xff]  }
 0x447   : > { %7993 = vmatpush1.bf16.msra.mxu0 %v10365_v14  ;;  %v10779_v14 = vld [vmem:[%s12038_s10 + $0x1e0] sm:$0xff]  }
 0x448   : > { %8165 = vmatpush1.bf16.msra.mxu1 %v10367_v25  ;;  %7994 = vmatprep.subr.bf16.mxu0 %v10374_v26  ;;  %v10780_v25 = vld [vmem:[%s12038_s10 + $0x120] sm:$0xff]  }
 0x449   : > { %8166 = vmatprep.subr.bf16.mxu1 %v10376_v34  ;;  %v10781_v26 = vld [vmem:[%s12038_s10 + $0x1a0] sm:$0xff]   ;;  %v10782_v34 = vld [vmem:[%s12038_s10 + $0x168] sm:$0xff]  }
 0x44b   : > { %7995 = vmatpush1.bf16.msra.mxu0 %v10373_v41  ;;  %v10783_v41 = vld [vmem:[%s12038_s10 + $0x1e8] sm:$0xff]  }
 0x44c   : > { %8167 = vmatpush1.bf16.msra.mxu1 %v10375_v1  ;;  %10474 = vmatprep.subr.bf16.mxu0 %v10730_v43  ;;  %v10784_v1 = vld [vmem:[%s12038_s10 + $0x128] sm:$0xff]  }
 0x44d   : > { %10496 = vmatprep.subr.bf16.mxu1 %v10731_v23  ;;  %v10785_v43 = vld [vmem:[%s12038_s10 + $0x1a8] sm:$0xff]   ;;  %v10786_v23 = vld [vmem:[%s12038_s10 + $0x170] sm:$0xff]  }
 0x44e   : > { %7997 = vmatmul.mubr.bf16.vlgmr.msra.gmra.mrb[12].mxu0 %v11815_v28 }
 0x44f   : > { %8169 = vmatmul.mubr.bf16.vlgmr.msra.gmra.mrb[12].mxu1 %v11815_v28  ;;  %10475 = vmatpush3.bf16.msra.mxu0 %v10732_v40  ;;  %v10739_v28 = vld [vmem:[%s12038_s10 + $0xd0] sm:$0xff]  }
 0x450   : > { %10444 = vmatprep.mubr.msk.bf16.mxu0 %vm10442_vm8, %v10443_v18  ;;  %10497 = vmatpush3.bf16.msra.mxu1 %v10733_v56  ;;  %v10746_v18 = vld [vmem:[%s12038_s10 + $0x60] sm:$0xff]   ;;  %v10787_v40 = vld [vmem:[%s12038_s10 + $0x1f0] sm:$0xff]  }
 0x451   : > { %10450 = vmatprep.mubr.msk.bf16.mxu1 %vm10448_vm9, %v10449_v55  ;;  %10476 = vmatprep.subr.bf16.mxu0 %v10734_v30  ;;  %v10747_v55 = vld [vmem:[%s12038_s10 + $0xe0] sm:$0xff]   ;;  %v10788_v56 = vld [vmem:[%s12038_s10 + $0x130] sm:$0xff]  }
 0x452   : > { %10498 = vmatprep.subr.bf16.mxu1 %v10735_v44  ;;  %v10789_v30 = vld [vmem:[%s12038_s10 + $0x1b0] sm:$0xff]   ;;  %v10790_v44 = vld [vmem:[%s12038_s10 + $0x178] sm:$0xff]  }
 0x453   : > { %10477 = vmatpush3.bf16.msra.mxu0 %v10736_v5  ;;  %v10791_v5 = vld [vmem:[%s12038_s10 + $0x1f8] sm:$0xff]  }
 0x454   : > { %10499 = vmatpush3.bf16.msra.mxu1 %v10737_v27  ;;  %10478 = vmatprep.subr.bf16.mxu0 %v10738_v51  ;;  %v10792_v27 = vld [vmem:[%s12038_s10 + $0x138] sm:$0xff]  }
 0x455   : > { %10500 = vmatprep.subr.bf16.mxu1 %v10739_v28  ;;  %v10793_v51 = vld [vmem:[%s12038_s10 + $0x1b8] sm:$0xff]   ;;  %v8212_v28 = vadd.s32 512, %v12076_v32 }
 0x457   : > { %10479 = vmatpush3.bf16.msra.mxu0 %v10740_v24  ;;  %v8214_v24 = vadd.s32 768, %v12076_v32 }
 0x458   : > { %10501 = vmatpush3.bf16.msra.mxu1 %v10741_v52  ;;  %10480 = vmatprep.subr.bf16.mxu0 %v10742_v46  ;;  %v8213_v52 = vadd.s32 640, %v12076_v32  ;;  %v8215_v46 = vadd.s32 896, %v12076_v32 }
 0x459   : > { %10502 = vmatprep.subr.bf16.mxu1 %v10743_v11  ;;  %v8220_v11 = vadd.s32 %v8212_v28, %v12080_v21 }
 0x45b   : > { %10481 = vmatpush3.bf16.msra.mxu0 %v10744_v17  ;;  %v8222_v17 = vadd.s32 %v8214_v24, %v12080_v21 }
 0x45c   : > { %10503 = vmatpush3.bf16.msra.mxu1 %v10745_v60  ;;  %10482 = vmatprep.subr.bf16.mxu0 %v10746_v18  ;;  %v8221_v60 = vadd.s32 %v8213_v52, %v12080_v21  ;;  %v8223_v18 = vadd.s32 %v8215_v46, %v12080_v21 }
 0x45d   : > { %10504 = vmatprep.subr.bf16.mxu1 %v10747_v55  ;;  %v8228_v55 = vadd.s32 %v8212_v28, %v12109_v19 }
 0x45e   : > { %v8239_v32 = vshrl.u32 %v8223_v18, 16 }
 0x45f   : > { %10483 = vmatpush3.bf16.msra.mxu0 %v10748_v39  ;;  %v8230_v39 = vadd.s32 %v8214_v24, %v12109_v19 }
 0x460   : > { %10505 = vmatpush3.bf16.msra.mxu1 %v10749_v10  ;;  %10484 = vmatprep.subr.bf16.mxu0 %v10750_v53  ;;  %v8229_v10 = vadd.s32 %v8213_v52, %v12109_v19  ;;  %v8236_v53 = vshrl.u32 %v8220_v11, 16  ;;  %v8255_v21 = vxor.u32 %v8239_v32, %v8223_v18 }
 0x461   : > { %10506 = vmatprep.subr.bf16.mxu1 %v10751_v13  ;;  %v8231_v13 = vadd.s32 %v8215_v46, %v12109_v19 }
 0x463   : > { %10485 = vmatpush3.bf16.msra.mxu0 %v10752_v33  ;;  %v8238_v33 = vshrl.u32 %v8222_v17, 16 }
 0x464   : > { %10507 = vmatpush3.bf16.msra.mxu1 %v10753_v63  ;;  %10486 = vmatprep.subr.bf16.mxu0 %v10754_v45  ;;  %v8237_v63 = vshrl.u32 %v8221_v60, 16  ;;  %v8244_v45 = vshrl.u32 %v8228_v55, 16 }
 0x465   : > { %10508 = vmatprep.subr.bf16.mxu1 %v10755_v61  ;;  %v8246_v61 = vshrl.u32 %v8230_v39, 16 }
 0x467   : > { %10487 = vmatpush3.bf16.msra.mxu0 %v10756_v3  ;;  %v8245_v3 = vshrl.u32 %v8229_v10, 16 }
 0x468   : > { %10509 = vmatpush3.bf16.msra.mxu1 %v10757_v42  ;;  %10488 = vmatprep.subr.bf16.mxu0 %v10758_v35  ;;  %v8252_v42 = vxor.u32 %v8236_v53, %v8220_v11  ;;  %v8247_v35 = vshrl.u32 %v8231_v13, 16 }
 0x469   : > { %10510 = vmatprep.subr.bf16.mxu1 %v10759_v37  ;;  %v8254_v37 = vxor.u32 %v8238_v33, %v8222_v17  ;;  %v4910_v33 = vrot.slane %v12229_v0, %v1083_v47 }
 0x46b   : > { %10489 = vmatpush3.bf16.msra.mxu0 %v10760_v22  ;;  %v8253_v22 = vxor.u32 %v8237_v63, %v8221_v60 }
 0x46c   : > { %10511 = vmatpush3.bf16.msra.mxu1 %v10761_v59  ;;  %10518 = vmatprep.subr.bf16.mxu0 %v10762_v58  ;;  %v8260_v59 = vxor.u32 %v8244_v45, %v8228_v55  ;;  %v8262_v58 = vxor.u32 %v8246_v61, %v8230_v39  ;;  %v4918_v45 = vrot.slane %v12229_v0, %v1091_v48 }
 0x46d   : > { %10540 = vmatprep.subr.bf16.mxu1 %v10763_v2  ;;  %v8261_v2 = vxor.u32 %v8245_v3, %v8229_v10  ;;  %v4914_v61 = vrot.slane %v12229_v0, %v1087_v49 }
 0x46e   : > { %10447 = vmatmul.mubr.msk.bf16.vlgmr.msra.gmra.mrb[16].mxu0 %vm10445_vm10, %v10446_v15  ;;  %v10776_v15 = vld [vmem:[%s12038_s10 + $0x118] sm:$0xff]   ;;  %v8276_v19 = vmul.u32 2146121005, %v8260_v59 }
 0x46f   : > { %10453 = vmatmul.mubr.msk.bf16.vlgmr.msra.gmra.mrb[16].mxu1 %vm10451_vm11, %v10452_v31  ;;  %10519 = vmatpush3.bf16.msra.mxu0 %v10764_v4  ;;  %v10777_v31 = vld [vmem:[%s12038_s10 + $0x198] sm:$0xff]   ;;  %v8268_v4 = vmul.u32 2146121005, %v8252_v42 }
 0x470   : > { %10541 = vmatpush3.bf16.msra.mxu1 %v10765_v29  ;;  %10520 = vmatprep.subr.bf16.mxu0 %v10766_v16  ;;  %v8263_v29 = vxor.u32 %v8247_v35, %v8231_v13  ;;  %v8270_v16 = vmul.u32 2146121005, %v8254_v37  ;;  %v4922_v35 = vrot.slane %v12229_v0, %v1095_v50 }
 0x471   : > { %10542 = vmatprep.subr.bf16.mxu1 %v10767_v12  ;;  %v8269_v12 = vmul.u32 2146121005, %v8253_v22 }
 0x473   : > { %10521 = vmatpush3.bf16.msra.mxu0 %v10768_v62  ;;  %v8271_v62 = vmul.u32 2146121005, %v8255_v21 }
 0x474   : > { %10543 = vmatpush3.bf16.msra.mxu1 %v10769_v9  ;;  %10522 = vmatprep.subr.bf16.mxu0 %v10770_v38  ;;  %v8278_v9 = vmul.u32 2146121005, %v8262_v58  ;;  %v8277_v38 = vmul.u32 2146121005, %v8261_v2 }
 0x475   : > { %10544 = vmatprep.subr.bf16.mxu1 %v10771_v36  ;;  %v8284_v36 = vshrl.u32 %v8268_v4, 15 }
 0x477   : > { %10523 = vmatpush3.bf16.msra.mxu0 %v10772_v20  ;;  %v8279_v20 = vmul.u32 2146121005, %v8263_v29 }
 0x478   : > { %10545 = vmatpush3.bf16.msra.mxu1 %v10773_v57  ;;  %10524 = vmatprep.subr.bf16.mxu0 %v10774_v7  ;;  %v8286_v57 = vshrl.u32 %v8270_v16, 15  ;;  %v8285_v7 = vshrl.u32 %v8269_v12, 15 }
 0x479   : > { %10546 = vmatprep.subr.bf16.mxu1 %v10775_v8  ;;  %v8287_v8 = vshrl.u32 %v8271_v62, 15 }
 0x47b   : > { %10525 = vmatpush3.bf16.msra.mxu0 %v10776_v15  ;;  %v8292_v15 = vshrl.u32 %v8276_v19, 15 }
 0x47c   : > { %10547 = vmatpush3.bf16.msra.mxu1 %v10777_v31  ;;  %10526 = vmatprep.subr.bf16.mxu0 %v10778_v54  ;;  %v8294_v31 = vshrl.u32 %v8278_v9, 15  ;;  %v8293_v54 = vshrl.u32 %v8277_v38, 15 }
 0x47d   : > { %10548 = vmatprep.subr.bf16.mxu1 %v10779_v14  ;;  %v8300_v14 = vxor.u32 %v8284_v36, %v8268_v4 }
 0x47f   : > { %10527 = vmatpush3.bf16.msra.mxu0 %v10780_v25  ;;  %v8295_v25 = vshrl.u32 %v8279_v20, 15 }
 0x480   : > { %10549 = vmatpush3.bf16.msra.mxu1 %v10781_v26  ;;  %10528 = vmatprep.subr.bf16.mxu0 %v10782_v34  ;;  %v8302_v26 = vxor.u32 %v8286_v57, %v8270_v16  ;;  %v8301_v34 = vxor.u32 %v8285_v7, %v8269_v12 }
 0x481   : > { %10550 = vmatprep.subr.bf16.mxu1 %v10783_v41  ;;  %v8303_v41 = vxor.u32 %v8287_v8, %v8271_v62 }
 0x483   : > { %10529 = vmatpush3.bf16.msra.mxu0 %v10784_v1  ;;  %v8308_v1 = vxor.u32 %v8292_v15, %v8276_v19 }
 0x484   : > { %10551 = vmatpush3.bf16.msra.mxu1 %v10785_v43  ;;  %10530 = vmatprep.subr.bf16.mxu0 %v10786_v23  ;;  %v8310_v43 = vxor.u32 %v8294_v31, %v8278_v9  ;;  %v8309_v23 = vxor.u32 %v8293_v54, %v8277_v38 }
 0x485   : > { %10552 = vmatprep.subr.bf16.mxu1 %v10787_v40  ;;  %v8316_v40 = vmul.u32 2221713035, %v8300_v14 }
 0x486   : > { %v8325_v28 = vmul.u32 2221713035, %v8309_v23 }
 0x487   : > { %10531 = vmatpush3.bf16.msra.mxu0 %v10788_v56  ;;  %v8311_v56 = vxor.u32 %v8295_v25, %v8279_v20  ;;  %v8332_v24 = vshrl.u32 %v8316_v40, 16 }
 0x488   : > { %10553 = vmatpush3.bf16.msra.mxu1 %v10789_v30  ;;  %10532 = vmatprep.subr.bf16.mxu0 %v10790_v44  ;;  %v8318_v30 = vmul.u32 2221713035, %v8302_v26  ;;  %v8317_v44 = vmul.u32 2221713035, %v8301_v34  ;;  %v8341_v55 = vshrl.u32 %v8325_v28, 16 }
 0x489   : > { %10554 = vmatprep.subr.bf16.mxu1 %v10791_v5  ;;  %v8319_v5 = vmul.u32 2221713035, %v8303_v41  ;;  %v8327_v52 = vmul.u32 2221713035, %v8311_v56  ;;  %v8348_v39 = vxor.u32 %v8332_v24, %v8316_v40 }
 0x48a   : > { %v8334_v46 = vshrl.u32 %v8318_v30, 16  ;;  %v8333_v11 = vshrl.u32 %v8317_v44, 16  ;;  %v8357_v42 = vxor.u32 %v8341_v55, %v8325_v28 }
 0x48b   : > { %10533 = vmatpush3.bf16.msra.mxu0 %v10792_v27  ;;  %v8324_v27 = vmul.u32 2221713035, %v8308_v1  ;;  %v8335_v17 = vshrl.u32 %v8319_v5, 16  ;;  %v8343_v10 = vshrl.u32 %v8327_v52, 16  ;;  %vm8364_vm12 = vcmp.lt.u32.totalorder %v8348_v39, 1288490188 }
 0x48c   : > { %10555 = vmatpush3.bf16.msra.mxu1 %v10793_v51  ;;  %v8326_v51 = vmul.u32 2221713035, %v8310_v43  ;;  %v12586_v53 = vxor.u32 %v8334_v46, %v8318_v30  ;;  %v8349_v13 = vxor.u32 %v8333_v11, %v8317_v44  ;;  %vm8373_vm2 = vcmp.lt.u32.totalorder %v8357_v42, 1288490188 }
 0x48d   : > { %v8340_v60 = vshrl.u32 %v8324_v27, 16  ;;  %v12591_v63 = vxor.u32 %v8335_v17, %v8319_v5  ;;  %v8359_v47 = vxor.u32 %v8343_v10, %v8327_v52  ;;  %v10377_v17 = vld [vmem:[%s504_s27] ss:$0 sm:$0xff] }
 0x48e   : > { %v8342_v18 = vshrl.u32 %v8326_v51, 16  ;;  %vm8366_vm13 = vcmp.lt.u32.totalorder %v12586_v53, 1288490188  ;;  %vm8365_vm14 = vcmp.lt.u32.totalorder %v8349_v13, 1288490188 }
 0x48f   : > { %v8356_v32 = vxor.u32 %v8340_v60, %v8324_v27  ;;  %vm8367_vm15 = vcmp.lt.u32.totalorder %v12591_v63, 1288490188  ;;  %vm8375_vm3 = vcmp.lt.u32.totalorder %v8359_v47, 1288490188  ;;  %vm10454_vm5 = vmpackc.low %vm8373_vm2, %vm8365_vm14 }
 0x490   : > { %v12599_v3 = vxor.u32 %v8342_v18, %v8326_v51  ;;  %vm10460_vm6 = vmpackc.low %vm8375_vm3, %vm8367_vm15 }
 0x491   : > { %vm8372_vm0 = vcmp.lt.u32.totalorder %v8356_v32, 1288490188 }
 0x492   : > { %vm8374_vm1 = vcmp.lt.u32.totalorder %v12599_v3, 1288490188  ;;  %vm12614_vm4 = vmpackc.low %vm8372_vm0, %vm8364_vm12 }
 0x493   : > { %vm10463_vm7 = vmpackc.low %vm8374_vm1, %vm8366_vm13 }
 0x521   : > { %v7998_v37 = vpop.f32.mrb[12].mxu0 }
 0x522   : > { %v10586_v22 = vadd.f32 %v7998_v37, %v4910_v33  ;;  %v8170_v21 = vpop.f32.mrb[12].mxu1  ;;  %v8000_v48 = vpop.f32.mrb[13].mxu0 }
 0x523   : > { %v10590_v49 = vadd.f32 %v8170_v21, %v4918_v45  ;;  %v10587_v59 = vadd.f32 %v8000_v48, %v4914_v61  ;;  %v8172_v58 = vpop.f32.mrb[13].mxu1  ;;  %v8002_v2 = vpop.f32.mrb[14].mxu0 }
 0x524   : > { %v8183_v6 = vmax.f32 %v10586_v22, 0.0  ;;  %v10591_v50 = vadd.f32 %v8172_v58, %v4922_v35  ;;  %v10588_v0 = vadd.f32 %v8002_v2, %v4910_v33  ;;  %v8174_v4 = vpop.f32.mrb[14].mxu1  ;;  %v8004_v29 = vpop.f32.mrb[15].mxu0 }
 0x525   : > { %v8185_v16 = vmax.f32 %v10590_v49, 0.0  ;;  %v8184_v12 = vmax.f32 %v10587_v59, 0.0  ;;  %v10592_v62 = vadd.f32 %v8174_v4, %v4918_v45  ;;  %v10589_v19 = vadd.f32 %v8004_v29, %v4914_v61  ;;  %v8176_v9 = vpop.f32.mrb[15].mxu1 }
 0x526   : > { %v8380_v38 = vmul.f32 3.3333333, %v8183_v6  ;;  %v8186_v36 = vmax.f32 %v10591_v50, 0.0  ;;  %v8191_v20 = vmax.f32 %v10588_v0, 0.0  ;;  %v10593_v57 = vadd.f32 %v8176_v9, %v4922_v35 }
 0x527   : > { %v8382_v7 = vmul.f32 3.3333333, %v8185_v16  ;;  %v8381_v8 = vmul.f32 3.3333333, %v8184_v12  ;;  %v8193_v15 = vmax.f32 %v10592_v62, 0.0  ;;  %v8192_v31 = vmax.f32 %v10589_v19, 0.0 }
 0x528   : > { %v8396_v54 = vsel %vm8364_vm12, %v8380_v38, 0.0  ;;  %v8383_v14 = vmul.f32 3.3333333, %v8186_v36  ;;  %v8388_v25 = vmul.f32 3.3333333, %v8191_v20  ;;  %v8194_v26 = vmax.f32 %v10593_v57, 0.0 }
 0x529   : > { %8412 = vst [vmem:[%s12377_s24 + $0x20] sm:$0xff] %v8396_v54  ;;  %v8398_v34 = vsel %vm8366_vm13, %v8382_v7, 0.0  ;;  %v8397_v41 = vsel %vm8365_vm14, %v8381_v8, 0.0  ;;  %v8390_v43 = vmul.f32 3.3333333, %v8193_v15 }
 0x52a   : > { %v8389_v23 = vmul.f32 3.3333333, %v8192_v31  ;;  %8414 = vst [vmem:[%s12377_s24 + $0x30] sm:$0xff] %v8398_v34  ;;  %8413 = vst [vmem:[%s12377_s24 + $0x28] sm:$0xff] %v8397_v41  ;;  %v8399_v40 = vsel %vm8367_vm15, %v8383_v14, 0.0  ;;  %v8404_v56 = vsel %vm8372_vm0, %v8388_v25, 0.0  ;;  %v10458_v30 = vpack.c.bf16 %v8388_v25, %v8380_v38 }
 0x52b   : > { %v8391_v44 = vmul.f32 3.3333333, %v8194_v26  ;;  %8415 = vst [vmem:[%s12377_s24 + $0x38] sm:$0xff] %v8399_v40  ;;  %8420 = vst [vmem:[%s12377_s24 + $0x60] sm:$0xff] %v8404_v56  ;;  %v8406_v5 = vsel %vm8374_vm1, %v8390_v43, 0.0  ;;  %v10464_v27 = vpack.c.bf16 %v8390_v43, %v8382_v7 }
 0x52c   : > { %v8405_v51 = vsel %vm8373_vm2, %v8389_v23, 0.0  ;;  %v10455_v28 = vpack.c.bf16 %v8389_v23, %v8381_v8  ;;  %8422 = vst [vmem:[%s12377_s24 + $0x70] sm:$0xff] %v8406_v5 }
 0x52d   : > { %8421 = vst [vmem:[%s12377_s24 + $0x68] sm:$0xff] %v8405_v51  ;;  %v8407_v24 = vsel %vm8375_vm3, %v8391_v44, 0.0  ;;  %v10461_v52 = vpack.c.bf16 %v8391_v44, %v8383_v14 }
 0x52e   : > { %8423 = vst [vmem:[%s12377_s24 + $0x78] sm:$0xff] %v8407_v24  ;;  %10456 = vmatprep.mubr.msk.bf16.mxu0 %vm10454_vm5, %v10455_v28 }
 0x52f   : > { %10462 = vmatprep.mubr.msk.bf16.mxu1 %vm10460_vm6, %v10461_v52  ;;  %10459 = vmatmul.mubr.msk.bf16.vlgmr.msra.gmra.mrb[20].mxu0 %vm12614_vm4, %v10458_v30 }
 0x530   : > { %10465 = vmatmul.mubr.msk.bf16.vlgmr.msra.gmra.mrb[20].mxu1 %vm10463_vm7, %v10464_v27 }
 0x541   : > { %v10490_v46 = vpop.f32.mrb[16].mxu0 }
 0x542   : > { %v10512_v11 = vpop.f32.mrb[16].mxu1  ;;  %v10491_v60 = vpop.f32.mrb[17].mxu0 }
 0x543   : > { %v10492_v18 = vadd.f32 %v10491_v60, %v10490_v46  ;;  %v10513_v55 = vpop.f32.mrb[17].mxu1  ;;  %v10493_v39 = vpop.f32.mrb[18].mxu0 }
 0x544   : > { %v10514_v10 = vadd.f32 %v10513_v55, %v10512_v11  ;;  %v10515_v53 = vpop.f32.mrb[18].mxu1  ;;  %v10494_v13 = vpop.f32.mrb[19].mxu0 }
 0x545   : > { %v8986_v33 = vadd.f32 %v10492_v18, %v10377_v17  ;;  %v10495_v63 = vadd.f32 %v10494_v13, %v10493_v39  ;;  %v10516_v32 = vpop.f32.mrb[19].mxu1 }
 0x546   : > { %v10517_v45 = vadd.f32 %v10516_v32, %v10515_v53 }
 0x547   : > { %v9027_v61 = vadd.f32 %v10514_v10, %v8986_v33  ;;  %v8989_v3 = vadd.f32 %v10495_v63, %v10377_v17 }
 0x549   : > { %v9030_v42 = vadd.f32 %v10517_v45, %v8989_v3 }
 0x602   : > { %v10534_v35 = vpop.f32.mrb[20].mxu0 }
 0x603   : > { %v10556_v47 = vpop.f32.mrb[20].mxu1  ;;  %v10535_v37 = vpop.f32.mrb[21].mxu0 }
 0x604   : > { %v10536_v22 = vadd.f32 %v10535_v37, %v10534_v35  ;;  %v10557_v21 = vpop.f32.mrb[21].mxu1  ;;  %v10537_v48 = vpop.f32.mrb[22].mxu0 }
 0x605   : > { %v10558_v49 = vadd.f32 %v10557_v21, %v10556_v47  ;;  %v10559_v59 = vpop.f32.mrb[22].mxu1  ;;  %v10538_v58 = vpop.f32.mrb[23].mxu0 }
 0x606   : > { %v9068_v2 = vadd.f32 %v10536_v22, %v9027_v61  ;;  %v10539_v6 = vadd.f32 %v10538_v58, %v10537_v48  ;;  %v10560_v50 = vpop.f32.mrb[23].mxu1 }
 0x607   : > { %v10561_v0 = vadd.f32 %v10560_v50, %v10559_v59 }
 0x608   : > { %v9109_v4 = vadd.f32 %v10558_v49, %v9068_v2  ;;  %v9071_v29 = vadd.f32 %v10539_v6, %v9030_v42 }
 0x60a   : > { %9115 = vst [vmem:[%s524_s16] sm:$0xff] %v9109_v4  ;;  %v9112_v16 = vadd.f32 %v10561_v0, %v9071_v29 }
 0x60c   : > { %9116 = vst [vmem:[%s524_s16 + $0x8] sm:$0xff] %v9112_v16 }
 0x60d PF: > { %s21_s15 = sadd.s32 1, %s10833_s15   ;;  %s12678_s11 = smov %s10821_s12 }
 0x60e   : > { %p18_p10 = scmp.ge.s32.totalorder %s21_s15, 4   ;;  %s12679_s12 = smov %s10923_s20 }
 0x60f   : > { %s12680_s13 = smov %s10829_s14  ;;  %s12681_s14 = smov %s12683_s0 }
 0x610   :  { %20 = sbr.rel (!%p18_p10) target bundleno = 5 (0x5), region = 136 }

</bundles_post_ra>
